<compile_context>
chip_gen: v5e
topology: v5e:2x2
jax: 0.10.0
libtpu: 0.0.40
codegen_flags: <defaults>
</compile_context>

<pallas_src>
from functools import partial

import jax
import jax.numpy as jnp
from jax import lax
from jax.experimental import pallas as pl
from jax.experimental.pallas import tpu as pltpu

# ---- model hyperparameters (from the PyTorch script) ----
BLOCK_SIZE = 64     # T
N_EMBD     = 128    # C
NUM_HEADS  = 4
HEAD_SIZE  = N_EMBD // NUM_HEADS   # 32


# ---------------- Pallas kernel ----------------

def _mha_fused_kernel(x_ref, wqkv_ref, wp_ref, bp_ref, o_ref, *, num_heads, head_size):
    """One grid point = Bblk batch elements; full multi-head causal attention + proj.

    x_ref   : (Bblk, T, C)     bf16
    wqkv_ref: (C, 3*H*hs)      bf16   columns = [q heads | k heads | v heads],
                                      Q columns pre-scaled by C**-0.5
    wp_ref  : (C, C)           bf16
    bp_ref  : (1, C)           f32
    o_ref   : (Bblk, T, C)     bf16   (lane-dense, 128-wide writeback)
    """
    H, hs = num_heads, head_size
    Bblk, T, C = x_ref.shape
    M = Bblk * T

    # Flatten batch*seq so the projection matmuls see M = Bblk*T (>=256 with Bblk>=4).
    x = x_ref[...].reshape(M, C)                                     # (M, C) bf16

    # One wide QKV projection: (M, C) @ (C, 3*H*hs); f32 accumulate on the MXU,
    # then a single bf16 cast (no per-head casts inside the loop).
    qkv = jnp.dot(x, wqkv_ref[...],
                  preferred_element_type=jnp.float32).astype(jnp.bfloat16)

    # Causal mask, hoisted out of the per-head loop.
    row = lax.broadcasted_iota(jnp.int32, (T, T), 0)
    col = lax.broadcasted_iota(jnp.int32, (T, T), 1)
    causal = (col <= row)[None]                                      # (1, T, T)

    head_outs = []
    for h in range(H):
        q = qkv[:, h * hs:(h + 1) * hs].reshape(Bblk, T, hs)             # bf16
        k = qkv[:, (H + h) * hs:(H + h + 1) * hs].reshape(Bblk, T, hs)   # bf16
        v = qkv[:, (2 * H + h) * hs:(2 * H + h + 1) * hs].reshape(Bblk, T, hs)

        # scores, batched over the Bblk axis; scale already folded into Q weights.
        s = jnp.einsum('bqd,bkd->bqk', q, k,
                       preferred_element_type=jnp.float32)           # (Bblk, T, T)
        s = jnp.where(causal, s, -jnp.inf)
        # numerically stable softmax; diagonal is always unmasked so no all--inf row.
        s = s - jnp.max(s, axis=-1, keepdims=True)
        p = jnp.exp(s)
        p = p * pl.reciprocal(jnp.sum(p, axis=-1, keepdims=True), approx=True)

        ho = jnp.einsum('bqk,bkd->bqd', p.astype(jnp.bfloat16), v,
                        preferred_element_type=jnp.float32)          # (Bblk, T, hs)
        head_outs.append(ho.astype(jnp.bfloat16))

    cat = jnp.concatenate(head_outs, axis=-1).reshape(M, C)          # (M, C) bf16

    # Output projection (single K=128 matmul), lane-dense bf16 store.
    y = jnp.dot(cat, wp_ref[...], preferred_element_type=jnp.float32) + bp_ref[...]
    o_ref[...] = y.reshape(Bblk, T, C).astype(o_ref.dtype)


# ---------------- one-time weight packing (hoisted out of the forward path) ----------------

def pack_mha_weights(wq, wk, wv, w_proj, b_proj):
    """Precompute the packed bf16 weights the kernel consumes (call once at init).

    wq/wk/wv: (H, C, hs) stored so q = x @ wq[h];  w_proj: (C, C) so y = cat @ w_proj + b.
    The reference's C**-0.5 attention scale is folded into the Q weight columns.
    """
    H, C, hs = wq.shape
    scale = C ** -0.5
    w_qkv = jnp.concatenate(
        [jnp.transpose(wq * scale, (1, 0, 2)).reshape(C, H * hs),
         jnp.transpose(wk, (1, 0, 2)).reshape(C, H * hs),
         jnp.transpose(wv, (1, 0, 2)).reshape(C, H * hs)], axis=-1)
    return (w_qkv.astype(jnp.bfloat16),
            w_proj.astype(jnp.bfloat16),
            b_proj.reshape(1, C).astype(jnp.float32))


# ---------------- wrapper ----------------

def _pick_block_b(B):
    """Prefer >=2 grid steps (both v7x TensorCores busy) with the largest Bblk
    that divides B; with T=64, Bblk>=4 lifts the matmul M dim to >=256."""
    for cand in (8, 4, 2):
        if B % cand == 0 and B // cand >= 2:
            return cand
    for cand in (8, 4, 2, 1):
        if B % cand == 0:
            return cand
    return 1


@partial(jax.jit, static_argnames=("num_heads",))
def multi_head_attention(x, w_qkv, w_proj, b_proj, *, num_heads=NUM_HEADS):
    """x: (B, T, C); w_qkv/w_proj/b_proj: packed weights from pack_mha_weights()."""
    B, T, C = x.shape
    hs = C // num_heads
    Bblk = _pick_block_b(B)

    kernel = partial(_mha_fused_kernel, num_heads=num_heads, head_size=hs)

    out = pl.pallas_call(
        kernel,
        out_shape=jax.ShapeDtypeStruct((B, T, C), jnp.bfloat16),
        grid_spec=pltpu.PrefetchScalarGridSpec(
            num_scalar_prefetch=0,
            grid=(B // Bblk,),
            in_specs=[
                pl.BlockSpec((Bblk, T, C), lambda b: (b, 0, 0)),
                pl.BlockSpec((C, 3 * num_heads * hs), lambda b: (0, 0)),
                pl.BlockSpec((C, C), lambda b: (0, 0)),
                pl.BlockSpec((1, C), lambda b: (0, 0)),
            ],
            out_specs=pl.BlockSpec((Bblk, T, C), lambda b: (b, 0, 0)),
        ),
        compiler_params=pltpu.CompilerParams(
            # grid steps shard across TensorCores on v7x; no-op on v5e/v6e.
            dimension_semantics=("parallel",)),
    )(x.astype(jnp.bfloat16), w_qkv, w_proj, b_proj)

    return out


# ---------------- pure-JAX reference (mirrors the PyTorch forward, eval mode) ----------------

def _reference(x, wq, wk, wv, w_proj, b_proj):
    B, T, C = x.shape
    H = wq.shape[0]
    heads = []
    tril = jnp.tril(jnp.ones((T, T), dtype=bool))
    for h in range(H):
        q = x @ wq[h]
        k = x @ wk[h]
        v = x @ wv[h]
        wei = (q @ jnp.swapaxes(k, -1, -2)) * (C ** -0.5)
        wei = jnp.where(tril, wei, -jnp.inf)
        wei = jax.nn.softmax(wei, axis=-1)
        heads.append(wei @ v)
    cat = jnp.concatenate(heads, axis=-1)
    return cat @ w_proj + b_proj


if __name__ == "__main__":
    key = jax.random.PRNGKey(0)
    kx, kq, kk, kv, kp, kb = jax.random.split(key, 6)

    B, T, C, H, hs = 8, BLOCK_SIZE, N_EMBD, NUM_HEADS, HEAD_SIZE

    x = jax.random.normal(kx, (B, T, C), dtype=jnp.float32)

    # nn.Linear(n_embd, head_size, bias=False) weight is (head_size, n_embd);
    # stored transposed as (C, hs) so q = x @ W inside the kernel.
    bound = 1.0 / (C ** 0.5)
    wq = jax.random.uniform(kq, (H, C, hs), jnp.float32, -bound, bound)
    wk = jax.random.uniform(kk, (H, C, hs), jnp.float32, -bound, bound)
    wv = jax.random.uniform(kv, (H, C, hs), jnp.float32, -bound, bound)
    # nn.Linear(n_embd, n_embd): weight (C, C) stored transposed, bias (C,)
    w_proj = jax.random.uniform(kp, (C, C), jnp.float32, -bound, bound)
    b_proj = jax.random.uniform(kb, (C,), jnp.float32, -bound, bound)

    # One-time pack (transpose/concat/bf16 cast + scale fold) -- NOT per forward call.
    w_qkv_p, w_proj_p, b_proj_p = pack_mha_weights(wq, wk, wv, w_proj, b_proj)

    out = multi_head_attention(x, w_qkv_p, w_proj_p, b_proj_p, num_heads=H)
    out = jax.block_until_ready(out)

    # Kernel feeds the MXU bf16 and emits bf16, so compare against a reference built
    # from the same bf16-quantized inputs (f32 math) with a relaxed tolerance.
    q32 = lambda a: a.astype(jnp.bfloat16).astype(jnp.float32)
    ref = _reference(q32(x), q32(wq), q32(wk), q32(wv), q32(w_proj), b_proj)

    assert out.shape == (B, T, C)
    assert jnp.allclose(out.astype(jnp.float32), ref, rtol=2e-2, atol=2e-2), \
        "mismatch vs reference"

    print("KERNEL_OK")
</pallas_src>

<mosaic_0001>
module attributes {stable_mosaic.version = 11 : i64} {
  func.func @_mha_fused_kernel(%arg0: i32, %arg1: memref<4x64x128xbf16, #tpu.memory_space<vmem>>, %arg2: memref<128x384xbf16, #tpu.memory_space<vmem>>, %arg3: memref<128x128xbf16, #tpu.memory_space<vmem>>, %arg4: memref<1x128xf32, #tpu.memory_space<vmem>>, %arg5: memref<4x64x128xbf16, #tpu.memory_space<vmem>>) attributes {dimension_semantics = [#tpu.dimension_semantics<parallel>], iteration_bounds = array<i64: 2>, scalar_prefetch = 0 : i64, scratch_operands = 0 : i64, tpu.core_type = #tpu.core_type<tc>, window_params = [{transform_indices = @transform_0, window_bounds = array<i64: 4, 64, 128>}, {pipeline_mode = #tpu.pipeline_mode<synchronous>, transform_indices = @transform_1, window_bounds = array<i64: 128, 384>}, {pipeline_mode = #tpu.pipeline_mode<synchronous>, transform_indices = @transform_2, window_bounds = array<i64: 128, 128>}, {pipeline_mode = #tpu.pipeline_mode<synchronous>, transform_indices = @transform_3, window_bounds = array<i64: 1, 128>}, {transform_indices = @transform_4, window_bounds = array<i64: 4, 64, 128>}]} {
    %c0 = arith.constant 0 : index
    %c0_0 = arith.constant 0 : index
    %c0_1 = arith.constant 0 : index
    %0 = vector.load %arg1[%c0, %c0_0, %c0_1] : memref<4x64x128xbf16, #tpu.memory_space<vmem>>, vector<4x64x128xbf16>
    %1 = vector.shape_cast %0 : vector<4x64x128xbf16> to vector<256x128xbf16>
    %c0_2 = arith.constant 0 : index
    %c0_3 = arith.constant 0 : index
    %2 = vector.load %arg2[%c0_2, %c0_3] : memref<128x384xbf16, #tpu.memory_space<vmem>>, vector<128x384xbf16>
    %cst = arith.constant dense<0.000000e+00> : vector<256x384xf32>
    %3 = tpu.matmul %1, %2, %cst {dimension_numbers = #tpu.dot_dimension_numbers<[1], [0], [0], [1], [0, 0, 1, 1], [], []>} : vector<256x128xbf16>, vector<128x384xbf16>, vector<256x384xf32> -> vector<256x384xf32>
    %4 = arith.truncf %3 : vector<256x384xf32> to vector<256x384xbf16>
    %5 = tpu.iota {dimensions = array<i32: 0>} : vector<64x64xi32>
    %6 = tpu.iota {dimensions = array<i32: 1>} : vector<64x64xi32>
    %7 = arith.cmpi sle, %6, %5 : vector<64x64xi32>
    %8 = vector.shape_cast %7 : vector<64x64xi1> to vector<1x64x64xi1>
    %9 = vector.extract_strided_slice %4 {offsets = [0, 0], sizes = [256, 32], strides = [1, 1]} : vector<256x384xbf16> to vector<256x32xbf16>
    %10 = vector.shape_cast %9 : vector<256x32xbf16> to vector<4x64x32xbf16>
    %11 = vector.extract_strided_slice %4 {offsets = [0, 128], sizes = [256, 32], strides = [1, 1]} : vector<256x384xbf16> to vector<256x32xbf16>
    %12 = vector.shape_cast %11 : vector<256x32xbf16> to vector<4x64x32xbf16>
    %13 = vector.extract_strided_slice %4 {offsets = [0, 256], sizes = [256, 32], strides = [1, 1]} : vector<256x384xbf16> to vector<256x32xbf16>
    %14 = vector.shape_cast %13 : vector<256x32xbf16> to vector<4x64x32xbf16>
    "tpu.trace_start"() <{level = 10 : i32, message = "bqd,bkd->bqk"}> : () -> ()
    %cst_4 = arith.constant dense<0.000000e+00> : vector<4x64x64xf32>
    %15 = tpu.matmul %10, %12, %cst_4 {dimension_numbers = #tpu.dot_dimension_numbers<[2], [2], [1], [1], [0, 0, 0, 1, 1, 1], [0], [0]>} : vector<4x64x32xbf16>, vector<4x64x32xbf16>, vector<4x64x64xf32> -> vector<4x64x64xf32>
    %cst_5 = arith.constant 0xFF800000 : f32
    "tpu.trace_stop"() : () -> ()
    %16 = vector.shape_cast %8 : vector<1x64x64xi1> to vector<1x64x64xi1>
    %17 = vector.broadcast %16 : vector<1x64x64xi1> to vector<4x64x64xi1>
    %18 = vector.broadcast %cst_5 : f32 to vector<4x64x64xf32>
    %19 = arith.select %17, %15, %18 : vector<4x64x64xi1>, vector<4x64x64xf32>
    %cst_6 = arith.constant dense<0xFF800000> : vector<4x64xf32>
    %20 = vector.multi_reduction <maximumf>, %19, %cst_6 [2] : vector<4x64x64xf32> to vector<4x64xf32>
    %21 = vector.shape_cast %20 : vector<4x64xf32> to vector<4x64x1xf32>
    %22 = vector.broadcast %21 : vector<4x64x1xf32> to vector<4x64x64xf32>
    %23 = arith.subf %19, %22 : vector<4x64x64xf32>
    %24 = math.exp %23 : vector<4x64x64xf32>
    %cst_7 = arith.constant dense<0.000000e+00> : vector<4x64xf32>
    %25 = vector.multi_reduction <add>, %24, %cst_7 [2] : vector<4x64x64xf32> to vector<4x64xf32>
    %26 = vector.shape_cast %25 : vector<4x64xf32> to vector<4x64x1xf32>
    %27 = tpu.reciprocal %26 {approx = true} : vector<4x64x1xf32> -> vector<4x64x1xf32>
    %28 = vector.broadcast %27 : vector<4x64x1xf32> to vector<4x64x64xf32>
    %29 = arith.mulf %24, %28 : vector<4x64x64xf32>
    %30 = arith.truncf %29 : vector<4x64x64xf32> to vector<4x64x64xbf16>
    "tpu.trace_start"() <{level = 10 : i32, message = "bqk,bkd->bqd"}> : () -> ()
    %cst_8 = arith.constant dense<0.000000e+00> : vector<4x64x32xf32>
    %31 = tpu.matmul %30, %14, %cst_8 {dimension_numbers = #tpu.dot_dimension_numbers<[2], [1], [1], [2], [0, 0, 0, 1, 1, 2], [0], [0]>} : vector<4x64x64xbf16>, vector<4x64x32xbf16>, vector<4x64x32xf32> -> vector<4x64x32xf32>
    "tpu.trace_stop"() : () -> ()
    %32 = arith.truncf %31 : vector<4x64x32xf32> to vector<4x64x32xbf16>
    %33 = vector.extract_strided_slice %4 {offsets = [0, 32], sizes = [256, 32], strides = [1, 1]} : vector<256x384xbf16> to vector<256x32xbf16>
    %34 = vector.shape_cast %33 : vector<256x32xbf16> to vector<4x64x32xbf16>
    %35 = vector.extract_strided_slice %4 {offsets = [0, 160], sizes = [256, 32], strides = [1, 1]} : vector<256x384xbf16> to vector<256x32xbf16>
    %36 = vector.shape_cast %35 : vector<256x32xbf16> to vector<4x64x32xbf16>
    %37 = vector.extract_strided_slice %4 {offsets = [0, 288], sizes = [256, 32], strides = [1, 1]} : vector<256x384xbf16> to vector<256x32xbf16>
    %38 = vector.shape_cast %37 : vector<256x32xbf16> to vector<4x64x32xbf16>
    "tpu.trace_start"() <{level = 10 : i32, message = "bqd,bkd->bqk"}> : () -> ()
    %cst_9 = arith.constant dense<0.000000e+00> : vector<4x64x64xf32>
    %39 = tpu.matmul %34, %36, %cst_9 {dimension_numbers = #tpu.dot_dimension_numbers<[2], [2], [1], [1], [0, 0, 0, 1, 1, 1], [0], [0]>} : vector<4x64x32xbf16>, vector<4x64x32xbf16>, vector<4x64x64xf32> -> vector<4x64x64xf32>
    %cst_10 = arith.constant 0xFF800000 : f32
    "tpu.trace_stop"() : () -> ()
    %40 = vector.shape_cast %8 : vector<1x64x64xi1> to vector<1x64x64xi1>
    %41 = vector.broadcast %40 : vector<1x64x64xi1> to vector<4x64x64xi1>
    %42 = vector.broadcast %cst_10 : f32 to vector<4x64x64xf32>
    %43 = arith.select %41, %39, %42 : vector<4x64x64xi1>, vector<4x64x64xf32>
    %cst_11 = arith.constant dense<0xFF800000> : vector<4x64xf32>
    %44 = vector.multi_reduction <maximumf>, %43, %cst_11 [2] : vector<4x64x64xf32> to vector<4x64xf32>
    %45 = vector.shape_cast %44 : vector<4x64xf32> to vector<4x64x1xf32>
    %46 = vector.broadcast %45 : vector<4x64x1xf32> to vector<4x64x64xf32>
    %47 = arith.subf %43, %46 : vector<4x64x64xf32>
    %48 = math.exp %47 : vector<4x64x64xf32>
    %cst_12 = arith.constant dense<0.000000e+00> : vector<4x64xf32>
    %49 = vector.multi_reduction <add>, %48, %cst_12 [2] : vector<4x64x64xf32> to vector<4x64xf32>
    %50 = vector.shape_cast %49 : vector<4x64xf32> to vector<4x64x1xf32>
    %51 = tpu.reciprocal %50 {approx = true} : vector<4x64x1xf32> -> vector<4x64x1xf32>
    %52 = vector.broadcast %51 : vector<4x64x1xf32> to vector<4x64x64xf32>
    %53 = arith.mulf %48, %52 : vector<4x64x64xf32>
    %54 = arith.truncf %53 : vector<4x64x64xf32> to vector<4x64x64xbf16>
    "tpu.trace_start"() <{level = 10 : i32, message = "bqk,bkd->bqd"}> : () -> ()
    %cst_13 = arith.constant dense<0.000000e+00> : vector<4x64x32xf32>
    %55 = tpu.matmul %54, %38, %cst_13 {dimension_numbers = #tpu.dot_dimension_numbers<[2], [1], [1], [2], [0, 0, 0, 1, 1, 2], [0], [0]>} : vector<4x64x64xbf16>, vector<4x64x32xbf16>, vector<4x64x32xf32> -> vector<4x64x32xf32>
    "tpu.trace_stop"() : () -> ()
    %56 = arith.truncf %55 : vector<4x64x32xf32> to vector<4x64x32xbf16>
    %57 = vector.extract_strided_slice %4 {offsets = [0, 64], sizes = [256, 32], strides = [1, 1]} : vector<256x384xbf16> to vector<256x32xbf16>
    %58 = vector.shape_cast %57 : vector<256x32xbf16> to vector<4x64x32xbf16>
    %59 = vector.extract_strided_slice %4 {offsets = [0, 192], sizes = [256, 32], strides = [1, 1]} : vector<256x384xbf16> to vector<256x32xbf16>
    %60 = vector.shape_cast %59 : vector<256x32xbf16> to vector<4x64x32xbf16>
    %61 = vector.extract_strided_slice %4 {offsets = [0, 320], sizes = [256, 32], strides = [1, 1]} : vector<256x384xbf16> to vector<256x32xbf16>
    %62 = vector.shape_cast %61 : vector<256x32xbf16> to vector<4x64x32xbf16>
    "tpu.trace_start"() <{level = 10 : i32, message = "bqd,bkd->bqk"}> : () -> ()
    %cst_14 = arith.constant dense<0.000000e+00> : vector<4x64x64xf32>
    %63 = tpu.matmul %58, %60, %cst_14 {dimension_numbers = #tpu.dot_dimension_numbers<[2], [2], [1], [1], [0, 0, 0, 1, 1, 1], [0], [0]>} : vector<4x64x32xbf16>, vector<4x64x32xbf16>, vector<4x64x64xf32> -> vector<4x64x64xf32>
    %cst_15 = arith.constant 0xFF800000 : f32
    "tpu.trace_stop"() : () -> ()
    %64 = vector.shape_cast %8 : vector<1x64x64xi1> to vector<1x64x64xi1>
    %65 = vector.broadcast %64 : vector<1x64x64xi1> to vector<4x64x64xi1>
    %66 = vector.broadcast %cst_15 : f32 to vector<4x64x64xf32>
    %67 = arith.select %65, %63, %66 : vector<4x64x64xi1>, vector<4x64x64xf32>
    %cst_16 = arith.constant dense<0xFF800000> : vector<4x64xf32>
    %68 = vector.multi_reduction <maximumf>, %67, %cst_16 [2] : vector<4x64x64xf32> to vector<4x64xf32>
    %69 = vector.shape_cast %68 : vector<4x64xf32> to vector<4x64x1xf32>
    %70 = vector.broadcast %69 : vector<4x64x1xf32> to vector<4x64x64xf32>
    %71 = arith.subf %67, %70 : vector<4x64x64xf32>
    %72 = math.exp %71 : vector<4x64x64xf32>
    %cst_17 = arith.constant dense<0.000000e+00> : vector<4x64xf32>
    %73 = vector.multi_reduction <add>, %72, %cst_17 [2] : vector<4x64x64xf32> to vector<4x64xf32>
    %74 = vector.shape_cast %73 : vector<4x64xf32> to vector<4x64x1xf32>
    %75 = tpu.reciprocal %74 {approx = true} : vector<4x64x1xf32> -> vector<4x64x1xf32>
    %76 = vector.broadcast %75 : vector<4x64x1xf32> to vector<4x64x64xf32>
    %77 = arith.mulf %72, %76 : vector<4x64x64xf32>
    %78 = arith.truncf %77 : vector<4x64x64xf32> to vector<4x64x64xbf16>
    "tpu.trace_start"() <{level = 10 : i32, message = "bqk,bkd->bqd"}> : () -> ()
    %cst_18 = arith.constant dense<0.000000e+00> : vector<4x64x32xf32>
    %79 = tpu.matmul %78, %62, %cst_18 {dimension_numbers = #tpu.dot_dimension_numbers<[2], [1], [1], [2], [0, 0, 0, 1, 1, 2], [0], [0]>} : vector<4x64x64xbf16>, vector<4x64x32xbf16>, vector<4x64x32xf32> -> vector<4x64x32xf32>
    "tpu.trace_stop"() : () -> ()
    %80 = arith.truncf %79 : vector<4x64x32xf32> to vector<4x64x32xbf16>
    %81 = vector.extract_strided_slice %4 {offsets = [0, 96], sizes = [256, 32], strides = [1, 1]} : vector<256x384xbf16> to vector<256x32xbf16>
    %82 = vector.shape_cast %81 : vector<256x32xbf16> to vector<4x64x32xbf16>
    %83 = vector.extract_strided_slice %4 {offsets = [0, 224], sizes = [256, 32], strides = [1, 1]} : vector<256x384xbf16> to vector<256x32xbf16>
    %84 = vector.shape_cast %83 : vector<256x32xbf16> to vector<4x64x32xbf16>
    %85 = vector.extract_strided_slice %4 {offsets = [0, 352], sizes = [256, 32], strides = [1, 1]} : vector<256x384xbf16> to vector<256x32xbf16>
    %86 = vector.shape_cast %85 : vector<256x32xbf16> to vector<4x64x32xbf16>
    "tpu.trace_start"() <{level = 10 : i32, message = "bqd,bkd->bqk"}> : () -> ()
    %cst_19 = arith.constant dense<0.000000e+00> : vector<4x64x64xf32>
    %87 = tpu.matmul %82, %84, %cst_19 {dimension_numbers = #tpu.dot_dimension_numbers<[2], [2], [1], [1], [0, 0, 0, 1, 1, 1], [0], [0]>} : vector<4x64x32xbf16>, vector<4x64x32xbf16>, vector<4x64x64xf32> -> vector<4x64x64xf32>
    %cst_20 = arith.constant 0xFF800000 : f32
    "tpu.trace_stop"() : () -> ()
    %88 = vector.shape_cast %8 : vector<1x64x64xi1> to vector<1x64x64xi1>
    %89 = vector.broadcast %88 : vector<1x64x64xi1> to vector<4x64x64xi1>
    %90 = vector.broadcast %cst_20 : f32 to vector<4x64x64xf32>
    %91 = arith.select %89, %87, %90 : vector<4x64x64xi1>, vector<4x64x64xf32>
    %cst_21 = arith.constant dense<0xFF800000> : vector<4x64xf32>
    %92 = vector.multi_reduction <maximumf>, %91, %cst_21 [2] : vector<4x64x64xf32> to vector<4x64xf32>
    %93 = vector.shape_cast %92 : vector<4x64xf32> to vector<4x64x1xf32>
    %94 = vector.broadcast %93 : vector<4x64x1xf32> to vector<4x64x64xf32>
    %95 = arith.subf %91, %94 : vector<4x64x64xf32>
    %96 = math.exp %95 : vector<4x64x64xf32>
    %cst_22 = arith.constant dense<0.000000e+00> : vector<4x64xf32>
    %97 = vector.multi_reduction <add>, %96, %cst_22 [2] : vector<4x64x64xf32> to vector<4x64xf32>
    %98 = vector.shape_cast %97 : vector<4x64xf32> to vector<4x64x1xf32>
    %99 = tpu.reciprocal %98 {approx = true} : vector<4x64x1xf32> -> vector<4x64x1xf32>
    %100 = vector.broadcast %99 : vector<4x64x1xf32> to vector<4x64x64xf32>
    %101 = arith.mulf %96, %100 : vector<4x64x64xf32>
    %102 = arith.truncf %101 : vector<4x64x64xf32> to vector<4x64x64xbf16>
    "tpu.trace_start"() <{level = 10 : i32, message = "bqk,bkd->bqd"}> : () -> ()
    %cst_23 = arith.constant dense<0.000000e+00> : vector<4x64x32xf32>
    %103 = tpu.matmul %102, %86, %cst_23 {dimension_numbers = #tpu.dot_dimension_numbers<[2], [1], [1], [2], [0, 0, 0, 1, 1, 2], [0], [0]>} : vector<4x64x64xbf16>, vector<4x64x32xbf16>, vector<4x64x32xf32> -> vector<4x64x32xf32>
    "tpu.trace_stop"() : () -> ()
    %104 = arith.truncf %103 : vector<4x64x32xf32> to vector<4x64x32xbf16>
    %105 = tpu.concatenate %32, %56, %80, %104 in 2 : vector<4x64x32xbf16>, vector<4x64x32xbf16>, vector<4x64x32xbf16>, vector<4x64x32xbf16> -> vector<4x64x128xbf16>
    %106 = vector.shape_cast %105 : vector<4x64x128xbf16> to vector<256x128xbf16>
    %c0_24 = arith.constant 0 : index
    %c0_25 = arith.constant 0 : index
    %107 = vector.load %arg3[%c0_24, %c0_25] : memref<128x128xbf16, #tpu.memory_space<vmem>>, vector<128x128xbf16>
    %cst_26 = arith.constant dense<0.000000e+00> : vector<256x128xf32>
    %108 = tpu.matmul %106, %107, %cst_26 {dimension_numbers = #tpu.dot_dimension_numbers<[1], [0], [0], [1], [0, 0, 1, 1], [], []>} : vector<256x128xbf16>, vector<128x128xbf16>, vector<256x128xf32> -> vector<256x128xf32>
    %c0_27 = arith.constant 0 : index
    %c0_28 = arith.constant 0 : index
    %109 = vector.load %arg4[%c0_27, %c0_28] : memref<1x128xf32, #tpu.memory_space<vmem>>, vector<1x128xf32>
    %110 = vector.broadcast %109 : vector<1x128xf32> to vector<256x128xf32>
    %111 = arith.addf %108, %110 : vector<256x128xf32>
    %112 = vector.shape_cast %111 : vector<256x128xf32> to vector<4x64x128xf32>
    %113 = arith.truncf %112 : vector<4x64x128xf32> to vector<4x64x128xbf16>
    %c0_29 = arith.constant 0 : index
    %c0_30 = arith.constant 0 : index
    %c0_31 = arith.constant 0 : index
    %114 = vector.load %arg5[%c0_29, %c0_30, %c0_31] : memref<4x64x128xbf16, #tpu.memory_space<vmem>>, vector<4x64x128xbf16>
    tpu.vector_store %arg5[%c0_29, %c0_30, %c0_31], %113 {strides = array<i32>} : memref<4x64x128xbf16, #tpu.memory_space<vmem>>, vector<4x64x128xbf16>,
    return
  }
  func.func @transform_0(%arg0: i32) -> (i32, i32, i32) {
    %c0_i32 = arith.constant 0 : i32
    %c0_i32_0 = arith.constant 0 : i32
    %c0_i32_1 = arith.constant 0 : i32
    return %arg0, %c0_i32, %c0_i32_0 : i32, i32, i32
  }
  func.func @transform_1(%arg0: i32) -> (i32, i32) {
    %c0_i32 = arith.constant 0 : i32
    %c0_i32_0 = arith.constant 0 : i32
    %c0_i32_1 = arith.constant 0 : i32
    return %c0_i32, %c0_i32_0 : i32, i32
  }
  func.func @transform_2(%arg0: i32) -> (i32, i32) {
    %c0_i32 = arith.constant 0 : i32
    %c0_i32_0 = arith.constant 0 : i32
    %c0_i32_1 = arith.constant 0 : i32
    return %c0_i32, %c0_i32_0 : i32, i32
  }
  func.func @transform_3(%arg0: i32) -> (i32, i32) {
    %c0_i32 = arith.constant 0 : i32
    %c0_i32_0 = arith.constant 0 : i32
    %c0_i32_1 = arith.constant 0 : i32
    return %c0_i32, %c0_i32_0 : i32, i32
  }
  func.func @transform_4(%arg0: i32) -> (i32, i32, i32) {
    %c0_i32 = arith.constant 0 : i32
    %c0_i32_0 = arith.constant 0 : i32
    %c0_i32_1 = arith.constant 0 : i32
    return %arg0, %c0_i32, %c0_i32_0 : i32, i32, i32
  }
}

</mosaic_0001>

<bundles_post_ra>
// kernel: multi_head_attention.1
= control target key start
LH: loop header
LB: loop body
LE: loop exit
PB: predicated region body
PF: predicated region fallthrough
CT: control target
= control target key end

     0   :  { %9 = vsyncpa [#allocation3], 0  ;;  %s11047_s0 = inlined_call_operand.vmem [shape: bf16[8,64,128], index: 0, kind: input, shape index: {}]   ;;  %s11048_s1 = inlined_call_operand.vmem [shape: bf16[128,384], index: 1, kind: input, shape index: {}]   ;;  %s11049_s2 = inlined_call_operand.vmem [shape: bf16[128,128], index: 2, kind: input, shape index: {}]   ;;  %s11050_s3 = inlined_call_operand.vmem [shape: f32[1,128], index: 3, kind: input, shape index: {}]   ;;  %s11051_s4 = inlined_call_operand.hbm [shape: bf16[8,64,128], index: 4, kind: output, shape index: {}]  }
   0x1   :  { %11 = vsyncpa [#allocation3 + $0x1], 0  ;;  %s7401_s15 = smov 0   ;;  %s7403_s16 = smov 0  }
   0x2   :  { %s7405_s17 = smov 0   ;;  %s7407_s18 = smov 0  }
   0x3 LB: > { %s7422_s19 = sadd.s32 4294967295, %s7370_s18   ;;  %s6248_s20 = sadd.s32 4294967294, %s7370_s18   ;;  %s7370_s18 = sphi %s7407_s18, %s11568_s18   ;;  %s7366_s17 = sphi %s7405_s17, %s11567_s17   ;;  %s7362_s16 = sphi %s7403_s16, %s11566_s16   ;;  %s7358_s15 = sphi %s7401_s15, %s11565_s15  }
   0x4   : > { %s7426_s21 = sadd.s32 1, %s7370_s18   ;;  %s113_s22 = sadd.s32 1, %s7366_s17 }
   0x5   : > { %s110_s23 = ssub.s32 %s7370_s18, %s7426_s21  ;;  %p123_p0 = scmp.ne.s32.totalorder %s7366_s17, %s7362_s16 }
   0x6   : > { %p111_p1 = scmp.eq.s32.totalorder %s110_s23, 0  ;;  %p124_p2 = scmp.eq.s32.totalorder %s7422_s19, 1 }
   0x7   : > { %p129_p3 = scmp.ne.s32.totalorder %s7362_s16, %s7358_s15  ;;  %p130_p4 = scmp.eq.s32.totalorder %s6248_s20, 1 }
   0x8   : > { %s7437_s24 = scalar_select %p111_p1, %s7366_s17, %s113_s22  }
   0x9   : > { %p7439_p5 = por %p124_p2, %p123_p0  ;;  %p7443_p6 = por %p130_p4, %p129_p3 }
   0xa   : > { %p6251_p7 = scmp.ge.s32.totalorder %s7370_s18, 1  ;;  %p167_p8 = scmp.lt.s32.totalorder %s7370_s18, 3 }
   0xc   : > { %p168_p9 = pnand %p6251_p7, %p167_p8 }
   0xe   : > { %171 = sbr.rel (%p168_p9) target bundleno = 3921 (0xf51), region = 36 }
  0x13   : > { %v6406_v0 = vld [vmem:[%s11048_s1 + $0xa8] sm:$0xf]  ;;  %v6621_v1 = vld [vmem:[%s11048_s1 + $0xb0] sm:$0xf0]  ;;  %v6394_v2 = vld [vmem:[%s11048_s1 + $0x90] sm:$0xf] }
  0x14   : > { %v6407_v3 = vor.u32 %v6621_v1, %v6406_v0  ;;  %v6618_v4 = vld [vmem:[%s11048_s1 + $0x98] sm:$0xf0]  ;;  %v6382_v6 = vld [vmem:[%s11048_s1 + $0x78] sm:$0xf]  ;;  %v6615_v7 = vld [vmem:[%s11048_s1 + $0x80] sm:$0xf0] }
  0x15   : > { %v6395_v5 = vor.u32 %v6618_v4, %v6394_v2  ;;  %v6383_v8 = vor.u32 %v6615_v7, %v6382_v6  ;;  %v6370_v9 = vld [vmem:[%s11048_s1 + $0x60] sm:$0xf]  ;;  %v6612_v10 = vld [vmem:[%s11048_s1 + $0x68] sm:$0xf0]  ;;  %v6358_v12 = vld [vmem:[%s11048_s1 + $0x48] sm:$0xf] }
  0x16   : > { %6728 = vmatpush.bf16.msra.mxu1 %v6407_v3  ;;  %491 = vmatpush.bf16.msra.mxu0 %v6407_v3  ;;  %v6371_v11 = vor.u32 %v6612_v10, %v6370_v9  ;;  %v6609_v13 = vld [vmem:[%s11048_s1 + $0x50] sm:$0xf0]  ;;  %s6253_s30 = sshll.u32 %s7422_s19, 2  ;;  %v6346_v15 = vld [vmem:[%s11048_s1 + $0x30] sm:$0xf]  ;;  %s7372_s29 = smov 96  }
  0x17   : > { %6729 = vmatpush.bf16.msra.mxu2 %v6407_v3  ;;  %6730 = vmatpush.bf16.msra.mxu3 %v6407_v3  ;;  %v6359_v14 = vor.u32 %v6609_v13, %v6358_v12  ;;  %v6606_v16 = vld [vmem:[%s11048_s1 + $0x38] sm:$0xf0]  ;;  %p195_p10 = scmp.lt.s32.totalorder %s6253_s30, 7  ;;  %v6334_v18 = vld [vmem:[%s11048_s1 + $0x18] sm:$0xf]  ;;  %vm929_vm0 = vcmask 261120  }
  0x18   : > { %v6347_v17 = vor.u32 %v6606_v16, %v6346_v15  ;;  %v6603_v19 = vld [vmem:[%s11048_s1 + $0x20] sm:$0xf0]  ;;  %v6322_v21 = vld [vmem:[%s11048_s1] sm:$0xf]  ;;  %v6600_v22 = vld [vmem:[%s11048_s1 + $0x8] sm:$0xf0] }
  0x19   : > { %s11570_s30 = smov (!%p195_p10, %s6253_s30), 7  ;;  %v6335_v20 = vor.u32 %v6603_v19, %v6334_v18  ;;  %v6620_v23 = vld [vmem:[%s11048_s1 + $0xac] sm:$0xf]  ;;  %v6408_v24 = vld [vmem:[%s11048_s1 + $0xb4] sm:$0xf0]  ;;  %v6323_v25 = vor.u32 %v6600_v22, %v6322_v21  ;;  %vm1262_vm5 = vcmask 523264  }
  0x1a   : > { %6731 = vmatpush.bf16.msra.mxu1 %v6395_v5  ;;  %492 = vmatpush.bf16.msra.mxu0 %v6395_v5  ;;  %s6582_s23 = sshll.u32 %s11570_s30, 5  ;;  %v6411_v26 = vor.u32 %v6620_v23, %v6408_v24  ;;  %v6617_v27 = vld [vmem:[%s11048_s1 + $0x94] sm:$0xf]  ;;  %v6396_v28 = vld [vmem:[%s11048_s1 + $0x9c] sm:$0xf0]  ;;  %s7374_s5 = smov 32  }
  0x1b   : > { %6732 = vmatpush.bf16.msra.mxu2 %v6395_v5  ;;  %6733 = vmatpush.bf16.msra.mxu3 %v6395_v5  ;;  %s7507_s8 = scalar_lea.vmem %s11047_s0, %s6582_s23  ;;  %v6399_v30 = vor.u32 %v6617_v27, %v6396_v28  ;;  %v6614_v31 = vld [vmem:[%s11048_s1 + $0x7c] sm:$0xf]  ;;  %v6384_v32 = vld [vmem:[%s11048_s1 + $0x84] sm:$0xf0]  ;;  %v6611_v34 = vld [vmem:[%s11048_s1 + $0x64] sm:$0xf] }
  0x1c   : > { %v7516_v29 = vld [vmem:[%s7507_s8 + $0x20] sm:$0xff]  ;;  %v6387_v33 = vor.u32 %v6614_v31, %v6384_v32  ;;  %v6372_v35 = vld [vmem:[%s11048_s1 + $0x6c] sm:$0xf0]  ;;  %v6608_v37 = vld [vmem:[%s11048_s1 + $0x4c] sm:$0xf]  ;;  %vm5899_vm10 = vcmask 785408  }
  0x1d   : > { %v6375_v36 = vor.u32 %v6611_v34, %v6372_v35  ;;  %v6360_v38 = vld [vmem:[%s11048_s1 + $0x54] sm:$0xf0]  ;;  %v6605_v40 = vld [vmem:[%s11048_s1 + $0x34] sm:$0xf]  ;;  %v6348_v41 = vld [vmem:[%s11048_s1 + $0x3c] sm:$0xf0] }
  0x1e   : > { %6734 = vmatpush.bf16.msra.mxu1 %v6383_v8  ;;  %493 = vmatpush.bf16.msra.mxu0 %v6383_v8  ;;  %v6363_v39 = vor.u32 %v6608_v37, %v6360_v38  ;;  %v7544_v42 = vld [vmem:[%s7507_s8 + $0x28] sm:$0xff]  ;;  %v6351_v43 = vor.u32 %v6605_v40, %v6348_v41  ;;  %v6602_v44 = vld [vmem:[%s11048_s1 + $0x1c] sm:$0xf]  ;;  %v7554_v46 = vld [vmem:[%s7507_s8] sm:$0xff]  ;;  %s7328_s7 = scalar_lea.hbm %s11051_s4, 256 }
  0x1f   : > { %6735 = vmatpush.bf16.msra.mxu2 %v6383_v8  ;;  %6736 = vmatpush.bf16.msra.mxu3 %v6383_v8  ;;  %v6336_v45 = vld [vmem:[%s11048_s1 + $0x24] sm:$0xf0]  ;;  %v6599_v48 = vld [vmem:[%s11048_s1 + $0x4] sm:$0xf]  ;;  %v6324_v49 = vld [vmem:[%s11048_s1 + $0xc] sm:$0xf0] }
  0x20   : > { %v6339_v47 = vor.u32 %v6602_v44, %v6336_v45  ;;  %v6327_v50 = vor.u32 %v6599_v48, %v6324_v49  ;;  %v7564_v51 = vld [vmem:[%s7507_s8 + $0x30] sm:$0xff]  ;;  %v6584_v52 = vld [vmem:[%s7507_s8 + $0x8] sm:$0xff]  ;;  %v7569_v53 = vld [vmem:[%s7507_s8 + $0x38] sm:$0xff] }
  0x21   : > { %v6585_v54 = vld [vmem:[%s7507_s8 + $0x10] sm:$0xff]  ;;  %v7575_v55 = vld [vmem:[%s7507_s8 + $0x40] sm:$0xff]  ;;  %v6586_v56 = vld [vmem:[%s7507_s8 + $0x18] sm:$0xff] }
  0x22   : > { %6737 = vmatpush.bf16.msra.mxu1 %v6371_v11  ;;  %494 = vmatpush.bf16.msra.mxu0 %v6371_v11  ;;  %v7580_v57 = vld [vmem:[%s7507_s8 + $0x48] sm:$0xff]  ;;  %v7584_v58 = vld [vmem:[%s7507_s8 + $0x50] sm:$0xff]  ;;  %v6622_v60 = vld [vmem:[%s11048_s1 + $0xb8] sm:$0xf0] }
  0x23   : > { %6738 = vmatpush.bf16.msra.mxu2 %v6371_v11  ;;  %6739 = vmatpush.bf16.msra.mxu3 %v6371_v11  ;;  %v6414_v59 = vld [vmem:[%s11048_s1 + $0xb0] sm:$0xf]  ;;  %v6402_v62 = vld [vmem:[%s11048_s1 + $0x98] sm:$0xf]  ;;  %v6619_v63 = vld [vmem:[%s11048_s1 + $0xa0] sm:$0xf0] }
  0x24   : > { %v6415_v61 = vor.u32 %v6622_v60, %v6414_v59  ;;  %v6390_v0 = vld [vmem:[%s11048_s1 + $0x80] sm:$0xf]  ;;  %v6403_v1 = vor.u32 %v6619_v63, %v6402_v62  ;;  %v6616_v2 = vld [vmem:[%s11048_s1 + $0x88] sm:$0xf0]  ;;  %v6378_v4 = vld [vmem:[%s11048_s1 + $0x68] sm:$0xf] }
  0x25   : > { %v6391_v3 = vor.u32 %v6616_v2, %v6390_v0  ;;  %v6613_v5 = vld [vmem:[%s11048_s1 + $0x70] sm:$0xf0]  ;;  %v7612_v7 = vld [vmem:[%s7507_s8 + $0x58] sm:$0xff]  ;;  %v6366_v8 = vld [vmem:[%s11048_s1 + $0x50] sm:$0xf] }
  0x26   : > { %6740 = vmatpush.bf16.msra.mxu1 %v6359_v14  ;;  %495 = vmatpush.bf16.msra.mxu0 %v6359_v14  ;;  %v6379_v6 = vor.u32 %v6613_v5, %v6378_v4  ;;  %v6610_v9 = vld [vmem:[%s11048_s1 + $0x58] sm:$0xf0]  ;;  %v6354_v11 = vld [vmem:[%s11048_s1 + $0x38] sm:$0xf]  ;;  %v6607_v12 = vld [vmem:[%s11048_s1 + $0x40] sm:$0xf0] }
  0x27   : > { %6741 = vmatpush.bf16.msra.mxu2 %v6359_v14  ;;  %6742 = vmatpush.bf16.msra.mxu3 %v6359_v14  ;;  %v6367_v10 = vor.u32 %v6610_v9, %v6366_v8  ;;  %v6342_v13 = vld [vmem:[%s11048_s1 + $0x20] sm:$0xf]  ;;  %v6355_v14 = vor.u32 %v6607_v12, %v6354_v11  ;;  %v6604_v15 = vld [vmem:[%s11048_s1 + $0x28] sm:$0xf0]  ;;  %v6330_v18 = vld [vmem:[%s11048_s1 + $0x8] sm:$0xf] }
  0x28   : > { %v6343_v16 = vor.u32 %v6604_v15, %v6342_v13  ;;  %v6601_v19 = vld [vmem:[%s11048_s1 + $0x10] sm:$0xf0]  ;;  %v7661_v31 = vld [vmem:[%s7507_s8 + $0x60] sm:$0xff] }
  0x2a   : > { %6743 = vmatpush.bf16.msra.mxu1 %v6347_v17  ;;  %496 = vmatpush.bf16.msra.mxu0 %v6347_v17 }
  0x2b   : > { %6744 = vmatpush.bf16.msra.mxu2 %v6347_v17  ;;  %6745 = vmatpush.bf16.msra.mxu3 %v6347_v17 }
  0x2e   : > { %6746 = vmatpush.bf16.msra.mxu1 %v6335_v20  ;;  %497 = vmatpush.bf16.msra.mxu0 %v6335_v20 }
  0x2f   : > { %6747 = vmatpush.bf16.msra.mxu2 %v6335_v20  ;;  %6748 = vmatpush.bf16.msra.mxu3 %v6335_v20  ;;  %v6331_v20 = vor.u32 %v6601_v19, %v6330_v18 }
  0x32   : > { %6749 = vmatpush.bf16.msra.mxu1 %v6323_v25  ;;  %498 = vmatpush.bf16.msra.mxu0 %v6323_v25 }
  0x33   : > { %6750 = vmatpush.bf16.msra.mxu2 %v6323_v25  ;;  %6751 = vmatpush.bf16.msra.mxu3 %v6323_v25 }
  0x35   : > { %519 = vmatmul.bf16.vlgmr.msra.gmra.mxu1 %v7516_v29  ;;  %499 = vmatmul.bf16.vlgmr.msra.gmra.mxu0 %v7554_v46 }
  0x36   : > { %580 = vmatpush.bf16.msrb.mxu1 %v6411_v26  ;;  %539 = vmatmul.bf16.vlgmr.msra.gmra.mxu2 %v7575_v55 }
  0x37   : > { %669 = vmatpush.bf16.msrb.mxu2 %v6415_v61  ;;  %559 = vmatmul.bf16.vlgmr.msra.gmra.mxu3 %v7661_v31 }
  0x3a   : > { %581 = vmatpush.bf16.msrb.mxu1 %v6399_v30 }
  0x3b   : > { %670 = vmatpush.bf16.msrb.mxu2 %v6403_v1 }
  0x3e   : > { %582 = vmatpush.bf16.msrb.mxu1 %v6387_v33 }
  0x3f   : > { %671 = vmatpush.bf16.msrb.mxu2 %v6391_v3 }
  0x42   : > { %583 = vmatpush.bf16.msrb.mxu1 %v6375_v36 }
  0x43   : > { %672 = vmatpush.bf16.msrb.mxu2 %v6379_v6 }
  0x45   : > { %524 = vmatmul.bf16.gmra.mxu1 %v7544_v42  ;;  %504 = vmatmul.bf16.gmra.mxu0 %v6584_v52 }
  0x46   : > { %584 = vmatpush.bf16.msrb.mxu1 %v6363_v39  ;;  %544 = vmatmul.bf16.gmra.mxu2 %v7580_v57 }
  0x47   : > { %673 = vmatpush.bf16.msrb.mxu2 %v6367_v10 }
  0x4a   : > { %585 = vmatpush.bf16.msrb.mxu1 %v6351_v43  ;;  %v7683_v43 = vld [vmem:[%s7507_s8 + $0x68] sm:$0xff] }
  0x4b   : > { %674 = vmatpush.bf16.msrb.mxu2 %v6355_v14  ;;  %564 = vmatmul.bf16.gmra.mxu3 %v7683_v43 }
  0x4e   : > { %586 = vmatpush.bf16.msrb.mxu1 %v6339_v47 }
  0x4f   : > { %675 = vmatpush.bf16.msrb.mxu2 %v6343_v16 }
  0x52   : > { %587 = vmatpush.bf16.msrb.mxu1 %v6327_v50 }
  0x53   : > { %676 = vmatpush.bf16.msrb.mxu2 %v6331_v20 }
  0x55   : > { %529 = vmatmul.bf16.gmra.mxu1 %v7564_v51  ;;  %509 = vmatmul.bf16.gmra.mxu0 %v6585_v54 }
  0x56   : > { %549 = vmatmul.bf16.gmra.mxu2 %v7584_v58 }
  0x65   : > { %534 = vmatmul.bf16.gmra.mxu1 %v7569_v53  ;;  %514 = vmatmul.bf16.gmra.mxu0 %v6586_v56 }
  0x66   : > { %554 = vmatmul.bf16.gmra.mxu2 %v7612_v7 }
  0x75   : > { %588 = vmatmul.bf16.vlgmr.msrb.gmra.mxu1 %v7554_v46 }
  0x76   : > { %677 = vmatmul.bf16.vlgmr.msrb.gmra.mxu2 %v7554_v46 }
  0x85   : > { %593 = vmatmul.bf16.gmra.mxu1 %v6584_v52 }
  0x86   : > { %682 = vmatmul.bf16.gmra.mxu2 %v6584_v52 }
  0x95   : > { %598 = vmatmul.bf16.gmra.mxu1 %v6585_v54 }
  0x96   : > { %687 = vmatmul.bf16.gmra.mxu2 %v6585_v54 }
  0xa5   : > { %603 = vmatmul.bf16.gmra.mxu1 %v6586_v56 }
  0xa6   : > { %692 = vmatmul.bf16.gmra.mxu2 %v6586_v56  ;;  %v7707_v56 = vld [vmem:[%s7507_s8 + $0x70] sm:$0xff] }
  0xa7   : > { %569 = vmatmul.bf16.gmra.mxu3 %v7707_v56 }
  0xb2   : > { %v7633_v17 = vpop.f32.mrf.mxu1  ;;  %v500_v27 = vpop.f32.mrf.mxu0 }
  0xb5   : > { %608 = vmatmul.bf16.gmra.mxu1 %v7516_v29 }
  0xb6   : > { %697 = vmatmul.bf16.gmra.mxu2 %v7516_v29 }
  0xb9   : > { %v7672_v37 = vpop.f32.mrf.mxu2 }
  0xba   : > { %v7643_v21 = vpop.f32.mrf.mxu1  ;;  %v502_v30 = vpop.f32.mrf.mxu0 }
  0xc1   : > { %v7687_v45 = vpop.f32.mrf.mxu2 }
  0xc2   : > { %v7645_v22 = vpop.f32.mrf.mxu1  ;;  %v505_v34 = vpop.f32.mrf.mxu0 }
  0xc5   : > { %613 = vmatmul.bf16.gmra.mxu1 %v7544_v42 }
  0xc6   : > { %702 = vmatmul.bf16.gmra.mxu2 %v7544_v42 }
  0xc9   : > { %v7696_v49 = vpop.f32.mrf.mxu2 }
  0xca   : > { %v7648_v23 = vpop.f32.mrf.mxu1  ;;  %v507_v41 = vpop.f32.mrf.mxu0 }
  0xd1   : > { %v7709_v59 = vpop.f32.mrf.mxu2 }
  0xd2   : > { %v7650_v24 = vpop.f32.mrf.mxu1  ;;  %v510_v47 = vpop.f32.mrf.mxu0 }
  0xd5   : > { %618 = vmatmul.bf16.gmra.mxu1 %v7564_v51 }
  0xd6   : > { %707 = vmatmul.bf16.gmra.mxu2 %v7564_v51  ;;  %v7731_v51 = vld [vmem:[%s7507_s8 + $0x78] sm:$0xff]  ;;  %s7373_s8 = smov 64  }
  0xd7   : > { %574 = vmatmul.bf16.gmra.mxu3 %v7731_v51 }
  0xd9   : > { %v7720_v0 = vpop.f32.mrf.mxu2 }
  0xda   : > { %v7653_v25 = vpop.f32.mrf.mxu1  ;;  %v512_v60 = vpop.f32.mrf.mxu0 }
  0xe1   : > { %v7735_v8 = vpop.f32.mrf.mxu2 }
  0xe2   : > { %v7655_v26 = vpop.f32.mrf.mxu1  ;;  %v515_v3 = vpop.f32.mrf.mxu0 }
  0xe5   : > { %623 = vmatmul.bf16.gmra.mxu1 %v7569_v53 }
  0xe6   : > { %712 = vmatmul.bf16.gmra.mxu2 %v7569_v53 }
  0xe9   : > { %v7745_v13 = vpop.f32.mrf.mxu2 }
  0xea   : > { %v7658_v28 = vpop.f32.mrf.mxu1  ;;  %v517_v9 = vpop.f32.mrf.mxu0 }
  0xf2   : > { %v589_v32 = vpop.f32.mrf.mxu1 }
  0xf3   : > { %v7663_v33 = vpack.c.bf16 %v589_v32, %v500_v27 }
  0xf5   : > { %628 = vmatmul.bf16.gmra.mxu1 %v7575_v55  ;;  %2019 = vrot.lane.b32.xlu2 %v7663_v33, %s7372_s29  ;;  %v905_v38 = vunpack.c.l.b16 %v7663_v33 }
  0xf6   : > { %717 = vmatmul.bf16.gmra.mxu2 %v7575_v55 }
  0xfa   : > { %v591_v35 = vpop.f32.mrf.mxu1 }
  0xfb   : > { %v7670_v36 = vpack.c.bf16 %v591_v35, %v502_v30 }
  0xfd   : > { %11189 = vst [vmem:[#allocation5_spill] sm:$0xff] %v7670_v36  ;;  %2021 = vrot.lane.b32.xlu0 %v7670_v36, %s7372_s29  ;;  %v906_v39 = vunpack.c.l.b16 %v7670_v36 }
  0xff   : > { %v7678_v40 = vpack.c.b16 %v906_v39, %v905_v38  ;;  %v7757_v38 = vpop.f32.mrf.mxu2 }
 0x101   : > { %11190 = vst [vmem:[#allocation6_spill] sm:$0xff] %v7678_v40  ;;  %2115 = vrot.lane.b32.xlu1 %v7678_v40, %s7372_s29 }
 0x102   : > { %v594_v29 = vpop.f32.mrf.mxu1 }
 0x103   : > { %v7685_v44 = vpack.c.bf16 %v594_v29, %v505_v34 }
 0x105   : > { %11191 = vst [vmem:[#allocation7_spill] sm:$0xff] %v7685_v44  ;;  %633 = vmatmul.bf16.gmra.mxu1 %v7580_v57  ;;  %2023 = vrot.lane.b32.xlu0 %v7685_v44, %s7372_s29  ;;  %v907_v50 = vunpack.c.l.b16 %v7685_v44 }
 0x106   : > { %722 = vmatmul.bf16.gmra.mxu2 %v7580_v57 }
 0x10a   : > { %v596_v46 = vpop.f32.mrf.mxu1 }
 0x10b   : > { %v7694_v48 = vpack.c.bf16 %v596_v46, %v507_v41  ;;  %v875_v46 = vrot.slane %v7685_v44, 4 }
 0x10d   : > { %2025 = vrot.lane.b32.xlu1 %v7694_v48, %s7372_s29  ;;  %v908_v52 = vunpack.c.l.b16 %v7694_v48  ;;  %v876_v29 = vrot.slane %v7694_v48, 4  ;;  %v919_v55 = vunpack.c.l.b16 %v875_v46 }
 0x10f   : > { %v7702_v54 = vpack.c.b16 %v908_v52, %v907_v50 }
 0x111   : > { %11192 = vst [vmem:[#allocation8_spill] sm:$0xff] %v7702_v54  ;;  %2117 = vrot.lane.b32.xlu2 %v7702_v54, %s7372_s29 }
 0x112   : > { %v599_v42 = vpop.f32.mrf.mxu1 }
 0x113   : > { %v7713_v61 = vpack.c.bf16 %v599_v42, %v510_v47 }
 0x115   : > { %638 = vmatmul.bf16.gmra.mxu1 %v7584_v58  ;;  %v909_v1 = vunpack.c.l.b16 %v7713_v61  ;;  %v877_v27 = vrot.slane %v7713_v61, 4 }
 0x116   : > { %727 = vmatmul.bf16.gmra.mxu2 %v7584_v58 }
 0x117   : > { %v921_v39 = vunpack.c.l.b16 %v877_v27 }
 0x119   : > { %2027 = vrot.lane.b32.xlu2 %v7713_v61, %s7372_s29 }
 0x11a   : > { %v601_v62 = vpop.f32.mrf.mxu1 }
 0x11b   : > { %v7718_v63 = vpack.c.bf16 %v601_v62, %v512_v60  ;;  %v920_v60 = vunpack.c.l.b16 %v876_v29  ;;  %v7772_v62 = vpop.f32.mrf.mxu2 }
 0x11d   : > { %11193 = vst [vmem:[#allocation9_spill] sm:$0xff] %v7718_v63  ;;  %2029 = vrot.lane.b32.xlu1 %v7718_v63, %s7372_s29  ;;  %v910_v2 = vunpack.c.l.b16 %v7718_v63  ;;  %v878_v19 = vrot.slane %v7718_v63, 4 }
 0x11f   : > { %v7726_v4 = vpack.c.b16 %v910_v2, %v909_v1  ;;  %v922_v35 = vunpack.c.l.b16 %v878_v19  ;;  %v926_v1 = vpack.c.b16 %v920_v60, %v919_v55  ;;  %v874_v2 = vrot.slane %v7670_v36, 4 }
 0x121   : > { %11194 = vst [vmem:[#allocation10_spill] sm:$0xff] %v7726_v4  ;;  %2119 = vrot.lane.b32.xlu2 %v7726_v4, %s7372_s29  ;;  %v927_v41 = vpack.c.b16 %v922_v35, %v921_v39 }
 0x122   : > { %v604_v5 = vpop.f32.mrf.mxu1 }
 0x123   : > { %v7733_v6 = vpack.c.bf16 %v604_v5, %v515_v3  ;;  %v949_v42 = vsel %vm929_vm0, %v927_v41, 0  ;;  %v873_v3 = vrot.slane %v7663_v33, 4 }
 0x125   : > { %11195 = vst [vmem:[#allocation11_spill] sm:$0xff] %v7733_v6  ;;  %643 = vmatmul.bf16.gmra.mxu1 %v7612_v7  ;;  %2031 = vrot.lane.b32.xlu0 %v7733_v6, %s7372_s29  ;;  %v879_v12 = vrot.slane %v7733_v6, 4  ;;  %v911_v53 = vunpack.c.l.b16 %v7733_v6 }
 0x126   : > { %732 = vmatmul.bf16.gmra.mxu2 %v7612_v7 }
 0x127   : > { %v923_v15 = vunpack.c.l.b16 %v879_v12  ;;  %v918_v12 = vunpack.c.l.b16 %v874_v2 }
 0x12a   : > { %v606_v10 = vpop.f32.mrf.mxu1 }
 0x12b   : > { %v7742_v11 = vpack.c.bf16 %v606_v10, %v517_v9  ;;  %v946_v9 = vsel %vm929_vm0, %v926_v1, 0 }
 0x12d   : > { %2033 = vrot.lane.b32.xlu1 %v7742_v11, %s7372_s29  ;;  %v880_v14 = vrot.slane %v7742_v11, 4  ;;  %v912_v18 = vunpack.c.l.b16 %v7742_v11 }
 0x12f   : > { %v924_v16 = vunpack.c.l.b16 %v880_v14  ;;  %v7755_v34 = vpack.c.b16 %v912_v18, %v911_v53  ;;  %v7785_v14 = vpop.f32.mrf.mxu2 }
 0x131   : > { %v928_v20 = vpack.c.b16 %v924_v16, %v923_v15  ;;  %11196 = vst [vmem:[#allocation12_spill] sm:$0xff] %v7755_v34  ;;  %v917_v15 = vunpack.c.l.b16 %v873_v3 }
 0x132   : > { %v609_v30 = vpop.f32.mrf.mxu1 }
 0x133   : > { %v952_v32 = vsel %vm929_vm0, %v928_v20, 0  ;;  %v7766_v50 = vpack.c.bf16 %v609_v30, %v7633_v17  ;;  %v925_v16 = vpack.c.b16 %v918_v12, %v917_v15 }
 0x134   : > { %958 = vmatpush.bf16.xpose.msrb.mxu3 %v952_v32 }
 0x135   : > { %648 = vmatmul.bf16.gmra.mxu1 %v7661_v31  ;;  %2121 = vrot.lane.b32.xlu1 %v7755_v34, %s7372_s29  ;;  %11197 = vst [vmem:[#allocation13_spill] sm:$0xff] %v7766_v50  ;;  %v943_v53 = vsel %vm929_vm0, %v925_v16, 0 }
 0x136   : > { %737 = vmatmul.bf16.gmra.mxu2 %v7661_v31 }
 0x137   : > { %v7798_v27 = vpop.f32.mrf.mxu2 }
 0x13a   : > { %v611_v47 = vpop.f32.mrf.mxu1 }
 0x13b   : > { %v7769_v52 = vpack.c.bf16 %v611_v47, %v7643_v21  ;;  %v983_v21 = vunpack.c.l.b16 %v7766_v50 }
 0x13c   : > { %959 = vmatpush.bf16.xpose.msrb.mxu3 %v949_v42 }
 0x13d   : > { %11198 = vst [vmem:[#allocation14_spill] sm:$0xff] %v7769_v52  ;;  %2037 = vrot.lane.b32.xlu0 %v7769_v52, %s7372_s29  ;;  %2035 = vrot.lane.b32.xlu1 %v7766_v50, %s7372_s29  ;;  %v984_v17 = vunpack.c.l.b16 %v7769_v52 }
 0x13f   : > { %v7783_v10 = vpack.c.b16 %v984_v17, %v983_v21 }
 0x141   : > { %11199 = vst [vmem:[#allocation15_spill] sm:$0xff] %v7783_v10 }
 0x142   : > { %v614_v5 = vpop.f32.mrf.mxu1 }
 0x143   : > { %v7792_v19 = vpack.c.bf16 %v614_v5, %v7645_v22 }
 0x144   : > { %960 = vmatpush.bf16.xpose.msrb.mxu3 %v946_v9 }
 0x145   : > { %653 = vmatmul.bf16.gmra.mxu1 %v7683_v43  ;;  %2188 = vrot.lane.b32.xlu1 %v7783_v10, %s7372_s29  ;;  %11200 = vst [vmem:[#allocation16_spill] sm:$0xff] %v7792_v19  ;;  %v985_v22 = vunpack.c.l.b16 %v7792_v19 }
 0x14a   : > { %v616_v18 = vpop.f32.mrf.mxu1 }
 0x14b   : > { %v7795_v20 = vpack.c.bf16 %v616_v18, %v7648_v23  ;;  %v7811_v23 = vpop.f32.mrf.mxu2  ;;  %742 = vmatmul.bf16.gmra.mxu2 %v7683_v43 }
 0x14c   : > { %961 = vmatpush.bf16.xpose.msrb.mxu3 %v943_v53 }
 0x14d   : > { %11201 = vst [vmem:[#allocation17_spill] sm:$0xff] %v7795_v20  ;;  %2041 = vrot.lane.b32.xlu2 %v7795_v20, %s7372_s29  ;;  %2039 = vrot.lane.b32.xlu1 %v7792_v19, %s7372_s29  ;;  %v986_v57 = vunpack.c.l.b16 %v7795_v20 }
 0x14f   : > { %v7813_v35 = vpack.c.b16 %v986_v57, %v985_v22 }
 0x151   : > { %11203 = vst [vmem:[#allocation19_spill] sm:$0xff] %v7813_v35 }
 0x152   : > { %v619_v30 = vpop.f32.mrf.mxu1 }
 0x153   : > { %v7807_v32 = vpack.c.bf16 %v619_v30, %v7650_v24  ;;  %6416 = vmatmul.msk.bf16.vlgmr.msrb.gmra.mxu3 %vm929_vm0, %v7678_v40  ;;  %v688_v41 = vpop.f32.mrf.mxu2 }
 0x154   : > { %v767_v16 = vpack.c.bf16 %v688_v41, %v688_v41 }
 0x155   : > { %11202 = vst [vmem:[#allocation18_spill] sm:$0xff] %v7807_v32  ;;  %658 = vmatmul.bf16.gmra.mxu1 %v7707_v56  ;;  %2043 = vrot.lane.b32.xlu2 %v7807_v32, %s7372_s29  ;;  %v987_v29 = vunpack.c.l.b16 %v7807_v32 }
 0x156   : > { %2190 = vrot.lane.b32.xlu1 %v7813_v35, %s7372_s29 }
 0x15a   : > { %v621_v39 = vpop.f32.mrf.mxu1 }
 0x15b   : > { %v7822_v24 = vpack.c.bf16 %v621_v39, %v7653_v25  ;;  %v690_v25 = vpop.f32.mrf.mxu2  ;;  %747 = vmatmul.bf16.gmra.mxu2 %v7707_v56 }
 0x15c   : > { %v769_v22 = vpack.c.bf16 %v690_v25, %v690_v25  ;;  %v1679_v25 = vunpack.c.l.b16 %v767_v16 }
 0x15d   : > { %11204 = vst [vmem:[#allocation20_spill] sm:$0xff] %v7822_v24  ;;  %2045 = vrot.lane.b32.xlu0 %v7822_v24, %s7372_s29  ;;  %v988_v46 = vunpack.c.l.b16 %v7822_v24  ;;  %v886_v2 = vrot.slane %v7822_v24, 4 }
 0x15f   : > { %v7828_v47 = vpack.c.b16 %v988_v46, %v987_v29  ;;  %v1000_v18 = vunpack.c.l.b16 %v886_v2  ;;  %v763_v46 = vpack.c.bf16 %v7798_v27, %v7798_v27  ;;  %v883_v2 = vrot.slane %v7792_v19, 4 }
 0x160   : > { %v761_v27 = vpack.c.bf16 %v7785_v14, %v7785_v14 }
 0x161   : > { %11205 = vst [vmem:[#allocation21_spill] sm:$0xff] %v7828_v47  ;;  %2192 = vrot.lane.b32.xlu1 %v7828_v47, %s7372_s29  ;;  %v997_v16 = vunpack.c.l.b16 %v883_v2 }
 0x162   : > { %v624_v42 = vpop.f32.mrf.mxu1 }
 0x163   : > { %v7833_v58 = vpack.c.bf16 %v624_v42, %v7655_v26  ;;  %6417 = vmatmul.msk.bf16.gmra.mxu3 %vm929_vm0, %v7702_v54  ;;  %v693_v17 = vpop.f32.mrf.mxu2  ;;  %v765_v42 = vpack.c.bf16 %v7811_v23, %v7811_v23 }
 0x164   : > { %v771_v12 = vpack.c.bf16 %v693_v17, %v693_v17  ;;  %v1680_v17 = vunpack.c.l.b16 %v769_v22 }
 0x165   : > { %11206 = vst [vmem:[#allocation22_spill] sm:$0xff] %v7833_v58  ;;  %663 = vmatmul.bf16.gmra.mxu1 %v7731_v51  ;;  %2047 = vrot.lane.b32.xlu0 %v7833_v58, %s7372_s29  ;;  %v887_v1 = vrot.slane %v7833_v58, 4  ;;  %v989_v7 = vunpack.c.l.b16 %v7833_v58 }
 0x166   : > { %v1681_v29 = vunpack.c.l.b16 %v771_v12  ;;  %v7881_v31 = vpack.c.b16 %v1680_v17, %v1679_v25 }
 0x167   : > { %v1001_v21 = vunpack.c.l.b16 %v887_v1 }
 0x168   : > { %11212 = vst [vmem:[#allocation28_spill] sm:$0xff] %v7881_v31 }
 0x16a   : > { %v626_v60 = vpop.f32.mrf.mxu1 }
 0x16b   : > { %v7842_v55 = vpack.c.bf16 %v626_v60, %v7658_v28  ;;  %v885_v28 = vrot.slane %v7807_v32, 4  ;;  %v695_v39 = vpop.f32.mrf.mxu2  ;;  %v884_v60 = vrot.slane %v7795_v20, 4  ;;  %752 = vmatmul.bf16.gmra.mxu2 %v7731_v51 }
 0x16d   : > { %11207 = vst [vmem:[#allocation23_spill] sm:$0xff] %v7842_v55  ;;  %2049 = vrot.lane.b32.xlu1 %v7842_v55, %s7372_s29  ;;  %v888_v26 = vrot.slane %v7842_v55, 4  ;;  %v990_v5 = vunpack.c.l.b16 %v7842_v55  ;;  %v999_v41 = vunpack.c.l.b16 %v885_v28 }
 0x16f   : > { %v1002_v3 = vunpack.c.l.b16 %v888_v26  ;;  %v7858_v30 = vpack.c.b16 %v990_v5, %v989_v7  ;;  %v1005_v1 = vpack.c.b16 %v1000_v18, %v999_v41  ;;  %v1677_v5 = vunpack.c.l.b16 %v763_v46 }
 0x170   : > { %v1678_v7 = vunpack.c.l.b16 %v765_v42 }
 0x171   : > { %v1006_v9 = vpack.c.b16 %v1002_v3, %v1001_v21  ;;  %11209 = vst [vmem:[#allocation25_spill] sm:$0xff] %v7858_v30  ;;  %v759_v3 = vpack.c.bf16 %v7772_v62, %v7772_v62  ;;  %v1026_v12 = vsel %vm929_vm0, %v1005_v1, 0 }
 0x172   : > { %v629_v15 = vpop.f32.mrf.mxu1  ;;  %v7891_v22 = vpack.c.b16 %v1678_v7, %v1677_v5  ;;  %v7928_v7 = vpop.permute.xlu2 %2019 }
 0x173   : > { %v7853_v53 = vpack.c.bf16 %v629_v15, %v7672_v37  ;;  %6418 = vmatmul.msk.bf16.gmra.mxu3 %vm929_vm0, %v7726_v4  ;;  %v1029_v57 = vsel %vm929_vm0, %v1006_v9, 0  ;;  %v773_v37 = vpack.c.bf16 %v695_v39, %v695_v39  ;;  %v998_v9 = vunpack.c.l.b16 %v884_v60  ;;  %v7884_v15 = vpop.f32.mrf.mxu2  ;;  %v7914_v2 = vpop.permute.xlu1 %2115 }
 0x174   : > { %1035 = vmatpush.bf16.xpose.msra.mxu3 %v1029_v57  ;;  %v1675_v18 = vunpack.c.l.b16 %v759_v3  ;;  %v1676_v57 = vunpack.c.l.b16 %v761_v27  ;;  %11213 = vst [vmem:[#allocation29_spill] sm:$0xff] %v7891_v22  ;;  %v7918_v3 = vpop.permute.xlu0 %2021 }
 0x175   : > { %11208 = vst [vmem:[#allocation24_spill] sm:$0xff] %v7853_v53  ;;  %2051 = vrot.lane.b32.xlu2 %v7853_v53, %s7372_s29  ;;  %2194 = vrot.lane.b32.xlu1 %v7858_v30, %s7372_s29  ;;  %v1682_v26 = vunpack.c.l.b16 %v773_v37  ;;  %v1060_v62 = vunpack.c.l.b16 %v7853_v53  ;;  %v1004_v41 = vpack.c.b16 %v998_v9, %v997_v16 }
 0x176   : > { %v7899_v46 = vpack.c.b16 %v1676_v57, %v1675_v18 }
 0x177   : > { %v7871_v21 = vpack.c.b16 %v1682_v26, %v1681_v29  ;;  %v881_v29 = vrot.slane %v7766_v50, 4  ;;  %v1023_v60 = vsel %vm929_vm0, %v1004_v41, 0  ;;  %v7912_v26 = vpop.f32.mrf.mxu3 }
 0x178   : > { %11215 = vst [vmem:[#allocation31_spill] sm:$0xff] %v7899_v46 }
 0x179   : > { %11210 = vst [vmem:[#allocation26_spill] sm:$0xff] %v7871_v21  ;;  %1707 = vmatpush.bf16.msrb.mxu0 %v7871_v21  ;;  %v995_v17 = vunpack.c.l.b16 %v881_v29 }
 0x17a   : > { %v631_v23 = vpop.f32.mrf.mxu1  ;;  %v7942_v57 = vpop.permute.xlu2 %2117 }
 0x17b   : > { %v7878_v28 = vpack.c.bf16 %v631_v23, %v7687_v45  ;;  %v882_v45 = vrot.slane %v7769_v52, 4  ;;  %v7908_v1 = vpop.f32.mrf.mxu2 }
 0x17c   : > { %1036 = vmatpush.bf16.xpose.msra.mxu3 %v1026_v12 }
 0x17d   : > { %11211 = vst [vmem:[#allocation27_spill] sm:$0xff] %v7878_v28  ;;  %2053 = vrot.lane.b32.xlu0 %v7878_v28, %s7372_s29  ;;  %v1061_v14 = vunpack.c.l.b16 %v7878_v28  ;;  %1708 = vmatpush.bf16.msrb.mxu0 %v7881_v31  ;;  %v996_v25 = vunpack.c.l.b16 %v882_v45 }
 0x17f   : > { %v7893_v39 = vpack.c.b16 %v1061_v14, %v1060_v62  ;;  %v2026_v12 = vpop.permute.xlu1 %2025  ;;  %v7931_v43 = vpop.f32.mrf.mxu3 }
 0x181   : > { %11214 = vst [vmem:[#allocation30_spill] sm:$0xff] %v7893_v39  ;;  %2261 = vrot.lane.b32.xlu1 %v7893_v39, %s7372_s29  ;;  %1709 = vmatpush.bf16.msrb.mxu0 %v7891_v22 }
 0x182   : > { %v634_v37 = vpop.f32.mrf.mxu1 }
 0x183   : > { %v7902_v42 = vpack.c.bf16 %v634_v37, %v7696_v49  ;;  %6419 = vmatmul.msk.bf16.gmra.mxu3 %vm929_vm0, %v7755_v34  ;;  %v1003_v49 = vpack.c.b16 %v996_v25, %v995_v17  ;;  %v7924_v9 = vpop.f32.mrf.mxu2 }
 0x184   : > { %1037 = vmatpush.bf16.xpose.msra.mxu3 %v1023_v60 }
 0x185   : > { %11216 = vst [vmem:[#allocation32_spill] sm:$0xff] %v7902_v42  ;;  %2055 = vrot.lane.b32.xlu0 %v7902_v42, %s7372_s29  ;;  %1710 = vmatpush.bf16.msrb.mxu0 %v7899_v46  ;;  %v1020_v23 = vsel %vm929_vm0, %v1003_v49, 0  ;;  %v1062_v14 = vunpack.c.l.b16 %v7902_v42 }
 0x187   : > { %v7948_v60 = vpop.f32.mrf.mxu3 }
 0x18a   : > { %v636_v27 = vpop.f32.mrf.mxu1 }
 0x18b   : > { %v7921_v5 = vpack.c.bf16 %v636_v27, %v7709_v59  ;;  %v2024_v59 = vpop.permute.xlu0 %2023  ;;  %v7938_v45 = vpop.f32.mrf.mxu2 }
 0x18c   : > { %1038 = vmatpush.bf16.xpose.msra.mxu3 %v1020_v23 }
 0x18d   : > { %11217 = vst [vmem:[#allocation33_spill] sm:$0xff] %v7921_v5  ;;  %2057 = vrot.lane.b32.xlu2 %v7921_v5, %s7372_s29  ;;  %v1063_v62 = vunpack.c.l.b16 %v7921_v5 }
 0x18f   : > { %v7936_v18 = vpack.c.b16 %v1063_v62, %v1062_v14  ;;  %v2030_v41 = vpop.permute.xlu1 %2029  ;;  %v7970_v20 = vpop.f32.mrf.mxu3 }
 0x191   : > { %11218 = vst [vmem:[#allocation34_spill] sm:$0xff] %v7936_v18 }
 0x192   : > { %v639_v16 = vpop.f32.mrf.mxu1 }
 0x193   : > { %6420 = vmatmul.msk.bf16.vlgmr.msra.gmra.mxu3 %vm929_vm0, %v7783_v10  ;;  %v7946_v29 = vpack.c.bf16 %v639_v16, %v7720_v0  ;;  %v7953_v49 = vpop.f32.mrf.mxu2  ;;  %v2028_v16 = vpop.permute.xlu2 %2027 }
 0x194   : > { %v2087_v34 = vrot.slane %v2028_v16, 4 }
 0x195   : > { %2263 = vrot.lane.b32.xlu2 %v7936_v18, %s7372_s29  ;;  %11219 = vst [vmem:[#allocation35_spill] sm:$0xff] %v7946_v29  ;;  %v1064_v56 = vunpack.c.l.b16 %v7946_v29 }
 0x197   : > { %v2032_v25 = vpop.permute.xlu0 %2031 }
 0x198   : > { %v2089_v27 = vrot.slane %v2032_v25, 4 }
 0x19a   : > { %v641_v37 = vpop.f32.mrf.mxu1 }
 0x19b   : > { %v7951_v17 = vpack.c.bf16 %v641_v37, %v7735_v8  ;;  %v2088_v8 = vrot.slane %v2030_v41, 4  ;;  %v2129_v37 = vunpack.c.l.b16 %v2089_v27 }
 0x19d   : > { %11220 = vst [vmem:[#allocation36_spill] sm:$0xff] %v7951_v17  ;;  %2059 = vrot.lane.b32.xlu2 %v7946_v29, %s7372_s29  ;;  %2061 = vrot.lane.b32.xlu0 %v7951_v17, %s7372_s29  ;;  %v1065_v0 = vunpack.c.l.b16 %v7951_v17 }
 0x19f   : > { %v2034_v23 = vpop.permute.xlu1 %2033  ;;  %v7961_v62 = vpack.c.b16 %v1065_v0, %v1064_v56  ;;  %v710_v56 = vpop.f32.mrf.mxu2  ;;  %v2128_v0 = vunpack.c.l.b16 %v2088_v8 }
 0x1a0   : > { %v2090_v14 = vrot.slane %v2034_v23, 4  ;;  %v2127_v23 = vunpack.c.l.b16 %v2087_v34 }
 0x1a1   : > { %11221 = vst [vmem:[#allocation37_spill] sm:$0xff] %v7961_v62  ;;  %2265 = vrot.lane.b32.xlu1 %v7961_v62, %s7372_s29 }
 0x1a2   : > { %v2130_v10 = vunpack.c.l.b16 %v2090_v14  ;;  %v644_v50 = vpop.f32.mrf.mxu1  ;;  %v2133_v16 = vpack.c.b16 %v2128_v0, %v2127_v23  ;;  %v894_v23 = vrot.slane %v7951_v17, 4 }
 0x1a3   : > { %v7966_v52 = vpack.c.bf16 %v644_v50, %v7745_v13  ;;  %6421 = vmatmul.msk.bf16.gmra.mxu3 %vm929_vm0, %v7813_v35  ;;  %v2086_v13 = vrot.slane %v2026_v12, 4  ;;  %v2085_v50 = vrot.slane %v2024_v59, 4 }
 0x1a4   : > { %v2134_v25 = vpack.c.b16 %v2130_v10, %v2129_v37  ;;  %v2154_v59 = vsel %vm929_vm0, %v2133_v16, 0 }
 0x1a5   : > { %11222 = vst [vmem:[#allocation38_spill] sm:$0xff] %v7966_v52  ;;  %2063 = vrot.lane.b32.xlu2 %v7966_v52, %s7372_s29  ;;  %v895_v37 = vrot.slane %v7966_v52, 4  ;;  %v2126_v19 = vunpack.c.l.b16 %v2086_v13  ;;  %v1066_v8 = vunpack.c.l.b16 %v7966_v52  ;;  %v2125_v12 = vunpack.c.l.b16 %v2085_v50 }
 0x1a6   : > { %v2157_v41 = vsel %vm929_vm0, %v2134_v25, 0  ;;  %v7988_v25 = vpop.f32.mrf.mxu3  ;;  %v2083_v13 = vrot.slane %v7928_v7, 4 }
 0x1a7   : > { %2163 = vmatpush.bf16.xpose.msra.mxu0 %v2157_v41  ;;  %v7975_v27 = vpop.permute.xlu1 %2121  ;;  %v713_v35 = vpop.f32.mrf.mxu2  ;;  %v1078_v0 = vunpack.c.l.b16 %v895_v37  ;;  %v2132_v16 = vpack.c.b16 %v2126_v19, %v2125_v12  ;;  %v783_v37 = vpack.c.bf16 %v7953_v49, %v7953_v49  ;;  %v781_v49 = vpack.c.bf16 %v7938_v45, %v7938_v45 }
 0x1a8   : > { %11223 = vst [vmem:[#allocation39_spill] sm:$0xff] %v7975_v27  ;;  %v775_v45 = vpack.c.bf16 %v7884_v15, %v7884_v15 }
 0x1a9   : > { %v2151_v19 = vsel %vm929_vm0, %v2132_v16, 0 }
 0x1aa   : > { %v646_v14 = vpop.f32.mrf.mxu1 }
 0x1ab   : > { %v7979_v10 = vpack.c.bf16 %v646_v14, %v7757_v38  ;;  %v2084_v14 = vrot.slane %v7918_v3, 4  ;;  %v1077_v3 = vunpack.c.l.b16 %v894_v23 }
 0x1ad   : > { %11224 = vst [vmem:[#allocation40_spill] sm:$0xff] %v7979_v10  ;;  %2065 = vrot.lane.b32.xlu0 %v7979_v10, %s7372_s29  ;;  %v1067_v34 = vunpack.c.l.b16 %v7979_v10  ;;  %v896_v51 = vrot.slane %v7979_v10, 4  ;;  %v893_v10 = vrot.slane %v7946_v29, 4  ;;  %v2124_v17 = vunpack.c.l.b16 %v2084_v14 }
 0x1ae   : > { %v8014_v16 = vpop.f32.mrf.mxu3 }
 0x1af   : > { %2164 = vmatpush.bf16.xpose.msra.mxu0 %v2154_v59  ;;  %v7990_v38 = vpack.c.b16 %v1067_v34, %v1066_v8  ;;  %v1079_v41 = vunpack.c.l.b16 %v896_v51  ;;  %v7995_v52 = vpop.permute.xlu1 %2035  ;;  %v787_v59 = vpack.c.bf16 %v713_v35, %v713_v35  ;;  %v785_v34 = vpack.c.bf16 %v710_v56, %v710_v56  ;;  %v715_v24 = vpop.f32.mrf.mxu2 }
 0x1b0   : > { %v2123_v51 = vunpack.c.l.b16 %v2083_v13  ;;  %v1076_v12 = vunpack.c.l.b16 %v893_v10  ;;  %v789_v35 = vpack.c.bf16 %v715_v24, %v715_v24 }
 0x1b1   : > { %11225 = vst [vmem:[#allocation41_spill] sm:$0xff] %v7990_v38  ;;  %2267 = vrot.lane.b32.xlu1 %v7990_v38, %s7372_s29  ;;  %v1083_v50 = vpack.c.b16 %v1079_v41, %v1078_v0  ;;  %v1766_v0 = vunpack.c.l.b16 %v787_v59  ;;  %v779_v41 = vpack.c.bf16 %v7924_v9, %v7924_v9  ;;  %v1765_v13 = vunpack.c.l.b16 %v785_v34 }
 0x1b2   : > { %v649_v8 = vpop.f32.mrf.mxu1  ;;  %v1082_v23 = vpack.c.b16 %v1077_v3, %v1076_v12  ;;  %v1767_v14 = vunpack.c.l.b16 %v789_v35  ;;  %v2131_v24 = vpack.c.b16 %v2124_v17, %v2123_v51  ;;  %v891_v9 = vrot.slane %v7902_v42, 4 }
 0x1b3   : > { %6422 = vmatmul.msk.bf16.gmra.mxu3 %vm929_vm0, %v7828_v47  ;;  %v1106_v7 = vsel %vm929_vm0, %v1083_v50, 0  ;;  %v1764_v47 = vunpack.c.l.b16 %v783_v37  ;;  %v892_v50 = vrot.slane %v7921_v5, 4  ;;  %v8012_v56 = vpack.c.bf16 %v649_v8, %v7912_v26 }
 0x1b4   : > { %1112 = vmatpush.bf16.xpose.msrb.mxu3 %v1106_v7  ;;  %v8019_v10 = vpack.c.b16 %v1767_v14, %v1766_v0  ;;  %v777_v26 = vpack.c.bf16 %v7908_v1, %v7908_v1  ;;  %v1762_v59 = vunpack.c.l.b16 %v779_v41  ;;  %v1763_v7 = vunpack.c.l.b16 %v781_v49 }
 0x1b5   : > { %11226 = vst [vmem:[#allocation42_spill] sm:$0xff] %v8012_v56  ;;  %v1075_v37 = vunpack.c.l.b16 %v892_v50  ;;  %v1103_v17 = vsel %vm929_vm0, %v1082_v23, 0  ;;  %v8031_v51 = vpack.c.b16 %v1765_v13, %v1764_v47  ;;  %v1137_v1 = vunpack.c.l.b16 %v8012_v56 }
 0x1b6   : > { %11227 = vst [vmem:[#allocation43_spill] sm:$0xff] %v8019_v10  ;;  %1792 = vmatpush.bf16.msra.mxu1 %v8019_v10  ;;  %v1074_v12 = vunpack.c.l.b16 %v891_v9  ;;  %v1760_v0 = vunpack.c.l.b16 %v775_v45  ;;  %v890_v35 = vrot.slane %v7878_v28, 4  ;;  %v1761_v47 = vunpack.c.l.b16 %v777_v26  ;;  %v8050_v14 = vpop.f32.mrf.mxu3 }
 0x1b7   : > { %2165 = vmatpush.bf16.xpose.msra.mxu0 %v2151_v19  ;;  %v8025_v3 = vpop.permute.xlu1 %2188  ;;  %11230 = vst [vmem:[#allocation46_spill] sm:$0xff] %v8031_v51  ;;  %v8034_v15 = vpop.f32.mrf.mxu2  ;;  %v8042_v41 = vpack.c.b16 %v1763_v7, %v1762_v59  ;;  %v889_v23 = vrot.slane %v7853_v53, 4 }
 0x1b8   : > { %11228 = vst [vmem:[#allocation44_spill] sm:$0xff] %v8025_v3  ;;  %v1081_v50 = vpack.c.b16 %v1075_v37, %v1074_v12  ;;  %v1073_v26 = vunpack.c.l.b16 %v890_v35 }
 0x1b9   : > { %2067 = vrot.lane.b32.xlu1 %v8012_v56, %s7372_s29  ;;  %11231 = vst [vmem:[#allocation47_spill] sm:$0xff] %v8042_v41  ;;  %v1072_v37 = vunpack.c.l.b16 %v889_v23 }
 0x1ba   : > { %v651_v8 = vpop.f32.mrf.mxu1  ;;  %1793 = vmatpush.bf16.msra.mxu1 %v8031_v51  ;;  %v1100_v45 = vsel %vm929_vm0, %v1081_v50, 0 }
 0x1bb   : > { %v8028_v34 = vpack.c.bf16 %v651_v8, %v7931_v43  ;;  %v2148_v43 = vsel %vm929_vm0, %v2131_v24, 0  ;;  %v8052_v24 = vpack.c.b16 %v1761_v47, %v1760_v0  ;;  %v1080_v7 = vpack.c.b16 %v1073_v26, %v1072_v37 }
 0x1bc   : > { %1113 = vmatpush.bf16.xpose.msrb.mxu3 %v1103_v17  ;;  %v8068_v17 = vpop.permute.xlu0 %2037 }
 0x1bd   : > { %11229 = vst [vmem:[#allocation45_spill] sm:$0xff] %v8028_v34  ;;  %2069 = vrot.lane.b32.xlu0 %v8028_v34, %s7372_s29  ;;  %v1138_v19 = vunpack.c.l.b16 %v8028_v34  ;;  %v1097_v12 = vsel %vm929_vm0, %v1080_v7, 0 }
 0x1be   : > { %11233 = vst [vmem:[#allocation49_spill] sm:$0xff] %v8052_v24  ;;  %1794 = vmatpush.bf16.msra.mxu1 %v8042_v41  ;;  %v577_v0 = vpop.f32.mrf.mxu3 }
 0x1bf   : > { %2166 = vmatpush.bf16.xpose.msra.mxu0 %v2148_v43  ;;  %v8044_v49 = vpack.c.b16 %v1138_v19, %v1137_v1  ;;  %v8061_v59 = vpop.f32.mrf.mxu2  ;;  %v8063_v8 = vpop.permute.xlu1 %2039 }
 0x1c1   : > { %11232 = vst [vmem:[#allocation48_spill] sm:$0xff] %v8044_v49  ;;  %2334 = vrot.lane.b32.xlu1 %v8044_v49, %s7372_s29 }
 0x1c2   : > { %v654_v13 = vpop.f32.mrf.mxu1  ;;  %1795 = vmatpush.bf16.msra.mxu1 %v8052_v24 }
 0x1c3   : > { %v8055_v9 = vpack.c.bf16 %v654_v13, %v7948_v60  ;;  %6423 = vmatmul.msk.bf16.gmra.mxu3 %vm929_vm0, %v7858_v30  ;;  %v822_v60 = vlaneseq  ;;  %v8085_v13 = vpop.permute.xlu2 %2119 }
 0x1c4   : > { %1114 = vmatpush.bf16.xpose.msrb.mxu3 %v1100_v45  ;;  %11236 = vst [vmem:[#allocation52_spill] sm:$0xff] %v8085_v13 }
 0x1c5   : > { %11234 = vst [vmem:[#allocation50_spill] sm:$0xff] %v8055_v9  ;;  %2071 = vrot.lane.b32.xlu2 %v8055_v9, %s7372_s29  ;;  %v8074_v43 = vshrl.u32 %v822_v60, 7  ;;  %v1139_v47 = vunpack.c.l.b16 %v8055_v9  ;;  %v8082_v23 = vand.u32 127, %v822_v60 }
 0x1c7   : > { %v8076_v35 = vpop.f32.mrf.mxu2  ;;  %vm8148_vm3 = vcmp.le.s32.totalorder %v8082_v23, %v8074_v43 }
 0x1c8   : > { %v8087_v45 = vpop.permute.xlu1 %2190 }
 0x1c9   : > { %11237 = vst [vmem:[#allocation53_spill] sm:$0xff] %v8087_v45 }
 0x1ca   : > { %v656_v1 = vpop.f32.mrf.mxu1 }
 0x1cb   : > { %v8071_v19 = vpack.c.bf16 %v656_v1, %v7970_v20  ;;  %v826_v20 = vadd.s32 24, %v8074_v43 }
 0x1cc   : > { %1115 = vmatpush.bf16.xpose.msrb.mxu3 %v1097_v12 }
 0x1cd   : > { %11235 = vst [vmem:[#allocation51_spill] sm:$0xff] %v8071_v19  ;;  %2073 = vrot.lane.b32.xlu0 %v8071_v19, %s7372_s29  ;;  %v1140_v50 = vunpack.c.l.b16 %v8071_v19  ;;  %vm8092_vm1 = vcmp.le.s32.totalorder %v8082_v23, %v826_v20 }
 0x1cf   : > { %v8089_v26 = vpack.c.b16 %v1140_v50, %v1139_v47  ;;  %v2046_v7 = vpop.permute.xlu0 %2045  ;;  %v8100_v60 = vpop.f32.mrf.mxu2 }
 0x1d0   : > { %v2042_v50 = vpop.permute.xlu2 %2041  ;;  %v2096_v32 = vrot.slane %v2046_v7, 4 }
 0x1d1   : > { %11238 = vst [vmem:[#allocation54_spill] sm:$0xff] %v8089_v26  ;;  %2336 = vrot.lane.b32.xlu1 %v8089_v26, %s7372_s29 }
 0x1d2   : > { %v659_v1 = vpop.f32.mrf.mxu1 }
 0x1d3   : > { %6424 = vmatmul.msk.bf16.vlgmr.msrb.gmra.mxu3 %vm929_vm0, %v7893_v39  ;;  %v8103_v12 = vpack.c.bf16 %v659_v1, %v7988_v25  ;;  %v8105_v30 = vpop.permute.xlu1 %2192 }
 0x1d4   : > { %11242 = vst [vmem:[#allocation56_spill] sm:$0xff] %v8105_v30  ;;  %v2092_v30 = vrot.slane %v8068_v17, 4  ;;  %v827_v17 = vadd.s32 32, %v8074_v43 }
 0x1d5   : > { %11241 = vst [vmem:[#allocation55_spill] sm:$0xff] %v8103_v12 }
 0x1d6   : > { %v963_v47 = vpop.f32.mrf.mxu3  ;;  %vm8168_vm6 = vcmp.le.s32.totalorder %v8082_v23, %v827_v17  ;;  %v795_v17 = vpack.c.bf16 %v8076_v35, %v8076_v35 }
 0x1d7   : > { %v2048_v28 = vpop.permute.xlu0 %2047  ;;  %v8109_v53 = vpop.f32.mrf.mxu2 }
 0x1d8   : > { %v2097_v5 = vrot.slane %v2048_v28, 4  ;;  %v2044_v1 = vpop.permute.xlu2 %2043 }
 0x1d9   : > { %2075 = vrot.lane.b32.xlu1 %v8103_v12, %s7372_s29  ;;  %v2095_v54 = vrot.slane %v2044_v1, 4 }
 0x1da   : > { %v661_v20 = vpop.f32.mrf.mxu1  ;;  %v2202_v4 = vunpack.c.l.b16 %v2097_v5 }
 0x1db   : > { %v8114_v39 = vpack.c.bf16 %v661_v20, %v8014_v16  ;;  %v829_v16 = vadd.s32 48, %v8074_v43  ;;  %v2201_v20 = vunpack.c.l.b16 %v2096_v32 }
 0x1dd   : > { %11243 = vst [vmem:[#allocation57_spill] sm:$0xff] %v8114_v39  ;;  %vm8127_vm2 = vcmp.le.s32.totalorder %v8082_v23, %v829_v16 }
 0x1de   : > { %v8111_v42 = vpop.f32.mrf.mxu3 }
 0x1df   : > { %v2050_v29 = vpop.permute.xlu1 %2049  ;;  %v8120_v40 = vpop.f32.mrf.mxu2 }
 0x1e0   : > { %v2098_v25 = vrot.slane %v2050_v29, 4 }
 0x1e1   : > { %2077 = vrot.lane.b32.xlu1 %v8114_v39, %s7372_s29 }
 0x1e2   : > { %v2203_v58 = vunpack.c.l.b16 %v2098_v25  ;;  %v664_v55 = vpop.f32.mrf.mxu1  ;;  %v2200_v25 = vunpack.c.l.b16 %v2095_v54  ;;  %v830_v54 = vadd.s32 56, %v8074_v43 }
 0x1e3   : > { %6425 = vmatmul.msk.bf16.gmra.mxu3 %vm929_vm0, %v7936_v18  ;;  %v8132_v5 = vpack.c.bf16 %v664_v55, %v8050_v14  ;;  %v2094_v18 = vrot.slane %v2042_v50, 4 }
 0x1e4   : > { %v2207_v28 = vpack.c.b16 %v2203_v58, %v2202_v4  ;;  %v2093_v4 = vrot.slane %v8063_v8, 4  ;;  %v2206_v1 = vpack.c.b16 %v2201_v20, %v2200_v25  ;;  %v2091_v20 = vrot.slane %v7995_v52, 4 }
 0x1e5   : > { %11246 = vst [vmem:[#allocation58_spill] sm:$0xff] %v8132_v5  ;;  %v903_v51 = vrot.slane %v8132_v5, 4  ;;  %v2199_v14 = vunpack.c.l.b16 %v2094_v18  ;;  %vm8154_vm4 = vcmp.le.s32.totalorder %v8082_v23, %v830_v54  ;;  %v2197_v52 = vunpack.c.l.b16 %v2092_v30 }
 0x1e6   : > { %v8123_v41 = vpop.f32.mrf.mxu3  ;;  %v2230_v29 = vsel %vm929_vm0, %v2207_v28, 0  ;;  %v2198_v45 = vunpack.c.l.b16 %v2093_v4  ;;  %v2227_v55 = vsel %vm929_vm0, %v2206_v1, 0  ;;  %v824_v4 = vadd.s32 8, %v8074_v43 }
 0x1e7   : > { %2236 = vmatpush.bf16.xpose.msrb.mxu1 %v2230_v29  ;;  %v733_v28 = vpop.f32.mrf.mxu2  ;;  %v1155_v8 = vunpack.c.l.b16 %v903_v51  ;;  %v901_v51 = vrot.slane %v8103_v12, 4  ;;  %v2196_v36 = vunpack.c.l.b16 %v2091_v20  ;;  %v799_v30 = vpack.c.bf16 %v8109_v53, %v8109_v53 }
 0x1e8   : > { %v2205_v1 = vpack.c.b16 %v2199_v14, %v2198_v45  ;;  %v801_v45 = vpack.c.bf16 %v8120_v40, %v8120_v40  ;;  %vm8179_vm7 = vcmp.le.s32.totalorder %v8082_v23, %v824_v4 }
 0x1e9   : > { %v1153_v14 = vunpack.c.l.b16 %v901_v51  ;;  %v797_v51 = vpack.c.bf16 %v8100_v60, %v8100_v60  ;;  %v791_v60 = vpack.c.bf16 %v8034_v15, %v8034_v15  ;;  %v11257_v15 = vmov 0 }
 0x1ea   : > { %v666_v58 = vpop.f32.mrf.mxu1  ;;  %v2224_v53 = vsel %vm929_vm0, %v2205_v1, 0  ;;  %v1849_v1 = vunpack.c.l.b16 %v799_v30  ;;  %v1850_v3 = vunpack.c.l.b16 %v801_v45  ;;  %v8209_v30 = vsel %vm8179_vm7, %v8111_v42, -inf }
 0x1eb   : > { %v8135_v32 = vpack.c.bf16 %v666_v58, %v577_v0  ;;  %v902_v0 = vrot.slane %v8114_v39, 4  ;;  %v803_v58 = vpack.c.bf16 %v733_v28, %v733_v28  ;;  %v8176_v28 = vpop.permute.xlu2 %2051 }
 0x1ed   : > { %11247 = vst [vmem:[#allocation59_spill] sm:$0xff] %v8135_v32  ;;  %v904_v16 = vrot.slane %v8135_v32, 4  ;;  %v1154_v54 = vunpack.c.l.b16 %v902_v0  ;;  %v1851_v0 = vunpack.c.l.b16 %v803_v58 }
 0x1ee   : > { %v8140_v24 = vpop.f32.mrf.mxu3 }
 0x1ef   : > { %2237 = vmatpush.bf16.xpose.msrb.mxu1 %v2227_v55  ;;  %v1156_v50 = vunpack.c.l.b16 %v904_v16  ;;  %v8162_v16 = vsel %vm8148_vm3, %v963_v47, -inf  ;;  %v735_v47 = vpop.f32.mrf.mxu2  ;;  %v1159_v58 = vpack.c.b16 %v1154_v54, %v1153_v14  ;;  %v793_v54 = vpack.c.bf16 %v8061_v59, %v8061_v59 }
 0x1f0   : > { %v805_v20 = vpack.c.bf16 %v735_v47, %v735_v47  ;;  %v1263_v40 = vsel %vm1262_vm5, %v8162_v16, -inf }
 0x1f1   : > { %v1160_v18 = vpack.c.b16 %v1156_v50, %v1155_v8  ;;  %v1180_v14 = vsel %vm929_vm0, %v1159_v58, 0  ;;  %v825_v58 = vadd.s32 16, %v8074_v43 }
 0x1f2   : > { %v1852_v47 = vunpack.c.l.b16 %v805_v20  ;;  %v1847_v20 = vunpack.c.l.b16 %v795_v17 }
 0x1f3   : > { %6426 = vmatmul.msk.bf16.gmra.mxu3 %vm929_vm0, %v7961_v62  ;;  %v1183_v55 = vsel %vm929_vm0, %v1160_v18, 0  ;;  %v828_v62 = vadd.s32 40, %v8074_v43  ;;  %v8219_v59 = vpop.permute.xlu2 %2057  ;;  %vm8242_vm9 = vcmp.le.s32.totalorder %v8082_v23, %v825_v58 }
 0x1f4   : > { %1189 = vmatpush.bf16.xpose.msra.mxu3 %v1183_v55  ;;  %v900_v55 = vrot.slane %v8071_v19, 4  ;;  %v899_v19 = vrot.slane %v8055_v9, 4  ;;  %v8199_v27 = vpack.c.b16 %v1852_v47, %v1851_v0  ;;  %v1848_v0 = vunpack.c.l.b16 %v797_v51 }
 0x1f5   : > { %vm8213_vm8 = vcmp.le.s32.totalorder %v8082_v23, %v828_v62  ;;  %v1846_v51 = vunpack.c.l.b16 %v793_v54  ;;  %v2054_v54 = vpop.permute.xlu0 %2053 }
 0x1f6   : > { %v973_v18 = vpop.f32.mrf.mxu3  ;;  %11256 = vst [vmem:[#allocation60_spill] sm:$0xff] %v8199_v27  ;;  %v1152_v45 = vunpack.c.l.b16 %v900_v55  ;;  %1877 = vmatpush.bf16.msra.mxu2 %v8199_v27  ;;  %v11258_v15 = vsel %vm8213_vm8, 4294967295, %v11257_v15  ;;  %v1845_v55 = vunpack.c.l.b16 %v791_v60 }
 0x1f7   : > { %v8193_v4 = vsel %vm8168_vm6, %v973_v18, -inf  ;;  %2238 = vmatpush.bf16.xpose.msrb.mxu1 %v2224_v53  ;;  %1264 = vmax.xlane.f32.xlu0 %v1263_v40  ;;  %v2204_v18 = vpack.c.b16 %v2197_v52, %v2196_v36  ;;  %11259 = vst [vmem:[#allocation61_spill] sm:$0xff] %v11258_v15  ;;  %v8217_v36 = vpack.c.b16 %v1850_v3, %v1849_v1  ;;  %v1151_v52 = vunpack.c.l.b16 %v899_v19 }
 0x1f8   : > { %v1275_v35 = vsel %vm1262_vm5, %v8193_v4, -inf  ;;  %v1266_v40 = vsel %vm1262_vm5, %v8209_v30, -inf  ;;  %v898_v3 = vrot.slane %v8028_v34, 4  ;;  %v8230_v19 = vpack.c.b16 %v1848_v0, %v1847_v20 }
 0x1f9   : > { %1276 = vmax.xlane.f32.xlu2 %v1275_v35  ;;  %11260 = vst [vmem:[#allocation62_spill] sm:$0xff] %v8217_v36  ;;  %v2221_v42 = vsel %vm929_vm0, %v2204_v18, 0  ;;  %v1158_v17 = vpack.c.b16 %v1152_v45, %v1151_v52  ;;  %v897_v35 = vrot.slane %v8012_v56, 4  ;;  %v8239_v18 = vpack.c.b16 %v1846_v51, %v1845_v55 }
 0x1fa   : > { %11261 = vst [vmem:[#allocation63_spill] sm:$0xff] %v8230_v19  ;;  %1878 = vmatpush.bf16.msra.mxu2 %v8217_v36  ;;  %v1150_v60 = vunpack.c.l.b16 %v898_v3  ;;  %v8252_v20 = vsel %vm8242_vm9, %v8123_v41, -inf  ;;  %v1141_v41 = vunpack.c.l.b16 %v8103_v12 }
 0x1fb   : > { %v1177_v1 = vsel %vm929_vm0, %v1158_v17, 0  ;;  %11262 = vst [vmem:[#allocation64_spill] sm:$0xff] %v8239_v18  ;;  %v8254_v0 = vpop.permute.xlu2 %2263  ;;  %v1269_v23 = vsel %vm1262_vm5, %v8252_v20, -inf }
 0x1fc   : > { %1190 = vmatpush.bf16.xpose.msra.mxu3 %v1180_v14  ;;  %v1149_v14 = vunpack.c.l.b16 %v897_v35  ;;  %11265 = vst [vmem:[#allocation65_spill] sm:$0xff] %v8254_v0 }
 0x1fd   : > { %v2056_v55 = vpop.permute.xlu0 %2055 }
 0x1fe   : > { %v975_v53 = vpop.f32.mrf.mxu3  ;;  %1879 = vmatpush.bf16.msra.mxu2 %v8230_v19  ;;  %v1157_v52 = vpack.c.b16 %v1150_v60, %v1149_v14 }
 0x1ff   : > { %2239 = vmatpush.bf16.xpose.msrb.mxu1 %v2221_v42  ;;  %1267 = vmax.xlane.f32.xlu0 %v1266_v40  ;;  %v8226_v62 = vsel %vm8213_vm8, %v975_v53, -inf  ;;  %v1142_v42 = vunpack.c.l.b16 %v8114_v39 }
 0x200   : > { %v1278_v47 = vsel %vm1262_vm5, %v8226_v62, -inf  ;;  %v1174_v53 = vsel %vm929_vm0, %v1157_v52, 0 }
 0x201   : > { %1279 = vmax.xlane.f32.xlu2 %v1278_v47  ;;  %v8264_v3 = vpack.c.b16 %v1142_v42, %v1141_v41 }
 0x202   : > { %1880 = vmatpush.bf16.msra.mxu2 %v8239_v18 }
 0x203   : > { %6427 = vmatmul.msk.bf16.gmra.mxu3 %vm929_vm0, %v7990_v38  ;;  %v2060_v17 = vpop.permute.xlu2 %2059  ;;  %11266 = vst [vmem:[#allocation66_spill] sm:$0xff] %v8264_v3 }
 0x204   : > { %1191 = vmatpush.bf16.xpose.msra.mxu3 %v1177_v1 }
 0x206   : > { %v8247_v45 = vpop.f32.mrf.mxu3 }
 0x20b   : > { %1270 = vmax.xlane.f32.xlu1 %v1269_v23  ;;  %v2064_v47 = vpop.permute.xlu2 %2063 }
 0x20c   : > { %1192 = vmatpush.bf16.xpose.msra.mxu3 %v1174_v53  ;;  %v2105_v35 = vrot.slane %v2064_v47, 4 }
 0x20e   : > { %v8261_v40 = vpop.f32.mrf.mxu3  ;;  %v2275_v53 = vunpack.c.l.b16 %v2105_v35 }
 0x20f   : > { %v2062_v58 = vpop.permute.xlu0 %2061 }
 0x210   : > { %v2104_v42 = vrot.slane %v2062_v58, 4 }
 0x212   : > { %v2274_v47 = vunpack.c.l.b16 %v2104_v42 }
 0x213   : > { %2338 = vrot.lane.b32.xlu0 %v8264_v3, %s7372_s29  ;;  %6428 = vmatmul.msk.bf16.vlgmr.msra.gmra.mxu3 %vm929_vm0, %v8044_v49  ;;  %v2103_v49 = vrot.slane %v2060_v17, 4 }
 0x215   : > { %v2273_v35 = vunpack.c.l.b16 %v2103_v49 }
 0x216   : > { %v8270_v51 = vpop.f32.mrf.mxu3 }
 0x217   : > { %v2279_v17 = vpack.c.b16 %v2274_v47, %v2273_v35 }
 0x21b   : > { %2079 = vrot.lane.b32.xlu0 %v8132_v5, %s7372_s29 }
 0x21e   : > { %v1042_v1 = vpop.f32.mrf.mxu3 }
 0x21f   : > { %v2066_v60 = vpop.permute.xlu0 %2065  ;;  %v8276_v14 = vsel %vm8179_vm7, %v1042_v1, -inf }
 0x220   : > { %v2106_v52 = vrot.slane %v2066_v60, 4  ;;  %v1290_v23 = vsel %vm1262_vm5, %v8276_v14, -inf }
 0x221   : > { %1291 = vmax.xlane.f32.xlu2 %v1290_v23  ;;  %v2102_v23 = vrot.slane %v8219_v59, 4 }
 0x222   : > { %v2276_v41 = vunpack.c.l.b16 %v2106_v52  ;;  %v2101_v52 = vrot.slane %v2056_v55, 4  ;;  %v2099_v55 = vrot.slane %v8176_v28, 4  ;;  %v1144_v28 = vunpack.c.l.b16 %v8135_v32 }
 0x223   : > { %6429 = vmatmul.msk.bf16.gmra.mxu3 %vm929_vm0, %v8089_v26  ;;  %v2272_v26 = vunpack.c.l.b16 %v2102_v23 }
 0x224   : > { %v2280_v56 = vpack.c.b16 %v2276_v41, %v2275_v53  ;;  %2081 = vrot.lane.b32.xlu1 %v8135_v32, %s7372_s29  ;;  %v8292_v53 = vpop.permute.xlu1 %2194  ;;  %v2271_v42 = vunpack.c.l.b16 %v2101_v52 }
 0x225   : > { %11267 = vst [vmem:[#allocation67_spill] sm:$0xff] %v8292_v53 }
 0x226   : > { %v1045_v34 = vpop.f32.mrf.mxu3  ;;  %v2303_v1 = vsel %vm929_vm0, %v2280_v56, 0  ;;  %v2300_v56 = vsel %vm929_vm0, %v2279_v17, 0  ;;  %v2278_v49 = vpack.c.b16 %v2272_v26, %v2271_v42  ;;  %v2269_v17 = vunpack.c.l.b16 %v2099_v55 }
 0x227   : > { %v8287_v60 = vsel %vm8242_vm9, %v1045_v34, -inf  ;;  %2309 = vmatpush.bf16.xpose.msrb.mxu2 %v2303_v1  ;;  %v8295_v34 = vpop.f32.mrf.mxu2  ;;  %v2100_v1 = vrot.slane %v2054_v54, 4  ;;  %v1143_v55 = vunpack.c.l.b16 %v8132_v5 }
 0x228   : > { %v1293_v58 = vsel %vm1262_vm5, %v8287_v60, -inf }
 0x229   : > { %1294 = vmax.xlane.f32.xlu2 %v1293_v58  ;;  %v2270_v47 = vunpack.c.l.b16 %v2100_v1  ;;  %v2297_v58 = vsel %vm929_vm0, %v2278_v49, 0 }
 0x22b   : > { %v2277_v23 = vpack.c.b16 %v2270_v47, %v2269_v17  ;;  %v8325_v47 = vsel %vm8127_vm2, %v8247_v45, -inf }
 0x22c   : > { %v8300_v35 = vpop.permute.xlu1 %2261 }
 0x22d   : > { %11268 = vst [vmem:[#allocation68_spill] sm:$0xff] %v8300_v35  ;;  %v2294_v1 = vsel %vm929_vm0, %v2277_v23, 0 }
 0x22e   : > { %v1047_v41 = vpop.f32.mrf.mxu3 }
 0x22f   : > { %2310 = vmatpush.bf16.xpose.msrb.mxu2 %v2300_v56  ;;  %v8309_v54 = vpop.f32.mrf.mxu2 }
 0x233   : > { %6430 = vmatmul.msk.bf16.gmra.mxu3 %vm929_vm0, %v8264_v3 }
 0x234   : > { %v8312_v42 = vpop.permute.xlu1 %2265 }
 0x235   : > { %11269 = vst [vmem:[#allocation69_spill] sm:$0xff] %v8312_v42 }
 0x236   : > { %v1050_v59 = vpop.f32.mrf.mxu3 }
 0x237   : > { %v8305_v52 = vsel %vm8168_vm6, %v1050_v59, -inf  ;;  %2311 = vmatpush.bf16.xpose.msrb.mxu2 %v2297_v58  ;;  %v8327_v58 = vpack.c.b16 %v1144_v28, %v1143_v55  ;;  %v743_v17 = vpop.f32.mrf.mxu2  ;;  %v8342_v28 = vsel %vm8092_vm1, %v8140_v24, -inf }
 0x238   : > { %v1299_v26 = vsel %vm1262_vm5, %v8305_v52, -inf  ;;  %v811_v44 = vpack.c.bf16 %v743_v17, %v743_v17 }
 0x239   : > { %1300 = vmax.xlane.f32.xlu2 %v1299_v26  ;;  %11270 = vst [vmem:[#allocation70_spill] sm:$0xff] %v8327_v58  ;;  %v1281_v26 = vsel %vm1262_vm5, %v8325_v47, -inf }
 0x23c   : > { %v8333_v23 = vpop.permute.xlu1 %2267 }
 0x23d   : > { %11271 = vst [vmem:[#allocation71_spill] sm:$0xff] %v8333_v23 }
 0x23e   : > { %v1052_v56 = vpop.f32.mrf.mxu3 }
 0x23f   : > { %2312 = vmatpush.bf16.xpose.msrb.mxu2 %v2294_v1  ;;  %v8317_v49 = vsel %vm8213_vm8, %v1052_v56, -inf  ;;  %v8337_v1 = vsel %vm8092_vm1, %v1047_v41, -inf  ;;  %v745_v45 = vpop.f32.mrf.mxu2 }
 0x240   : > { %v1302_v59 = vsel %vm1262_vm5, %v8317_v49, -inf  ;;  %v1296_v55 = vsel %vm1262_vm5, %v8337_v1, -inf  ;;  %v813_v6 = vpack.c.bf16 %v745_v45, %v745_v45 }
 0x241   : > { %1303 = vmax.xlane.f32.xlu2 %v1302_v59  ;;  %v1272_v59 = vsel %vm1262_vm5, %v8342_v28, -inf }
 0x243   : > { %6431 = vmatmul.msk.bf16.gmra.mxu3 %vm929_vm0, %v8327_v58 }
 0x244   : > { %v8352_v41 = vpop.permute.xlu1 %2067 }
 0x245   : > { %1282 = vmax.xlane.f32.xlu0 %v1281_v26 }
 0x246   : > { %v1055_v56 = vpop.f32.mrf.mxu3 }
 0x247   : > { %v8358_v24 = vsel %vm8127_vm2, %v1055_v56, -inf  ;;  %v8374_v56 = vpop.permute.xlu0 %2069 }
 0x24c   : > { %v8376_v32 = vpop.permute.xlu1 %2334 }
 0x24d   : > { %1297 = vmax.xlane.f32.xlu0 %v1296_v55  ;;  %v748_v55 = vpop.f32.mrf.mxu2  ;;  %11272 = vst [vmem:[#allocation72_spill] sm:$0xff] %v8376_v32 }
 0x24e   : > { %1273 = vmax.xlane.f32.xlu1 %v1272_v59  ;;  %v1057_v26 = vpop.f32.mrf.mxu3  ;;  %v8363_v59 = vsel %vm8154_vm4, %v8261_v40, -inf  ;;  %v815_v23 = vpack.c.bf16 %v748_v55, %v748_v55 }
 0x24f   : > { %v8350_v3 = vsel %vm8154_vm4, %v1057_v26, -inf  ;;  %v1305_v26 = vsel %vm1262_vm5, %v8358_v24, -inf  ;;  %v1284_v9 = vsel %vm1262_vm5, %v8363_v59, -inf  ;;  %v8380_v5 = vpop.permute.xlu0 %2073 }
 0x250   : > { %v1308_v38 = vsel %vm1262_vm5, %v8350_v3, -inf  ;;  %v1934_v13 = vunpack.c.l.b16 %v815_v23 }
 0x251   : > { %1309 = vmax.xlane.f32.xlu2 %v1308_v38  ;;  %v8372_v38 = vsel %vm8148_vm3, %v8270_v51, -inf }
 0x252   : > { %v1287_v40 = vsel %vm1262_vm5, %v8372_v38, -inf }
 0x254   : > { %v8382_v18 = vpop.permute.xlu1 %2336 }
 0x255   : > { %1306 = vmax.xlane.f32.xlu0 %v1305_v26  ;;  %v750_v12 = vpop.f32.mrf.mxu2  ;;  %11273 = vst [vmem:[#allocation73_spill] sm:$0xff] %v8382_v18 }
 0x256   : > { %1285 = vmax.xlane.f32.xlu1 %v1284_v9  ;;  %v1117_v39 = vpop.f32.mrf.mxu3  ;;  %v817_v42 = vpack.c.bf16 %v750_v12, %v750_v12  ;;  %v807_v12 = vpack.c.bf16 %v8295_v34, %v8295_v34 }
 0x257   : > { %v8386_v9 = vsel %vm8148_vm3, %v1117_v39, -inf }
 0x258   : > { %v1311_v51 = vsel %vm1262_vm5, %v8386_v9, -inf  ;;  %v1935_v63 = vunpack.c.l.b16 %v817_v42 }
 0x25a   : > { %v8403_v17 = vpack.c.b16 %v1935_v63, %v1934_v13 }
 0x25c   : > { %v8391_v35 = vpop.permute.xlu1 %2075  ;;  %11275 = vst [vmem:[#allocation75_spill] sm:$0xff] %v8403_v17 }
 0x25d   : > { %v753_v19 = vpop.f32.mrf.mxu2 }
 0x25e   : > { %1288 = vmax.xlane.f32.xlu1 %v1287_v40  ;;  %v1119_v26 = vpop.f32.mrf.mxu3  ;;  %v819_v27 = vpack.c.bf16 %v753_v19, %v753_v19  ;;  %v8395_v19 = vpop.permute.xlu2 %2071 }
 0x25f   : > { %v8421_v13 = vsel %vm8179_vm7, %v1119_v26, -inf }
 0x260   : > { %v1936_v18 = vunpack.c.l.b16 %v819_v27  ;;  %v809_v27 = vpack.c.bf16 %v8309_v54, %v8309_v54 }
 0x264   : > { %v2078_v45 = vpop.permute.xlu1 %2077 }
 0x265   : > { %v755_v0 = vpop.f32.mrf.mxu2 }
 0x266   : > { %1312 = vmax.xlane.f32.xlu1 %v1311_v51  ;;  %v1122_v36 = vpop.f32.mrf.mxu3  ;;  %v821_v53 = vpack.c.bf16 %v755_v0, %v755_v0 }
 0x267   : > { %v8433_v26 = vsel %vm8242_vm9, %v1122_v36, -inf }
 0x268   : > { %v1937_v51 = vunpack.c.l.b16 %v821_v53 }
 0x26a   : > { %v1265_v32 = vpop.xlane.xlu0 %1264  ;;  %v8397_v55 = vpack.c.b16 %v1937_v51, %v1936_v18  ;;  %v1930_v18 = vunpack.c.l.b16 %v807_v12  ;;  %v1314_v12 = vsel %vm1262_vm5, %v8421_v13, -inf }
 0x26b   : > { %v1359_v40 = vsub.f32 %v8162_v16, %v1265_v32  ;;  %v1932_v32 = vunpack.c.l.b16 %v811_v44  ;;  %v1933_v16 = vunpack.c.l.b16 %v813_v6 }
 0x26c   : > { %11274 = vst [vmem:[#allocation74_spill] sm:$0xff] %v8397_v55  ;;  %1962 = vmatpush.bf16.msrb.mxu3 %v8397_v55  ;;  %v8414_v44 = vpop.xlane.xlu2 %1276 }
 0x26d   : > { %v1391_v39 = vmul.f32 1.442695, %v1359_v40  ;;  %v1931_v40 = vunpack.c.l.b16 %v809_v27 }
 0x26e   : > { %v8393_v10 = vpop.f32.mrf.mxu3 }
 0x26f   : > { %6796 = vpow2.f32 %v1391_v39  ;;  %v8409_v39 = vpack.c.b16 %v1933_v16, %v1932_v32  ;;  %v8416_v6 = vpack.c.b16 %v1931_v40, %v1930_v18 }
 0x270   : > { %1963 = vmatpush.bf16.msrb.mxu3 %v8403_v17 }
 0x271   : > { %11276 = vst [vmem:[#allocation76_spill] sm:$0xff] %v8409_v39 }
 0x272   : > { %v1268_v0 = vpop.xlane.xlu0 %1267  ;;  %11277 = vst [vmem:[#allocation77_spill] sm:$0xff] %v8416_v6 }
 0x273   : > { %v1360_v53 = vsub.f32 %v8209_v30, %v1268_v0 }
 0x274   : > { %1964 = vmatpush.bf16.msrb.mxu3 %v8409_v39  ;;  %v1280_v16 = vpop.xlane.xlu2 %1279 }
 0x275   : > { %v8407_v42 = vpop.eup %6796  ;;  %v1393_v23 = vmul.f32 1.442695, %v1360_v53  ;;  %v1364_v53 = vsub.f32 %v8226_v62, %v1280_v16 }
 0x276   : > { %v1455_v34 = vsel %vm1262_vm5, %v8407_v42, 0.0  ;;  %v1127_v63 = vpop.f32.mrf.mxu3 }
 0x277   : > { %6798 = vpow2.f32 %v1393_v23  ;;  %1456 = vadd.xlane.f32.xlu2 %v1455_v34  ;;  %v1317_v23 = vsel %vm1262_vm5, %v8433_v26, -inf }
 0x278   : > { %1965 = vmatpush.bf16.msrb.mxu3 %v8416_v6 }
 0x27d   : > { %v8423_v30 = vpop.eup %6798 }
 0x27e   : > { %v1271_v54 = vpop.xlane.xlu1 %1270  ;;  %v1458_v51 = vsel %vm1262_vm5, %v8423_v30, 0.0  ;;  %v1129_v0 = vpop.f32.mrf.mxu3 }
 0x27f   : > { %v1361_v27 = vsub.f32 %v8252_v20, %v1271_v54  ;;  %1459 = vadd.xlane.f32.xlu0 %v1458_v51  ;;  %1315 = vmax.xlane.f32.xlu2 %v1314_v12  ;;  %v1401_v20 = vmul.f32 1.442695, %v1364_v53  ;;  %v8446_v54 = vsel %vm8168_vm6, %v1127_v63, -inf  ;;  %v8463_v39 = vsel %vm8213_vm8, %v1129_v0, -inf }
 0x280   : > { %v1323_v62 = vsel %vm1262_vm5, %v8446_v54, -inf }
 0x281   : > { %v1395_v32 = vmul.f32 1.442695, %v1361_v27 }
 0x283   : > { %6800 = vpow2.f32 %v1395_v32 }
 0x284   : > { %6802 = vpow2.f32 %v1401_v20  ;;  %v2112_v20 = vrot.slane %v2078_v45, 4  ;;  %v2110_v45 = vrot.slane %v8380_v5, 4 }
 0x285   : > { %v8438_v18 = vpop.permute.xlu0 %2338 }
 0x286   : > { %11278 = vst [vmem:[#allocation78_spill] sm:$0xff] %v8438_v18  ;;  %v1132_v36 = vpop.f32.mrf.mxu3  ;;  %v2347_v17 = vunpack.c.l.b16 %v2112_v20 }
 0x287   : > { %1318 = vmax.xlane.f32.xlu2 %v1317_v23  ;;  %v8452_v51 = vsel %vm8127_vm2, %v1132_v36, -inf  ;;  %v2111_v36 = vrot.slane %v8391_v35, 4  ;;  %v2345_v35 = vunpack.c.l.b16 %v2110_v45 }
 0x288   : > { %v1329_v27 = vsel %vm1262_vm5, %v8452_v51, -inf }
 0x289   : > { %v8440_v40 = vpop.eup %6800  ;;  %v2346_v55 = vunpack.c.l.b16 %v2111_v36 }
 0x28a   : > { %v1461_v34 = vsel %vm1262_vm5, %v8440_v40, 0.0  ;;  %v8456_v32 = vpop.eup %6802 }
 0x28b   : > { %1462 = vadd.xlane.f32.xlu0 %v1461_v34  ;;  %v1470_v53 = vsel %vm1262_vm5, %v8456_v32, 0.0 }
 0x28d   : > { %v2080_v12 = vpop.permute.xlu0 %2079 }
 0x28e   : > { %v2113_v63 = vrot.slane %v2080_v12, 4  ;;  %v1326_v12 = vsel %vm1262_vm5, %v8463_v39, -inf }
 0x28f   : > { %1324 = vmax.xlane.f32.xlu2 %v1323_v62 }
 0x290   : > { %v2348_v34 = vunpack.c.l.b16 %v2113_v63  ;;  %v2352_v63 = vpack.c.b16 %v2347_v17, %v2346_v55 }
 0x293   : > { %1330 = vmax.xlane.f32.xlu0 %v1329_v27 }
 0x296   : > { %v2082_v16 = vpop.permute.xlu1 %2081 }
 0x297   : > { %v2114_v23 = vrot.slane %v2082_v16, 4  ;;  %1471 = vadd.xlane.f32.xlu2 %v1470_v53  ;;  %v2109_v16 = vrot.slane %v8395_v19, 4  ;;  %v1134_v53 = vpop.f32.mrf.mxu3 }
 0x299   : > { %v2349_v6 = vunpack.c.l.b16 %v2114_v23  ;;  %v2344_v0 = vunpack.c.l.b16 %v2109_v16  ;;  %v2108_v23 = vrot.slane %v8374_v56, 4  ;;  %v1292_v56 = vpop.xlane.xlu2 %1291 }
 0x29b   : > { %v2353_v62 = vpack.c.b16 %v2349_v6, %v2348_v34  ;;  %v2373_v6 = vsel %vm929_vm0, %v2352_v63, 0  ;;  %v2351_v20 = vpack.c.b16 %v2345_v35, %v2344_v0  ;;  %v2107_v34 = vrot.slane %v8352_v41, 4 }
 0x29d   : > { %v2376_v27 = vsel %vm929_vm0, %v2353_v62, 0  ;;  %v2343_v62 = vunpack.c.l.b16 %v2108_v23  ;;  %v2370_v36 = vsel %vm929_vm0, %v2351_v20, 0 }
 0x29e   : > { %2382 = vmatpush.bf16.xpose.msra.mxu3 %v2376_v27  ;;  %v2342_v27 = vunpack.c.l.b16 %v2107_v34 }
 0x29f   : > { %1327 = vmax.xlane.f32.xlu2 %v1326_v12  ;;  %v1194_v55 = vpop.f32.mrf.mxu3 }
 0x2a0   : > { %v2350_v5 = vpack.c.b16 %v2343_v62, %v2342_v27 }
 0x2a1   : > { %v1295_v20 = vpop.xlane.xlu2 %1294 }
 0x2a2   : > { %v2367_v19 = vsel %vm929_vm0, %v2350_v5, 0 }
 0x2a6   : > { %2383 = vmatpush.bf16.xpose.msra.mxu3 %v2373_v6 }
 0x2a7   : > { %v8476_v63 = vpop.f32.mrf.mxu3 }
 0x2ae   : > { %2384 = vmatpush.bf16.xpose.msra.mxu3 %v2370_v36  ;;  %v1363_v36 = vsub.f32 %v8193_v4, %v8414_v44  ;;  %v1368_v44 = vsub.f32 %v8276_v14, %v1292_v56  ;;  %v8514_v14 = vsel %vm8154_vm4, %v1134_v53, -inf }
 0x2af   : > { %v1199_v23 = vpop.f32.mrf.mxu3 }
 0x2b0   : > { %v1399_v5 = vmul.f32 1.442695, %v1363_v36 }
 0x2b6   : > { %2385 = vmatpush.bf16.xpose.msra.mxu3 %v2367_v19  ;;  %v8490_v19 = vpop.xlane.xlu2 %1300 }
 0x2b8   : > { %v1283_v17 = vpop.xlane.xlu0 %1282 }
 0x2b9   : > { %v1365_v12 = vsub.f32 %v8325_v47, %v1283_v17  ;;  %v8492_v17 = vpop.f32.mrf.mxu3 }
 0x2ba   : > { %v8586_v15 = vsel %vm8092_vm1, %v8492_v17, -inf }
 0x2bb   : > { %v1403_v45 = vmul.f32 1.442695, %v1365_v12 }
 0x2bd   : > { %6804 = vpow2.f32 %v1403_v45 }
 0x2be   : > { %v1304_v36 = vpop.xlane.xlu2 %1303 }
 0x2bf   : > { %v1372_v56 = vsub.f32 %v8317_v49, %v1304_v36 }
 0x2c1   : > { %v1274_v16 = vpop.xlane.xlu1 %1273  ;;  %v1417_v53 = vmul.f32 1.442695, %v1372_v56 }
 0x2c2   : > { %v1362_v41 = vsub.f32 %v8342_v28, %v1274_v16 }
 0x2c3   : > { %v8479_v35 = vpop.eup %6804 }
 0x2c4   : > { %v1397_v6 = vmul.f32 1.442695, %v1362_v41  ;;  %v1473_v0 = vsel %vm1262_vm5, %v8479_v35, 0.0  ;;  %v1369_v41 = vsub.f32 %v8287_v60, %v1295_v20 }
 0x2c5   : > { %1474 = vadd.xlane.f32.xlu2 %v1473_v0 }
 0x2c6   : > { %6806 = vpow2.f32 %v1397_v6  ;;  %v8531_v49 = vpop.xlane.xlu2 %1309 }
 0x2c9   : > { %v1286_v34 = vpop.xlane.xlu1 %1285 }
 0x2ca   : > { %v1366_v47 = vsub.f32 %v8363_v59, %v1286_v34  ;;  %v8498_v59 = vsel %vm8092_vm1, %v8393_v10, -inf  ;;  %v1409_v10 = vmul.f32 1.442695, %v1368_v44  ;;  %v1411_v34 = vmul.f32 1.442695, %v1369_v41 }
 0x2cb   : > { %v1320_v6 = vsel %vm1262_vm5, %v8498_v59, -inf  ;;  %v8529_v44 = vsel %vm8148_vm3, %v1194_v55, -inf }
 0x2cc   : > { %v8484_v62 = vpop.eup %6806  ;;  %v1405_v27 = vmul.f32 1.442695, %v1366_v47 }
 0x2cd   : > { %v1464_v28 = vsel %vm1262_vm5, %v8484_v62, 0.0 }
 0x2ce   : > { %6808 = vpow2.f32 %v1405_v27  ;;  %1465 = vadd.xlane.f32.xlu1 %v1464_v28  ;;  %v8510_v27 = vpop.f32.mrf.mxu3 }
 0x2cf   : > { %6810 = vpow2.f32 %v1399_v5  ;;  %v1332_v5 = vsel %vm1262_vm5, %v8514_v14, -inf }
 0x2d1   : > { %v1289_v12 = vpop.xlane.xlu1 %1288 }
 0x2d2   : > { %v1367_v45 = vsub.f32 %v8372_v38, %v1289_v12  ;;  %v1298_v38 = vpop.xlane.xlu0 %1297 }
 0x2d3   : > { %v1370_v41 = vsub.f32 %v8337_v1, %v1298_v38  ;;  %v8545_v1 = vsel %vm8242_vm9, %v1199_v23, -inf  ;;  %v8550_v38 = vsel %vm8179_vm7, %v8476_v63, -inf }
 0x2d4   : > { %v8500_v4 = vpop.eup %6808  ;;  %v1407_v16 = vmul.f32 1.442695, %v1367_v45 }
 0x2d5   : > { %v1476_v0 = vsel %vm1262_vm5, %v8500_v4, 0.0  ;;  %v8508_v47 = vpop.eup %6810  ;;  %v1413_v36 = vmul.f32 1.442695, %v1370_v41 }
 0x2d6   : > { %6812 = vpow2.f32 %v1407_v16  ;;  %1321 = vmax.xlane.f32.xlu1 %v1320_v6  ;;  %1477 = vadd.xlane.f32.xlu0 %v1476_v0  ;;  %v1467_v20 = vsel %vm1262_vm5, %v8508_v47, 0.0  ;;  %v1206_v6 = vpop.f32.mrf.mxu3 }
 0x2d7   : > { %6814 = vpow2.f32 %v1409_v10 }
 0x2d8   : > { %6816 = vpow2.f32 %v1411_v34  ;;  %v1335_v34 = vsel %vm1262_vm5, %v8529_v44, -inf }
 0x2d9   : > { %6818 = vpow2.f32 %v1417_v53 }
 0x2da   : > { %v1307_v12 = vpop.xlane.xlu0 %1306  ;;  %6820 = vpow2.f32 %v1413_v36  ;;  %v1371_v36 = vsub.f32 %v8305_v52, %v8490_v19 }
 0x2db   : > { %v1373_v0 = vsub.f32 %v8358_v24, %v1307_v12  ;;  %v1313_v12 = vpop.xlane.xlu1 %1312 }
 0x2dc   : > { %v8516_v60 = vpop.eup %6812 }
 0x2dd   : > { %v1479_v28 = vsel %vm1262_vm5, %v8516_v60, 0.0  ;;  %v8525_v45 = vpop.eup %6814  ;;  %v1419_v56 = vmul.f32 1.442695, %v1373_v0 }
 0x2de   : > { %1468 = vadd.xlane.f32.xlu1 %v1467_v20  ;;  %1480 = vadd.xlane.f32.xlu2 %v1479_v28  ;;  %v8533_v16 = vpop.eup %6816  ;;  %v1482_v10 = vsel %vm1262_vm5, %v8525_v45, 0.0  ;;  %v1338_v28 = vsel %vm1262_vm5, %v8550_v38, -inf  ;;  %v8558_v53 = vpop.f32.mrf.mxu3 }
 0x2df   : > { %1333 = vmax.xlane.f32.xlu0 %v1332_v5  ;;  %v1485_v55 = vsel %vm1262_vm5, %v8533_v16, 0.0  ;;  %v8552_v20 = vpop.eup %6818  ;;  %6822 = vpow2.f32 %v1419_v56  ;;  %v1341_v5 = vsel %vm1262_vm5, %v8545_v1, -inf  ;;  %v1375_v56 = vsub.f32 %v8386_v9, %v1313_v12 }
 0x2e0   : > { %v1494_v23 = vsel %vm1262_vm5, %v8552_v20, 0.0  ;;  %v8562_v63 = vpop.eup %6820 }
 0x2e1   : > { %v1423_v52 = vmul.f32 1.442695, %v1375_v56  ;;  %v1344_v56 = vsel %vm1262_vm5, %v8586_v15, -inf }
 0x2e5   : > { %v8564_v41 = vpop.eup %6822 }
 0x2e6   : > { %1483 = vadd.xlane.f32.xlu1 %v1482_v10  ;;  %1336 = vmax.xlane.f32.xlu2 %v1335_v34  ;;  %v8570_v34 = vsel %vm8213_vm8, %v1206_v6, -inf  ;;  %v1415_v6 = vmul.f32 1.442695, %v1371_v36 }
 0x2e7   : > { %1486 = vadd.xlane.f32.xlu0 %v1485_v55 }
 0x2ea   : > { %v1457_v24 = vpop.xlane.xlu2 %1456 }
 0x2eb   : > { %6824 = vrcp.f32 %v1457_v24  ;;  %v1488_v24 = vsel %vm1262_vm5, %v8562_v63, 0.0 }
 0x2ee   : > { %1339 = vmax.xlane.f32.xlu1 %v1338_v28  ;;  %1342 = vmax.xlane.f32.xlu2 %v1341_v5  ;;  %v1350_v28 = vsel %vm1262_vm5, %v8570_v34, -inf }
 0x2ef   : > { %1495 = vadd.xlane.f32.xlu0 %v1494_v23  ;;  %v1497_v23 = vsel %vm1262_vm5, %v8564_v41, 0.0 }
 0x2f1   : > { %v6825_v55 = vpop.eup %6824 }
 0x2f2   : > { %v1460_v0 = vpop.xlane.xlu0 %1459  ;;  %v8566_v10 = vpop.xlane.xlu2 %1315  ;;  %v1583_v5 = vmul.f32 %v6825_v55, %v8407_v42 }
 0x2f3   : > { %6826 = vrcp.f32 %v1460_v0  ;;  %v1211_v0 = vpop.f32.mrf.mxu3 }
 0x2f4   : > { %v1615_v19 = vpack.c.bf16 %v1583_v5, %v1583_v5  ;;  %v8590_v42 = vsel %vm8154_vm4, %v1211_v0, -inf  ;;  %6828 = vpow2.f32 %v1415_v6 }
 0x2f5   : > { %6830 = vpow2.f32 %v1423_v52 }
 0x2f6   : > { %1489 = vadd.xlane.f32.xlu1 %v1488_v24  ;;  %1351 = vmax.xlane.f32.xlu2 %v1350_v28 }
 0x2f7   : > { %1498 = vadd.xlane.f32.xlu0 %v1497_v23 }
 0x2f9   : > { %v6827_v18 = vpop.eup %6826 }
 0x2fa   : > { %v1584_v9 = vmul.f32 %v6827_v18, %v8423_v30  ;;  %v1319_v12 = vpop.xlane.xlu2 %1318  ;;  %v1356_v30 = vsel %vm1262_vm5, %v8590_v42, -inf  ;;  %v1655_v18 = vunpack.c.l.b16 %v1615_v19  ;;  %v8597_v23 = vpop.eup %6828 }
 0x2fb   : > { %v1377_v36 = vsub.f32 %v8433_v26, %v1319_v12  ;;  %v8600_v0 = vpop.eup %6830  ;;  %v1491_v52 = vsel %vm1262_vm5, %v8597_v23, 0.0  ;;  %v8610_v12 = vsel %vm8168_vm6, %v8510_v27, -inf }
 0x2fc   : > { %v1616_v55 = vpack.c.bf16 %v1584_v9, %v1584_v9  ;;  %v1503_v19 = vsel %vm1262_vm5, %v8600_v0, 0.0 }
 0x2fd   : > { %v1427_v5 = vmul.f32 1.442695, %v1377_v36 }
 0x2fe   : > { %1345 = vmax.xlane.f32.xlu1 %v1344_v56  ;;  %v1656_v24 = vunpack.c.l.b16 %v1616_v55  ;;  %v1463_v17 = vpop.xlane.xlu0 %1462 }
 0x2ff   : > { %1357 = vmax.xlane.f32.xlu0 %v1356_v30  ;;  %6832 = vpow2.f32 %v1427_v5  ;;  %v1347_v30 = vsel %vm1262_vm5, %v8610_v12, -inf }
 0x300   : > { %v1663_v28 = vpack.c.b16 %v1656_v24, %v1655_v18 }
 0x302   : > { %6432 = vmatmul.msk.bf16.vlgmr.msrb.gmra.mxu0 %vm1262_vm5, %v1663_v28  ;;  %v1325_v6 = vpop.xlane.xlu2 %1324 }
 0x303   : > { %v1379_v26 = vsub.f32 %v8446_v54, %v1325_v6  ;;  %v1374_v54 = vsub.f32 %v8350_v3, %v8531_v49  ;;  %v8626_v3 = vsel %vm8127_vm2, %v8558_v53, -inf }
 0x305   : > { %v1431_v9 = vmul.f32 1.442695, %v1379_v26  ;;  %v8612_v36 = vpop.eup %6832  ;;  %v1421_v18 = vmul.f32 1.442695, %v1374_v54 }
 0x306   : > { %1492 = vadd.xlane.f32.xlu1 %v1491_v52  ;;  %v1331_v55 = vpop.xlane.xlu0 %1330  ;;  %v1509_v27 = vsel %vm1262_vm5, %v8612_v36, 0.0 }
 0x307   : > { %1504 = vadd.xlane.f32.xlu0 %v1503_v19  ;;  %6834 = vpow2.f32 %v1431_v9  ;;  %v1381_v56 = vsub.f32 %v8452_v51, %v1331_v55  ;;  %v1353_v51 = vsel %vm1262_vm5, %v8626_v3, -inf  ;;  %v1376_v19 = vsub.f32 %v8421_v13, %v8566_v10 }
 0x308   : > { %6836 = vpow2.f32 %v1421_v18 }
 0x309   : > { %v1435_v24 = vmul.f32 1.442695, %v1381_v56  ;;  %v1425_v9 = vmul.f32 1.442695, %v1376_v19 }
 0x30a   : > { %v1472_v52 = vpop.xlane.xlu2 %1471 }
 0x30b   : > { %6838 = vpow2.f32 %v1435_v24 }
 0x30c   : > { %6840 = vpow2.f32 %v1425_v9 }
 0x30d   : > { %v8628_v49 = vpop.eup %6834  ;;  %6842 = vrcp.f32 %v1463_v17 }
 0x30e   : > { %1348 = vmax.xlane.f32.xlu1 %v1347_v30  ;;  %2847 = vrot.lane.b32.xlu2 %v7881_v31, %s7372_s29  ;;  %v1515_v28 = vsel %vm1262_vm5, %v8628_v49, 0.0  ;;  %v8636_v5 = vpop.eup %6836 }
 0x30f   : > { %1510 = vadd.xlane.f32.xlu0 %v1509_v27  ;;  %v1500_v53 = vsel %vm1262_vm5, %v8636_v5, 0.0 }
 0x311   : > { %v8638_v6 = vpop.eup %6838 }
 0x312   : > { %v1521_v26 = vsel %vm1262_vm5, %v8638_v6, 0.0  ;;  %v1328_v55 = vpop.xlane.xlu2 %1327  ;;  %v8649_v30 = vpop.eup %6840 }
 0x313   : > { %v1380_v54 = vsub.f32 %v8463_v39, %v1328_v55  ;;  %v1506_v27 = vsel %vm1262_vm5, %v8649_v30, 0.0  ;;  %v6843_v10 = vpop.eup %6842 }
 0x314   : > { %v1585_v39 = vmul.f32 %v6843_v10, %v8440_v40 }
 0x315   : > { %v1433_v56 = vmul.f32 1.442695, %v1380_v54 }
 0x316   : > { %2843 = vrot.lane.b32.xlu2 %v7899_v46, %s7372_s29  ;;  %1354 = vmax.xlane.f32.xlu1 %v1353_v51 }
 0x317   : > { %1516 = vadd.xlane.f32.xlu0 %v1515_v28  ;;  %6844 = vpow2.f32 %v1433_v56 }
 0x31d   : > { %v8655_v18 = vpop.eup %6844 }
 0x31e   : > { %1501 = vadd.xlane.f32.xlu1 %v1500_v53  ;;  %v1518_v24 = vsel %vm1262_vm5, %v8655_v18, 0.0 }
 0x31f   : > { %1522 = vadd.xlane.f32.xlu0 %v1521_v26  ;;  %v1617_v26 = vpack.c.bf16 %v1585_v39, %v1585_v39 }
 0x321   : > { %v1657_v55 = vunpack.c.l.b16 %v1617_v26 }
 0x337   : > { %2340 = vrot.lane.b32.xlu1 %v8327_v58, %s7372_s29 }
 0x338   : > { %v1475_v51 = vpop.xlane.xlu2 %1474 }
 0x33f   : > { %1507 = vadd.xlane.f32.xlu2 %v1506_v27  ;;  %2849 = vrot.lane.b32.xlu1 %v7871_v21, %s7372_s29 }
 0x341   : > { %v1466_v13 = vpop.xlane.xlu1 %1465 }
 0x342   : > { %6846 = vrcp.f32 %v1466_v13 }
 0x343   : > { %6848 = vrcp.f32 %v1472_v52 }
 0x347   : > { %1519 = vadd.xlane.f32.xlu2 %v1518_v24  ;;  %2845 = vrot.lane.b32.xlu1 %v7891_v22, %s7372_s29 }
 0x348   : > { %v6847_v17 = vpop.eup %6846 }
 0x349   : > { %v1322_v28 = vpop.xlane.xlu1 %1321  ;;  %v1586_v53 = vmul.f32 %v6847_v17, %v8484_v62  ;;  %v1478_v9 = vpop.xlane.xlu0 %1477 }
 0x34a   : > { %v6849_v13 = vpop.eup %6848 }
 0x34b   : > { %v1618_v19 = vpack.c.bf16 %v1586_v53, %v1586_v53  ;;  %v1588_v10 = vmul.f32 %v6849_v13, %v8456_v32  ;;  %v1378_v32 = vsub.f32 %v8498_v59, %v1322_v28 }
 0x34d   : > { %v1658_v54 = vunpack.c.l.b16 %v1618_v19  ;;  %v1620_v17 = vpack.c.bf16 %v1588_v10, %v1588_v10 }
 0x34f   : > { %v1664_v56 = vpack.c.b16 %v1658_v54, %v1657_v55 }
 0x351   : > { %6433 = vmatmul.msk.bf16.gmra.mxu0 %vm1262_vm5, %v1664_v56  ;;  %v1469_v40 = vpop.xlane.xlu1 %1468  ;;  %v1481_v27 = vpop.xlane.xlu2 %1480 }
 0x352   : > { %6850 = vrcp.f32 %v1469_v40  ;;  %v1334_v24 = vpop.xlane.xlu0 %1333  ;;  %v1660_v40 = vunpack.c.l.b16 %v1620_v17 }
 0x353   : > { %6852 = vrcp.f32 %v1481_v27 }
 0x354   : > { %6854 = vrcp.f32 %v1478_v9 }
 0x358   : > { %v6851_v46 = vpop.eup %6850 }
 0x359   : > { %v1484_v62 = vpop.xlane.xlu1 %1483  ;;  %v1337_v39 = vpop.xlane.xlu2 %1336  ;;  %v1587_v52 = vmul.f32 %v6851_v46, %v8508_v47 }
 0x35a   : > { %v6853_v53 = vpop.eup %6852  ;;  %6856 = vrcp.f32 %v1484_v62  ;;  %v1383_v26 = vsub.f32 %v8529_v44, %v1337_v39  ;;  %v1487_v31 = vpop.xlane.xlu0 %1486  ;;  %v1429_v62 = vmul.f32 1.442695, %v1378_v32 }
 0x35b   : > { %v1619_v19 = vpack.c.bf16 %v1587_v52, %v1587_v52  ;;  %6858 = vrcp.f32 %v1475_v51  ;;  %v1591_v54 = vmul.f32 %v6853_v53, %v8516_v60  ;;  %v6855_v9 = vpop.eup %6854 }
 0x35c   : > { %v1439_v55 = vmul.f32 1.442695, %v1383_v26  ;;  %v1590_v52 = vmul.f32 %v6855_v9, %v8500_v4 }
 0x35d   : > { %v1659_v56 = vunpack.c.l.b16 %v1619_v19  ;;  %v1623_v46 = vpack.c.bf16 %v1591_v54, %v1591_v54  ;;  %v1382_v19 = vsub.f32 %v8514_v14, %v1334_v24 }
 0x35e   : > { %6860 = vpow2.f32 %v1439_v55 }
 0x35f   : > { %v1665_v27 = vpack.c.b16 %v1660_v40, %v1659_v56  ;;  %6862 = vrcp.f32 %v1487_v31  ;;  %v1740_v17 = vunpack.c.l.b16 %v1623_v46  ;;  %v1437_v56 = vmul.f32 1.442695, %v1382_v19 }
 0x360   : > { %v6857_v13 = vpop.eup %6856  ;;  %6864 = vpow2.f32 %v1429_v62 }
 0x361   : > { %v1592_v47 = vmul.f32 %v6857_v13, %v8525_v45  ;;  %6434 = vmatmul.msk.bf16.gmra.mxu0 %vm1262_vm5, %v1665_v27  ;;  %v1340_v44 = vpop.xlane.xlu1 %1339  ;;  %v1343_v10 = vpop.xlane.xlu2 %1342 }
 0x362   : > { %v6859_v51 = vpop.eup %6858  ;;  %v1385_v60 = vsub.f32 %v8545_v1, %v1343_v10  ;;  %v1622_v1 = vpack.c.bf16 %v1590_v52, %v1590_v52  ;;  %v1384_v24 = vsub.f32 %v8550_v38, %v1340_v44 }
 0x363   : > { %v1624_v39 = vpack.c.bf16 %v1592_v47, %v1592_v47  ;;  %v1589_v26 = vmul.f32 %v6859_v51, %v8479_v35  ;;  %v1496_v51 = vpop.xlane.xlu0 %1495 }
 0x364   : > { %v8673_v59 = vpop.eup %6860  ;;  %v1443_v28 = vmul.f32 1.442695, %v1385_v60  ;;  %v1662_v40 = vunpack.c.l.b16 %v1622_v1 }
 0x365   : > { %v1741_v53 = vunpack.c.l.b16 %v1624_v39  ;;  %v1527_v45 = vsel %vm1262_vm5, %v8673_v59, 0.0  ;;  %v1621_v54 = vpack.c.bf16 %v1589_v26, %v1589_v26  ;;  %v6863_v31 = vpop.eup %6862  ;;  %v1441_v39 = vmul.f32 1.442695, %v1384_v24 }
 0x366   : > { %1528 = vadd.xlane.f32.xlu2 %v1527_v45  ;;  %6866 = vpow2.f32 %v1443_v28  ;;  %v8680_v32 = vpop.eup %6864  ;;  %v1593_v35 = vmul.f32 %v6863_v31, %v8533_v16 }
 0x367   : > { %v1748_v55 = vpack.c.b16 %v1741_v53, %v1740_v17  ;;  %v1661_v27 = vunpack.c.l.b16 %v1621_v54  ;;  %v1512_v47 = vsel %vm1262_vm5, %v8680_v32, 0.0 }
 0x368   : > { %v1625_v10 = vpack.c.bf16 %v1593_v35, %v1593_v35 }
 0x369   : > { %6436 = vmatmul.msk.bf16.vlgmr.msra.gmra.mxu1 %vm1262_vm5, %v1748_v55  ;;  %v1490_v4 = vpop.xlane.xlu1 %1489  ;;  %v1666_v13 = vpack.c.b16 %v1662_v40, %v1661_v27 }
 0x36a   : > { %6868 = vrcp.f32 %v1490_v4  ;;  %v1742_v28 = vunpack.c.l.b16 %v1625_v10 }
 0x36b   : > { %6870 = vpow2.f32 %v1437_v56 }
 0x36c   : > { %v8682_v9 = vpop.eup %6866  ;;  %6872 = vrcp.f32 %v1496_v51 }
 0x36d   : > { %v1533_v14 = vsel %vm1262_vm5, %v8682_v9, 0.0 }
 0x36e   : > { %1534 = vadd.xlane.f32.xlu0 %v1533_v14 }
 0x370   : > { %v6869_v46 = vpop.eup %6868 }
 0x371   : > { %v1594_v62 = vmul.f32 %v6869_v46, %v8562_v63  ;;  %6435 = vmatmul.msk.bf16.gmra.mxu0 %vm1262_vm5, %v1666_v13  ;;  %v1346_v16 = vpop.xlane.xlu1 %1345  ;;  %1513 = vadd.xlane.f32.xlu1 %v1512_v47  ;;  %v8693_v44 = vpop.eup %6870 }
 0x372   : > { %v1386_v60 = vsub.f32 %v8586_v15, %v1346_v16  ;;  %v1524_v63 = vsel %vm1262_vm5, %v8693_v44, 0.0  ;;  %v6873_v26 = vpop.eup %6872  ;;  %v1499_v46 = vpop.xlane.xlu0 %1498 }
 0x373   : > { %v1626_v52 = vpack.c.bf16 %v1594_v62, %v1594_v62  ;;  %v1596_v55 = vmul.f32 %v6873_v26, %v8552_v20  ;;  %v1352_v62 = vpop.xlane.xlu2 %1351  ;;  %v11282_v26 = vld [vmem:[#allocation11_spill] sm:$0xff] }
 0x374   : > { %v1445_v38 = vmul.f32 1.442695, %v1386_v60 }
 0x375   : > { %v1743_v17 = vunpack.c.l.b16 %v1626_v52  ;;  %v1628_v31 = vpack.c.bf16 %v1596_v55, %v1596_v55  ;;  %v1388_v55 = vsub.f32 %v8570_v34, %v1352_v62 }
 0x376   : > { %6874 = vpow2.f32 %v1445_v38 }
 0x377   : > { %6876 = vpow2.f32 %v1441_v39  ;;  %v1749_v53 = vpack.c.b16 %v1743_v17, %v1742_v28  ;;  %v1745_v24 = vunpack.c.l.b16 %v1628_v31  ;;  %v11283_v31 = vld [vmem:[#allocation7_spill] sm:$0xff] }
 0x379   : > { %6437 = vmatmul.msk.bf16.gmra.mxu1 %vm1262_vm5, %v1749_v53  ;;  %v1493_v45 = vpop.xlane.xlu1 %1492  ;;  %1525 = vadd.xlane.f32.xlu1 %v1524_v63 }
 0x37a   : > { %6878 = vrcp.f32 %v1493_v45  ;;  %v1358_v63 = vpop.xlane.xlu0 %1357  ;;  %v11281_v45 = vld [vmem:[#allocation43_spill] sm:$0xff] }
 0x37b   : > { %v2848_v53 = vpop.permute.xlu2 %2847  ;;  %v1390_v34 = vsub.f32 %v8590_v42, %v1358_v63 }
 0x37c   : > { %v8698_v15 = vpop.eup %6874 }
 0x37d   : > { %v8700_v19 = vpop.eup %6876  ;;  %v1536_v1 = vsel %vm1262_vm5, %v8698_v15, 0.0 }
 0x37e   : > { %1537 = vadd.xlane.f32.xlu2 %v1536_v1  ;;  %v1530_v54 = vsel %vm1262_vm5, %v8700_v19, 0.0 }
 0x37f   : > { %v8755_v62 = vpop.f32.mrf.mxu0 }
 0x380   : > { %v6879_v4 = vpop.eup %6878 }
 0x381   : > { %v1595_v56 = vmul.f32 %v6879_v4, %v8597_v23  ;;  %6448 = vmatmul.msk.bf16.vlgmr.msra.gmra.mxu0 %vm929_vm0, %v7914_v2  ;;  %v1349_v40 = vpop.xlane.xlu1 %1348  ;;  %1531 = vadd.xlane.f32.xlu1 %v1530_v54  ;;  %v1449_v54 = vmul.f32 1.442695, %v1388_v55  ;;  %v11292_v55 = vld [vmem:[#allocation56_spill] sm:$0xff] }
 0x382   : > { %v1387_v35 = vsub.f32 %v8610_v12, %v1349_v40  ;;  %3161 = vrot.lane.b32.xlu0 %v7742_v11, %s7373_s8  ;;  %v1505_v4 = vpop.xlane.xlu0 %1504  ;;  %v11285_v40 = vld [vmem:[#allocation44_spill] sm:$0xff] }
 0x383   : > { %v1627_v27 = vpack.c.bf16 %v1595_v56, %v1595_v56  ;;  %v2844_v1 = vpop.permute.xlu2 %2843  ;;  %v11284_v56 = vld [vmem:[#allocation39_spill] sm:$0xff] }
 0x384   : > { %v1447_v20 = vmul.f32 1.442695, %v1387_v35 }
 0x385   : > { %v1744_v14 = vunpack.c.l.b16 %v1627_v27 }
 0x386   : > { %6880 = vpow2.f32 %v1447_v20 }
 0x387   : > { %v1750_v13 = vpack.c.b16 %v1745_v24, %v1744_v14  ;;  %6882 = vrcp.f32 %v1499_v46  ;;  %v1453_v24 = vmul.f32 1.442695, %v1390_v34 }
 0x389   : > { %6438 = vmatmul.msk.bf16.gmra.mxu1 %vm1262_vm5, %v1750_v13  ;;  %v8714_v23 = vpop.xlane.xlu1 %1354  ;;  %v11286_v13 = vld [vmem:[#allocation5_spill] sm:$0xff] }
 0x38a   : > { %3153 = vrot.lane.b32.xlu0 %v7694_v48, %s7373_s8 }
 0x38c   : > { %v8718_v2 = vpop.eup %6880 }
 0x38d   : > { %v1539_v12 = vsel %vm1262_vm5, %v8718_v2, 0.0  ;;  %v6883_v10 = vpop.eup %6882 }
 0x38e   : > { %1540 = vadd.xlane.f32.xlu1 %v1539_v12  ;;  %v1597_v51 = vmul.f32 %v6883_v10, %v8564_v41  ;;  %v11280_v41 = vld [vmem:[#allocation52_spill] sm:$0xff] }
 0x390   : > { %v1629_v60 = vpack.c.bf16 %v1597_v51, %v1597_v51 }
 0x391   : > { %6449 = vmatmul.msk.bf16.gmra.mxu0 %vm929_vm0, %v7942_v57  ;;  %v1502_v47 = vpop.xlane.xlu1 %1501  ;;  %v11279_v57 = vld [vmem:[#allocation9_spill] sm:$0xff] }
 0x392   : > { %6884 = vrcp.f32 %v1502_v47  ;;  %3147 = vrot.lane.b32.xlu0 %v7663_v33, %s7373_s8  ;;  %v1746_v38 = vunpack.c.l.b16 %v1629_v60  ;;  %11287 = vst [vmem:[#allocation9_spill] sm:$0xff] %v8755_v62 }
 0x393   : > { %6886 = vrcp.f32 %v1505_v4  ;;  %v1511_v4 = vpop.xlane.xlu0 %1510 }
 0x394   : > { %6888 = vpow2.f32 %v1449_v54 }
 0x396   : > { %3155 = vrot.lane.b32.xlu2 %v7713_v61, %s7373_s8 }
 0x398   : > { %v6885_v16 = vpop.eup %6884 }
 0x399   : > { %v1598_v39 = vmul.f32 %v6885_v16, %v8636_v5  ;;  %v6887_v20 = vpop.eup %6886  ;;  %v1389_v16 = vsub.f32 %v8626_v3, %v8714_v23  ;;  %v8770_v3 = vpop.f32.mrf.mxu0 }
 0x39a   : > { %v1599_v14 = vmul.f32 %v6887_v20, %v8600_v0  ;;  %v8752_v46 = vpop.eup %6888  ;;  %11290 = vst [vmem:[#allocation52_spill] sm:$0xff] %v8770_v3 }
 0x39b   : > { %v1630_v52 = vpack.c.bf16 %v1598_v39, %v1598_v39  ;;  %v1542_v0 = vsel %vm1262_vm5, %v8752_v46, 0.0 }
 0x39c   : > { %v1631_v10 = vpack.c.bf16 %v1599_v14, %v1599_v14  ;;  %v11298_v14 = vld [vmem:[#allocation46_spill] sm:$0xff] }
 0x39d   : > { %v1747_v28 = vunpack.c.l.b16 %v1630_v52  ;;  %v11288_v52 = vld [vmem:[#allocation49_spill] sm:$0xff] }
 0x39e   : > { %3157 = vrot.lane.b32.xlu2 %v11279_v57, %s7373_s8  ;;  %v1825_v60 = vunpack.c.l.b16 %v1631_v10 }
 0x39f   : > { %v1751_v17 = vpack.c.b16 %v1747_v28, %v1746_v38  ;;  %v1451_v28 = vmul.f32 1.442695, %v1389_v16 }
 0x3a1   : > { %6439 = vmatmul.msk.bf16.gmra.mxu1 %vm1262_vm5, %v1751_v17  ;;  %6450 = vmatmul.msk.bf16.gmra.mxu0 %vm929_vm0, %v11280_v41  ;;  %v11289_v17 = vld [vmem:[#allocation53_spill] sm:$0xff] }
 0x3a6   : > { %2922 = vrot.lane.b32.xlu2 %v11281_v45, %s7372_s29 }
 0x3a7   : > { %3159 = vrot.lane.b32.xlu1 %v11282_v26, %s7373_s8 }
 0x3a9   : > { %v8739_v5 = vpop.permute.xlu1 %2340 }
 0x3af   : > { %3151 = vrot.lane.b32.xlu1 %v11283_v31, %s7373_s8 }
 0x3b1   : > { %6451 = vmatmul.msk.bf16.gmra.mxu0 %vm929_vm0, %v11284_v56  ;;  %6452 = vmatmul.msk.bf16.vlgmr.msrb.gmra.mxu1 %vm929_vm0, %v11285_v40  ;;  %v2850_v35 = vpop.permute.xlu1 %2849  ;;  %v11295_v40 = vld [vmem:[#allocation67_spill] sm:$0xff] }
 0x3b2   : > { %v1508_v27 = vpop.xlane.xlu2 %1507  ;;  %2871 = vmatpush.bf16.msrb.mxu0 %v2850_v35 }
 0x3b3   : > { %6890 = vrcp.f32 %v1508_v27 }
 0x3b4   : > { %6892 = vpow2.f32 %v1453_v24 }
 0x3b5   : > { %6894 = vpow2.f32 %v1451_v28 }
 0x3b6   : > { %2872 = vmatpush.bf16.msrb.mxu0 %v2848_v53  ;;  %6896 = vrcp.f32 %v1511_v4 }
 0x3b7   : > { %3149 = vrot.lane.b32.xlu1 %v11286_v13, %s7373_s8 }
 0x3b9   : > { %v6891_v12 = vpop.eup %6890  ;;  %v2846_v47 = vpop.permute.xlu1 %2845 }
 0x3ba   : > { %v1600_v51 = vmul.f32 %v6891_v12, %v8649_v30  ;;  %2873 = vmatpush.bf16.msrb.mxu0 %v2846_v47  ;;  %v8763_v30 = vpop.eup %6892  ;;  %v1520_v56 = vpop.xlane.xlu2 %1519 }
 0x3bb   : > { %v1548_v53 = vsel %vm1262_vm5, %v8763_v30, 0.0  ;;  %v8772_v23 = vpop.eup %6894  ;;  %v1517_v47 = vpop.xlane.xlu0 %1516 }
 0x3bc   : > { %v1632_v42 = vpack.c.bf16 %v1600_v51, %v1600_v51  ;;  %1543 = vadd.xlane.f32.xlu0 %v1542_v0  ;;  %v1545_v41 = vsel %vm1262_vm5, %v8772_v23, 0.0  ;;  %v6897_v27 = vpop.eup %6896 }
 0x3bd   : > { %v1601_v24 = vmul.f32 %v6897_v27, %v8612_v36 }
 0x3be   : > { %v1826_v39 = vunpack.c.l.b16 %v1632_v42  ;;  %2874 = vmatpush.bf16.msrb.mxu0 %v2844_v1 }
 0x3bf   : > { %2916 = vrot.lane.b32.xlu1 %v11288_v52, %s7372_s29  ;;  %v1633_v51 = vpack.c.bf16 %v1601_v24, %v1601_v24 }
 0x3c0   : > { %v1833_v38 = vpack.c.b16 %v1826_v39, %v1825_v60 }
 0x3c1   : > { %6453 = vmatmul.msk.bf16.gmra.mxu1 %vm929_vm0, %v11289_v17  ;;  %v1827_v28 = vunpack.c.l.b16 %v1633_v51 }
 0x3c2   : > { %6440 = vmatmul.msk.bf16.vlgmr.msra.gmra.mxu2 %vm1262_vm5, %v1833_v38  ;;  %v11301_v38 = vld [vmem:[#allocation47_spill] sm:$0xff] }
 0x3c3   : > { %v1523_v4 = vpop.xlane.xlu0 %1522 }
 0x3c4   : > { %1549 = vadd.xlane.f32.xlu0 %v1548_v53 }
 0x3ce   : > { %v8774_v63 = vpop.f32.mrf.mxu0 }
 0x3cf   : > { %11291 = vst [vmem:[#allocation43_spill] sm:$0xff] %v8774_v63  ;;  %1546 = vadd.xlane.f32.xlu2 %v1545_v41 }
 0x3d1   : > { %6454 = vmatmul.msk.bf16.gmra.mxu1 %vm929_vm0, %v11292_v55 }
 0x3d6   : > { %v8780_v1 = vpop.f32.mrf.mxu0 }
 0x3d7   : > { %11293 = vst [vmem:[#allocation11_spill] sm:$0xff] %v8780_v1 }
 0x3d9   : > { %v1529_v12 = vpop.xlane.xlu2 %1528 }
 0x3de   : > { %v8782_v54 = vpop.f32.mrf.mxu0 }
 0x3df   : > { %11294 = vst [vmem:[#allocation7_spill] sm:$0xff] %v8782_v54 }
 0x3e1   : > { %6455 = vmatmul.msk.bf16.gmra.mxu1 %vm929_vm0, %v11295_v40 }
 0x3e4   : > { %v1514_v35 = vpop.xlane.xlu1 %1513 }
 0x3e5   : > { %6898 = vrcp.f32 %v1514_v35 }
 0x3e6   : > { %v8786_v20 = vpop.f32.mrf.mxu0  ;;  %v8788_v34 = vpop.f32.mrf.mxu1  ;;  %6900 = vrcp.f32 %v1520_v56 }
 0x3e7   : > { %11296 = vst [vmem:[#allocation39_spill] sm:$0xff] %v8786_v20  ;;  %2920 = vrot.lane.b32.xlu2 %v11298_v14, %s7372_s29  ;;  %6902 = vrcp.f32 %v1517_v47  ;;  %v11328_v20 = vld [vmem:[#allocation22_spill] sm:$0xff] }
 0x3e8   : > { %11297 = vst [vmem:[#allocation44_spill] sm:$0xff] %v8788_v34  ;;  %6904 = vrcp.f32 %v1529_v12 }
 0x3eb   : > { %v6899_v10 = vpop.eup %6898 }
 0x3ec   : > { %v1602_v42 = vmul.f32 %v6899_v10, %v8680_v32  ;;  %v1526_v0 = vpop.xlane.xlu1 %1525  ;;  %v6901_v41 = vpop.eup %6900 }
 0x3ed   : > { %v6903_v55 = vpop.eup %6902  ;;  %v1604_v40 = vmul.f32 %v6901_v41, %v8655_v18 }
 0x3ee   : > { %v1634_v16 = vpack.c.bf16 %v1602_v42, %v1602_v42  ;;  %v8794_v60 = vpop.f32.mrf.mxu0  ;;  %v8796_v39 = vpop.f32.mrf.mxu1  ;;  %v1603_v27 = vmul.f32 %v6903_v55, %v8628_v49 }
 0x3ef   : > { %11299 = vst [vmem:[#allocation5_spill] sm:$0xff] %v8794_v60  ;;  %2918 = vrot.lane.b32.xlu2 %v11301_v38, %s7372_s29  ;;  %v6905_v56 = vpop.eup %6904  ;;  %v1636_v10 = vpack.c.bf16 %v1604_v40, %v1604_v40 }
 0x3f0   : > { %11300 = vst [vmem:[#allocation53_spill] sm:$0xff] %v8796_v39  ;;  %v1828_v36 = vunpack.c.l.b16 %v1634_v16  ;;  %v1607_v24 = vmul.f32 %v6905_v56, %v8673_v59  ;;  %v1635_v42 = vpack.c.bf16 %v1603_v27, %v1603_v27 }
 0x3f1   : > { %v1538_v17 = vpop.xlane.xlu2 %1537  ;;  %v1830_v41 = vunpack.c.l.b16 %v1636_v10 }
 0x3f2   : > { %v1834_v53 = vpack.c.b16 %v1828_v36, %v1827_v28  ;;  %v1639_v16 = vpack.c.bf16 %v1607_v24, %v1607_v24  ;;  %v1535_v28 = vpop.xlane.xlu0 %1534  ;;  %v1829_v55 = vunpack.c.l.b16 %v1635_v42 }
 0x3f4   : > { %v1532_v32 = vpop.xlane.xlu1 %1531  ;;  %6441 = vmatmul.msk.bf16.gmra.mxu2 %vm1262_vm5, %v1834_v53  ;;  %v1910_v49 = vunpack.c.l.b16 %v1639_v16  ;;  %v1835_v27 = vpack.c.b16 %v1830_v41, %v1829_v55 }
 0x3f5   : > { %6906 = vrcp.f32 %v1532_v32 }
 0x3f6   : > { %v8802_v35 = vpop.f32.mrf.mxu0  ;;  %v8806_v12 = vpop.f32.mrf.mxu1  ;;  %6908 = vrcp.f32 %v1526_v0 }
 0x3f7   : > { %11302 = vst [vmem:[#allocation56_spill] sm:$0xff] %v8802_v35  ;;  %6910 = vrcp.f32 %v1538_v17 }
 0x3f8   : > { %11303 = vst [vmem:[#allocation67_spill] sm:$0xff] %v8806_v12  ;;  %6912 = vrcp.f32 %v1523_v4 }
 0x3f9   : > { %v8808_v47 = vpop.permute.xlu2 %3155  ;;  %6914 = vrcp.f32 %v1535_v28 }
 0x3fb   : > { %v6907_v51 = vpop.eup %6906 }
 0x3fc   : > { %v1608_v36 = vmul.f32 %v6907_v51, %v8700_v19  ;;  %v6909_v56 = vpop.eup %6908 }
 0x3fd   : > { %v6911_v24 = vpop.eup %6910  ;;  %v1606_v0 = vmul.f32 %v6909_v56, %v8693_v44 }
 0x3fe   : > { %v1640_v18 = vpack.c.bf16 %v1608_v36, %v1608_v36  ;;  %v2168_v53 = vpop.f32.mrf.mxu0  ;;  %v8811_v40 = vpop.f32.mrf.mxu1  ;;  %v1610_v17 = vmul.f32 %v6911_v24, %v8698_v15 }
 0x3ff   : > { %11304 = vst [vmem:[#allocation47_spill] sm:$0xff] %v8811_v40  ;;  %v6913_v34 = vpop.eup %6912 }
 0x400   : > { %v1911_v59 = vunpack.c.l.b16 %v1640_v18  ;;  %v6915_v19 = vpop.eup %6914  ;;  %v1605_v51 = vmul.f32 %v6913_v34, %v8638_v6  ;;  %v1642_v36 = vpack.c.bf16 %v1610_v17, %v1610_v17 }
 0x401   : > { %v3158_v32 = vpop.permute.xlu2 %3157  ;;  %v1609_v42 = vmul.f32 %v6915_v19, %v8682_v9  ;;  %v1541_v56 = vpop.xlane.xlu1 %1540 }
 0x402   : > { %v1918_v12 = vpack.c.b16 %v1911_v59, %v1910_v49  ;;  %v1637_v44 = vpack.c.bf16 %v1605_v51, %v1605_v51  ;;  %v1913_v59 = vunpack.c.l.b16 %v1642_v36  ;;  %v3162_v19 = vpop.permute.xlu0 %3161  ;;  %v3216_v36 = vrot.slane %v3158_v32, 4 }
 0x403   : > { %v1641_v18 = vpack.c.bf16 %v1609_v42, %v1609_v42  ;;  %v3218_v42 = vrot.slane %v3162_v19, 4  ;;  %6916 = vrcp.f32 %v1541_v56 }
 0x404   : > { %6442 = vmatmul.msk.bf16.gmra.mxu2 %vm1262_vm5, %v1835_v27  ;;  %6444 = vmatmul.msk.bf16.vlgmr.msrb.gmra.mxu3 %vm1262_vm5, %v1918_v12  ;;  %v1638_v12 = vpack.c.bf16 %v1606_v0, %v1606_v0  ;;  %v1831_v34 = vunpack.c.l.b16 %v1637_v44  ;;  %v8835_v0 = vsel %vm8148_vm3, %v2168_v53, -inf }
 0x405   : > { %v1912_v55 = vunpack.c.l.b16 %v1641_v18  ;;  %v2439_v51 = vsel %vm1262_vm5, %v8835_v0, -inf }
 0x406   : > { %v2170_v4 = vpop.f32.mrf.mxu0  ;;  %v8825_v15 = vpop.f32.mrf.mxu1  ;;  %v1832_v49 = vunpack.c.l.b16 %v1638_v12  ;;  %v3258_v12 = vunpack.c.l.b16 %v3218_v42 }
 0x407   : > { %v8819_v10 = vsel %vm8179_vm7, %v2170_v4, -inf  ;;  %11305 = vst [vmem:[#allocation79_spill] sm:$0xff] %v8825_v15  ;;  %v1919_v24 = vpack.c.b16 %v1913_v59, %v1912_v55  ;;  %v3256_v55 = vunpack.c.l.b16 %v3216_v36 }
 0x408   : > { %v2442_v16 = vsel %vm1262_vm5, %v8819_v10, -inf  ;;  %v1836_v27 = vpack.c.b16 %v1832_v49, %v1831_v34 }
 0x409   : > { %v2923_v28 = vpop.permute.xlu2 %2922  ;;  %2443 = vmax.xlane.f32.xlu0 %v2442_v16 }
 0x40a   : > { %2944 = vmatpush.bf16.msra.mxu1 %v2923_v28  ;;  %v3154_v18 = vpop.permute.xlu0 %3153 }
 0x40b   : > { %v3214_v42 = vrot.slane %v3154_v18, 4 }
 0x40e   : > { %v2173_v41 = vpop.f32.mrf.mxu0  ;;  %v8839_v17 = vpop.f32.mrf.mxu1 }
 0x40f   : > { %v8829_v6 = vsel %vm8242_vm9, %v2173_v41, -inf  ;;  %11306 = vst [vmem:[#allocation80_spill] sm:$0xff] %v8839_v17  ;;  %v3215_v41 = vrot.slane %v8808_v47, 4  ;;  %v11308_v47 = vld [vmem:[#allocation68_spill] sm:$0xff] }
 0x410   : > { %v2445_v9 = vsel %vm1262_vm5, %v8829_v6, -inf }
 0x411   : > { %2446 = vmax.xlane.f32.xlu1 %v2445_v9 }
 0x412   : > { %v3148_v36 = vpop.permute.xlu0 %3147 }
 0x414   : > { %6443 = vmatmul.msk.bf16.gmra.mxu2 %vm1262_vm5, %v1836_v27  ;;  %6445 = vmatmul.msk.bf16.gmra.mxu3 %vm1262_vm5, %v1919_v24  ;;  %v3255_v24 = vunpack.c.l.b16 %v3215_v41 }
 0x416   : > { %v2175_v4 = vpop.f32.mrf.mxu0 }
 0x417   : > { %v8845_v53 = vsel %vm8092_vm1, %v2175_v4, -inf }
 0x418   : > { %2440 = vmax.xlane.f32.xlu2 %v2439_v51  ;;  %v2448_v34 = vsel %vm1262_vm5, %v8845_v53, -inf  ;;  %v3261_v51 = vpack.c.b16 %v3256_v55, %v3255_v24 }
 0x419   : > { %v3160_v16 = vpop.permute.xlu1 %3159 }
 0x41a   : > { %v3217_v28 = vrot.slane %v3160_v16, 4  ;;  %v3282_v41 = vsel %vm929_vm0, %v3261_v51, 0 }
 0x41c   : > { %v3257_v44 = vunpack.c.l.b16 %v3217_v28 }
 0x41e   : > { %v3262_v49 = vpack.c.b16 %v3258_v12, %v3257_v44  ;;  %v8848_v59 = vpop.f32.mrf.mxu1  ;;  %v2178_v9 = vpop.f32.mrf.mxu0 }
 0x41f   : > { %11307 = vst [vmem:[#allocation81_spill] sm:$0xff] %v8848_v59  ;;  %v8855_v19 = vsel %vm8168_vm6, %v2178_v9, -inf  ;;  %v3254_v9 = vunpack.c.l.b16 %v3214_v42 }
 0x420   : > { %2449 = vmax.xlane.f32.xlu2 %v2448_v34  ;;  %v3285_v27 = vsel %vm929_vm0, %v3262_v49, 0  ;;  %v2451_v12 = vsel %vm1262_vm5, %v8855_v19, -inf }
 0x421   : > { %v3152_v32 = vpop.permute.xlu1 %3151  ;;  %3291 = vmatpush.bf16.xpose.msra.mxu0 %v3285_v27 }
 0x422   : > { %v3213_v4 = vrot.slane %v3152_v32, 4  ;;  %v3211_v32 = vrot.slane %v3148_v36, 4 }
 0x424   : > { %6456 = vmatmul.msk.bf16.vlgmr.msrb.gmra.mxu2 %vm929_vm0, %v11308_v47  ;;  %v3253_v44 = vunpack.c.l.b16 %v3213_v4  ;;  %v3251_v36 = vunpack.c.l.b16 %v3211_v32 }
 0x426   : > { %v8859_v16 = vpop.f32.mrf.mxu1  ;;  %v2180_v28 = vpop.f32.mrf.mxu0  ;;  %v3260_v18 = vpack.c.b16 %v3254_v9, %v3253_v44 }
 0x427   : > { %11309 = vst [vmem:[#allocation68_spill] sm:$0xff] %v8859_v16  ;;  %v8866_v55 = vsel %vm8213_vm8, %v2180_v28, -inf }
 0x428   : > { %2452 = vmax.xlane.f32.xlu2 %v2451_v12  ;;  %v2454_v4 = vsel %vm1262_vm5, %v8866_v55, -inf  ;;  %v3279_v28 = vsel %vm929_vm0, %v3260_v18, 0  ;;  %v6917_v12 = vpop.eup %6916 }
 0x429   : > { %v3150_v49 = vpop.permute.xlu1 %3149  ;;  %3292 = vmatpush.bf16.xpose.msra.mxu0 %v3282_v41  ;;  %v1611_v44 = vmul.f32 %v6917_v12, %v8718_v2 }
 0x42a   : > { %v3212_v34 = vrot.slane %v3150_v49, 4  ;;  %v11311_v49 = vld [vmem:[#allocation65_spill] sm:$0xff] }
 0x42b   : > { %v1643_v32 = vpack.c.bf16 %v1611_v44, %v1611_v44 }
 0x42c   : > { %v3252_v51 = vunpack.c.l.b16 %v3212_v34 }
 0x42d   : > { %v1914_v12 = vunpack.c.l.b16 %v1643_v32 }
 0x42e   : > { %v2183_v24 = vpop.f32.mrf.mxu0  ;;  %v2241_v47 = vpop.f32.mrf.mxu1  ;;  %v3259_v9 = vpack.c.b16 %v3252_v51, %v3251_v36 }
 0x42f   : > { %v8870_v59 = vsel %vm8148_vm3, %v2241_v47, -inf  ;;  %v1544_v42 = vpop.xlane.xlu0 %1543  ;;  %v8880_v41 = vsel %vm8127_vm2, %v2183_v24, -inf }
 0x430   : > { %v2463_v56 = vsel %vm1262_vm5, %v8870_v59, -inf  ;;  %2455 = vmax.xlane.f32.xlu2 %v2454_v4  ;;  %6918 = vrcp.f32 %v1544_v42  ;;  %v2457_v18 = vsel %vm1262_vm5, %v8880_v41, -inf  ;;  %v3276_v42 = vsel %vm929_vm0, %v3259_v9, 0 }
 0x431   : > { %2464 = vmax.xlane.f32.xlu1 %v2463_v56  ;;  %3293 = vmatpush.bf16.xpose.msra.mxu0 %v3279_v28 }
 0x434   : > { %6457 = vmatmul.msk.bf16.gmra.mxu2 %vm929_vm0, %v11311_v49 }
 0x436   : > { %v2185_v34 = vpop.f32.mrf.mxu0  ;;  %v2243_v47 = vpop.f32.mrf.mxu1 }
 0x437   : > { %v6919_v4 = vpop.eup %6918  ;;  %v8888_v56 = vsel %vm8154_vm4, %v2185_v34, -inf  ;;  %v1550_v28 = vpop.xlane.xlu0 %1549  ;;  %v8896_v49 = vsel %vm8179_vm7, %v2243_v47, -inf }
 0x438   : > { %v1612_v2 = vmul.f32 %v6919_v4, %v8752_v46  ;;  %2458 = vmax.xlane.f32.xlu2 %v2457_v18  ;;  %v2460_v24 = vsel %vm1262_vm5, %v8888_v56, -inf  ;;  %6920 = vrcp.f32 %v1550_v28  ;;  %v2466_v46 = vsel %vm1262_vm5, %v8896_v49, -inf  ;;  %v11312_v18 = vld [vmem:[#allocation69_spill] sm:$0xff] }
 0x439   : > { %2461 = vmax.xlane.f32.xlu0 %v2460_v24  ;;  %3294 = vmatpush.bf16.xpose.msra.mxu0 %v3276_v42 }
 0x43a   : > { %v1644_v51 = vpack.c.bf16 %v1612_v2, %v1612_v2 }
 0x43c   : > { %v1915_v36 = vunpack.c.l.b16 %v1644_v51 }
 0x43e   : > { %v2246_v44 = vpop.f32.mrf.mxu1  ;;  %v1920_v34 = vpack.c.b16 %v1915_v36, %v1914_v12  ;;  %v6921_v4 = vpop.eup %6920 }
 0x43f   : > { %v8905_v32 = vsel %vm8242_vm9, %v2246_v44, -inf  ;;  %v1614_v47 = vmul.f32 %v6921_v4, %v8763_v30 }
 0x440   : > { %6446 = vmatmul.msk.bf16.gmra.mxu3 %vm1262_vm5, %v1920_v34  ;;  %v2469_v24 = vsel %vm1262_vm5, %v8905_v32, -inf }
 0x441   : > { %2467 = vmax.xlane.f32.xlu0 %v2466_v46  ;;  %v1646_v51 = vpack.c.bf16 %v1614_v47, %v1614_v47 }
 0x442   : > { %v1547_v9 = vpop.xlane.xlu2 %1546 }
 0x443   : > { %6922 = vrcp.f32 %v1547_v9  ;;  %v1917_v9 = vunpack.c.l.b16 %v1646_v51 }
 0x444   : > { %6458 = vmatmul.msk.bf16.gmra.mxu2 %vm929_vm0, %v11312_v18 }
 0x446   : > { %v2248_v2 = vpop.f32.mrf.mxu1 }
 0x447   : > { %v8913_v34 = vsel %vm8092_vm1, %v2248_v2, -inf  ;;  %v11313_v2 = vld [vmem:[#allocation71_spill] sm:$0xff] }
 0x449   : > { %v6923_v42 = vpop.eup %6922  ;;  %2470 = vmax.xlane.f32.xlu0 %v2469_v24  ;;  %v2917_v24 = vpop.permute.xlu1 %2916 }
 0x44a   : > { %v1613_v28 = vmul.f32 %v6923_v42, %v8772_v23  ;;  %v2921_v12 = vpop.permute.xlu2 %2920  ;;  %v2472_v23 = vsel %vm1262_vm5, %v8913_v34, -inf }
 0x44b   : > { %2945 = vmatpush.bf16.msra.mxu1 %v2921_v12 }
 0x44c   : > { %v1645_v36 = vpack.c.bf16 %v1613_v28, %v1613_v28 }
 0x44e   : > { %v2251_v44 = vpop.f32.mrf.mxu1  ;;  %v1916_v46 = vunpack.c.l.b16 %v1645_v36 }
 0x44f   : > { %v8917_v30 = vsel %vm8168_vm6, %v2251_v44, -inf }
 0x450   : > { %v2475_v4 = vsel %vm1262_vm5, %v8917_v30, -inf  ;;  %v1921_v18 = vpack.c.b16 %v1917_v9, %v1916_v46  ;;  %v11314_v46 = vld [vmem:[#allocation72_spill] sm:$0xff]  ;;  %v8940_v9 = vpop.f32.mrf.mxu2 }
 0x451   : > { %2476 = vmax.xlane.f32.xlu2 %v2475_v4  ;;  %2473 = vmax.xlane.f32.xlu0 %v2472_v23  ;;  %11315 = vst [vmem:[#allocation61_spill] sm:$0xff] %v8940_v9 }
 0x452   : > { %v2919_v47 = vpop.permute.xlu2 %2918  ;;  %6447 = vmatmul.msk.bf16.gmra.mxu3 %vm1262_vm5, %v1921_v18 }
 0x453   : > { %2946 = vmatpush.bf16.msra.mxu1 %v2919_v47 }
 0x454   : > { %6459 = vmatmul.msk.bf16.gmra.mxu2 %vm929_vm0, %v11313_v2  ;;  %v11317_v2 = vld [vmem:[#allocation73_spill] sm:$0xff] }
 0x456   : > { %v2253_v42 = vpop.f32.mrf.mxu1 }
 0x457   : > { %2947 = vmatpush.bf16.msra.mxu1 %v2917_v24  ;;  %v8928_v51 = vsel %vm8213_vm8, %v2253_v42, -inf }
 0x458   : > { %v2478_v28 = vsel %vm1262_vm5, %v8928_v51, -inf  ;;  %v8948_v47 = vpop.f32.mrf.mxu2 }
 0x459   : > { %2479 = vmax.xlane.f32.xlu2 %v2478_v28  ;;  %11316 = vst [vmem:[#allocation65_spill] sm:$0xff] %v8948_v47  ;;  %v11320_v28 = vld [vmem:[#allocation78_spill] sm:$0xff] }
 0x45e   : > { %v2256_v12 = vpop.f32.mrf.mxu1 }
 0x45f   : > { %v8934_v36 = vsel %vm8127_vm2, %v2256_v12, -inf }
 0x460   : > { %v2481_v44 = vsel %vm1262_vm5, %v8934_v36, -inf }
 0x461   : > { %2482 = vmax.xlane.f32.xlu0 %v2481_v44 }
 0x462   : > { %6460 = vmatmul.msk.bf16.vlgmr.msra.gmra.mxu3 %vm929_vm0, %v11314_v46 }
 0x466   : > { %v2258_v4 = vpop.f32.mrf.mxu1 }
 0x467   : > { %v8944_v23 = vsel %vm8154_vm4, %v2258_v4, -inf }
 0x468   : > { %v2484_v18 = vsel %vm1262_vm5, %v8944_v23, -inf }
 0x469   : > { %2485 = vmax.xlane.f32.xlu1 %v2484_v18 }
 0x472   : > { %6461 = vmatmul.msk.bf16.gmra.mxu3 %vm929_vm0, %v11317_v2 }
 0x477   : > { %v8952_v24 = vpop.f32.mrf.mxu2 }
 0x478   : > { %11318 = vst [vmem:[#allocation69_spill] sm:$0xff] %v8952_v24 }
 0x47f   : > { %v8954_v42 = vpop.f32.mrf.mxu2 }
 0x480   : > { %11319 = vst [vmem:[#allocation71_spill] sm:$0xff] %v8954_v42 }
 0x482   : > { %6462 = vmatmul.msk.bf16.gmra.mxu3 %vm929_vm0, %v11320_v28 }
 0x487   : > { %v8958_v12 = vpop.f32.mrf.mxu2 }
 0x488   : > { %11321 = vst [vmem:[#allocation72_spill] sm:$0xff] %v8958_v12 }
 0x48b   : > { %v2441_v44 = vpop.xlane.xlu2 %2440 }
 0x48c   : > { %v2535_v46 = vsub.f32 %v8835_v0, %v2441_v44  ;;  %v2444_v0 = vpop.xlane.xlu0 %2443 }
 0x48e   : > { %v2567_v4 = vmul.f32 1.442695, %v2535_v46 }
 0x48f   : > { %v8961_v9 = vpop.f32.mrf.mxu2 }
 0x490   : > { %11322 = vst [vmem:[#allocation73_spill] sm:$0xff] %v8961_v9  ;;  %6924 = vpow2.f32 %v2567_v4  ;;  %v2536_v4 = vsub.f32 %v8819_v10, %v2444_v0  ;;  %v2447_v9 = vpop.xlane.xlu1 %2446 }
 0x492   : > { %6463 = vmatmul.msk.bf16.gmra.mxu3 %vm929_vm0, %v8739_v5  ;;  %v2569_v5 = vmul.f32 1.442695, %v2536_v4 }
 0x493   : > { %v2450_v18 = vpop.xlane.xlu2 %2449 }
 0x496   : > { %v8965_v2 = vpop.eup %6924 }
 0x497   : > { %v8967_v24 = vpop.f32.mrf.mxu2  ;;  %v2631_v28 = vsel %vm1262_vm5, %v8965_v2, 0.0 }
 0x498   : > { %11323 = vst [vmem:[#allocation78_spill] sm:$0xff] %v8967_v24  ;;  %2632 = vadd.xlane.f32.xlu2 %v2631_v28  ;;  %v2537_v24 = vsub.f32 %v8829_v6, %v2447_v9 }
 0x49b   : > { %v2453_v12 = vpop.xlane.xlu2 %2452 }
 0x49c   : > { %v2539_v42 = vsub.f32 %v8855_v19, %v2453_v12  ;;  %v2538_v19 = vsub.f32 %v8845_v53, %v2450_v18  ;;  %v2571_v12 = vmul.f32 1.442695, %v2537_v24 }
 0x49e   : > { %v2575_v44 = vmul.f32 1.442695, %v2539_v42  ;;  %v2573_v0 = vmul.f32 1.442695, %v2538_v19 }
 0x49f   : > { %v8972_v46 = vpop.f32.mrf.mxu2 }
 0x4a0   : > { %11324 = vst [vmem:[#allocation82_spill] sm:$0xff] %v8972_v46  ;;  %6926 = vpow2.f32 %v2575_v44 }
 0x4a1   : > { %6928 = vpow2.f32 %v2569_v5 }
 0x4a2   : > { %6930 = vpow2.f32 %v2571_v12 }
 0x4a3   : > { %6932 = vpow2.f32 %v2573_v0  ;;  %v2456_v19 = vpop.xlane.xlu2 %2455 }
 0x4a4   : > { %v2540_v0 = vsub.f32 %v8866_v55, %v2456_v19  ;;  %v2465_v39 = vpop.xlane.xlu1 %2464 }
 0x4a6   : > { %v8975_v47 = vpop.eup %6926 }
 0x4a7   : > { %v2314_v16 = vpop.f32.mrf.mxu2  ;;  %v2643_v28 = vsel %vm1262_vm5, %v8975_v47, 0.0  ;;  %v8987_v44 = vpop.eup %6928 }
 0x4a8   : > { %v8983_v42 = vsel %vm8148_vm3, %v2314_v16, -inf  ;;  %2644 = vadd.xlane.f32.xlu1 %v2643_v28  ;;  %v2634_v16 = vsel %vm1262_vm5, %v8987_v44, 0.0  ;;  %v8997_v18 = vpop.eup %6930 }
 0x4a9   : > { %v2487_v10 = vsel %vm1262_vm5, %v8983_v42, -inf  ;;  %v8999_v24 = vpop.eup %6932  ;;  %v2637_v5 = vsel %vm1262_vm5, %v8997_v18, 0.0 }
 0x4aa   : > { %2488 = vmax.xlane.f32.xlu2 %v2487_v10  ;;  %v2640_v28 = vsel %vm1262_vm5, %v8999_v24, 0.0 }
 0x4ab   : > { %v2459_v46 = vpop.xlane.xlu2 %2458 }
 0x4ac   : > { %v2541_v15 = vsub.f32 %v8880_v41, %v2459_v46 }
 0x4ae   : > { %v2579_v17 = vmul.f32 1.442695, %v2541_v15 }
 0x4af   : > { %v2316_v6 = vpop.f32.mrf.mxu2 }
 0x4b0   : > { %v8991_v9 = vsel %vm8179_vm7, %v2316_v6, -inf }
 0x4b1   : > { %v2490_v53 = vsel %vm1262_vm5, %v8991_v9, -inf }
 0x4b2   : > { %2491 = vmax.xlane.f32.xlu0 %v2490_v53  ;;  %2635 = vadd.xlane.f32.xlu2 %v2634_v16 }
 0x4b7   : > { %v2319_v4 = vpop.f32.mrf.mxu2 }
 0x4b8   : > { %v9007_v10 = vsel %vm8242_vm9, %v2319_v4, -inf }
 0x4b9   : > { %v2493_v53 = vsel %vm1262_vm5, %v9007_v10, -inf }
 0x4ba   : > { %2638 = vadd.xlane.f32.xlu0 %v2637_v5  ;;  %2641 = vadd.xlane.f32.xlu2 %v2640_v28  ;;  %v2462_v5 = vpop.xlane.xlu0 %2461  ;;  %v2577_v28 = vmul.f32 1.442695, %v2540_v0 }
 0x4bb   : > { %v2542_v19 = vsub.f32 %v8888_v56, %v2462_v5 }
 0x4bc   : > { %6934 = vpow2.f32 %v2577_v28 }
 0x4bd   : > { %6936 = vpow2.f32 %v2579_v17 }
 0x4bf   : > { %v2321_v12 = vpop.f32.mrf.mxu2 }
 0x4c0   : > { %v9012_v6 = vsel %vm8092_vm1, %v2321_v12, -inf }
 0x4c1   : > { %v2496_v16 = vsel %vm1262_vm5, %v9012_v6, -inf }
 0x4c2   : > { %2494 = vmax.xlane.f32.xlu0 %v2493_v53  ;;  %2497 = vmax.xlane.f32.xlu2 %v2496_v16  ;;  %v2468_v40 = vpop.xlane.xlu0 %2467  ;;  %v2581_v53 = vmul.f32 1.442695, %v2542_v19  ;;  %v9026_v16 = vpop.eup %6934 }
 0x4c3   : > { %v2646_v46 = vsel %vm1262_vm5, %v9026_v16, 0.0  ;;  %v9036_v15 = vpop.eup %6936 }
 0x4c4   : > { %6938 = vpow2.f32 %v2581_v53  ;;  %v2649_v19 = vsel %vm1262_vm5, %v9036_v15, 0.0  ;;  %v2477_v54 = vpop.xlane.xlu2 %2476 }
 0x4c5   : > { %v2547_v1 = vsub.f32 %v8917_v30, %v2477_v54 }
 0x4c7   : > { %v2324_v4 = vpop.f32.mrf.mxu2  ;;  %v2591_v62 = vmul.f32 1.442695, %v2547_v1 }
 0x4c8   : > { %v9021_v55 = vsel %vm8168_vm6, %v2324_v4, -inf }
 0x4c9   : > { %v2499_v12 = vsel %vm1262_vm5, %v9021_v55, -inf }
 0x4ca   : > { %2500 = vmax.xlane.f32.xlu0 %v2499_v12  ;;  %v2471_v5 = vpop.xlane.xlu0 %2470  ;;  %v9038_v28 = vpop.eup %6938  ;;  %v11325_v12 = vld [vmem:[#allocation6_spill] sm:$0xff] }
 0x4cb   : > { %v2545_v17 = vsub.f32 %v8905_v32, %v2471_v5  ;;  %v2652_v53 = vsel %vm1262_vm5, %v9038_v28, 0.0 }
 0x4cf   : > { %v2326_v0 = vpop.f32.mrf.mxu2 }
 0x4d0   : > { %v9030_v41 = vsel %vm8213_vm8, %v2326_v0, -inf  ;;  %v2587_v0 = vmul.f32 1.442695, %v2545_v17  ;;  %v2543_v17 = vsub.f32 %v8870_v59, %v2465_v39  ;;  %v9071_v59 = vpop.f32.mrf.mxu3 }
 0x4d1   : > { %v2502_v56 = vsel %vm1262_vm5, %v9030_v41, -inf  ;;  %11329 = vst [vmem:[#allocation6_spill] sm:$0xff] %v9071_v59 }
 0x4d2   : > { %2647 = vadd.xlane.f32.xlu0 %v2646_v46  ;;  %2503 = vmax.xlane.f32.xlu1 %v2502_v56  ;;  %6940 = vpow2.f32 %v2587_v0  ;;  %v2583_v60 = vmul.f32 1.442695, %v2543_v17  ;;  %v2544_v0 = vsub.f32 %v8896_v49, %v2468_v40  ;;  %v2474_v40 = vpop.xlane.xlu0 %2473  ;;  %v2480_v49 = vpop.xlane.xlu2 %2479 }
 0x4d3   : > { %v2546_v17 = vsub.f32 %v8913_v34, %v2474_v40  ;;  %v2548_v34 = vsub.f32 %v8928_v51, %v2480_v49 }
 0x4d4   : > { %6942 = vpow2.f32 %v2583_v60 }
 0x4d7   : > { %v2329_v4 = vpop.f32.mrf.mxu2 }
 0x4d8   : > { %v9053_v5 = vpop.eup %6940 }
 0x4da   : > { %2650 = vadd.xlane.f32.xlu0 %v2649_v19  ;;  %3243 = vrot.lane.b32.xlu2 %v11325_v12, %s7373_s8  ;;  %v2661_v19 = vsel %vm1262_vm5, %v9053_v5, 0.0  ;;  %v9063_v35 = vpop.eup %6942 }
 0x4db   : > { %2653 = vadd.xlane.f32.xlu1 %v2652_v53  ;;  %v11326_v53 = vld [vmem:[#allocation8_spill] sm:$0xff] }
 0x4dc   : > { %v2486_v1 = vpop.xlane.xlu1 %2485 }
 0x4df   : > { %v2331_v46 = vpop.f32.mrf.mxu2 }
 0x4e0   : > { %v9049_v56 = vsel %vm8154_vm4, %v2331_v46, -inf  ;;  %v11327_v46 = vld [vmem:[#allocation23_spill] sm:$0xff] }
 0x4e1   : > { %v2508_v32 = vsel %vm1262_vm5, %v9049_v56, -inf }
 0x4e3   : > { %2509 = vmax.xlane.f32.xlu1 %v2508_v32  ;;  %v2585_v32 = vmul.f32 1.442695, %v2544_v0  ;;  %v9078_v0 = vsel %vm8127_vm2, %v2329_v4, -inf  ;;  %v9090_v4 = vpop.xlane.xlu0 %2482 }
 0x4e4   : > { %v2505_v63 = vsel %vm1262_vm5, %v9078_v0, -inf }
 0x4e5   : > { %6944 = vpow2.f32 %v2585_v32  ;;  %v9080_v32 = vpop.f32.mrf.mxu3 }
 0x4e6   : > { %11330 = vst [vmem:[#allocation8_spill] sm:$0xff] %v9080_v32  ;;  %v2593_v32 = vmul.f32 1.442695, %v2548_v34 }
 0x4eb   : > { %2662 = vadd.xlane.f32.xlu1 %v2661_v19  ;;  %v2655_v19 = vsel %vm1262_vm5, %v9063_v35, 0.0  ;;  %v9069_v39 = vpop.eup %6944 }
 0x4ec   : > { %v2658_v60 = vsel %vm1262_vm5, %v9069_v39, 0.0 }
 0x4ed   : > { %v9087_v3 = vpop.f32.mrf.mxu3 }
 0x4ee   : > { %3245 = vrot.lane.b32.xlu0 %v11326_v53, %s7373_s8  ;;  %11331 = vst [vmem:[#allocation23_spill] sm:$0xff] %v9087_v3 }
 0x4f6   : > { %3177 = vrot.lane.b32.xlu0 %v11327_v46, %s7373_s8 }
 0x503   : > { %2656 = vadd.xlane.f32.xlu2 %v2655_v19  ;;  %v2589_v19 = vmul.f32 1.442695, %v2546_v17 }
 0x504   : > { %3175 = vrot.lane.b32.xlu1 %v11328_v20, %s7373_s8 }
 0x505   : > { %6946 = vpow2.f32 %v2589_v19  ;;  %v2550_v19 = vsub.f32 %v8944_v23, %v2486_v1 }
 0x506   : > { %6948 = vpow2.f32 %v2591_v62 }
 0x50b   : > { %2659 = vadd.xlane.f32.xlu2 %v2658_v60  ;;  %v2633_v59 = vpop.xlane.xlu2 %2632  ;;  %v9085_v60 = vpop.eup %6946 }
 0x50c   : > { %6950 = vrcp.f32 %v2633_v59  ;;  %v9095_v30 = vpop.eup %6948 }
 0x50d   : > { %6952 = vpow2.f32 %v2593_v32  ;;  %v2667_v59 = vsel %vm1262_vm5, %v9095_v30, 0.0 }
 0x512   : > { %v6951_v3 = vpop.eup %6950 }
 0x513   : > { %2506 = vmax.xlane.f32.xlu2 %v2505_v63  ;;  %v2664_v63 = vsel %vm1262_vm5, %v9085_v60, 0.0  ;;  %v9104_v32 = vpop.eup %6952 }
 0x51d   : > { %v2489_v40 = vpop.xlane.xlu2 %2488 }
 0x51e   : > { %v2551_v17 = vsub.f32 %v8983_v42, %v2489_v40  ;;  %v9099_v42 = vpop.f32.mrf.mxu3  ;;  %v2597_v40 = vmul.f32 1.442695, %v2550_v19 }
 0x51f   : > { %11332 = vst [vmem:[#allocation83_spill] sm:$0xff] %v9099_v42 }
 0x520   : > { %2665 = vadd.xlane.f32.xlu0 %v2664_v63  ;;  %v2599_v54 = vmul.f32 1.442695, %v2551_v17  ;;  %v2759_v17 = vmul.f32 %v6951_v3, %v8965_v2  ;;  %v11333_v63 = vld [vmem:[#allocation60_spill] sm:$0xff] }
 0x522   : > { %6954 = vpow2.f32 %v2599_v54 }
 0x525   : > { %v2636_v51 = vpop.xlane.xlu2 %2635  ;;  %v2492_v49 = vpop.xlane.xlu0 %2491 }
 0x526   : > { %6956 = vrcp.f32 %v2636_v51  ;;  %v2552_v62 = vsub.f32 %v8991_v9, %v2492_v49  ;;  %v2791_v9 = vpack.c.bf16 %v2759_v17, %v2759_v17  ;;  %v2670_v49 = vsel %vm1262_vm5, %v9104_v32, 0.0  ;;  %v9113_v3 = vpop.f32.mrf.mxu3 }
 0x527   : > { %11334 = vst [vmem:[#allocation84_spill] sm:$0xff] %v9113_v3 }
 0x528   : > { %v2601_v34 = vmul.f32 1.442695, %v2552_v62  ;;  %2668 = vadd.xlane.f32.xlu0 %v2667_v59  ;;  %v9106_v23 = vpop.eup %6954  ;;  %v2831_v59 = vunpack.c.l.b16 %v2791_v9 }
 0x529   : > { %v2679_v62 = vsel %vm1262_vm5, %v9106_v23, 0.0 }
 0x52a   : > { %6958 = vpow2.f32 %v2601_v34 }
 0x52b   : > { %2995 = vrot.lane.b32.xlu2 %v11333_v63, %s7372_s29  ;;  %6960 = vpow2.f32 %v2597_v40 }
 0x52c   : > { %v6957_v54 = vpop.eup %6956 }
 0x52d   : > { %v2760_v1 = vmul.f32 %v6957_v54, %v8987_v44  ;;  %v2642_v51 = vpop.xlane.xlu2 %2641  ;;  %v2639_v19 = vpop.xlane.xlu0 %2638 }
 0x52e   : > { %6962 = vrcp.f32 %v2642_v51  ;;  %2671 = vadd.xlane.f32.xlu1 %v2670_v49 }
 0x52f   : > { %v2792_v2 = vpack.c.bf16 %v2760_v1, %v2760_v1  ;;  %6964 = vrcp.f32 %v2639_v19 }
 0x530   : > { %2680 = vadd.xlane.f32.xlu0 %v2679_v62  ;;  %v9117_v40 = vpop.eup %6958 }
 0x531   : > { %v2832_v34 = vunpack.c.l.b16 %v2792_v2  ;;  %v9119_v44 = vpop.eup %6960  ;;  %v2682_v51 = vsel %vm1262_vm5, %v9117_v40, 0.0  ;;  %v9130_v2 = vpop.f32.mrf.mxu3 }
 0x532   : > { %v2676_v19 = vsel %vm1262_vm5, %v9119_v44, 0.0  ;;  %11335 = vst [vmem:[#allocation85_spill] sm:$0xff] %v9130_v2  ;;  %v11344_v2 = vld [vmem:[#allocation64_spill] sm:$0xff] }
 0x533   : > { %v2839_v17 = vpack.c.b16 %v2832_v34, %v2831_v59  ;;  %v2645_v34 = vpop.xlane.xlu1 %2644 }
 0x534   : > { %v6963_v54 = vpop.eup %6962  ;;  %6966 = vrcp.f32 %v2645_v34 }
 0x535   : > { %v6965_v42 = vpop.eup %6964  ;;  %6464 = vmatmul.msk.bf16.vlgmr.msrb.gmra.mxu0 %vm1262_vm5, %v2839_v17  ;;  %v9124_v1 = vpop.xlane.xlu0 %2494  ;;  %v2762_v49 = vmul.f32 %v6963_v54, %v8999_v24  ;;  %v2549_v24 = vsub.f32 %v8934_v36, %v9090_v4 }
 0x536   : > { %2683 = vadd.xlane.f32.xlu1 %v2682_v51  ;;  %v2761_v9 = vmul.f32 %v6965_v42, %v8997_v18 }
 0x537   : > { %v2794_v62 = vpack.c.bf16 %v2762_v49, %v2762_v49  ;;  %v2595_v49 = vmul.f32 1.442695, %v2549_v24  ;;  %v11339_v24 = vld [vmem:[#allocation18_spill] sm:$0xff] }
 0x538   : > { %2677 = vadd.xlane.f32.xlu0 %v2676_v19  ;;  %v2793_v59 = vpack.c.bf16 %v2761_v9, %v2761_v9 }
 0x539   : > { %v2834_v63 = vunpack.c.l.b16 %v2794_v62  ;;  %v9134_v20 = vpop.f32.mrf.mxu3 }
 0x53a   : > { %v2833_v3 = vunpack.c.l.b16 %v2793_v59  ;;  %11336 = vst [vmem:[#allocation86_spill] sm:$0xff] %v9134_v20  ;;  %v6967_v51 = vpop.eup %6966  ;;  %v11338_v59 = vld [vmem:[#allocation10_spill] sm:$0xff] }
 0x53b   : > { %v2763_v9 = vmul.f32 %v6967_v51, %v8975_v47 }
 0x53c   : > { %v2840_v18 = vpack.c.b16 %v2834_v63, %v2833_v3 }
 0x53d   : > { %v9132_v17 = vpop.xlane.xlu0 %2500  ;;  %v2795_v34 = vpack.c.bf16 %v2763_v9, %v2763_v9  ;;  %v11340_v9 = vld [vmem:[#allocation20_spill] sm:$0xff] }
 0x53f   : > { %v2835_v47 = vunpack.c.l.b16 %v2795_v34  ;;  %v11341_v34 = vld [vmem:[#allocation62_spill] sm:$0xff] }
 0x541   : > { %v9142_v19 = vpop.f32.mrf.mxu3 }
 0x542   : > { %11337 = vst [vmem:[#allocation87_spill] sm:$0xff] %v9142_v19  ;;  %v11343_v19 = vld [vmem:[#allocation16_spill] sm:$0xff] }
 0x545   : > { %v9138_v42 = vpop.xlane.xlu1 %2503  ;;  %6465 = vmatmul.msk.bf16.gmra.mxu0 %vm1262_vm5, %v2840_v18  ;;  %v2648_v54 = vpop.xlane.xlu0 %2647 }
 0x546   : > { %6968 = vrcp.f32 %v2648_v54 }
 0x547   : > { %6970 = vpow2.f32 %v2595_v49 }
 0x54c   : > { %v6969_v62 = vpop.eup %6968  ;;  %3247 = vrot.lane.b32.xlu0 %v11338_v59, %s7373_s8 }
 0x54d   : > { %v2764_v36 = vmul.f32 %v6969_v62, %v9026_v16  ;;  %v2651_v4 = vpop.xlane.xlu0 %2650  ;;  %v9149_v18 = vpop.eup %6970 }
 0x54e   : > { %v2654_v63 = vpop.xlane.xlu1 %2653  ;;  %6972 = vrcp.f32 %v2651_v4  ;;  %v2673_v51 = vsel %vm1262_vm5, %v9149_v18, 0.0  ;;  %v2387_v62 = vpop.f32.mrf.mxu3 }
 0x54f   : > { %v2796_v3 = vpack.c.bf16 %v2764_v36, %v2764_v36  ;;  %6974 = vrcp.f32 %v2654_v63  ;;  %3171 = vrot.lane.b32.xlu1 %v11339_v24, %s7373_s8  ;;  %v9162_v63 = vsel %vm8148_vm3, %v2387_v62, -inf }
 0x551   : > { %v2836_v54 = vunpack.c.l.b16 %v2796_v3  ;;  %v2511_v3 = vsel %vm1262_vm5, %v9162_v63, -inf }
 0x553   : > { %v2841_v49 = vpack.c.b16 %v2836_v54, %v2835_v47 }
 0x554   : > { %v6973_v20 = vpop.eup %6972  ;;  %3173 = vrot.lane.b32.xlu0 %v11340_v9, %s7373_s8  ;;  %2674 = vadd.xlane.f32.xlu2 %v2673_v51  ;;  %v11342_v51 = vld [vmem:[#allocation63_spill] sm:$0xff] }
 0x555   : > { %v6975_v16 = vpop.eup %6974  ;;  %6466 = vmatmul.msk.bf16.gmra.mxu0 %vm1262_vm5, %v2841_v49  ;;  %v2765_v4 = vmul.f32 %v6973_v20, %v9036_v15  ;;  %v2498_v20 = vpop.xlane.xlu2 %2497 }
 0x556   : > { %v2766_v36 = vmul.f32 %v6975_v16, %v9038_v28  ;;  %v9168_v15 = vpop.xlane.xlu1 %2509 }
 0x557   : > { %2993 = vrot.lane.b32.xlu1 %v11341_v34, %s7372_s29  ;;  %v2797_v54 = vpack.c.bf16 %v2765_v4, %v2765_v4 }
 0x558   : > { %v2798_v47 = vpack.c.bf16 %v2766_v36, %v2766_v36 }
 0x559   : > { %v2837_v49 = vunpack.c.l.b16 %v2797_v54 }
 0x55a   : > { %v2838_v28 = vunpack.c.l.b16 %v2798_v47 }
 0x55c   : > { %2991 = vrot.lane.b32.xlu0 %v11342_v51, %s7372_s29  ;;  %2512 = vmax.xlane.f32.xlu2 %v2511_v3  ;;  %v2842_v16 = vpack.c.b16 %v2838_v28, %v2837_v49  ;;  %v11345_v3 = vld [vmem:[#allocation17_spill] sm:$0xff] }
 0x55d   : > { %v3244_v36 = vpop.permute.xlu2 %3243 }
 0x55e   : > { %v2663_v4 = vpop.xlane.xlu1 %2662 }
 0x560   : > { %v3246_v62 = vpop.permute.xlu0 %3245 }
 0x564   : > { %3167 = vrot.lane.b32.xlu0 %v11343_v19, %s7373_s8 }
 0x565   : > { %6467 = vmatmul.msk.bf16.gmra.mxu0 %vm1262_vm5, %v2842_v16  ;;  %v2389_v16 = vpop.f32.mrf.mxu3 }
 0x568   : > { %v3178_v34 = vpop.permute.xlu0 %3177 }
 0x569   : > { %v3226_v47 = vrot.slane %v3178_v34, 4 }
 0x56b   : > { %v3331_v51 = vunpack.c.l.b16 %v3226_v47  ;;  %v2553_v47 = vsub.f32 %v9007_v10, %v9124_v1 }
 0x56c   : > { %2989 = vrot.lane.b32.xlu0 %v11344_v2, %s7372_s29  ;;  %v9180_v2 = vsel %vm8179_vm7, %v2389_v16, -inf  ;;  %v2554_v16 = vsub.f32 %v9012_v6, %v2498_v20 }
 0x56d   : > { %v2514_v34 = vsel %vm1262_vm5, %v9180_v2, -inf }
 0x56e   : > { %v2605_v10 = vmul.f32 1.442695, %v2554_v16 }
 0x574   : > { %3169 = vrot.lane.b32.xlu2 %v11345_v3, %s7373_s8 }
 0x575   : > { %6480 = vmatmul.msk.bf16.vlgmr.msra.gmra.mxu0 %vm929_vm0, %v3244_v36 }
 0x576   : > { %v3176_v54 = vpop.permute.xlu1 %3175  ;;  %v2657_v49 = vpop.xlane.xlu2 %2656 }
 0x577   : > { %v3225_v28 = vrot.slane %v3176_v54, 4  ;;  %6976 = vrcp.f32 %v2657_v49 }
 0x579   : > { %v3330_v19 = vunpack.c.l.b16 %v3225_v28 }
 0x57b   : > { %v3335_v9 = vpack.c.b16 %v3331_v51, %v3330_v19 }
 0x57d   : > { %v3358_v24 = vsel %vm929_vm0, %v3335_v9, 0  ;;  %v6977_v3 = vpop.eup %6976 }
 0x57e   : > { %3364 = vmatpush.bf16.xpose.msrb.mxu1 %v3358_v24  ;;  %v2660_v59 = vpop.xlane.xlu2 %2659  ;;  %v2767_v36 = vmul.f32 %v6977_v3, %v9063_v35  ;;  %v2603_v24 = vmul.f32 1.442695, %v2553_v47  ;;  %v2555_v47 = vsub.f32 %v9021_v55, %v9132_v17 }
 0x57f   : > { %6978 = vrcp.f32 %v2660_v59 }
 0x580   : > { %v2799_v51 = vpack.c.bf16 %v2767_v36, %v2767_v36  ;;  %6980 = vpow2.f32 %v2603_v24  ;;  %v11346_v36 = vld [vmem:[#allocation12_spill] sm:$0xff] }
 0x581   : > { %2515 = vmax.xlane.f32.xlu1 %v2514_v34  ;;  %6982 = vrcp.f32 %v2663_v4 }
 0x582   : > { %v2904_v59 = vunpack.c.l.b16 %v2799_v51  ;;  %6984 = vpow2.f32 %v2605_v10 }
 0x585   : > { %v6979_v19 = vpop.eup %6978  ;;  %6481 = vmatmul.msk.bf16.gmra.mxu0 %vm929_vm0, %v3246_v62 }
 0x586   : > { %v2768_v54 = vmul.f32 %v6979_v19, %v9069_v39  ;;  %v9190_v9 = vpop.xlane.xlu2 %2506  ;;  %v9194_v1 = vpop.eup %6980 }
 0x587   : > { %v6983_v62 = vpop.eup %6982  ;;  %v2685_v3 = vsel %vm1262_vm5, %v9194_v1, 0.0 }
 0x588   : > { %v2800_v49 = vpack.c.bf16 %v2768_v54, %v2768_v54  ;;  %v2769_v6 = vmul.f32 %v6983_v62, %v9053_v5  ;;  %v9199_v20 = vpop.eup %6984  ;;  %v2607_v5 = vmul.f32 1.442695, %v2555_v47 }
 0x589   : > { %v2688_v24 = vsel %vm1262_vm5, %v9199_v20, 0.0 }
 0x58a   : > { %v2905_v28 = vunpack.c.l.b16 %v2800_v49  ;;  %v2801_v19 = vpack.c.bf16 %v2769_v6, %v2769_v6 }
 0x58c   : > { %v2912_v34 = vpack.c.b16 %v2905_v28, %v2904_v59  ;;  %v2392_v59 = vpop.f32.mrf.mxu3  ;;  %v2906_v28 = vunpack.c.l.b16 %v2801_v19 }
 0x58e   : > { %6468 = vmatmul.msk.bf16.vlgmr.msra.gmra.mxu1 %vm1262_vm5, %v2912_v34  ;;  %v2996_v35 = vpop.permute.xlu2 %2995  ;;  %v9210_v34 = vsel %vm8242_vm9, %v2392_v59, -inf }
 0x58f   : > { %3017 = vmatpush.bf16.msra.mxu2 %v2996_v35  ;;  %v2517_v10 = vsel %vm1262_vm5, %v9210_v34, -inf }
 0x593   : > { %v2666_v39 = vpop.xlane.xlu0 %2665 }
 0x594   : > { %6986 = vrcp.f32 %v2666_v39 }
 0x596   : > { %2686 = vadd.xlane.f32.xlu0 %v2685_v3 }
 0x59a   : > { %v6987_v4 = vpop.eup %6986  ;;  %3249 = vrot.lane.b32.xlu1 %v11346_v36, %s7373_s8 }
 0x59b   : > { %v2770_v51 = vmul.f32 %v6987_v4, %v9085_v60  ;;  %v2669_v54 = vpop.xlane.xlu0 %2668  ;;  %v11347_v60 = vld [vmem:[#allocation14_spill] sm:$0xff]  ;;  %v11348_v4 = vld [vmem:[#allocation13_spill] sm:$0xff] }
 0x59c   : > { %6988 = vrcp.f32 %v2669_v54 }
 0x59d   : > { %v2802_v49 = vpack.c.bf16 %v2770_v51, %v2770_v51  ;;  %2689 = vadd.xlane.f32.xlu2 %v2688_v24 }
 0x59f   : > { %v2907_v16 = vunpack.c.l.b16 %v2802_v49 }
 0x5a1   : > { %v2672_v35 = vpop.xlane.xlu1 %2671  ;;  %v2913_v55 = vpack.c.b16 %v2907_v16, %v2906_v28 }
 0x5a2   : > { %6990 = vrcp.f32 %v2672_v35  ;;  %3165 = vrot.lane.b32.xlu1 %v11347_v60, %s7373_s8  ;;  %v6989_v17 = vpop.eup %6988  ;;  %v2556_v35 = vsub.f32 %v9030_v41, %v9138_v42 }
 0x5a3   : > { %6992 = vpow2.f32 %v2607_v5  ;;  %6469 = vmatmul.msk.bf16.gmra.mxu1 %vm1262_vm5, %v2913_v55  ;;  %v2771_v39 = vmul.f32 %v6989_v17, %v9095_v30  ;;  %v2681_v51 = vpop.xlane.xlu0 %2680  ;;  %v11349_v17 = vld [vmem:[#allocation15_spill] sm:$0xff] }
 0x5a5   : > { %2518 = vmax.xlane.f32.xlu2 %v2517_v10  ;;  %v2803_v47 = vpack.c.bf16 %v2771_v39, %v2771_v39  ;;  %v2609_v10 = vmul.f32 1.442695, %v2556_v35 }
 0x5a7   : > { %v2908_v49 = vunpack.c.l.b16 %v2803_v47 }
 0x5a8   : > { %v6991_v62 = vpop.eup %6990 }
 0x5a9   : > { %v9218_v3 = vpop.eup %6992  ;;  %v2772_v6 = vmul.f32 %v6991_v62, %v9104_v32  ;;  %v2684_v5 = vpop.xlane.xlu1 %2683 }
 0x5aa   : > { %3163 = vrot.lane.b32.xlu0 %v11348_v4, %s7373_s8  ;;  %v2691_v54 = vsel %vm1262_vm5, %v9218_v3, 0.0  ;;  %v2394_v32 = vpop.f32.mrf.mxu3 }
 0x5ab   : > { %v2804_v19 = vpack.c.bf16 %v2772_v6, %v2772_v6  ;;  %v2678_v30 = vpop.xlane.xlu0 %2677 }
 0x5ac   : > { %6994 = vrcp.f32 %v2678_v30 }
 0x5ad   : > { %2692 = vadd.xlane.f32.xlu2 %v2691_v54  ;;  %v2909_v24 = vunpack.c.l.b16 %v2804_v19  ;;  %v9233_v19 = vsel %vm8092_vm1, %v2394_v32, -inf }
 0x5af   : > { %v2914_v59 = vpack.c.b16 %v2909_v24, %v2908_v49 }
 0x5b2   : > { %v6995_v47 = vpop.eup %6994  ;;  %v9235_v41 = vpop.f32.mrf.mxu3 }
 0x5b3   : > { %6470 = vmatmul.msk.bf16.gmra.mxu1 %vm1262_vm5, %v2914_v59  ;;  %v2774_v42 = vmul.f32 %v6995_v47, %v9119_v44  ;;  %v2520_v59 = vsel %vm1262_vm5, %v9233_v19, -inf }
 0x5be   : > { %v3248_v28 = vpop.permute.xlu0 %3247 }
 0x5bf   : > { %6482 = vmatmul.msk.bf16.gmra.mxu0 %vm929_vm0, %v3248_v28  ;;  %v11350_v28 = vld [vmem:[#allocation38_spill] sm:$0xff] }
 0x5c1   : > { %v3172_v16 = vpop.permute.xlu1 %3171 }
 0x5c2   : > { %v3223_v55 = vrot.slane %v3172_v16, 4 }
 0x5c4   : > { %v3328_v54 = vunpack.c.l.b16 %v3223_v55  ;;  %v2806_v55 = vpack.c.bf16 %v2774_v42, %v2774_v42 }
 0x5c5   : > { %3316 = vrot.lane.b32.xlu2 %v11349_v17, %s7373_s8 }
 0x5c6   : > { %v3174_v39 = vpop.permute.xlu0 %3173 }
 0x5c7   : > { %v3224_v62 = vrot.slane %v3174_v39, 4  ;;  %v2675_v6 = vpop.xlane.xlu2 %2674 }
 0x5c8   : > { %6996 = vrcp.f32 %v2675_v6 }
 0x5c9   : > { %v3329_v24 = vunpack.c.l.b16 %v3224_v62  ;;  %v2994_v49 = vpop.permute.xlu1 %2993  ;;  %6998 = vpow2.f32 %v2609_v10 }
 0x5ca   : > { %3018 = vmatpush.bf16.msra.mxu2 %v2994_v49  ;;  %7000 = vrcp.f32 %v2684_v5 }
 0x5cb   : > { %v3334_v30 = vpack.c.b16 %v3329_v24, %v3328_v54  ;;  %7002 = vrcp.f32 %v2681_v51  ;;  %v2557_v51 = vsub.f32 %v9078_v0, %v9190_v9  ;;  %v2911_v24 = vunpack.c.l.b16 %v2806_v55 }
 0x5cc   : > { %2521 = vmax.xlane.f32.xlu1 %v2520_v59 }
 0x5cd   : > { %3191 = vrot.lane.b32.xlu2 %v11350_v28, %s7373_s8  ;;  %v3355_v32 = vsel %vm929_vm0, %v3334_v30, 0  ;;  %v2611_v59 = vmul.f32 1.442695, %v2557_v51 }
 0x5ce   : > { %v6997_v16 = vpop.eup %6996  ;;  %3365 = vmatpush.bf16.xpose.msrb.mxu1 %v3355_v32  ;;  %v2992_v35 = vpop.permute.xlu0 %2991 }
 0x5cf   : > { %v2773_v10 = vmul.f32 %v6997_v16, %v9149_v18  ;;  %v9244_v5 = vpop.xlane.xlu2 %2512  ;;  %3019 = vmatpush.bf16.msra.mxu2 %v2992_v35  ;;  %v9246_v44 = vpop.eup %6998  ;;  %7004 = vpow2.f32 %v2611_v59 }
 0x5d0   : > { %v7001_v39 = vpop.eup %7000  ;;  %v2694_v47 = vsel %vm1262_vm5, %v9246_v44, 0.0  ;;  %v2399_v18 = vpop.f32.mrf.mxu3 }
 0x5d1   : > { %v2805_v62 = vpack.c.bf16 %v2773_v10, %v2773_v10  ;;  %v7003_v6 = vpop.eup %7002  ;;  %v2776_v49 = vmul.f32 %v7001_v39, %v9117_v40  ;;  %v9257_v0 = vsel %vm8213_vm8, %v2399_v18, -inf  ;;  %v2558_v40 = vsub.f32 %v9049_v56, %v9168_v15  ;;  %v11351_v15 = vld [vmem:[#allocation40_spill] sm:$0xff] }
 0x5d2   : > { %v2775_v30 = vmul.f32 %v7003_v6, %v9106_v23  ;;  %v2526_v23 = vsel %vm1262_vm5, %v9257_v0, -inf }
 0x5d3   : > { %v2910_v54 = vunpack.c.l.b16 %v2805_v62  ;;  %v2808_v9 = vpack.c.bf16 %v2776_v49, %v2776_v49 }
 0x5d4   : > { %2695 = vadd.xlane.f32.xlu0 %v2694_v47  ;;  %v2807_v39 = vpack.c.bf16 %v2775_v30, %v2775_v30  ;;  %v2613_v47 = vmul.f32 1.442695, %v2558_v40 }
 0x5d5   : > { %v2915_v42 = vpack.c.b16 %v2911_v24, %v2910_v54  ;;  %v2978_v51 = vunpack.c.l.b16 %v2808_v9  ;;  %v9264_v49 = vpop.eup %7004  ;;  %v11353_v9 = vld [vmem:[#allocation19_spill] sm:$0xff] }
 0x5d6   : > { %v3168_v32 = vpop.permute.xlu0 %3167  ;;  %v2977_v54 = vunpack.c.l.b16 %v2807_v39  ;;  %7006 = vpow2.f32 %v2613_v47  ;;  %v2697_v56 = vsel %vm1262_vm5, %v9264_v49, 0.0 }
 0x5d7   : > { %v3221_v16 = vrot.slane %v3168_v32, 4  ;;  %v3170_v35 = vpop.permute.xlu2 %3169  ;;  %6471 = vmatmul.msk.bf16.gmra.mxu1 %vm1262_vm5, %v2915_v42  ;;  %v11352_v32 = vld [vmem:[#allocation35_spill] sm:$0xff] }
 0x5d8   : > { %v3222_v10 = vrot.slane %v3170_v35, 4  ;;  %v2985_v42 = vpack.c.b16 %v2978_v51, %v2977_v54  ;;  %v2402_v47 = vpop.f32.mrf.mxu3 }
 0x5d9   : > { %v3326_v55 = vunpack.c.l.b16 %v3221_v16  ;;  %v9280_v16 = vsel %vm8168_vm6, %v9235_v41, -inf  ;;  %v11356_v41 = vld [vmem:[#allocation33_spill] sm:$0xff] }
 0x5da   : > { %v3327_v62 = vunpack.c.l.b16 %v3222_v10  ;;  %v2523_v35 = vsel %vm1262_vm5, %v9280_v16, -inf  ;;  %v11354_v10 = vld [vmem:[#allocation32_spill] sm:$0xff] }
 0x5dc   : > { %2527 = vmax.xlane.f32.xlu0 %v2526_v23  ;;  %v3333_v6 = vpack.c.b16 %v3327_v62, %v3326_v55  ;;  %v9271_v59 = vpop.eup %7006  ;;  %v11355_v55 = vld [vmem:[#allocation36_spill] sm:$0xff] }
 0x5dd   : > { %v2700_v30 = vsel %vm1262_vm5, %v9271_v59, 0.0 }
 0x5de   : > { %v2990_v24 = vpop.permute.xlu0 %2989  ;;  %v3352_v18 = vsel %vm929_vm0, %v3333_v6, 0 }
 0x5df   : > { %3020 = vmatpush.bf16.msra.mxu2 %v2990_v24  ;;  %3366 = vmatpush.bf16.xpose.msrb.mxu1 %v3352_v18 }
 0x5e2   : > { %6472 = vmatmul.msk.bf16.vlgmr.msra.gmra.mxu2 %vm1262_vm5, %v2985_v42 }
 0x5e4   : > { %2698 = vadd.xlane.f32.xlu0 %v2697_v56 }
 0x5e5   : > { %3193 = vrot.lane.b32.xlu1 %v11351_v15, %s7373_s8 }
 0x5ec   : > { %2701 = vadd.xlane.f32.xlu0 %v2700_v30 }
 0x5ed   : > { %3187 = vrot.lane.b32.xlu1 %v11352_v32, %s7373_s8 }
 0x5f4   : > { %v2516_v40 = vpop.xlane.xlu1 %2515 }
 0x5f5   : > { %3318 = vrot.lane.b32.xlu1 %v11353_v9, %s7373_s8 }
 0x5f6   : > { %2524 = vmax.xlane.f32.xlu2 %v2523_v35 }
 0x5fd   : > { %3183 = vrot.lane.b32.xlu1 %v11354_v10, %s7373_s8 }
 0x600   : > { %3189 = vrot.lane.b32.xlu0 %v11355_v55, %s7373_s8 }
 0x609   : > { %v2687_v39 = vpop.xlane.xlu0 %2686 }
 0x60a   : > { %7008 = vrcp.f32 %v2687_v39 }
 0x60c   : > { %v3250_v62 = vpop.permute.xlu1 %3249 }
 0x60d   : > { %6483 = vmatmul.msk.bf16.gmra.mxu0 %vm929_vm0, %v3250_v62 }
 0x60e   : > { %3185 = vrot.lane.b32.xlu2 %v11356_v41, %s7373_s8 }
 0x610   : > { %v2690_v23 = vpop.xlane.xlu2 %2689  ;;  %v7009_v51 = vpop.eup %7008 }
 0x611   : > { %7010 = vrcp.f32 %v2690_v23  ;;  %v2777_v6 = vmul.f32 %v7009_v51, %v9194_v1  ;;  %v2404_v23 = vpop.f32.mrf.mxu3  ;;  %v2560_v1 = vsub.f32 %v9180_v2, %v2516_v40 }
 0x613   : > { %v2809_v24 = vpack.c.bf16 %v2777_v6, %v2777_v6 }
 0x614   : > { %v3166_v42 = vpop.permute.xlu1 %3165 }
 0x615   : > { %v3220_v35 = vrot.slane %v3166_v42, 4  ;;  %v2979_v62 = vunpack.c.l.b16 %v2809_v24  ;;  %v11357_v24 = vld [vmem:[#allocation74_spill] sm:$0xff]  ;;  %v11358_v42 = vld [vmem:[#allocation24_spill] sm:$0xff] }
 0x617   : > { %v7011_v54 = vpop.eup %7010  ;;  %v3325_v55 = vunpack.c.l.b16 %v3220_v35 }
 0x618   : > { %v2778_v18 = vmul.f32 %v7011_v54, %v9199_v20  ;;  %v9295_v56 = vpop.xlane.xlu2 %2518  ;;  %v9301_v20 = vsel %vm8154_vm4, %v2404_v23, -inf }
 0x619   : > { %v2532_v2 = vsel %vm1262_vm5, %v9301_v20, -inf }
 0x61a   : > { %v2810_v30 = vpack.c.bf16 %v2778_v18, %v2778_v18  ;;  %v2617_v18 = vmul.f32 1.442695, %v2560_v1  ;;  %v11360_v1 = vld [vmem:[#allocation75_spill] sm:$0xff] }
 0x61c   : > { %v3164_v39 = vpop.permute.xlu0 %3163  ;;  %v2980_v10 = vunpack.c.l.b16 %v2810_v30  ;;  %7012 = vpow2.f32 %v2617_v18 }
 0x61d   : > { %v3219_v32 = vrot.slane %v3164_v39, 4  ;;  %v11359_v39 = vld [vmem:[#allocation21_spill] sm:$0xff] }
 0x61e   : > { %v2986_v41 = vpack.c.b16 %v2980_v10, %v2979_v62  ;;  %v2559_v10 = vsub.f32 %v9162_v63, %v9244_v5 }
 0x61f   : > { %v3324_v9 = vunpack.c.l.b16 %v3219_v32  ;;  %v9308_v32 = vsel %vm8127_vm2, %v2402_v47, -inf }
 0x620   : > { %v2693_v51 = vpop.xlane.xlu2 %2692  ;;  %6473 = vmatmul.msk.bf16.gmra.mxu2 %vm1262_vm5, %v2986_v41 }
 0x621   : > { %v3332_v6 = vpack.c.b16 %v3325_v55, %v3324_v9  ;;  %v2529_v9 = vsel %vm1262_vm5, %v9308_v32, -inf  ;;  %v2615_v55 = vmul.f32 1.442695, %v2559_v10 }
 0x622   : > { %v9315_v41 = vpop.eup %7012 }
 0x623   : > { %v3349_v54 = vsel %vm929_vm0, %v3332_v6, 0  ;;  %7014 = vpow2.f32 %v2615_v55  ;;  %v2706_v63 = vsel %vm1262_vm5, %v9315_v41, 0.0 }
 0x624   : > { %3367 = vmatpush.bf16.xpose.msrb.mxu1 %v3349_v54  ;;  %7016 = vrcp.f32 %v2693_v51  ;;  %v11361_v51 = vld [vmem:[#allocation27_spill] sm:$0xff] }
 0x627   : > { %2533 = vmax.xlane.f32.xlu1 %v2532_v2  ;;  %v11362_v2 = vld [vmem:[#allocation76_spill] sm:$0xff] }
 0x628   : > { %v3317_v40 = vpop.permute.xlu2 %3316 }
 0x629   : > { %v9319_v5 = vpop.eup %7014 }
 0x62a   : > { %2530 = vmax.xlane.f32.xlu0 %v2529_v9  ;;  %v2703_v47 = vsel %vm1262_vm5, %v9319_v5, 0.0  ;;  %v7017_v35 = vpop.eup %7016 }
 0x62b   : > { %6484 = vmatmul.msk.bf16.vlgmr.msrb.gmra.mxu1 %vm929_vm0, %v3317_v40  ;;  %v2779_v62 = vmul.f32 %v7017_v35, %v9218_v3 }
 0x62d   : > { %v2811_v6 = vpack.c.bf16 %v2779_v62, %v2779_v62 }
 0x62f   : > { %v2981_v40 = vunpack.c.l.b16 %v2811_v6 }
 0x630   : > { %v3192_v55 = vpop.permute.xlu2 %3191 }
 0x632   : > { %2707 = vadd.xlane.f32.xlu0 %v2706_v63 }
 0x637   : > { %2704 = vadd.xlane.f32.xlu2 %v2703_v47  ;;  %v3233_v47 = vrot.slane %v3192_v55, 4 }
 0x63f   : > { %v2522_v54 = vpop.xlane.xlu1 %2521 }
 0x640   : > { %3068 = vrot.lane.b32.xlu1 %v11357_v24, %s7372_s29 }
 0x646   : > { %3179 = vrot.lane.b32.xlu0 %v11358_v42, %s7373_s8 }
 0x647   : > { %v2696_v30 = vpop.xlane.xlu0 %2695 }
 0x648   : > { %3320 = vrot.lane.b32.xlu1 %v11359_v39, %s7373_s8  ;;  %7018 = vrcp.f32 %v2696_v30  ;;  %v11363_v30 = vld [vmem:[#allocation77_spill] sm:$0xff] }
 0x64e   : > { %v7019_v23 = vpop.eup %7018  ;;  %3066 = vrot.lane.b32.xlu0 %v11360_v1, %s7372_s29 }
 0x64f   : > { %v2780_v18 = vmul.f32 %v7019_v23, %v9246_v44  ;;  %3181 = vrot.lane.b32.xlu2 %v11361_v51, %s7373_s8  ;;  %v2528_v10 = vpop.xlane.xlu0 %2527  ;;  %v3403_v23 = vunpack.c.l.b16 %v3233_v47  ;;  %v11365_v47 = vld [vmem:[#allocation25_spill] sm:$0xff] }
 0x650   : > { %3064 = vrot.lane.b32.xlu1 %v11362_v2, %s7372_s29  ;;  %v11364_v2 = vld [vmem:[#allocation30_spill] sm:$0xff] }
 0x651   : > { %v2812_v9 = vpack.c.bf16 %v2780_v18, %v2780_v18 }
 0x653   : > { %v2982_v63 = vunpack.c.l.b16 %v2812_v9 }
 0x655   : > { %v2987_v3 = vpack.c.b16 %v2982_v63, %v2981_v40 }
 0x656   : > { %3062 = vrot.lane.b32.xlu0 %v11363_v30, %s7372_s29 }
 0x657   : > { %v3194_v35 = vpop.permute.xlu1 %3193  ;;  %6474 = vmatmul.msk.bf16.gmra.mxu2 %vm1262_vm5, %v2987_v3  ;;  %v2699_v44 = vpop.xlane.xlu0 %2698  ;;  %v2561_v3 = vsub.f32 %v9210_v34, %v9295_v56  ;;  %v2564_v34 = vsub.f32 %v9257_v0, %v2528_v10 }
 0x658   : > { %v3234_v62 = vrot.slane %v3194_v35, 4  ;;  %7020 = vrcp.f32 %v2699_v44 }
 0x65a   : > { %v3404_v42 = vunpack.c.l.b16 %v3234_v62 }
 0x65c   : > { %v3408_v1 = vpack.c.b16 %v3404_v42, %v3403_v23 }
 0x65e   : > { %3389 = vrot.lane.b32.xlu0 %v11364_v2, %s7373_s8  ;;  %v3431_v6 = vsel %vm929_vm0, %v3408_v1, 0  ;;  %v7021_v55 = vpop.eup %7020  ;;  %v2562_v1 = vsub.f32 %v9233_v19, %v2522_v54 }
 0x65f   : > { %v3188_v18 = vpop.permute.xlu1 %3187  ;;  %3437 = vmatpush.bf16.xpose.msrb.mxu2 %v3431_v6  ;;  %v2702_v9 = vpop.xlane.xlu0 %2701  ;;  %v2781_v40 = vmul.f32 %v7021_v55, %v9264_v49  ;;  %v2619_v6 = vmul.f32 1.442695, %v2561_v3 }
 0x660   : > { %7022 = vrcp.f32 %v2702_v9  ;;  %v2621_v55 = vmul.f32 1.442695, %v2562_v1  ;;  %v3231_v56 = vrot.slane %v3188_v18, 4 }
 0x661   : > { %v2813_v42 = vpack.c.bf16 %v2781_v40, %v2781_v40  ;;  %7024 = vpow2.f32 %v2619_v6 }
 0x662   : > { %7026 = vpow2.f32 %v2621_v55 }
 0x663   : > { %v2983_v9 = vunpack.c.l.b16 %v2813_v42 }
 0x666   : > { %v7023_v63 = vpop.eup %7022  ;;  %3322 = vrot.lane.b32.xlu0 %v11365_v47, %s7373_s8 }
 0x667   : > { %v2782_v35 = vmul.f32 %v7023_v63, %v9271_v59  ;;  %v3319_v44 = vpop.permute.xlu1 %3318  ;;  %v2625_v59 = vmul.f32 1.442695, %v2564_v34  ;;  %v9353_v54 = vpop.eup %7024 }
 0x668   : > { %6485 = vmatmul.msk.bf16.gmra.mxu1 %vm929_vm0, %v3319_v44  ;;  %v3401_v44 = vunpack.c.l.b16 %v3231_v56  ;;  %v2709_v0 = vsel %vm1262_vm5, %v9353_v54, 0.0 }
 0x669   : > { %v2814_v62 = vpack.c.bf16 %v2782_v35, %v2782_v35  ;;  %v2525_v23 = vpop.xlane.xlu2 %2524  ;;  %7028 = vpow2.f32 %v2625_v59 }
 0x66a   : > { %v2563_v34 = vsub.f32 %v9280_v16, %v2525_v23  ;;  %v11369_v23 = vld [vmem:[#allocation58_spill] sm:$0xff] }
 0x66b   : > { %v2984_v49 = vunpack.c.l.b16 %v2814_v62  ;;  %v9355_v62 = vpop.eup %7026 }
 0x66c   : > { %v2712_v18 = vsel %vm1262_vm5, %v9355_v62, 0.0 }
 0x66d   : > { %v2988_v2 = vpack.c.b16 %v2984_v49, %v2983_v9 }
 0x66f   : > { %6475 = vmatmul.msk.bf16.gmra.mxu2 %vm1262_vm5, %v2988_v2  ;;  %v3184_v35 = vpop.permute.xlu1 %3183  ;;  %v9362_v49 = vpop.eup %7028 }
 0x670   : > { %v3229_v1 = vrot.slane %v3184_v35, 4  ;;  %v2718_v56 = vsel %vm1262_vm5, %v9362_v49, 0.0 }
 0x671   : > { %v3186_v40 = vpop.permute.xlu2 %3185 }
 0x672   : > { %v3190_v63 = vpop.permute.xlu0 %3189  ;;  %v3230_v3 = vrot.slane %v3186_v40, 4  ;;  %v3399_v9 = vunpack.c.l.b16 %v3229_v1  ;;  %v2623_v40 = vmul.f32 1.442695, %v2563_v34 }
 0x673   : > { %v3232_v19 = vrot.slane %v3190_v63, 4  ;;  %v9368_v63 = vpop.f32.mrf.mxu0 }
 0x674   : > { %v3400_v2 = vunpack.c.l.b16 %v3230_v3  ;;  %7030 = vpow2.f32 %v2623_v40  ;;  %11366 = vst [vmem:[#allocation12_spill] sm:$0xff] %v9368_v63  ;;  %v11375_v63 = vld [vmem:[#allocation55_spill] sm:$0xff] }
 0x675   : > { %v3402_v42 = vunpack.c.l.b16 %v3232_v19 }
 0x676   : > { %v3406_v55 = vpack.c.b16 %v3400_v2, %v3399_v9 }
 0x677   : > { %v3407_v10 = vpack.c.b16 %v3402_v42, %v3401_v44  ;;  %v11367_v44 = vld [vmem:[#allocation34_spill] sm:$0xff]  ;;  %v11371_v42 = vld [vmem:[#allocation59_spill] sm:$0xff] }
 0x678   : > { %2710 = vadd.xlane.f32.xlu2 %v2709_v0  ;;  %v3425_v59 = vsel %vm929_vm0, %v3406_v55, 0 }
 0x679   : > { %v3428_v6 = vsel %vm929_vm0, %v3407_v10, 0 }
 0x67a   : > { %2713 = vadd.xlane.f32.xlu1 %v2712_v18  ;;  %3438 = vmatpush.bf16.xpose.msrb.mxu2 %v3428_v6  ;;  %v9370_v19 = vpop.eup %7030  ;;  %v11373_v6 = vld [vmem:[#allocation37_spill] sm:$0xff] }
 0x67b   : > { %v2715_v35 = vsel %vm1262_vm5, %v9370_v19, 0.0  ;;  %v9376_v16 = vpop.f32.mrf.mxu0 }
 0x67c   : > { %11368 = vst [vmem:[#allocation14_spill] sm:$0xff] %v9376_v16 }
 0x680   : > { %2719 = vadd.xlane.f32.xlu2 %v2718_v56 }
 0x682   : > { %3439 = vmatpush.bf16.xpose.msrb.mxu2 %v3425_v59 }
 0x683   : > { %v9380_v3 = vpop.f32.mrf.mxu0 }
 0x684   : > { %11370 = vst [vmem:[#allocation13_spill] sm:$0xff] %v9380_v3 }
 0x68b   : > { %v9384_v0 = vpop.f32.mrf.mxu0 }
 0x68c   : > { %11372 = vst [vmem:[#allocation15_spill] sm:$0xff] %v9384_v0 }
 0x690   : > { %2716 = vadd.xlane.f32.xlu0 %v2715_v35 }
 0x693   : > { %3391 = vrot.lane.b32.xlu1 %v11367_v44, %s7373_s8  ;;  %v9390_v40 = vpop.f32.mrf.mxu0 }
 0x694   : > { %11374 = vst [vmem:[#allocation38_spill] sm:$0xff] %v9390_v40 }
 0x698   : > { %3207 = vrot.lane.b32.xlu2 %v11369_v23, %s7373_s8 }
 0x69a   : > { %v2534_v10 = vpop.xlane.xlu1 %2533 }
 0x69b   : > { %v2566_v9 = vsub.f32 %v9301_v20, %v2534_v10 }
 0x69d   : > { %v2531_v1 = vpop.xlane.xlu0 %2530  ;;  %v2629_v56 = vmul.f32 1.442695, %v2566_v9 }
 0x69e   : > { %v2565_v18 = vsub.f32 %v9308_v32, %v2531_v1 }
 0x6a0   : > { %v2627_v55 = vmul.f32 1.442695, %v2565_v18 }
 0x6a2   : > { %7032 = vpow2.f32 %v2627_v55 }
 0x6a4   : > { %3209 = vrot.lane.b32.xlu0 %v11371_v42, %s7373_s8 }
 0x6a5   : > { %v2708_v34 = vpop.xlane.xlu0 %2707 }
 0x6a8   : > { %v9394_v16 = vpop.eup %7032 }
 0x6aa   : > { %v2705_v2 = vpop.xlane.xlu2 %2704 }
 0x6ab   : > { %7034 = vrcp.f32 %v2705_v2  ;;  %v2721_v2 = vsel %vm1262_vm5, %v9394_v16, 0.0 }
 0x6ac   : > { %3393 = vrot.lane.b32.xlu0 %v11373_v6, %s7373_s8  ;;  %7036 = vpow2.f32 %v2629_v56  ;;  %v9403_v56 = vpop.f32.mrf.mxu0 }
 0x6ad   : > { %7038 = vrcp.f32 %v2708_v34  ;;  %11377 = vst [vmem:[#allocation40_spill] sm:$0xff] %v9403_v56  ;;  %v11378_v56 = vld [vmem:[#allocation50_spill] sm:$0xff] }
 0x6b1   : > { %v7035_v18 = vpop.eup %7034 }
 0x6b2   : > { %v3069_v59 = vpop.permute.xlu1 %3068  ;;  %v3182_v35 = vpop.permute.xlu2 %3181 }
 0x6b3   : > { %3090 = vmatpush.bf16.msrb.mxu3 %v3069_v59  ;;  %v3228_v32 = vrot.slane %v3182_v35, 4  ;;  %v9397_v55 = vpop.eup %7036  ;;  %v11376_v59 = vld [vmem:[#allocation57_spill] sm:$0xff] }
 0x6b4   : > { %3203 = vrot.lane.b32.xlu0 %v11375_v63, %s7373_s8  ;;  %v7039_v34 = vpop.eup %7038  ;;  %v2724_v40 = vsel %vm1262_vm5, %v9397_v55, 0.0 }
 0x6b5   : > { %v3398_v9 = vunpack.c.l.b16 %v3228_v32 }
 0x6b8   : > { %v3180_v1 = vpop.permute.xlu0 %3179 }
 0x6b9   : > { %v3227_v20 = vrot.slane %v3180_v1, 4  ;;  %v2783_v1 = vmul.f32 %v7035_v18, %v9319_v5  ;;  %v9412_v5 = vpop.f32.mrf.mxu0 }
 0x6ba   : > { %v3321_v10 = vpop.permute.xlu1 %3320  ;;  %11379 = vst [vmem:[#allocation74_spill] sm:$0xff] %v9412_v5 }
 0x6bb   : > { %v3397_v3 = vunpack.c.l.b16 %v3227_v20  ;;  %6486 = vmatmul.msk.bf16.gmra.mxu1 %vm929_vm0, %v3321_v10  ;;  %v2784_v20 = vmul.f32 %v7039_v34, %v9315_v41  ;;  %v2815_v0 = vpack.c.bf16 %v2783_v1, %v2783_v1 }
 0x6bc   : > { %3205 = vrot.lane.b32.xlu0 %v11376_v59, %s7373_s8 }
 0x6bd   : > { %2722 = vadd.xlane.f32.xlu1 %v2721_v2  ;;  %v3405_v35 = vpack.c.b16 %v3398_v9, %v3397_v3  ;;  %v2816_v59 = vpack.c.bf16 %v2784_v20, %v2784_v20  ;;  %v3050_v3 = vunpack.c.l.b16 %v2815_v0  ;;  %v11380_v2 = vld [vmem:[#allocation41_spill] sm:$0xff]  ;;  %v11386_v20 = vld [vmem:[#allocation54_spill] sm:$0xff] }
 0x6bf   : > { %v3422_v32 = vsel %vm929_vm0, %v3405_v35, 0  ;;  %v3051_v18 = vunpack.c.l.b16 %v2816_v59  ;;  %v11382_v35 = vld [vmem:[#allocation45_spill] sm:$0xff]  ;;  %v11384_v59 = vld [vmem:[#allocation42_spill] sm:$0xff] }
 0x6c0   : > { %3440 = vmatpush.bf16.xpose.msrb.mxu2 %v3422_v32  ;;  %v3067_v10 = vpop.permute.xlu0 %3066  ;;  %v11385_v32 = vld [vmem:[#allocation48_spill] sm:$0xff] }
 0x6c1   : > { %2725 = vadd.xlane.f32.xlu2 %v2724_v40  ;;  %3091 = vmatpush.bf16.msrb.mxu3 %v3067_v10  ;;  %v3058_v41 = vpack.c.b16 %v3051_v18, %v3050_v3  ;;  %v9417_v34 = vpop.f32.mrf.mxu0 }
 0x6c2   : > { %v3065_v63 = vpop.permute.xlu1 %3064  ;;  %11381 = vst [vmem:[#allocation21_spill] sm:$0xff] %v9417_v34 }
 0x6c4   : > { %3199 = vrot.lane.b32.xlu0 %v11378_v56, %s7373_s8 }
 0x6c5   : > { %3092 = vmatpush.bf16.msrb.mxu3 %v3065_v63  ;;  %v11383_v63 = vld [vmem:[#allocation51_spill] sm:$0xff] }
 0x6c8   : > { %v3063_v9 = vpop.permute.xlu0 %3062 }
 0x6c9   : > { %3093 = vmatpush.bf16.msrb.mxu3 %v3063_v9  ;;  %v3296_v1 = vpop.f32.mrf.mxu0 }
 0x6cc   : > { %3395 = vrot.lane.b32.xlu0 %v11380_v2, %s7373_s8  ;;  %6476 = vmatmul.msk.bf16.vlgmr.msrb.gmra.mxu3 %vm1262_vm5, %v3058_v41  ;;  %v9431_v41 = vpop.f32.mrf.mxu1 }
 0x6cd   : > { %11387 = vst [vmem:[#allocation27_spill] sm:$0xff] %v9431_v41 }
 0x6d0   : > { %v3390_v40 = vpop.permute.xlu0 %3389 }
 0x6d1   : > { %6488 = vmatmul.msk.bf16.vlgmr.msrb.gmra.mxu2 %vm929_vm0, %v3390_v40  ;;  %v3298_v10 = vpop.f32.mrf.mxu0 }
 0x6d4   : > { %3197 = vrot.lane.b32.xlu0 %v11382_v35, %s7373_s8 }
 0x6d6   : > { %3201 = vrot.lane.b32.xlu1 %v11383_v63, %s7373_s8 }
 0x6d8   : > { %v3323_v0 = vpop.permute.xlu0 %3322 }
 0x6d9   : > { %3195 = vrot.lane.b32.xlu2 %v11384_v59, %s7373_s8  ;;  %6487 = vmatmul.msk.bf16.gmra.mxu1 %vm929_vm0, %v3323_v0  ;;  %v3301_v9 = vpop.f32.mrf.mxu0 }
 0x6dc   : > { %3462 = vrot.lane.b32.xlu0 %v11385_v32, %s7373_s8 }
 0x6e1   : > { %3464 = vrot.lane.b32.xlu2 %v11386_v20, %s7373_s8  ;;  %v3303_v56 = vpop.f32.mrf.mxu0  ;;  %v9435_v20 = vpop.f32.mrf.mxu1 }
 0x6e2   : > { %11388 = vst [vmem:[#allocation77_spill] sm:$0xff] %v9435_v20 }
 0x6eb   : > { %v2711_v3 = vpop.xlane.xlu2 %2710 }
 0x6ec   : > { %7040 = vrcp.f32 %v2711_v3 }
 0x6ed   : > { %v2714_v18 = vpop.xlane.xlu1 %2713 }
 0x6ee   : > { %7042 = vrcp.f32 %v2714_v18  ;;  %v9439_v18 = vsel %vm8148_vm3, %v3296_v1, -inf }
 0x6f2   : > { %v7041_v40 = vpop.eup %7040 }
 0x6f3   : > { %v2785_v5 = vmul.f32 %v7041_v40, %v9353_v54  ;;  %v2720_v2 = vpop.xlane.xlu2 %2719  ;;  %v3567_v54 = vsel %vm1262_vm5, %v9439_v18, -inf }
 0x6f4   : > { %v7043_v34 = vpop.eup %7042  ;;  %7044 = vrcp.f32 %v2720_v2 }
 0x6f5   : > { %v2817_v0 = vpack.c.bf16 %v2785_v5, %v2785_v5  ;;  %v2786_v63 = vmul.f32 %v7043_v34, %v9355_v62  ;;  %v3306_v62 = vpop.f32.mrf.mxu0  ;;  %v9446_v5 = vsel %vm8179_vm7, %v3298_v10, -inf  ;;  %v9448_v34 = vpop.f32.mrf.mxu1 }
 0x6f6   : > { %11389 = vst [vmem:[#allocation25_spill] sm:$0xff] %v9448_v34  ;;  %v3570_v2 = vsel %vm1262_vm5, %v9446_v5, -inf }
 0x6f7   : > { %v2818_v35 = vpack.c.bf16 %v2786_v63, %v2786_v63  ;;  %v3052_v32 = vunpack.c.l.b16 %v2817_v0 }
 0x6f9   : > { %v3053_v59 = vunpack.c.l.b16 %v2818_v35 }
 0x6fa   : > { %v7045_v63 = vpop.eup %7044 }
 0x6fb   : > { %v3059_v3 = vpack.c.b16 %v3053_v59, %v3052_v32  ;;  %v9452_v59 = vsel %vm8092_vm1, %v3303_v56, -inf  ;;  %v9458_v32 = vsel %vm8242_vm9, %v3301_v9, -inf  ;;  %v2788_v10 = vmul.f32 %v7045_v63, %v9362_v49 }
 0x6fc   : > { %v3576_v40 = vsel %vm1262_vm5, %v9452_v59, -inf  ;;  %v3573_v56 = vsel %vm1262_vm5, %v9458_v32, -inf  ;;  %v9469_v9 = vsel %vm8168_vm6, %v3306_v62, -inf }
 0x6fd   : > { %6477 = vmatmul.msk.bf16.gmra.mxu3 %vm1262_vm5, %v3059_v3  ;;  %v3308_v3 = vpop.f32.mrf.mxu0 }
 0x6fe   : > { %v9475_v63 = vsel %vm8213_vm8, %v3308_v3, -inf }
 0x700   : > { %3568 = vmax.xlane.f32.xlu1 %v3567_v54  ;;  %v2820_v54 = vpack.c.bf16 %v2788_v10, %v2788_v10 }
 0x703   : > { %v2717_v35 = vpop.xlane.xlu0 %2716 }
 0x704   : > { %7046 = vrcp.f32 %v2717_v35 }
 0x705   : > { %v3392_v1 = vpop.permute.xlu1 %3391  ;;  %v3311_v62 = vpop.f32.mrf.mxu0 }
 0x706   : > { %6489 = vmatmul.msk.bf16.gmra.mxu2 %vm929_vm0, %v3392_v1  ;;  %3571 = vmax.xlane.f32.xlu0 %v3570_v2  ;;  %v9471_v1 = vpop.f32.mrf.mxu1  ;;  %v3579_v2 = vsel %vm1262_vm5, %v9469_v9, -inf  ;;  %v9484_v3 = vsel %vm8127_vm2, %v3311_v62, -inf }
 0x707   : > { %11390 = vst [vmem:[#allocation34_spill] sm:$0xff] %v9471_v1 }
 0x708   : > { %3577 = vmax.xlane.f32.xlu1 %v3576_v40 }
 0x70a   : > { %v7047_v0 = vpop.eup %7046  ;;  %3574 = vmax.xlane.f32.xlu2 %v3573_v56  ;;  %v3055_v56 = vunpack.c.l.b16 %v2820_v54  ;;  %v3585_v54 = vsel %vm1262_vm5, %v9484_v3, -inf }
 0x70b   : > { %v2787_v35 = vmul.f32 %v7047_v0, %v9370_v19  ;;  %v3582_v19 = vsel %vm1262_vm5, %v9475_v63, -inf  ;;  %v3208_v0 = vpop.permute.xlu2 %3207 }
 0x70d   : > { %v2819_v49 = vpack.c.bf16 %v2787_v35, %v2787_v35  ;;  %v3241_v35 = vrot.slane %v3208_v0, 4 }
 0x70e   : > { %v9486_v1 = vpop.f32.mrf.mxu1 }
 0x70f   : > { %v3054_v40 = vunpack.c.l.b16 %v2819_v49  ;;  %11391 = vst [vmem:[#allocation58_spill] sm:$0xff] %v9486_v1 }
 0x710   : > { %3580 = vmax.xlane.f32.xlu1 %v3579_v2  ;;  %v3476_v2 = vunpack.c.l.b16 %v3241_v35 }
 0x711   : > { %v3060_v10 = vpack.c.b16 %v3055_v56, %v3054_v40  ;;  %v11392_v40 = vld [vmem:[#allocation66_spill] sm:$0xff] }
 0x712   : > { %3583 = vmax.xlane.f32.xlu2 %v3582_v19 }
 0x713   : > { %6478 = vmatmul.msk.bf16.gmra.mxu3 %vm1262_vm5, %v3060_v10 }
 0x716   : > { %v3210_v34 = vpop.permute.xlu0 %3209  ;;  %v9494_v0 = vpop.f32.mrf.mxu1 }
 0x717   : > { %v3242_v49 = vrot.slane %v3210_v34, 4  ;;  %11393 = vst [vmem:[#allocation59_spill] sm:$0xff] %v9494_v0 }
 0x719   : > { %v3477_v41 = vunpack.c.l.b16 %v3242_v49 }
 0x71a   : > { %3466 = vrot.lane.b32.xlu0 %v11392_v40, %s7373_s8  ;;  %3586 = vmax.xlane.f32.xlu2 %v3585_v54 }
 0x71b   : > { %v3481_v56 = vpack.c.b16 %v3477_v41, %v3476_v2 }
 0x71d   : > { %v3504_v19 = vsel %vm929_vm0, %v3481_v56, 0 }
 0x71e   : > { %3510 = vmatpush.bf16.xpose.msra.mxu3 %v3504_v19  ;;  %v3394_v10 = vpop.permute.xlu0 %3393  ;;  %v9496_v34 = vpop.f32.mrf.mxu1 }
 0x71f   : > { %6490 = vmatmul.msk.bf16.gmra.mxu2 %vm929_vm0, %v3394_v10  ;;  %11394 = vst [vmem:[#allocation37_spill] sm:$0xff] %v9496_v34 }
 0x726   : > { %v3204_v62 = vpop.permute.xlu0 %3203  ;;  %v9502_v2 = vpop.f32.mrf.mxu1 }
 0x727   : > { %v3239_v35 = vrot.slane %v3204_v62, 4  ;;  %11395 = vst [vmem:[#allocation88_spill] sm:$0xff] %v9502_v2 }
 0x729   : > { %3468 = vrot.lane.b32.xlu1 %v8327_v58, %s7373_s8  ;;  %v3474_v54 = vunpack.c.l.b16 %v3239_v35 }
 0x72e   : > { %v3206_v49 = vpop.permute.xlu0 %3205 }
 0x72f   : > { %v3240_v1 = vrot.slane %v3206_v49, 4 }
 0x730   : > { %v2723_v20 = vpop.xlane.xlu1 %2722 }
 0x731   : > { %v3475_v41 = vunpack.c.l.b16 %v3240_v1  ;;  %7048 = vrcp.f32 %v2723_v20  ;;  %3977 = vrot.lane.b32.xlu1 %v7871_v21, %s7373_s8  ;;  %v3369_v20 = vpop.f32.mrf.mxu1  ;;  %v3313_v21 = vpop.f32.mrf.mxu0 }
 0x733   : > { %v3480_v56 = vpack.c.b16 %v3475_v41, %v3474_v54  ;;  %v9512_v41 = vsel %vm8154_vm4, %v3313_v21, -inf }
 0x734   : > { %v2726_v19 = vpop.xlane.xlu2 %2725 }
 0x735   : > { %7050 = vrcp.f32 %v2726_v19  ;;  %v3501_v10 = vsel %vm929_vm0, %v3480_v56, 0 }
 0x736   : > { %3511 = vmatpush.bf16.xpose.msra.mxu3 %v3501_v10  ;;  %v3200_v0 = vpop.permute.xlu0 %3199 }
 0x737   : > { %v7049_v34 = vpop.eup %7048 }
 0x738   : > { %v2789_v62 = vmul.f32 %v7049_v34, %v9394_v16  ;;  %v3588_v34 = vsel %vm1262_vm5, %v9512_v41, -inf }
 0x739   : > { %3973 = vrot.lane.b32.xlu1 %v7891_v22, %s7373_s8  ;;  %v3371_v10 = vpop.f32.mrf.mxu1 }
 0x73a   : > { %v2821_v35 = vpack.c.bf16 %v2789_v62, %v2789_v62  ;;  %v9519_v62 = vsel %vm8179_vm7, %v3371_v10, -inf }
 0x73b   : > { %v7051_v1 = vpop.eup %7050 }
 0x73c   : > { %v2790_v49 = vmul.f32 %v7051_v1, %v9397_v55  ;;  %v3056_v56 = vunpack.c.l.b16 %v2821_v35  ;;  %v3237_v55 = vrot.slane %v3200_v0, 4  ;;  %v3196_v21 = vpop.permute.xlu2 %3195 }
 0x73e   : > { %v2822_v2 = vpack.c.bf16 %v2790_v49, %v2790_v49  ;;  %v3396_v54 = vpop.permute.xlu0 %3395  ;;  %v3472_v22 = vunpack.c.l.b16 %v3237_v55  ;;  %v9527_v55 = vsel %vm8148_vm3, %v3369_v20, -inf }
 0x73f   : > { %6491 = vmatmul.msk.bf16.gmra.mxu2 %vm929_vm0, %v3396_v54 }
 0x740   : > { %v3057_v19 = vunpack.c.l.b16 %v2822_v2 }
 0x742   : > { %v3061_v16 = vpack.c.b16 %v3057_v19, %v3056_v56  ;;  %v3594_v56 = vsel %vm1262_vm5, %v9519_v62, -inf  ;;  %v3235_v19 = vrot.slane %v3196_v21, 4 }
 0x744   : > { %3589 = vmax.xlane.f32.xlu0 %v3588_v34  ;;  %6479 = vmatmul.msk.bf16.gmra.mxu3 %vm1262_vm5, %v3061_v16  ;;  %v3470_v58 = vunpack.c.l.b16 %v3235_v19 }
 0x746   : > { %v3198_v1 = vpop.permute.xlu0 %3197 }
 0x747   : > { %v3236_v35 = vrot.slane %v3198_v1, 4  ;;  %v3591_v1 = vsel %vm1262_vm5, %v9527_v55, -inf }
 0x748   : > { %v3202_v49 = vpop.permute.xlu1 %3201 }
 0x749   : > { %v3238_v54 = vrot.slane %v3202_v49, 4  ;;  %v3471_v16 = vunpack.c.l.b16 %v3236_v35 }
 0x74b   : > { %v3473_v2 = vunpack.c.l.b16 %v3238_v54  ;;  %v3478_v10 = vpack.c.b16 %v3471_v16, %v3470_v58 }
 0x74c   : > { %3595 = vmax.xlane.f32.xlu0 %v3594_v56 }
 0x74d   : > { %v3479_v34 = vpack.c.b16 %v3473_v2, %v3472_v22  ;;  %v3495_v40 = vsel %vm929_vm0, %v3478_v10, 0  ;;  %v3465_v22 = vpop.permute.xlu2 %3464 }
 0x74e   : > { %v3463_v49 = vpop.permute.xlu0 %3462 }
 0x74f   : > { %v3498_v0 = vsel %vm929_vm0, %v3479_v34, 0 }
 0x750   : > { %3512 = vmatpush.bf16.xpose.msra.mxu3 %v3498_v0 }
 0x758   : > { %3513 = vmatpush.bf16.xpose.msra.mxu3 %v3495_v40 }
 0x75f   : > { %6492 = vmatmul.msk.bf16.vlgmr.msra.gmra.mxu3 %vm929_vm0, %v3463_v49 }
 0x763   : > { %3592 = vmax.xlane.f32.xlu1 %v3591_v1 }
 0x76f   : > { %6493 = vmatmul.msk.bf16.gmra.mxu3 %vm929_vm0, %v3465_v22 }
 0x773   : > { %v3569_v54 = vpop.xlane.xlu1 %3568 }
 0x774   : > { %v3663_v58 = vsub.f32 %v9439_v18, %v3569_v54 }
 0x776   : > { %v3695_v21 = vmul.f32 1.442695, %v3663_v58 }
 0x778   : > { %7052 = vpow2.f32 %v3695_v21 }
 0x779   : > { %v3572_v40 = vpop.xlane.xlu0 %3571 }
 0x77a   : > { %v3664_v35 = vsub.f32 %v9446_v5, %v3572_v40 }
 0x77b   : > { %v3578_v0 = vpop.xlane.xlu1 %3577 }
 0x77c   : > { %v3697_v2 = vmul.f32 1.442695, %v3664_v35 }
 0x77d   : > { %v3575_v20 = vpop.xlane.xlu2 %3574 }
 0x77e   : > { %v9535_v56 = vpop.eup %7052  ;;  %7054 = vpow2.f32 %v3697_v2  ;;  %v3665_v19 = vsub.f32 %v9458_v32, %v3575_v20  ;;  %v3374_v32 = vpop.f32.mrf.mxu1 }
 0x77f   : > { %v3759_v34 = vsel %vm1262_vm5, %v9535_v56, 0.0  ;;  %v9552_v40 = vsel %vm8242_vm9, %v3374_v32, -inf }
 0x780   : > { %v3699_v16 = vmul.f32 1.442695, %v3665_v19  ;;  %3760 = vadd.xlane.f32.xlu2 %v3759_v34  ;;  %v3597_v2 = vsel %vm1262_vm5, %v9552_v40, -inf }
 0x782   : > { %7056 = vpow2.f32 %v3699_v16 }
 0x783   : > { %v3581_v21 = vpop.xlane.xlu1 %3580 }
 0x784   : > { %v9540_v18 = vpop.eup %7054 }
 0x785   : > { %v3584_v10 = vpop.xlane.xlu2 %3583  ;;  %v3762_v5 = vsel %vm1262_vm5, %v9540_v18, 0.0 }
 0x786   : > { %v3668_v49 = vsub.f32 %v9475_v63, %v3584_v10  ;;  %v3667_v63 = vsub.f32 %v9469_v9, %v3581_v21  ;;  %v3376_v19 = vpop.f32.mrf.mxu1  ;;  %v9565_v10 = vpop.f32.mrf.mxu2  ;;  %v11399_v21 = vld [vmem:[#allocation31_spill] sm:$0xff] }
 0x787   : > { %v9563_v16 = vsel %vm8092_vm1, %v3376_v19, -inf  ;;  %11396 = vst [vmem:[#allocation89_spill] sm:$0xff] %v9565_v10  ;;  %v3666_v19 = vsub.f32 %v9452_v59, %v3578_v0 }
 0x788   : > { %v9545_v1 = vpop.eup %7056  ;;  %v3705_v22 = vmul.f32 1.442695, %v3668_v49  ;;  %3763 = vadd.xlane.f32.xlu2 %v3762_v5  ;;  %v3703_v34 = vmul.f32 1.442695, %v3667_v63  ;;  %v3600_v9 = vsel %vm1262_vm5, %v9563_v16, -inf }
 0x789   : > { %v3765_v54 = vsel %vm1262_vm5, %v9545_v1, 0.0 }
 0x78a   : > { %7058 = vpow2.f32 %v3705_v22  ;;  %3766 = vadd.xlane.f32.xlu0 %v3765_v54  ;;  %v11397_v22 = vld [vmem:[#allocation28_spill] sm:$0xff] }
 0x78b   : > { %7060 = vpow2.f32 %v3703_v34  ;;  %v3701_v34 = vmul.f32 1.442695, %v3666_v19 }
 0x78c   : > { %v3467_v58 = vpop.permute.xlu0 %3466 }
 0x78d   : > { %6494 = vmatmul.msk.bf16.gmra.mxu3 %vm929_vm0, %v3467_v58  ;;  %7062 = vpow2.f32 %v3701_v34 }
 0x78e   : > { %v9574_v32 = vpop.f32.mrf.mxu2 }
 0x78f   : > { %11398 = vst [vmem:[#allocation28_spill] sm:$0xff] %v9574_v32 }
 0x790   : > { %v9554_v35 = vpop.eup %7058 }
 0x791   : > { %v3774_v20 = vsel %vm1262_vm5, %v9554_v35, 0.0  ;;  %v9570_v49 = vpop.eup %7060 }
 0x792   : > { %3598 = vmax.xlane.f32.xlu0 %v3597_v2  ;;  %3775 = vadd.xlane.f32.xlu1 %v3774_v20  ;;  %v3771_v54 = vsel %vm1262_vm5, %v9570_v49, 0.0 }
 0x796   : > { %v9580_v63 = vpop.f32.mrf.mxu2 }
 0x797   : > { %11400 = vst [vmem:[#allocation90_spill] sm:$0xff] %v9580_v63 }
 0x79a   : > { %3601 = vmax.xlane.f32.xlu0 %v3600_v9  ;;  %v3587_v9 = vpop.xlane.xlu2 %3586 }
 0x79b   : > { %v3469_v5 = vpop.permute.xlu1 %3468 }
 0x79d   : > { %6495 = vmatmul.msk.bf16.gmra.mxu3 %vm929_vm0, %v3469_v5  ;;  %v9599_v5 = vpop.eup %7062 }
 0x79e   : > { %v9584_v2 = vpop.f32.mrf.mxu2 }
 0x79f   : > { %11401 = vst [vmem:[#allocation91_spill] sm:$0xff] %v9584_v2 }
 0x7a0   : > { %3975 = vrot.lane.b32.xlu2 %v11397_v22, %s7373_s8 }
 0x7a2   : > { %3772 = vadd.xlane.f32.xlu0 %v3771_v54  ;;  %v3379_v54 = vpop.f32.mrf.mxu1 }
 0x7a3   : > { %v3978_v58 = vpop.permute.xlu1 %3977 }
 0x7a4   : > { %3999 = vmatpush.bf16.msrb.mxu0 %v3978_v58 }
 0x7a6   : > { %v9590_v20 = vpop.f32.mrf.mxu2 }
 0x7a7   : > { %11402 = vst [vmem:[#allocation92_spill] sm:$0xff] %v9590_v20 }
 0x7a8   : > { %3971 = vrot.lane.b32.xlu2 %v11399_v21, %s7373_s8 }
 0x7ab   : > { %4289 = vrot.lane.b32.xlu1 %v7742_v11, %s7374_s5 }
 0x7ae   : > { %v9597_v11 = vpop.f32.mrf.mxu2 }
 0x7af   : > { %11403 = vst [vmem:[#allocation93_spill] sm:$0xff] %v9597_v11 }
 0x7b3   : > { %4283 = vrot.lane.b32.xlu1 %v7713_v61, %s7374_s5 }
 0x7b6   : > { %4287 = vrot.lane.b32.xlu0 %v11282_v26, %s7374_s5  ;;  %v9601_v61 = vpop.f32.mrf.mxu2  ;;  %v3669_v26 = vsub.f32 %v9484_v3, %v3587_v9  ;;  %v3381_v3 = vpop.f32.mrf.mxu1 }
 0x7b7   : > { %11404 = vst [vmem:[#allocation94_spill] sm:$0xff] %v9601_v61  ;;  %v3590_v0 = vpop.xlane.xlu0 %3589  ;;  %v3974_v9 = vpop.permute.xlu1 %3973 }
 0x7b8   : > { %v3707_v59 = vmul.f32 1.442695, %v3669_v26  ;;  %v3670_v19 = vsub.f32 %v9512_v41, %v3590_v0  ;;  %v9619_v26 = vsel %vm8213_vm8, %v3381_v3, -inf }
 0x7b9   : > { %v3606_v41 = vsel %vm1262_vm5, %v9619_v26, -inf }
 0x7ba   : > { %7064 = vpow2.f32 %v3707_v59  ;;  %v3709_v61 = vmul.f32 1.442695, %v3670_v19 }
 0x7bb   : > { %4279 = vrot.lane.b32.xlu1 %v11283_v31, %s7374_s5  ;;  %v3768_v31 = vsel %vm1262_vm5, %v9599_v5, 0.0 }
 0x7bc   : > { %7066 = vpow2.f32 %v3709_v61 }
 0x7be   : > { %v9610_v58 = vpop.f32.mrf.mxu2 }
 0x7bf   : > { %11405 = vst [vmem:[#allocation95_spill] sm:$0xff] %v9610_v58  ;;  %v3596_v11 = vpop.xlane.xlu0 %3595 }
 0x7c0   : > { %v9615_v20 = vpop.eup %7064 }
 0x7c2   : > { %v9629_v19 = vpop.eup %7066 }
 0x7c3   : > { %4281 = vrot.lane.b32.xlu1 %v7694_v48, %s7374_s5  ;;  %v9608_v48 = vsel %vm8168_vm6, %v3379_v54, -inf }
 0x7c4   : > { %v3603_v34 = vsel %vm1262_vm5, %v9608_v48, -inf }
 0x7c6   : > { %v3442_v54 = vpop.f32.mrf.mxu2 }
 0x7c7   : > { %v9627_v0 = vsel %vm8148_vm3, %v3442_v54, -inf }
 0x7c8   : > { %v3615_v61 = vsel %vm1262_vm5, %v9627_v0, -inf }
 0x7ce   : > { %v3444_v58 = vpop.f32.mrf.mxu2 }
 0x7d1   : > { %3769 = vadd.xlane.f32.xlu2 %v3768_v31  ;;  %v3777_v31 = vsel %vm1262_vm5, %v9615_v20, 0.0 }
 0x7d6   : > { %v3593_v59 = vpop.xlane.xlu1 %3592 }
 0x7d7   : > { %v3671_v3 = vsub.f32 %v9527_v55, %v3593_v59  ;;  %v9644_v55 = vsel %vm8179_vm7, %v3444_v58, -inf  ;;  %v3672_v59 = vsub.f32 %v9519_v62, %v3596_v11 }
 0x7d9   : > { %3604 = vmax.xlane.f32.xlu2 %v3603_v34  ;;  %v3384_v34 = vpop.f32.mrf.mxu1  ;;  %v3711_v54 = vmul.f32 1.442695, %v3671_v3 }
 0x7db   : > { %7068 = vpow2.f32 %v3711_v54 }
 0x7e0   : > { %3778 = vadd.xlane.f32.xlu0 %v3777_v31  ;;  %v3780_v31 = vsel %vm1262_vm5, %v9629_v19, 0.0 }
 0x7e1   : > { %3607 = vmax.xlane.f32.xlu2 %v3606_v41  ;;  %v9638_v41 = vsel %vm8127_vm2, %v3384_v34, -inf  ;;  %v3713_v34 = vmul.f32 1.442695, %v3672_v59 }
 0x7e2   : > { %v3609_v63 = vsel %vm1262_vm5, %v9638_v41, -inf }
 0x7e3   : > { %7070 = vpow2.f32 %v3713_v34 }
 0x7e8   : > { %3616 = vmax.xlane.f32.xlu0 %v3615_v61  ;;  %v3618_v61 = vsel %vm1262_vm5, %v9644_v55, -inf }
 0x7e9   : > { %3781 = vadd.xlane.f32.xlu2 %v3780_v31  ;;  %v9649_v31 = vpop.eup %7068 }
 0x7ea   : > { %v3783_v3 = vsel %vm1262_vm5, %v9649_v31, 0.0  ;;  %v9653_v10 = vpop.eup %7070 }
 0x7eb   : > { %v3786_v62 = vsel %vm1262_vm5, %v9653_v10, 0.0 }
 0x7ed   : > { %3610 = vmax.xlane.f32.xlu1 %v3609_v63 }
 0x7f0   : > { %3619 = vmax.xlane.f32.xlu0 %v3618_v61 }
 0x7f3   : > { %v3761_v2 = vpop.xlane.xlu2 %3760 }
 0x7f4   : > { %7072 = vrcp.f32 %v3761_v2 }
 0x7f8   : > { %3784 = vadd.xlane.f32.xlu0 %v3783_v3 }
 0x7fa   : > { %v7073_v63 = vpop.eup %7072 }
 0x7fb   : > { %v3764_v58 = vpop.xlane.xlu2 %3763  ;;  %v3887_v59 = vmul.f32 %v7073_v63, %v9535_v56 }
 0x7fc   : > { %7074 = vrcp.f32 %v3764_v58 }
 0x7fd   : > { %v3767_v54 = vpop.xlane.xlu0 %3766  ;;  %v3919_v3 = vpack.c.bf16 %v3887_v59, %v3887_v59 }
 0x7fe   : > { %7076 = vrcp.f32 %v3767_v54 }
 0x7ff   : > { %v3959_v32 = vunpack.c.l.b16 %v3919_v3 }
 0x800   : > { %3787 = vadd.xlane.f32.xlu0 %v3786_v62 }
 0x801   : > { %4285 = vrot.lane.b32.xlu2 %v11279_v57, %s7374_s5 }
 0x802   : > { %v7075_v11 = vpop.eup %7074 }
 0x803   : > { %v3888_v61 = vmul.f32 %v7075_v11, %v9540_v18  ;;  %v3976_v34 = vpop.permute.xlu2 %3975  ;;  %v9678_v11 = vpop.f32.mrf.mxu2 }
 0x804   : > { %4000 = vmatpush.bf16.msrb.mxu0 %v3976_v34 }
 0x805   : > { %v3920_v2 = vpack.c.bf16 %v3888_v61, %v3888_v61  ;;  %v3599_v21 = vpop.xlane.xlu0 %3598  ;;  %v3776_v18 = vpop.xlane.xlu1 %3775 }
 0x806   : > { %4275 = vrot.lane.b32.xlu1 %v7663_v33, %s7374_s5 }
 0x807   : > { %v3960_v58 = vunpack.c.l.b16 %v3920_v2 }
 0x808   : > { %4001 = vmatpush.bf16.msrb.mxu0 %v3974_v9  ;;  %v3386_v9 = vpop.f32.mrf.mxu1 }
 0x809   : > { %v3967_v57 = vpack.c.b16 %v3960_v58, %v3959_v32  ;;  %v9676_v32 = vsel %vm8154_vm4, %v3386_v9, -inf }
 0x80a   : > { %v3612_v2 = vsel %vm1262_vm5, %v9676_v32, -inf }
 0x80b   : > { %v3972_v62 = vpop.permute.xlu2 %3971 }
 0x80c   : > { %4002 = vmatpush.bf16.msrb.mxu0 %v3972_v62 }
 0x80d   : > { %v9668_v56 = vpop.xlane.xlu0 %3601 }
 0x80e   : > { %4046 = vrot.lane.b32.xlu1 %v11301_v38, %s7373_s8 }
 0x80f   : > { %6496 = vmatmul.msk.bf16.vlgmr.msrb.gmra.mxu0 %vm1262_vm5, %v3967_v57 }
 0x814   : > { %4050 = vrot.lane.b32.xlu0 %v11281_v45, %s7373_s8 }
 0x815   : > { %v3773_v33 = vpop.xlane.xlu0 %3772 }
 0x81c   : > { %4048 = vrot.lane.b32.xlu0 %v11298_v14, %s7373_s8  ;;  %v3449_v14 = vpop.f32.mrf.mxu2 }
 0x81d   : > { %v4290_v63 = vpop.permute.xlu1 %4289  ;;  %v9685_v9 = vsel %vm8092_vm1, %v3449_v14, -inf }
 0x81e   : > { %v4346_v59 = vrot.slane %v4290_v63, 4  ;;  %v3624_v63 = vsel %vm1262_vm5, %v9685_v9, -inf }
 0x820   : > { %v4386_v3 = vunpack.c.l.b16 %v4346_v59 }
 0x824   : > { %4044 = vrot.lane.b32.xlu0 %v11288_v52, %s7373_s8 }
 0x828   : > { %v4288_v61 = vpop.permute.xlu0 %4287 }
 0x829   : > { %v4345_v34 = vrot.slane %v4288_v61, 4  ;;  %v3673_v61 = vsub.f32 %v9552_v40, %v3599_v21 }
 0x82a   : > { %3613 = vmax.xlane.f32.xlu2 %v3612_v2 }
 0x82b   : > { %v4385_v58 = vunpack.c.l.b16 %v4345_v34  ;;  %v3715_v52 = vmul.f32 1.442695, %v3673_v61  ;;  %v7077_v34 = vpop.eup %7076  ;;  %v4284_v61 = vpop.permute.xlu1 %4283 }
 0x82c   : > { %v3889_v2 = vmul.f32 %v7077_v34, %v9545_v1 }
 0x82d   : > { %v4390_v62 = vpack.c.b16 %v4386_v3, %v4385_v58  ;;  %7078 = vpow2.f32 %v3715_v52  ;;  %v3452_v52 = vpop.f32.mrf.mxu2 }
 0x82e   : > { %v3921_v58 = vpack.c.bf16 %v3889_v2, %v3889_v2 }
 0x82f   : > { %v4413_v57 = vsel %vm929_vm0, %v4390_v62, 0 }
 0x830   : > { %4419 = vmatpush.bf16.xpose.msra.mxu0 %v4413_v57 }
 0x833   : > { %v9693_v3 = vpop.eup %7078 }
 0x834   : > { %v3789_v21 = vsel %vm1262_vm5, %v9693_v3, 0.0 }
 0x838   : > { %3625 = vmax.xlane.f32.xlu1 %v3624_v63  ;;  %v3961_v63 = vunpack.c.l.b16 %v3921_v58 }
 0x842   : > { %4277 = vrot.lane.b32.xlu2 %v11286_v13, %s7374_s5 }
 0x844   : > { %v3770_v59 = vpop.xlane.xlu2 %3769 }
 0x845   : > { %7080 = vrcp.f32 %v3770_v59 }
 0x846   : > { %7082 = vrcp.f32 %v3773_v33 }
 0x847   : > { %7084 = vrcp.f32 %v3776_v18 }
 0x84b   : > { %v7081_v14 = vpop.eup %7080 }
 0x84c   : > { %v3890_v62 = vmul.f32 %v7081_v14, %v9599_v5  ;;  %v3605_v57 = vpop.xlane.xlu2 %3604  ;;  %v9703_v5 = vsel %vm8168_vm6, %v3452_v52, -inf }
 0x84d   : > { %v3675_v40 = vsub.f32 %v9608_v48, %v3605_v57  ;;  %v7083_v48 = vpop.eup %7082  ;;  %v3627_v18 = vsel %vm1262_vm5, %v9703_v5, -inf  ;;  %v4280_v57 = vpop.permute.xlu1 %4279 }
 0x84e   : > { %v3922_v13 = vpack.c.bf16 %v3890_v62, %v3890_v62  ;;  %3790 = vadd.xlane.f32.xlu0 %v3789_v21  ;;  %v7085_v34 = vpop.eup %7084  ;;  %v3891_v2 = vmul.f32 %v7083_v48, %v9570_v49 }
 0x84f   : > { %v3719_v54 = vmul.f32 1.442695, %v3675_v40 }
 0x850   : > { %v3962_v1 = vunpack.c.l.b16 %v3922_v13  ;;  %v3923_v62 = vpack.c.bf16 %v3891_v2, %v3891_v2 }
 0x851   : > { %4371 = vrot.lane.b32.xlu1 %v11325_v12, %s7374_s5  ;;  %7086 = vpow2.f32 %v3719_v54  ;;  %v3892_v12 = vmul.f32 %v7085_v34, %v9554_v35  ;;  %v3674_v35 = vsub.f32 %v9563_v16, %v9668_v56 }
 0x852   : > { %v3968_v33 = vpack.c.b16 %v3962_v1, %v3961_v63  ;;  %v3963_v52 = vunpack.c.l.b16 %v3923_v62  ;;  %v4343_v1 = vrot.slane %v4284_v61, 4 }
 0x853   : > { %v3779_v14 = vpop.xlane.xlu0 %3778  ;;  %v3924_v40 = vpack.c.bf16 %v3892_v12, %v3892_v12  ;;  %v3717_v34 = vmul.f32 1.442695, %v3674_v35 }
 0x854   : > { %v3608_v59 = vpop.xlane.xlu2 %3607  ;;  %6497 = vmatmul.msk.bf16.gmra.mxu0 %vm1262_vm5, %v3968_v33  ;;  %v4383_v62 = vunpack.c.l.b16 %v4343_v1 }
 0x855   : > { %v3964_v54 = vunpack.c.l.b16 %v3924_v40 }
 0x856   : > { %3628 = vmax.xlane.f32.xlu0 %v3627_v18  ;;  %v4282_v18 = vpop.permute.xlu1 %4281 }
 0x857   : > { %v9712_v58 = vpop.eup %7086  ;;  %v4342_v16 = vrot.slane %v4282_v18, 4  ;;  %v3454_v18 = vpop.f32.mrf.mxu2 }
 0x858   : > { %v3795_v13 = vsel %vm1262_vm5, %v9712_v58, 0.0 }
 0x859   : > { %4305 = vrot.lane.b32.xlu1 %v11327_v46, %s7374_s5  ;;  %v3969_v46 = vpack.c.b16 %v3964_v54, %v3963_v52  ;;  %v4382_v35 = vunpack.c.l.b16 %v4342_v16 }
 0x85b   : > { %v9716_v49 = vpop.xlane.xlu0 %3616 }
 0x85c   : > { %v3782_v21 = vpop.xlane.xlu2 %3781 }
 0x85d   : > { %7088 = vrcp.f32 %v3782_v21 }
 0x85e   : > { %3796 = vadd.xlane.f32.xlu0 %v3795_v13  ;;  %7090 = vrcp.f32 %v3779_v14  ;;  %v9725_v14 = vsel %vm8242_vm9, %v9678_v11, -inf  ;;  %v4341_v13 = vrot.slane %v4280_v57, 4 }
 0x85f   : > { %7092 = vpow2.f32 %v3717_v34  ;;  %v3621_v21 = vsel %vm1262_vm5, %v9725_v14, -inf }
 0x863   : > { %v7089_v63 = vpop.eup %7088  ;;  %v9730_v54 = vpop.xlane.xlu0 %3619 }
 0x864   : > { %v4286_v33 = vpop.permute.xlu2 %4285  ;;  %6498 = vmatmul.msk.bf16.gmra.mxu0 %vm1262_vm5, %v3969_v46  ;;  %v7091_v48 = vpop.eup %7090  ;;  %v3894_v12 = vmul.f32 %v7089_v63, %v9629_v19  ;;  %v4381_v46 = vunpack.c.l.b16 %v4341_v13 }
 0x865   : > { %v4344_v2 = vrot.slane %v4286_v33, 4  ;;  %v3893_v56 = vmul.f32 %v7091_v48, %v9615_v20  ;;  %v9733_v1 = vpop.eup %7092  ;;  %v3676_v48 = vsub.f32 %v9619_v26, %v3608_v59  ;;  %v3457_v26 = vpop.f32.mrf.mxu2 }
 0x866   : > { %v3926_v52 = vpack.c.bf16 %v3894_v12, %v3894_v12  ;;  %v4388_v33 = vpack.c.b16 %v4382_v35, %v4381_v46  ;;  %v3792_v57 = vsel %vm1262_vm5, %v9733_v1, 0.0 }
 0x867   : > { %v4384_v40 = vunpack.c.l.b16 %v4344_v2  ;;  %v3925_v11 = vpack.c.bf16 %v3893_v56, %v3893_v56  ;;  %v9752_v56 = vsel %vm8127_vm2, %v3457_v26, -inf }
 0x868   : > { %v3966_v63 = vunpack.c.l.b16 %v3926_v52  ;;  %v4407_v12 = vsel %vm929_vm0, %v4388_v33, 0 }
 0x869   : > { %v4389_v61 = vpack.c.b16 %v4384_v40, %v4383_v62  ;;  %v3965_v20 = vunpack.c.l.b16 %v3925_v11  ;;  %v3721_v62 = vmul.f32 1.442695, %v3676_v48  ;;  %v9744_v40 = vsel %vm8213_vm8, %v3454_v18, -inf }
 0x86b   : > { %3622 = vmax.xlane.f32.xlu2 %v3621_v21  ;;  %v4410_v19 = vsel %vm929_vm0, %v4389_v61, 0  ;;  %v3970_v34 = vpack.c.b16 %v3966_v63, %v3965_v20  ;;  %v3785_v2 = vpop.xlane.xlu0 %3784  ;;  %7094 = vpow2.f32 %v3721_v62  ;;  %v3611_v61 = vpop.xlane.xlu1 %3610  ;;  %v3633_v21 = vsel %vm1262_vm5, %v9752_v56, -inf }
 0x86c   : > { %4420 = vmatpush.bf16.xpose.msra.mxu0 %v4410_v19 }
 0x871   : > { %v9748_v16 = vpop.eup %7094 }
 0x872   : > { %4373 = vrot.lane.b32.xlu0 %v11326_v53, %s7374_s5  ;;  %v3630_v53 = vsel %vm1262_vm5, %v9744_v40, -inf  ;;  %v3798_v13 = vsel %vm1262_vm5, %v9748_v16, 0.0 }
 0x873   : > { %3793 = vadd.xlane.f32.xlu2 %v3792_v57  ;;  %v3788_v59 = vpop.xlane.xlu0 %3787 }
 0x874   : > { %6499 = vmatmul.msk.bf16.gmra.mxu0 %vm1262_vm5, %v3970_v34  ;;  %7096 = vrcp.f32 %v3788_v59  ;;  %v9760_v34 = vpop.f32.mrf.mxu3 }
 0x875   : > { %4421 = vmatpush.bf16.xpose.msra.mxu0 %v4407_v12  ;;  %7098 = vrcp.f32 %v3785_v2  ;;  %11406 = vst [vmem:[#allocation96_spill] sm:$0xff] %v9760_v34  ;;  %v3459_v12 = vpop.f32.mrf.mxu2 }
 0x878   : > { %v4276_v19 = vpop.permute.xlu1 %4275 }
 0x87a   : > { %v7097_v35 = vpop.eup %7096 }
 0x87b   : > { %3631 = vmax.xlane.f32.xlu2 %v3630_v53  ;;  %v7099_v11 = vpop.eup %7098  ;;  %v3896_v46 = vmul.f32 %v7097_v35, %v9653_v10  ;;  %v9764_v53 = vsel %vm8154_vm4, %v3459_v12, -inf  ;;  %v4339_v35 = vrot.slane %v4276_v19, 4  ;;  %v11411_v19 = vld [vmem:[#allocation10_spill] sm:$0xff] }
 0x87c   : > { %v3895_v63 = vmul.f32 %v7099_v11, %v9649_v31  ;;  %v11407_v31 = vld [vmem:[#allocation22_spill] sm:$0xff]  ;;  %v3636_v26 = vsel %vm1262_vm5, %v9764_v53, -inf  ;;  %v9771_v59 = vpop.f32.mrf.mxu3 }
 0x87d   : > { %v3928_v33 = vpack.c.bf16 %v3896_v46, %v3896_v46  ;;  %11408 = vst [vmem:[#allocation22_spill] sm:$0xff] %v9771_v59 }
 0x87e   : > { %v3927_v48 = vpack.c.bf16 %v3895_v63, %v3895_v63 }
 0x87f   : > { %v4033_v18 = vunpack.c.l.b16 %v3928_v33  ;;  %v4379_v33 = vunpack.c.l.b16 %v4339_v35 }
 0x880   : > { %v4047_v57 = vpop.permute.xlu1 %4046  ;;  %v4032_v2 = vunpack.c.l.b16 %v3927_v48 }
 0x882   : > { %v4040_v10 = vpack.c.b16 %v4033_v18, %v4032_v2  ;;  %v3677_v2 = vsub.f32 %v9638_v41, %v3611_v61  ;;  %v3679_v41 = vsub.f32 %v9627_v0, %v9716_v49  ;;  %v11417_v49 = vld [vmem:[#allocation20_spill] sm:$0xff] }
 0x883   : > { %3799 = vadd.xlane.f32.xlu2 %v3798_v13  ;;  %3634 = vmax.xlane.f32.xlu1 %v3633_v21 }
 0x884   : > { %v9774_v11 = vpop.f32.mrf.mxu3 }
 0x885   : > { %11409 = vst [vmem:[#allocation97_spill] sm:$0xff] %v9774_v11 }
 0x886   : > { %v4051_v52 = vpop.permute.xlu0 %4050 }
 0x887   : > { %4072 = vmatpush.bf16.msra.mxu1 %v4051_v52 }
 0x88e   : > { %v4049_v20 = vpop.permute.xlu0 %4048 }
 0x88f   : > { %4073 = vmatpush.bf16.msra.mxu1 %v4049_v20 }
 0x893   : > { %4074 = vmatpush.bf16.msra.mxu1 %v4047_v57 }
 0x896   : > { %v4045_v62 = vpop.permute.xlu0 %4044 }
 0x897   : > { %4075 = vmatpush.bf16.msra.mxu1 %v4045_v62  ;;  %v3723_v62 = vmul.f32 1.442695, %v3677_v2 }
 0x89a   : > { %6500 = vmatmul.msk.bf16.vlgmr.msra.gmra.mxu1 %vm1262_vm5, %v4040_v10 }
 0x89b   : > { %4303 = vrot.lane.b32.xlu2 %v11407_v31, %s7374_s5 }
 0x89c   : > { %3637 = vmax.xlane.f32.xlu0 %v3636_v26 }
 0x89d   : > { %v3614_v21 = vpop.xlane.xlu2 %3613 }
 0x89e   : > { %v3678_v13 = vsub.f32 %v9676_v32, %v3614_v21  ;;  %v9781_v32 = vpop.f32.mrf.mxu3 }
 0x89f   : > { %11410 = vst [vmem:[#allocation98_spill] sm:$0xff] %v9781_v32 }
 0x8a0   : > { %v3725_v52 = vmul.f32 1.442695, %v3678_v13  ;;  %v11414_v13 = vld [vmem:[#allocation18_spill] sm:$0xff] }
 0x8a2   : > { %7100 = vpow2.f32 %v3725_v52 }
 0x8a3   : > { %7102 = vpow2.f32 %v3723_v62 }
 0x8a5   : > { %v4278_v46 = vpop.permute.xlu2 %4277 }
 0x8a6   : > { %v4340_v63 = vrot.slane %v4278_v46, 4  ;;  %v9786_v10 = vpop.f32.mrf.mxu3 }
 0x8a7   : > { %11412 = vst [vmem:[#allocation10_spill] sm:$0xff] %v9786_v10  ;;  %v11421_v10 = vld [vmem:[#allocation64_spill] sm:$0xff] }
 0x8a8   : > { %v9776_v20 = vpop.eup %7100  ;;  %v4380_v48 = vunpack.c.l.b16 %v4340_v63  ;;  %v3727_v63 = vmul.f32 1.442695, %v3679_v41 }
 0x8a9   : > { %v3804_v57 = vsel %vm1262_vm5, %v9776_v20, 0.0  ;;  %v9790_v26 = vpop.eup %7102 }
 0x8aa   : > { %3805 = vadd.xlane.f32.xlu1 %v3804_v57  ;;  %v4387_v18 = vpack.c.b16 %v4380_v48, %v4379_v33  ;;  %v3801_v35 = vsel %vm1262_vm5, %v9790_v26, 0.0  ;;  %7104 = vpow2.f32 %v3727_v63 }
 0x8ab   : > { %v9788_v31 = vpop.xlane.xlu1 %3625 }
 0x8ac   : > { %v4404_v12 = vsel %vm929_vm0, %v4387_v18, 0 }
 0x8ad   : > { %4422 = vmatpush.bf16.xpose.msra.mxu0 %v4404_v12 }
 0x8ae   : > { %v9792_v21 = vpop.f32.mrf.mxu3 }
 0x8af   : > { %11413 = vst [vmem:[#allocation99_spill] sm:$0xff] %v9792_v21 }
 0x8b0   : > { %4375 = vrot.lane.b32.xlu0 %v11411_v19, %s7374_s5  ;;  %v9807_v57 = vpop.eup %7104  ;;  %v3680_v19 = vsub.f32 %v9644_v55, %v9730_v54 }
 0x8b1   : > { %v3807_v18 = vsel %vm1262_vm5, %v9807_v57, 0.0 }
 0x8b6   : > { %v9801_v46 = vpop.f32.mrf.mxu3 }
 0x8b7   : > { %11415 = vst [vmem:[#allocation18_spill] sm:$0xff] %v9801_v46 }
 0x8be   : > { %v9805_v48 = vpop.f32.mrf.mxu3 }
 0x8bf   : > { %11416 = vst [vmem:[#allocation100_spill] sm:$0xff] %v9805_v48  ;;  %v11420_v48 = vld [vmem:[#allocation16_spill] sm:$0xff] }
 0x8c1   : > { %v3791_v61 = vpop.xlane.xlu0 %3790 }
 0x8c2   : > { %7106 = vrcp.f32 %v3791_v61 }
 0x8c3   : > { %4299 = vrot.lane.b32.xlu1 %v11414_v13, %s7374_s5  ;;  %v4372_v52 = vpop.permute.xlu1 %4371  ;;  %v3729_v13 = vmul.f32 1.442695, %v3680_v19 }
 0x8c4   : > { %3802 = vadd.xlane.f32.xlu2 %v3801_v35  ;;  %6512 = vmatmul.msk.bf16.vlgmr.msra.gmra.mxu0 %vm929_vm0, %v4372_v52  ;;  %v11418_v35 = vld [vmem:[#allocation60_spill] sm:$0xff] }
 0x8c5   : > { %7108 = vpow2.f32 %v3729_v13 }
 0x8c6   : > { %v3515_v12 = vpop.f32.mrf.mxu3 }
 0x8c7   : > { %v9817_v2 = vsel %vm8148_vm3, %v3515_v12, -inf  ;;  %v11419_v12 = vld [vmem:[#allocation62_spill] sm:$0xff] }
 0x8c8   : > { %v3639_v52 = vsel %vm1262_vm5, %v9817_v2, -inf  ;;  %v7107_v41 = vpop.eup %7106 }
 0x8c9   : > { %v9803_v33 = vpop.xlane.xlu0 %3628 }
 0x8cb   : > { %v9824_v63 = vpop.eup %7108 }
 0x8cc   : > { %v3810_v61 = vsel %vm1262_vm5, %v9824_v63, 0.0 }
 0x8d1   : > { %v3797_v0 = vpop.xlane.xlu0 %3796 }
 0x8da   : > { %3808 = vadd.xlane.f32.xlu0 %v3807_v18  ;;  %v3897_v18 = vmul.f32 %v7107_v41, %v9693_v3 }
 0x8dc   : > { %4301 = vrot.lane.b32.xlu2 %v11417_v49, %s7374_s5  ;;  %v3929_v49 = vpack.c.bf16 %v3897_v18, %v3897_v18  ;;  %v4306_v18 = vpop.permute.xlu1 %4305 }
 0x8de   : > { %v3623_v62 = vpop.xlane.xlu2 %3622  ;;  %v4034_v46 = vunpack.c.l.b16 %v3929_v49 }
 0x8e2   : > { %3640 = vmax.xlane.f32.xlu0 %v3639_v52 }
 0x8e4   : > { %4123 = vrot.lane.b32.xlu2 %v11418_v35, %s7373_s8  ;;  %v4374_v55 = vpop.permute.xlu0 %4373 }
 0x8e5   : > { %6513 = vmatmul.msk.bf16.gmra.mxu0 %vm929_vm0, %v4374_v55 }
 0x8e6   : > { %v3794_v54 = vpop.xlane.xlu2 %3793 }
 0x8e7   : > { %7110 = vrcp.f32 %v3794_v54 }
 0x8e8   : > { %7112 = vrcp.f32 %v3797_v0 }
 0x8ec   : > { %4121 = vrot.lane.b32.xlu2 %v11419_v12, %s7373_s8 }
 0x8ed   : > { %v7111_v19 = vpop.eup %7110  ;;  %3811 = vadd.xlane.f32.xlu1 %v3810_v61  ;;  %v11422_v61 = vld [vmem:[#allocation17_spill] sm:$0xff] }
 0x8ee   : > { %v3898_v13 = vmul.f32 %v7111_v19, %v9733_v1  ;;  %v3632_v52 = vpop.xlane.xlu2 %3631  ;;  %v7113_v21 = vpop.eup %7112  ;;  %v4354_v19 = vrot.slane %v4306_v18, 4 }
 0x8ef   : > { %v3899_v1 = vmul.f32 %v7113_v21, %v9712_v58  ;;  %v11423_v58 = vld [vmem:[#allocation63_spill] sm:$0xff] }
 0x8f0   : > { %v3930_v55 = vpack.c.bf16 %v3898_v13, %v3898_v13 }
 0x8f1   : > { %v3931_v49 = vpack.c.bf16 %v3899_v1, %v3899_v1 }
 0x8f2   : > { %v4035_v54 = vunpack.c.l.b16 %v3930_v55 }
 0x8f4   : > { %4295 = vrot.lane.b32.xlu2 %v11420_v48, %s7374_s5  ;;  %v4041_v3 = vpack.c.b16 %v4035_v54, %v4034_v46  ;;  %v4459_v54 = vunpack.c.l.b16 %v4354_v19  ;;  %v3682_v19 = vsub.f32 %v9685_v9, %v9788_v31  ;;  %v3684_v9 = vsub.f32 %v9744_v40, %v3632_v52 }
 0x8f6   : > { %v3800_v41 = vpop.xlane.xlu2 %3799  ;;  %6501 = vmatmul.msk.bf16.gmra.mxu1 %vm1262_vm5, %v4041_v3  ;;  %4117 = vrot.lane.b32.xlu0 %v11421_v10, %s7373_s8 }
 0x8f7   : > { %7114 = vrcp.f32 %v3800_v41  ;;  %v4036_v41 = vunpack.c.l.b16 %v3931_v49 }
 0x8fc   : > { %4297 = vrot.lane.b32.xlu2 %v11422_v61, %s7374_s5  ;;  %v3683_v61 = vsub.f32 %v9703_v5, %v9803_v33  ;;  %v3733_v33 = vmul.f32 1.442695, %v3682_v19 }
 0x8fd   : > { %v7115_v0 = vpop.eup %7114 }
 0x8fe   : > { %v3900_v48 = vmul.f32 %v7115_v0, %v9748_v16  ;;  %v4304_v46 = vpop.permute.xlu2 %4303  ;;  %4291 = vrot.lane.b32.xlu0 %v11348_v4, %s7374_s5  ;;  %v3681_v4 = vsub.f32 %v9725_v14, %v3623_v62 }
 0x8ff   : > { %v4353_v13 = vrot.slane %v4304_v46, 4 }
 0x900   : > { %v3932_v55 = vpack.c.bf16 %v3900_v48, %v3900_v48  ;;  %v3731_v16 = vmul.f32 1.442695, %v3681_v4 }
 0x901   : > { %v4458_v3 = vunpack.c.l.b16 %v4353_v13 }
 0x902   : > { %v4037_v11 = vunpack.c.l.b16 %v3932_v55  ;;  %7116 = vpow2.f32 %v3731_v16  ;;  %v3737_v55 = vmul.f32 1.442695, %v3684_v9 }
 0x903   : > { %v4463_v32 = vpack.c.b16 %v4459_v54, %v4458_v3 }
 0x904   : > { %4119 = vrot.lane.b32.xlu2 %v11423_v58, %s7373_s8  ;;  %v4042_v21 = vpack.c.b16 %v4037_v11, %v4036_v41  ;;  %v3517_v11 = vpop.f32.mrf.mxu3 }
 0x905   : > { %v4486_v18 = vsel %vm929_vm0, %v4463_v32, 0  ;;  %v3735_v32 = vmul.f32 1.442695, %v3683_v61  ;;  %v9867_v5 = vsel %vm8179_vm7, %v3517_v11, -inf }
 0x906   : > { %4377 = vrot.lane.b32.xlu1 %v11346_v36, %s7374_s5  ;;  %6502 = vmatmul.msk.bf16.gmra.mxu1 %vm1262_vm5, %v4042_v21  ;;  %v3642_v48 = vsel %vm1262_vm5, %v9867_v5, -inf }
 0x907   : > { %4492 = vmatpush.bf16.xpose.msrb.mxu1 %v4486_v18  ;;  %7118 = vpow2.f32 %v3735_v32 }
 0x908   : > { %v9857_v36 = vpop.eup %7116  ;;  %7120 = vpow2.f32 %v3733_v33 }
 0x909   : > { %v3813_v14 = vsel %vm1262_vm5, %v9857_v36, 0.0 }
 0x90c   : > { %v3520_v49 = vpop.f32.mrf.mxu3 }
 0x90d   : > { %v9869_v62 = vpop.eup %7118  ;;  %v9878_v13 = vsel %vm8242_vm9, %v3520_v49, -inf }
 0x90e   : > { %4293 = vrot.lane.b32.xlu1 %v11347_v60, %s7374_s5  ;;  %v9861_v60 = vpop.xlane.xlu1 %3634  ;;  %v3819_v46 = vsel %vm1262_vm5, %v9869_v62, 0.0  ;;  %v9880_v54 = vpop.eup %7120  ;;  %v3645_v3 = vsel %vm1262_vm5, %v9878_v13, -inf }
 0x90f   : > { %v9852_v1 = vpop.xlane.xlu0 %3637  ;;  %v3816_v52 = vsel %vm1262_vm5, %v9880_v54, 0.0 }
 0x914   : > { %v3522_v41 = vpop.f32.mrf.mxu3 }
 0x915   : > { %v9888_v18 = vsel %vm8092_vm1, %v3522_v41, -inf }
 0x916   : > { %v3648_v11 = vsel %vm1262_vm5, %v9888_v18, -inf }
 0x91d   : > { %v3806_v31 = vpop.xlane.xlu1 %3805 }
 0x91e   : > { %7122 = vrcp.f32 %v3806_v31 }
 0x91f   : > { %7124 = vpow2.f32 %v3737_v55 }
 0x922   : > { %v4376_v0 = vpop.permute.xlu0 %4375 }
 0x923   : > { %6514 = vmatmul.msk.bf16.gmra.mxu0 %vm929_vm0, %v4376_v0 }
 0x924   : > { %v7123_v21 = vpop.eup %7122 }
 0x925   : > { %v3902_v4 = vmul.f32 %v7123_v21, %v9776_v20  ;;  %v9891_v61 = vpop.eup %7124  ;;  %v3525_v20 = vpop.f32.mrf.mxu3 }
 0x926   : > { %v3822_v49 = vsel %vm1262_vm5, %v9891_v61, 0.0 }
 0x927   : > { %v3934_v19 = vpack.c.bf16 %v3902_v4, %v3902_v4 }
 0x928   : > { %3814 = vadd.xlane.f32.xlu0 %v3813_v14 }
 0x92d   : > { %3643 = vmax.xlane.f32.xlu2 %v3642_v48 }
 0x930   : > { %3820 = vadd.xlane.f32.xlu0 %v3819_v46 }
 0x935   : > { %3646 = vmax.xlane.f32.xlu2 %v3645_v3  ;;  %v4300_v16 = vpop.permute.xlu1 %4299  ;;  %v4039_v3 = vunpack.c.l.b16 %v3934_v19 }
 0x936   : > { %v4351_v0 = vrot.slane %v4300_v16, 4 }
 0x937   : > { %v3803_v40 = vpop.xlane.xlu2 %3802 }
 0x938   : > { %7126 = vrcp.f32 %v3803_v40  ;;  %3817 = vadd.xlane.f32.xlu1 %v3816_v52  ;;  %v4456_v31 = vunpack.c.l.b16 %v4351_v0  ;;  %v9902_v40 = vsel %vm8168_vm6, %v3525_v20, -inf }
 0x939   : > { %v3651_v4 = vsel %vm1262_vm5, %v9902_v40, -inf }
 0x93d   : > { %3649 = vmax.xlane.f32.xlu2 %v3648_v11 }
 0x93e   : > { %v7127_v32 = vpop.eup %7126 }
 0x93f   : > { %v3901_v14 = vmul.f32 %v7127_v32, %v9790_v26  ;;  %v4302_v33 = vpop.permute.xlu2 %4301  ;;  %v3685_v32 = vsub.f32 %v9752_v56, %v9861_v60 }
 0x940   : > { %v4352_v48 = vrot.slane %v4302_v33, 4  ;;  %3823 = vadd.xlane.f32.xlu1 %v3822_v49 }
 0x941   : > { %v3933_v9 = vpack.c.bf16 %v3901_v14, %v3901_v14  ;;  %v3739_v14 = vmul.f32 1.442695, %v3685_v32 }
 0x942   : > { %v4457_v46 = vunpack.c.l.b16 %v4352_v48 }
 0x943   : > { %v4038_v55 = vunpack.c.l.b16 %v3933_v9  ;;  %v9914_v9 = vpop.f32.mrf.mxu1 }
 0x944   : > { %4319 = vrot.lane.b32.xlu0 %v11350_v28, %s7374_s5  ;;  %v4462_v41 = vpack.c.b16 %v4457_v46, %v4456_v31  ;;  %11424 = vst [vmem:[#allocation20_spill] sm:$0xff] %v9914_v9  ;;  %v11425_v31 = vld [vmem:[#allocation19_spill] sm:$0xff] }
 0x945   : > { %v4043_v26 = vpack.c.b16 %v4039_v3, %v4038_v55 }
 0x946   : > { %v4483_v52 = vsel %vm929_vm0, %v4462_v41, 0 }
 0x947   : > { %v4124_v21 = vpop.permute.xlu2 %4123  ;;  %6503 = vmatmul.msk.bf16.gmra.mxu1 %vm1262_vm5, %v4043_v26 }
 0x948   : > { %4493 = vmatpush.bf16.xpose.msrb.mxu1 %v4483_v52  ;;  %4145 = vmatpush.bf16.msra.mxu2 %v4124_v21 }
 0x949   : > { %3652 = vmax.xlane.f32.xlu1 %v3651_v4 }
 0x94b   : > { %v9925_v4 = vpop.f32.mrf.mxu1 }
 0x94c   : > { %11426 = vst [vmem:[#allocation60_spill] sm:$0xff] %v9925_v4 }
 0x94d   : > { %v3809_v11 = vpop.xlane.xlu0 %3808 }
 0x94e   : > { %7128 = vrcp.f32 %v3809_v11 }
 0x94f   : > { %v4122_v16 = vpop.permute.xlu2 %4121 }
 0x950   : > { %4146 = vmatpush.bf16.msra.mxu2 %v4122_v16 }
 0x954   : > { %v7129_v48 = vpop.eup %7128 }
 0x955   : > { %4444 = vrot.lane.b32.xlu2 %v11349_v17, %s7374_s5  ;;  %v9918_v46 = vpop.xlane.xlu0 %3640  ;;  %v3903_v56 = vmul.f32 %v7129_v48, %v9807_v57 }
 0x957   : > { %v4296_v28 = vpop.permute.xlu2 %4295  ;;  %v3935_v41 = vpack.c.bf16 %v3903_v56, %v3903_v56  ;;  %v3527_v56 = vpop.f32.mrf.mxu3 }
 0x958   : > { %v4349_v0 = vrot.slane %v4296_v28, 4 }
 0x959   : > { %v4105_v28 = vunpack.c.l.b16 %v3935_v41  ;;  %v9941_v41 = vsel %vm8213_vm8, %v3527_v56, -inf }
 0x95a   : > { %v4454_v20 = vunpack.c.l.b16 %v4349_v0 }
 0x95d   : > { %4321 = vrot.lane.b32.xlu2 %v11351_v15, %s7374_s5 }
 0x95f   : > { %v4298_v19 = vpop.permute.xlu2 %4297 }
 0x960   : > { %v4350_v33 = vrot.slane %v4298_v19, 4  ;;  %v3812_v49 = vpop.xlane.xlu1 %3811 }
 0x961   : > { %7130 = vrcp.f32 %v3812_v49 }
 0x962   : > { %v4455_v17 = vunpack.c.l.b16 %v4350_v33  ;;  %4446 = vrot.lane.b32.xlu1 %v11425_v31, %s7374_s5  ;;  %7132 = vpow2.f32 %v3739_v14 }
 0x964   : > { %v4461_v15 = vpack.c.b16 %v4455_v17, %v4454_v20 }
 0x966   : > { %v4480_v60 = vsel %vm929_vm0, %v4461_v15, 0 }
 0x967   : > { %v7131_v55 = vpop.eup %7130  ;;  %v4120_v3 = vpop.permute.xlu2 %4119  ;;  %4494 = vmatpush.bf16.xpose.msrb.mxu1 %v4480_v60 }
 0x968   : > { %v3904_v26 = vmul.f32 %v7131_v55, %v9824_v63  ;;  %4147 = vmatpush.bf16.msra.mxu2 %v4120_v3  ;;  %v9923_v52 = vpop.eup %7132  ;;  %v4118_v16 = vpop.permute.xlu0 %4117  ;;  %v3686_v63 = vsub.f32 %v9764_v53, %v9852_v1  ;;  %v11427_v53 = vld [vmem:[#allocation36_spill] sm:$0xff] }
 0x969   : > { %v3825_v57 = vsel %vm1262_vm5, %v9923_v52, 0.0 }
 0x96a   : > { %v3936_v21 = vpack.c.bf16 %v3904_v26, %v3904_v26  ;;  %v3741_v20 = vmul.f32 1.442695, %v3686_v63 }
 0x96c   : > { %v4106_v11 = vunpack.c.l.b16 %v3936_v21  ;;  %4148 = vmatpush.bf16.msra.mxu2 %v4118_v16  ;;  %7134 = vpow2.f32 %v3741_v20  ;;  %v3654_v16 = vsel %vm1262_vm5, %v9941_v41, -inf  ;;  %v11430_v20 = vld [vmem:[#allocation35_spill] sm:$0xff] }
 0x96e   : > { %v4113_v32 = vpack.c.b16 %v4106_v11, %v4105_v28  ;;  %3826 = vadd.xlane.f32.xlu0 %v3825_v57 }
 0x970   : > { %6504 = vmatmul.msk.bf16.vlgmr.msra.gmra.mxu2 %vm1262_vm5, %v4113_v32  ;;  %v4292_v49 = vpop.permute.xlu0 %4291 }
 0x971   : > { %v4347_v15 = vrot.slane %v4292_v49, 4 }
 0x972   : > { %v9948_v57 = vpop.eup %7134 }
 0x973   : > { %v4082_v0 = vpop.f32.mrf.mxu1  ;;  %v4452_v1 = vunpack.c.l.b16 %v4347_v15 }
 0x974   : > { %v4253_v14 = vpack.c.bf16 %v4082_v0, %v4082_v0 }
 0x976   : > { %v9933_v17 = vunpack.c.l.b16 %v4253_v14 }
 0x978   : > { %v4378_v19 = vpop.permute.xlu1 %4377 }
 0x979   : > { %6515 = vmatmul.msk.bf16.gmra.mxu0 %vm929_vm0, %v4378_v19  ;;  %v3828_v19 = vsel %vm1262_vm5, %v9948_v57, 0.0 }
 0x97b   : > { %v4084_v33 = vpop.f32.mrf.mxu1 }
 0x97c   : > { %v4254_v48 = vpack.c.bf16 %v4084_v33, %v4084_v33 }
 0x97e   : > { %v9935_v31 = vunpack.c.l.b16 %v4254_v48  ;;  %v3530_v48 = vpop.f32.mrf.mxu3 }
 0x980   : > { %v4294_v55 = vpop.permute.xlu1 %4293 }
 0x981   : > { %v4348_v3 = vrot.slane %v4294_v55, 4 }
 0x982   : > { %4317 = vrot.lane.b32.xlu0 %v11427_v53, %s7374_s5  ;;  %v11432_v53 = vld [vmem:[#allocation32_spill] sm:$0xff] }
 0x983   : > { %v4453_v26 = vunpack.c.l.b16 %v4348_v3  ;;  %v4087_v21 = vpop.f32.mrf.mxu1  ;;  %v11431_v3 = vld [vmem:[#allocation33_spill] sm:$0xff] }
 0x984   : > { %v4255_v32 = vpack.c.bf16 %v4087_v21, %v4087_v21 }
 0x985   : > { %v4460_v28 = vpack.c.b16 %v4453_v26, %v4452_v1 }
 0x986   : > { %3655 = vmax.xlane.f32.xlu2 %v3654_v16  ;;  %v9952_v14 = vunpack.c.l.b16 %v4255_v32  ;;  %v3532_v55 = vpop.f32.mrf.mxu3 }
 0x987   : > { %v4477_v11 = vsel %vm929_vm0, %v4460_v28, 0  ;;  %v9966_v1 = vsel %vm8154_vm4, %v3532_v55, -inf }
 0x988   : > { %4495 = vmatpush.bf16.xpose.msrb.mxu1 %v4477_v11  ;;  %11428 = vst [vmem:[#allocation62_spill] sm:$0xff] %v9952_v14  ;;  %v3660_v16 = vsel %vm1262_vm5, %v9966_v1, -inf }
 0x98b   : > { %v4089_v0 = vpop.f32.mrf.mxu1 }
 0x98c   : > { %v4256_v63 = vpack.c.bf16 %v4089_v0, %v4089_v0  ;;  %3829 = vadd.xlane.f32.xlu1 %v3828_v19 }
 0x98e   : > { %v9954_v33 = vunpack.c.l.b16 %v4256_v63 }
 0x990   : > { %11429 = vst [vmem:[#allocation16_spill] sm:$0xff] %v9954_v33 }
 0x99b   : > { %v3815_v15 = vpop.xlane.xlu0 %3814 }
 0x99c   : > { %7136 = vrcp.f32 %v3815_v15 }
 0x99e   : > { %4315 = vrot.lane.b32.xlu2 %v11430_v20, %s7374_s5 }
 0x9a0   : > { %v3644_v56 = vpop.xlane.xlu2 %3643 }
 0x9a2   : > { %v7137_v28 = vpop.eup %7136 }
 0x9a3   : > { %v3905_v11 = vmul.f32 %v7137_v28, %v9857_v36  ;;  %v3821_v63 = vpop.xlane.xlu0 %3820 }
 0x9a5   : > { %4313 = vrot.lane.b32.xlu1 %v11431_v3, %s7374_s5  ;;  %v3937_v19 = vpack.c.bf16 %v3905_v11, %v3905_v11 }
 0x9a6   : > { %4311 = vrot.lane.b32.xlu2 %v11432_v53, %s7374_s5 }
 0x9a7   : > { %v4107_v3 = vunpack.c.l.b16 %v3937_v19 }
 0x9a8   : > { %v9968_v26 = vpop.xlane.xlu2 %3646 }
 0x9ab   : > { %v3818_v21 = vpop.xlane.xlu1 %3817 }
 0x9ac   : > { %7138 = vrcp.f32 %v3818_v21  ;;  %3661 = vmax.xlane.f32.xlu0 %v3660_v16 }
 0x9ad   : > { %4448 = vrot.lane.b32.xlu1 %v11359_v39, %s7374_s5 }
 0x9b0   : > { %v3650_v32 = vpop.xlane.xlu2 %3649 }
 0x9b2   : > { %v7139_v0 = vpop.eup %7138 }
 0x9b3   : > { %v3906_v20 = vmul.f32 %v7139_v0, %v9880_v54  ;;  %v3824_v15 = vpop.xlane.xlu1 %3823 }
 0x9b4   : > { %7140 = vrcp.f32 %v3824_v15 }
 0x9b5   : > { %v3938_v55 = vpack.c.bf16 %v3906_v20, %v3906_v20  ;;  %7142 = vrcp.f32 %v3821_v63 }
 0x9b6   : > { %v4320_v36 = vpop.permute.xlu0 %4319 }
 0x9b7   : > { %v4108_v53 = vunpack.c.l.b16 %v3938_v55  ;;  %v4361_v54 = vrot.slane %v4320_v36, 4  ;;  %v3687_v55 = vsub.f32 %v9817_v2, %v9918_v46  ;;  %v11433_v46 = vld [vmem:[#allocation75_spill] sm:$0xff] }
 0x9b8   : > { %v4445_v49 = vpop.permute.xlu2 %4444 }
 0x9b9   : > { %6516 = vmatmul.msk.bf16.vlgmr.msrb.gmra.mxu1 %vm929_vm0, %v4445_v49  ;;  %v4114_v21 = vpack.c.b16 %v4108_v53, %v4107_v3  ;;  %v4531_v15 = vunpack.c.l.b16 %v4361_v54  ;;  %v3688_v3 = vsub.f32 %v9867_v5, %v3644_v56 }
 0x9ba   : > { %v7141_v16 = vpop.eup %7140 }
 0x9bb   : > { %6505 = vmatmul.msk.bf16.gmra.mxu2 %vm1262_vm5, %v4114_v21  ;;  %v7143_v39 = vpop.eup %7142  ;;  %v3908_v28 = vmul.f32 %v7141_v16, %v9891_v61  ;;  %v3743_v16 = vmul.f32 1.442695, %v3687_v55 }
 0x9bc   : > { %v3907_v11 = vmul.f32 %v7143_v39, %v9869_v62  ;;  %v3745_v39 = vmul.f32 1.442695, %v3688_v3  ;;  %v3653_v2 = vpop.xlane.xlu1 %3652 }
 0x9bd   : > { %v3940_v19 = vpack.c.bf16 %v3908_v28, %v3908_v28  ;;  %v9990_v28 = vsel %vm8127_vm2, %v3530_v48, -inf  ;;  %7144 = vpow2.f32 %v3743_v16 }
 0x9be   : > { %v3939_v20 = vpack.c.bf16 %v3907_v11, %v3907_v11  ;;  %7146 = vpow2.f32 %v3745_v39  ;;  %v3657_v5 = vsel %vm1262_vm5, %v9990_v28, -inf }
 0x9bf   : > { %v4110_v21 = vunpack.c.l.b16 %v3940_v19  ;;  %v3690_v19 = vsub.f32 %v9888_v18, %v3650_v32 }
 0x9c0   : > { %v4322_v0 = vpop.permute.xlu2 %4321  ;;  %4196 = vrot.lane.b32.xlu0 %v11357_v24, %s7373_s8  ;;  %v4109_v62 = vunpack.c.l.b16 %v3939_v20 }
 0x9c1   : > { %v4362_v63 = vrot.slane %v4322_v0, 4  ;;  %v11434_v0 = vld [vmem:[#allocation24_spill] sm:$0xff]  ;;  %v3749_v20 = vmul.f32 1.442695, %v3690_v19 }
 0x9c2   : > { %v4115_v36 = vpack.c.b16 %v4110_v21, %v4109_v62 }
 0x9c3   : > { %v4532_v49 = vunpack.c.l.b16 %v4362_v63  ;;  %v9997_v56 = vpop.eup %7144  ;;  %v11435_v63 = vld [vmem:[#allocation76_spill] sm:$0xff]  ;;  %7148 = vpow2.f32 %v3749_v20 }
 0x9c4   : > { %v3831_v48 = vsel %vm1262_vm5, %v9997_v56, 0.0 }
 0x9c5   : > { %v4536_v53 = vpack.c.b16 %v4532_v49, %v4531_v15  ;;  %v11436_v49 = vld [vmem:[#allocation30_spill] sm:$0xff] }
 0x9c7   : > { %v4559_v61 = vsel %vm929_vm0, %v4536_v53, 0 }
 0x9c8   : > { %4565 = vmatpush.bf16.xpose.msrb.mxu2 %v4559_v61  ;;  %4309 = vrot.lane.b32.xlu0 %v11361_v51, %s7374_s5  ;;  %v9999_v51 = vpop.eup %7146 }
 0x9c9   : > { %v3834_v54 = vsel %vm1262_vm5, %v9999_v51, 0.0  ;;  %v10017_v53 = vpop.eup %7148 }
 0x9ca   : > { %v3840_v62 = vsel %vm1262_vm5, %v10017_v53, 0.0 }
 0x9cb   : > { %6506 = vmatmul.msk.bf16.gmra.mxu2 %vm1262_vm5, %v4115_v36 }
 0x9cf   : > { %3658 = vmax.xlane.f32.xlu2 %v3657_v5 }
 0x9d0   : > { %4194 = vrot.lane.b32.xlu0 %v11433_v46, %s7373_s8 }
 0x9d4   : > { %v4447_v11 = vpop.permute.xlu1 %4446 }
 0x9d5   : > { %6517 = vmatmul.msk.bf16.gmra.mxu1 %vm929_vm0, %v4447_v11 }
 0x9d7   : > { %3832 = vadd.xlane.f32.xlu1 %v3831_v48  ;;  %3835 = vadd.xlane.f32.xlu2 %v3834_v54 }
 0x9d8   : > { %4190 = vrot.lane.b32.xlu0 %v11363_v30, %s7373_s8 }
 0x9e1   : > { %v3827_v15 = vpop.xlane.xlu0 %3826 }
 0x9e2   : > { %7150 = vrcp.f32 %v3827_v15 }
 0x9e8   : > { %v7151_v61 = vpop.eup %7150 }
 0x9ef   : > { %4307 = vrot.lane.b32.xlu2 %v11434_v0, %s7374_s5 }
 0x9f0   : > { %4192 = vrot.lane.b32.xlu1 %v11435_v63, %s7373_s8 }
 0x9f4   : > { %v4318_v3 = vpop.permute.xlu0 %4317 }
 0x9f5   : > { %v4360_v18 = vrot.slane %v4318_v3, 4  ;;  %v3689_v3 = vsub.f32 %v9878_v13, %v9968_v26 }
 0x9f7   : > { %4450 = vrot.lane.b32.xlu2 %v11365_v47, %s7374_s5  ;;  %v3909_v47 = vmul.f32 %v7151_v61, %v9923_v52  ;;  %v4530_v39 = vunpack.c.l.b16 %v4360_v18  ;;  %v3691_v52 = vsub.f32 %v9902_v40, %v3653_v2 }
 0x9f8   : > { %4517 = vrot.lane.b32.xlu1 %v11436_v49, %s7374_s5 }
 0x9f9   : > { %v3656_v55 = vpop.xlane.xlu2 %3655  ;;  %v3941_v48 = vpack.c.bf16 %v3909_v47, %v3909_v47  ;;  %v3751_v18 = vmul.f32 1.442695, %v3691_v52 }
 0x9fb   : > { %v4111_v20 = vunpack.c.l.b16 %v3941_v48 }
 0x9ff   : > { %v3830_v21 = vpop.xlane.xlu1 %3829 }
 0xa00   : > { %7152 = vrcp.f32 %v3830_v21  ;;  %v3747_v21 = vmul.f32 1.442695, %v3689_v3 }
 0xa01   : > { %v4316_v32 = vpop.permute.xlu2 %4315 }
 0xa02   : > { %v4359_v16 = vrot.slane %v4316_v32, 4  ;;  %3841 = vadd.xlane.f32.xlu0 %v3840_v62  ;;  %7154 = vpow2.f32 %v3747_v21 }
 0xa03   : > { %7156 = vpow2.f32 %v3751_v18 }
 0xa04   : > { %v4529_v36 = vunpack.c.l.b16 %v4359_v16 }
 0xa06   : > { %v7153_v5 = vpop.eup %7152  ;;  %v4535_v11 = vpack.c.b16 %v4530_v39, %v4529_v36 }
 0xa07   : > { %v3910_v54 = vmul.f32 %v7153_v5, %v9948_v57  ;;  %v3692_v57 = vsub.f32 %v9941_v41, %v3656_v55 }
 0xa08   : > { %v4556_v0 = vsel %vm929_vm0, %v4535_v11, 0  ;;  %v10031_v26 = vpop.eup %7154  ;;  %v10043_v11 = vpop.f32.mrf.mxu0 }
 0xa09   : > { %v3942_v19 = vpack.c.bf16 %v3910_v54, %v3910_v54  ;;  %4566 = vmatpush.bf16.xpose.msrb.mxu2 %v4556_v0  ;;  %v4312_v61 = vpop.permute.xlu2 %4311  ;;  %v3753_v47 = vmul.f32 1.442695, %v3692_v57  ;;  %v10033_v40 = vpop.eup %7156  ;;  %v3837_v41 = vsel %vm1262_vm5, %v10031_v26, 0.0 }
 0xa0a   : > { %v4357_v32 = vrot.slane %v4312_v61, 4  ;;  %v10047_v0 = vpop.f32.mrf.mxu2 }
 0xa0b   : > { %v4112_v15 = vunpack.c.l.b16 %v3942_v19  ;;  %7158 = vpow2.f32 %v3753_v47  ;;  %11437 = vst [vmem:[#allocation64_spill] sm:$0xff] %v10047_v0 }
 0xa0c   : > { %v4527_v39 = vunpack.c.l.b16 %v4357_v32 }
 0xa0d   : > { %v4116_v49 = vpack.c.b16 %v4112_v15, %v4111_v20 }
 0xa0f   : > { %6507 = vmatmul.msk.bf16.gmra.mxu2 %vm1262_vm5, %v4116_v49 }
 0xa10   : > { %v10049_v19 = vpop.f32.mrf.mxu0 }
 0xa11   : > { %v10041_v55 = vpop.eup %7158 }
 0xa12   : > { %v3846_v48 = vsel %vm1262_vm5, %v10041_v55, 0.0  ;;  %v10051_v15 = vpop.f32.mrf.mxu2 }
 0xa13   : > { %11438 = vst [vmem:[#allocation17_spill] sm:$0xff] %v10051_v15 }
 0xa16   : > { %4519 = vrot.lane.b32.xlu0 %v11367_v44, %s7374_s5  ;;  %v3843_v44 = vsel %vm1262_vm5, %v10033_v40, 0.0 }
 0xa17   : > { %v4314_v62 = vpop.permute.xlu1 %4313 }
 0xa18   : > { %v4358_v16 = vrot.slane %v4314_v62, 4  ;;  %v10053_v49 = vpop.f32.mrf.mxu0 }
 0xa1a   : > { %v4528_v13 = vunpack.c.l.b16 %v4358_v16 }
 0xa1c   : > { %v4534_v36 = vpack.c.b16 %v4528_v13, %v4527_v39 }
 0xa1e   : > { %v4553_v2 = vsel %vm929_vm0, %v4534_v36, 0  ;;  %v11441_v36 = vld [vmem:[#allocation55_spill] sm:$0xff] }
 0xa1f   : > { %v4449_v5 = vpop.permute.xlu1 %4448  ;;  %4567 = vmatpush.bf16.xpose.msrb.mxu2 %v4553_v2  ;;  %v3662_v54 = vpop.xlane.xlu0 %3661 }
 0xa20   : > { %6518 = vmatmul.msk.bf16.gmra.mxu1 %vm929_vm0, %v4449_v5  ;;  %3838 = vadd.xlane.f32.xlu2 %v3837_v41  ;;  %v10059_v21 = vpop.f32.mrf.mxu0 }
 0xa22   : > { %3844 = vadd.xlane.f32.xlu1 %v3843_v44 }
 0xa28   : > { %3847 = vadd.xlane.f32.xlu2 %v3846_v48 }
 0xa32   : > { %v4197_v20 = vpop.permute.xlu0 %4196 }
 0xa33   : > { %4218 = vmatpush.bf16.msrb.mxu3 %v4197_v20 }
 0xa3a   : > { %v4310_v3 = vpop.permute.xlu0 %4309 }
 0xa3b   : > { %4337 = vrot.lane.b32.xlu1 %v11371_v42, %s7374_s5  ;;  %v4356_v44 = vrot.slane %v4310_v3, 4 }
 0xa3e   : > { %v4155_v52 = vpop.f32.mrf.mxu2 }
 0xa3f   : > { %v4261_v32 = vpack.c.bf16 %v4155_v52, %v4155_v52  ;;  %v11442_v52 = vld [vmem:[#allocation57_spill] sm:$0xff] }
 0xa40   : > { %4335 = vrot.lane.b32.xlu2 %v11369_v23, %s7374_s5 }
 0xa41   : > { %v10064_v42 = vunpack.c.l.b16 %v4261_v32 }
 0xa42   : > { %v3659_v61 = vpop.xlane.xlu2 %3658  ;;  %v4195_v18 = vpop.permute.xlu0 %4194 }
 0xa43   : > { %v3693_v57 = vsub.f32 %v9990_v28, %v3659_v61  ;;  %4521 = vrot.lane.b32.xlu1 %v11373_v6, %s7374_s5  ;;  %4219 = vmatpush.bf16.msrb.mxu3 %v4195_v18  ;;  %11439 = vst [vmem:[#allocation63_spill] sm:$0xff] %v10064_v42  ;;  %v10072_v28 = vpop.f32.mrf.mxu0  ;;  %v4526_v61 = vunpack.c.l.b16 %v4356_v44 }
 0xa45   : > { %v3755_v62 = vmul.f32 1.442695, %v3693_v57 }
 0xa46   : > { %v4157_v16 = vpop.f32.mrf.mxu2 }
 0xa47   : > { %7160 = vpow2.f32 %v3755_v62  ;;  %v4262_v47 = vpack.c.bf16 %v4157_v16, %v4157_v16  ;;  %v3694_v16 = vsub.f32 %v9966_v1, %v3662_v54 }
 0xa49   : > { %v10066_v39 = vunpack.c.l.b16 %v4262_v47  ;;  %v3757_v44 = vmul.f32 1.442695, %v3694_v16 }
 0xa4a   : > { %v3836_v23 = vpop.xlane.xlu2 %3835  ;;  %v3833_v41 = vpop.xlane.xlu1 %3832 }
 0xa4b   : > { %11440 = vst [vmem:[#allocation19_spill] sm:$0xff] %v10066_v39  ;;  %4331 = vrot.lane.b32.xlu1 %v11441_v36, %s7374_s5  ;;  %7162 = vrcp.f32 %v3833_v41  ;;  %v10080_v32 = vpop.f32.mrf.mxu0 }
 0xa4c   : > { %7164 = vrcp.f32 %v3836_v23 }
 0xa4d   : > { %v10074_v6 = vpop.eup %7160  ;;  %7166 = vpow2.f32 %v3757_v44  ;;  %v11448_v44 = vld [vmem:[#allocation45_spill] sm:$0xff] }
 0xa4e   : > { %v4160_v2 = vpop.f32.mrf.mxu2  ;;  %v3849_v5 = vsel %vm1262_vm5, %v10074_v6, 0.0 }
 0xa4f   : > { %3850 = vadd.xlane.f32.xlu0 %v3849_v5  ;;  %v4263_v18 = vpack.c.bf16 %v4160_v2, %v4160_v2 }
 0xa51   : > { %v7163_v13 = vpop.eup %7162  ;;  %v10083_v3 = vunpack.c.l.b16 %v4263_v18 }
 0xa52   : > { %v4308_v48 = vpop.permute.xlu2 %4307  ;;  %v7165_v5 = vpop.eup %7164  ;;  %v3911_v1 = vmul.f32 %v7163_v13, %v9997_v56 }
 0xa53   : > { %v4355_v20 = vrot.slane %v4308_v48, 4  ;;  %4333 = vrot.lane.b32.xlu1 %v11442_v52, %s7374_s5  ;;  %11443 = vst [vmem:[#allocation36_spill] sm:$0xff] %v10083_v3  ;;  %v3912_v54 = vmul.f32 %v7165_v5, %v9999_v51  ;;  %v10095_v52 = vpop.f32.mrf.mxu0  ;;  %v4191_v56 = vpop.permute.xlu0 %4190 }
 0xa55   : > { %v4525_v57 = vunpack.c.l.b16 %v4355_v20  ;;  %v11445_v20 = vld [vmem:[#allocation41_spill] sm:$0xff]  ;;  %v3944_v18 = vpack.c.bf16 %v3912_v54, %v3912_v54 }
 0xa56   : > { %v4162_v62 = vpop.f32.mrf.mxu2 }
 0xa57   : > { %v4264_v47 = vpack.c.bf16 %v4162_v62, %v4162_v62  ;;  %v4533_v36 = vpack.c.b16 %v4526_v61, %v4525_v57  ;;  %v3943_v61 = vpack.c.bf16 %v3911_v1, %v3911_v1  ;;  %v11446_v62 = vld [vmem:[#allocation42_spill] sm:$0xff] }
 0xa59   : > { %v10085_v41 = vunpack.c.l.b16 %v4264_v47  ;;  %v4550_v23 = vsel %vm929_vm0, %v4533_v36, 0  ;;  %v4178_v16 = vunpack.c.l.b16 %v3943_v61  ;;  %v4179_v47 = vunpack.c.l.b16 %v3944_v18  ;;  %v11447_v36 = vld [vmem:[#allocation50_spill] sm:$0xff]  ;;  %v11449_v61 = vld [vmem:[#allocation51_spill] sm:$0xff] }
 0xa5a   : > { %v4451_v48 = vpop.permute.xlu2 %4450  ;;  %4568 = vmatpush.bf16.xpose.msrb.mxu2 %v4550_v23  ;;  %v10101_v23 = vpop.eup %7166 }
 0xa5b   : > { %11444 = vst [vmem:[#allocation35_spill] sm:$0xff] %v10085_v41  ;;  %4523 = vrot.lane.b32.xlu1 %v11445_v20, %s7374_s5  ;;  %6519 = vmatmul.msk.bf16.gmra.mxu1 %vm929_vm0, %v4451_v48  ;;  %v4186_v51 = vpack.c.b16 %v4179_v47, %v4178_v16  ;;  %v3852_v13 = vsel %vm1262_vm5, %v10101_v23, 0.0  ;;  %v10105_v5 = vpop.f32.mrf.mxu0  ;;  %v11450_v16 = vld [vmem:[#allocation48_spill] sm:$0xff]  ;;  %v11451_v41 = vld [vmem:[#allocation54_spill] sm:$0xff] }
 0xa62   : > { %v4193_v57 = vpop.permute.xlu1 %4192 }
 0xa63   : > { %4323 = vrot.lane.b32.xlu1 %v11446_v62, %s7374_s5  ;;  %4220 = vmatpush.bf16.msrb.mxu3 %v4193_v57  ;;  %v4424_v20 = vpop.f32.mrf.mxu0 }
 0xa64   : > { %4327 = vrot.lane.b32.xlu0 %v11447_v36, %s7374_s5  ;;  %v10115_v62 = vsel %vm8148_vm3, %v4424_v20, -inf }
 0xa65   : > { %v4695_v47 = vsel %vm1262_vm5, %v10115_v62, -inf }
 0xa67   : > { %4221 = vmatpush.bf16.msrb.mxu3 %v4191_v56 }
 0xa69   : > { %3853 = vadd.xlane.f32.xlu2 %v3852_v13 }
 0xa6a   : > { %v4518_v48 = vpop.permute.xlu1 %4517  ;;  %6508 = vmatmul.msk.bf16.vlgmr.msrb.gmra.mxu3 %vm1262_vm5, %v4186_v51 }
 0xa6b   : > { %6520 = vmatmul.msk.bf16.vlgmr.msrb.gmra.mxu2 %vm929_vm0, %v4518_v48  ;;  %v4426_v1 = vpop.f32.mrf.mxu0 }
 0xa6c   : > { %4325 = vrot.lane.b32.xlu0 %v11448_v44, %s7374_s5  ;;  %v10128_v51 = vsel %vm8179_vm7, %v4426_v1, -inf }
 0xa6d   : > { %v4698_v20 = vsel %vm1262_vm5, %v10128_v51, -inf }
 0xa73   : > { %v4429_v18 = vpop.f32.mrf.mxu0 }
 0xa75   : > { %v3842_v54 = vpop.xlane.xlu0 %3841 }
 0xa76   : > { %7168 = vrcp.f32 %v3842_v54 }
 0xa7b   : > { %v4431_v36 = vpop.f32.mrf.mxu0 }
 0xa7c   : > { %v10124_v56 = vsel %vm8092_vm1, %v4431_v36, -inf  ;;  %v7169_v48 = vpop.eup %7168 }
 0xa7d   : > { %v4704_v44 = vsel %vm1262_vm5, %v10124_v56, -inf  ;;  %v3914_v54 = vmul.f32 %v7169_v48, %v10017_v53 }
 0xa81   : > { %4329 = vrot.lane.b32.xlu2 %v11449_v61, %s7374_s5 }
 0xa83   : > { %v4434_v61 = vpop.f32.mrf.mxu0 }
 0xa88   : > { %v4520_v57 = vpop.permute.xlu0 %4519 }
 0xa89   : > { %4590 = vrot.lane.b32.xlu2 %v11450_v16, %s7374_s5  ;;  %6521 = vmatmul.msk.bf16.gmra.mxu2 %vm929_vm0, %v4520_v57  ;;  %v10137_v57 = vsel %vm8168_vm6, %v4434_v61, -inf  ;;  %v3946_v16 = vpack.c.bf16 %v3914_v54, %v3914_v54 }
 0xa8d   : > { %4696 = vmax.xlane.f32.xlu1 %v4695_v47 }
 0xa93   : > { %v3839_v13 = vpop.xlane.xlu2 %3838 }
 0xa94   : > { %7170 = vrcp.f32 %v3839_v13 }
 0xa95   : > { %4705 = vmax.xlane.f32.xlu1 %v4704_v44  ;;  %v3845_v36 = vpop.xlane.xlu1 %3844  ;;  %v4707_v44 = vsel %vm1262_vm5, %v10137_v57, -inf }
 0xa96   : > { %4699 = vmax.xlane.f32.xlu0 %v4698_v20  ;;  %v4181_v20 = vunpack.c.l.b16 %v3946_v16 }
 0xa9a   : > { %v7171_v1 = vpop.eup %7170 }
 0xa9b   : > { %v3913_v47 = vmul.f32 %v7171_v1, %v10031_v26  ;;  %v3848_v13 = vpop.xlane.xlu2 %3847 }
 0xa9c   : > { %7172 = vrcp.f32 %v3848_v13 }
 0xa9d   : > { %v3945_v2 = vpack.c.bf16 %v3913_v47, %v3913_v47  ;;  %4708 = vmax.xlane.f32.xlu1 %v4707_v44  ;;  %7174 = vrcp.f32 %v3845_v36 }
 0xa9f   : > { %v4180_v60 = vunpack.c.l.b16 %v3945_v2 }
 0xaa1   : > { %v4187_v53 = vpack.c.b16 %v4181_v20, %v4180_v60  ;;  %v10149_v60 = vsel %vm8242_vm9, %v4429_v18, -inf }
 0xaa2   : > { %v7173_v48 = vpop.eup %7172 }
 0xaa3   : > { %6509 = vmatmul.msk.bf16.gmra.mxu3 %vm1262_vm5, %v4187_v53  ;;  %v7175_v61 = vpop.eup %7174  ;;  %v3916_v54 = vmul.f32 %v7173_v48, %v10041_v55  ;;  %v4336_v3 = vpop.permute.xlu2 %4335 }
 0xaa4   : > { %v3915_v26 = vmul.f32 %v7175_v61, %v10033_v40  ;;  %v4369_v47 = vrot.slane %v4336_v3, 4  ;;  %v4701_v40 = vsel %vm1262_vm5, %v10149_v60, -inf  ;;  %v4436_v61 = vpop.f32.mrf.mxu0 }
 0xaa5   : > { %v3948_v1 = vpack.c.bf16 %v3916_v54, %v3916_v54  ;;  %v10157_v18 = vsel %vm8213_vm8, %v4436_v61, -inf  ;;  %v11452_v54 = vld [vmem:[#allocation66_spill] sm:$0xff] }
 0xaa6   : > { %v3947_v13 = vpack.c.bf16 %v3915_v26, %v3915_v26  ;;  %v4604_v20 = vunpack.c.l.b16 %v4369_v47  ;;  %v10162_v26 = vpop.f32.mrf.mxu1 }
 0xaa7   : > { %v4183_v44 = vunpack.c.l.b16 %v3948_v1  ;;  %11453 = vst [vmem:[#allocation33_spill] sm:$0xff] %v10162_v26  ;;  %v4710_v1 = vsel %vm1262_vm5, %v10157_v18, -inf }
 0xaa8   : > { %v4182_v16 = vunpack.c.l.b16 %v3947_v13 }
 0xaaa   : > { %4592 = vrot.lane.b32.xlu0 %v11451_v41, %s7374_s5  ;;  %v4188_v55 = vpack.c.b16 %v4183_v44, %v4182_v16 }
 0xaac   : > { %v4439_v13 = vpop.f32.mrf.mxu0 }
 0xaad   : > { %v4338_v36 = vpop.permute.xlu1 %4337  ;;  %v10168_v44 = vsel %vm8127_vm2, %v4439_v13, -inf  ;;  %v11456_v13 = vld [vmem:[#allocation29_spill] sm:$0xff] }
 0xaae   : > { %v4370_v2 = vrot.slane %v4338_v36, 4  ;;  %v11454_v36 = vld [vmem:[#allocation70_spill] sm:$0xff]  ;;  %v10174_v16 = vpop.f32.mrf.mxu1 }
 0xaaf   : > { %11455 = vst [vmem:[#allocation32_spill] sm:$0xff] %v10174_v16 }
 0xab0   : > { %v4605_v53 = vunpack.c.l.b16 %v4370_v2  ;;  %v4713_v2 = vsel %vm1262_vm5, %v10168_v44, -inf }
 0xab2   : > { %v4609_v48 = vpack.c.b16 %v4605_v53, %v4604_v20  ;;  %4702 = vmax.xlane.f32.xlu2 %v4701_v40 }
 0xab3   : > { %6510 = vmatmul.msk.bf16.gmra.mxu3 %vm1262_vm5, %v4188_v55 }
 0xab4   : > { %v4632_v3 = vsel %vm929_vm0, %v4609_v48, 0 }
 0xab5   : > { %v4522_v41 = vpop.permute.xlu1 %4521  ;;  %4638 = vmatpush.bf16.xpose.msra.mxu3 %v4632_v3 }
 0xab6   : > { %4594 = vrot.lane.b32.xlu1 %v11452_v54, %s7374_s5  ;;  %6522 = vmatmul.msk.bf16.gmra.mxu2 %vm929_vm0, %v4522_v41  ;;  %v4497_v3 = vpop.f32.mrf.mxu1  ;;  %v4441_v54 = vpop.f32.mrf.mxu0 }
 0xaba   : > { %4711 = vmax.xlane.f32.xlu2 %v4710_v1 }
 0xabd   : > { %v4332_v47 = vpop.permute.xlu1 %4331 }
 0xabe   : > { %4596 = vrot.lane.b32.xlu1 %v11454_v36, %s7374_s5  ;;  %v4367_v20 = vrot.slane %v4332_v47, 4  ;;  %v10184_v47 = vsel %vm8154_vm4, %v4441_v54, -inf }
 0xac0   : > { %v4602_v55 = vunpack.c.l.b16 %v4367_v20 }
 0xac2   : > { %4714 = vmax.xlane.f32.xlu2 %v4713_v2  ;;  %v3851_v36 = vpop.xlane.xlu0 %3850  ;;  %v4499_v2 = vpop.f32.mrf.mxu1 }
 0xac3   : > { %7176 = vrcp.f32 %v3851_v36  ;;  %v10190_v20 = vsel %vm8179_vm7, %v4499_v2, -inf }
 0xac5   : > { %v4334_v53 = vpop.permute.xlu1 %4333 }
 0xac6   : > { %v4368_v40 = vrot.slane %v4334_v53, 4  ;;  %5103 = vrot.lane.b32.xlu1 %v11397_v22, %s7374_s5  ;;  %v4716_v22 = vsel %vm1262_vm5, %v10184_v47, -inf  ;;  %v4722_v53 = vsel %vm1262_vm5, %v10190_v20, -inf }
 0xac8   : > { %v4603_v48 = vunpack.c.l.b16 %v4368_v40 }
 0xaca   : > { %v4608_v61 = vpack.c.b16 %v4603_v48, %v4602_v55  ;;  %v7177_v48 = vpop.eup %7176 }
 0xacc   : > { %v4629_v41 = vsel %vm929_vm0, %v4608_v61, 0  ;;  %v3917_v61 = vmul.f32 %v7177_v48, %v10074_v6 }
 0xacd   : > { %v4524_v1 = vpop.permute.xlu1 %4523  ;;  %4639 = vmatpush.bf16.xpose.msra.mxu3 %v4629_v41 }
 0xace   : > { %5101 = vrot.lane.b32.xlu1 %v11456_v13, %s7374_s5  ;;  %6523 = vmatmul.msk.bf16.gmra.mxu2 %vm929_vm0, %v4524_v1  ;;  %v3949_v1 = vpack.c.bf16 %v3917_v61, %v3917_v61 }
 0xad0   : > { %v4184_v26 = vunpack.c.l.b16 %v3949_v1 }
 0xad4   : > { %4717 = vmax.xlane.f32.xlu0 %v4716_v22 }
 0xad5   : > { %v4324_v39 = vpop.permute.xlu1 %4323 }
 0xad6   : > { %v4328_v40 = vpop.permute.xlu0 %4327  ;;  %v4363_v59 = vrot.slane %v4324_v39, 4 }
 0xad7   : > { %v4365_v54 = vrot.slane %v4328_v40, 4 }
 0xad9   : > { %v4600_v0 = vunpack.c.l.b16 %v4365_v54 }
 0xadc   : > { %4723 = vmax.xlane.f32.xlu0 %v4722_v53  ;;  %v3854_v55 = vpop.xlane.xlu2 %3853 }
 0xadd   : > { %7178 = vrcp.f32 %v3854_v55 }
 0xade   : > { %v4326_v22 = vpop.permute.xlu0 %4325 }
 0xadf   : > { %v4364_v53 = vrot.slane %v4326_v22, 4 }
 0xae1   : > { %v4599_v48 = vunpack.c.l.b16 %v4364_v53 }
 0xae3   : > { %v7179_v41 = vpop.eup %7178 }
 0xae4   : > { %v3918_v13 = vmul.f32 %v7179_v41, %v10101_v23  ;;  %v4330_v36 = vpop.permute.xlu2 %4329  ;;  %v4598_v23 = vunpack.c.l.b16 %v4363_v59  ;;  %v10200_v41 = vsel %vm8148_vm3, %v4497_v3, -inf }
 0xae5   : > { %v4366_v42 = vrot.slane %v4330_v36, 4 }
 0xae6   : > { %v3950_v2 = vpack.c.bf16 %v3918_v13, %v3918_v13  ;;  %v4606_v61 = vpack.c.b16 %v4599_v48, %v4598_v23 }
 0xae7   : > { %v4601_v15 = vunpack.c.l.b16 %v4366_v42 }
 0xae8   : > { %v4185_v16 = vunpack.c.l.b16 %v3950_v2  ;;  %v4623_v54 = vsel %vm929_vm0, %v4606_v61, 0 }
 0xae9   : > { %v4607_v34 = vpack.c.b16 %v4601_v15, %v4600_v0 }
 0xaea   : > { %v4189_v55 = vpack.c.b16 %v4185_v16, %v4184_v26 }
 0xaeb   : > { %v4626_v6 = vsel %vm929_vm0, %v4607_v34, 0  ;;  %v4719_v34 = vsel %vm1262_vm5, %v10200_v41, -inf }
 0xaec   : > { %6511 = vmatmul.msk.bf16.gmra.mxu3 %vm1262_vm5, %v4189_v55  ;;  %v4591_v26 = vpop.permute.xlu2 %4590 }
 0xaed   : > { %v4223_v40 = vpop.f32.mrf.mxu3  ;;  %4640 = vmatpush.bf16.xpose.msra.mxu3 %v4626_v6 }
 0xaee   : > { %v4267_v42 = vpack.c.bf16 %v4223_v40, %v4223_v40 }
 0xaf0   : > { %v10205_v15 = vunpack.c.l.b16 %v4267_v42 }
 0xaf2   : > { %11457 = vst [vmem:[#allocation75_spill] sm:$0xff] %v10205_v15 }
 0xaf5   : > { %v4225_v1 = vpop.f32.mrf.mxu3  ;;  %4641 = vmatpush.bf16.xpose.msra.mxu3 %v4623_v54 }
 0xaf6   : > { %v4268_v0 = vpack.c.bf16 %v4225_v1, %v4225_v1 }
 0xaf8   : > { %v10207_v39 = vunpack.c.l.b16 %v4268_v0  ;;  %4720 = vmax.xlane.f32.xlu1 %v4719_v34 }
 0xafa   : > { %11458 = vst [vmem:[#allocation24_spill] sm:$0xff] %v10207_v39 }
 0xafc   : > { %6524 = vmatmul.msk.bf16.vlgmr.msra.gmra.mxu3 %vm929_vm0, %v4591_v26 }
 0xb00   : > { %v4697_v16 = vpop.xlane.xlu1 %4696 }
 0xb01   : > { %v4791_v3 = vsub.f32 %v10115_v62, %v4697_v16 }
 0xb03   : > { %v4823_v13 = vmul.f32 1.442695, %v4791_v3 }
 0xb05   : > { %7180 = vpow2.f32 %v4823_v13  ;;  %v11459_v13 = vld [vmem:[#allocation26_spill] sm:$0xff] }
 0xb08   : > { %v10222_v62 = vpop.xlane.xlu1 %4705 }
 0xb09   : > { %v4700_v36 = vpop.xlane.xlu0 %4699 }
 0xb0a   : > { %v4792_v22 = vsub.f32 %v10128_v51, %v4700_v36  ;;  %v4502_v51 = vpop.f32.mrf.mxu1 }
 0xb0b   : > { %v10214_v2 = vpop.eup %7180 }
 0xb0c   : > { %v4825_v53 = vmul.f32 1.442695, %v4792_v22  ;;  %v4887_v55 = vsel %vm1262_vm5, %v10214_v2, 0.0 }
 0xb0d   : > { %4888 = vadd.xlane.f32.xlu2 %v4887_v55 }
 0xb0e   : > { %7182 = vpow2.f32 %v4825_v53 }
 0xb10   : > { %v4709_v23 = vpop.xlane.xlu1 %4708 }
 0xb12   : > { %v4504_v0 = vpop.f32.mrf.mxu1 }
 0xb14   : > { %v10218_v6 = vpop.eup %7182 }
 0xb15   : > { %v4890_v48 = vsel %vm1262_vm5, %v10218_v6, 0.0 }
 0xb16   : > { %4891 = vadd.xlane.f32.xlu2 %v4890_v48 }
 0xb1c   : > { %v4593_v40 = vpop.permute.xlu0 %4592 }
 0xb1d   : > { %6525 = vmatmul.msk.bf16.gmra.mxu3 %vm929_vm0, %v4593_v40 }
 0xb25   : > { %v4703_v61 = vpop.xlane.xlu2 %4702 }
 0xb26   : > { %v4793_v42 = vsub.f32 %v10149_v60, %v4703_v61  ;;  %v4228_v54 = vpop.f32.mrf.mxu3  ;;  %v4507_v60 = vpop.f32.mrf.mxu1 }
 0xb27   : > { %v4269_v26 = vpack.c.bf16 %v4228_v54, %v4228_v54  ;;  %v11462_v54 = vld [vmem:[#allocation31_spill] sm:$0xff] }
 0xb28   : > { %v4827_v1 = vmul.f32 1.442695, %v4793_v42  ;;  %v4595_v34 = vpop.permute.xlu1 %4594  ;;  %v10242_v42 = vsel %vm8242_vm9, %v4502_v51, -inf }
 0xb29   : > { %v10232_v48 = vunpack.c.l.b16 %v4269_v26  ;;  %v4795_v26 = vsub.f32 %v10137_v57, %v4709_v23 }
 0xb2a   : > { %7184 = vpow2.f32 %v4827_v1 }
 0xb2b   : > { %11460 = vst [vmem:[#allocation76_spill] sm:$0xff] %v10232_v48 }
 0xb2d   : > { %6526 = vmatmul.msk.bf16.gmra.mxu3 %vm929_vm0, %v4595_v34  ;;  %v4712_v16 = vpop.xlane.xlu2 %4711 }
 0xb2e   : > { %v4796_v3 = vsub.f32 %v10157_v18, %v4712_v16  ;;  %5105 = vrot.lane.b32.xlu2 %v11459_v13, %s7374_s5  ;;  %v4230_v36 = vpop.f32.mrf.mxu3  ;;  %v4725_v16 = vsel %vm1262_vm5, %v10242_v42, -inf  ;;  %v4509_v13 = vpop.f32.mrf.mxu1 }
 0xb2f   : > { %v4270_v22 = vpack.c.bf16 %v4230_v36, %v4230_v36  ;;  %v4831_v36 = vmul.f32 1.442695, %v4795_v26  ;;  %v10260_v57 = vsel %vm8213_vm8, %v4509_v13, -inf }
 0xb30   : > { %v10230_v53 = vpop.eup %7184  ;;  %v4833_v55 = vmul.f32 1.442695, %v4796_v3  ;;  %v4597_v51 = vpop.permute.xlu1 %4596  ;;  %v4734_v26 = vsel %vm1262_vm5, %v10260_v57, -inf }
 0xb31   : > { %v10234_v40 = vunpack.c.l.b16 %v4270_v22  ;;  %v4893_v61 = vsel %vm1262_vm5, %v10230_v53, 0.0 }
 0xb32   : > { %7186 = vpow2.f32 %v4833_v55  ;;  %4894 = vadd.xlane.f32.xlu0 %v4893_v61  ;;  %v10256_v55 = vsel %vm8092_vm1, %v4504_v0, -inf }
 0xb33   : > { %11461 = vst [vmem:[#allocation30_spill] sm:$0xff] %v10234_v40  ;;  %7188 = vpow2.f32 %v4831_v36 }
 0xb35   : > { %v4715_v13 = vpop.xlane.xlu2 %4714 }
 0xb36   : > { %5099 = vrot.lane.b32.xlu2 %v11462_v54, %s7374_s5  ;;  %v4233_v1 = vpop.f32.mrf.mxu3  ;;  %v4728_v54 = vsel %vm1262_vm5, %v10256_v55, -inf  ;;  %v4512_v0 = vpop.f32.mrf.mxu1  ;;  %v4797_v18 = vsub.f32 %v10168_v44, %v4715_v13 }
 0xb37   : > { %v4271_v22 = vpack.c.bf16 %v4233_v1, %v4233_v1  ;;  %v10276_v36 = vsel %vm8127_vm2, %v4512_v0, -inf  ;;  %v10289_v0 = vsel %vm8168_vm6, %v4507_v60, -inf }
 0xb38   : > { %v10246_v34 = vpop.eup %7186  ;;  %v4731_v13 = vsel %vm1262_vm5, %v10289_v0, -inf  ;;  %v5104_v60 = vpop.permute.xlu1 %5103 }
 0xb39   : > { %v4902_v3 = vsel %vm1262_vm5, %v10246_v34, 0.0  ;;  %v10266_v1 = vunpack.c.l.b16 %v4271_v22  ;;  %v10279_v22 = vpop.f32.mrf.mxu2 }
 0xb3a   : > { %4726 = vmax.xlane.f32.xlu0 %v4725_v16  ;;  %4903 = vadd.xlane.f32.xlu1 %v4902_v3  ;;  %11465 = vst [vmem:[#allocation41_spill] sm:$0xff] %v10279_v22  ;;  %v4794_v3 = vsub.f32 %v10124_v56, %v10222_v62 }
 0xb3b   : > { %11463 = vst [vmem:[#allocation55_spill] sm:$0xff] %v10266_v1 }
 0xb3c   : > { %v4829_v1 = vmul.f32 1.442695, %v4794_v3 }
 0xb3d   : > { %6527 = vmatmul.msk.bf16.gmra.mxu3 %vm929_vm0, %v4597_v51  ;;  %v10272_v51 = vpop.eup %7188 }
 0xb3e   : > { %v4235_v23 = vpop.f32.mrf.mxu3  ;;  %v4514_v3 = vpop.f32.mrf.mxu1 }
 0xb3f   : > { %v4272_v61 = vpack.c.bf16 %v4235_v23, %v4235_v23 }
 0xb41   : > { %v10268_v16 = vunpack.c.l.b16 %v4272_v61  ;;  %v4737_v61 = vsel %vm1262_vm5, %v10276_v36, -inf }
 0xb42   : > { %4729 = vmax.xlane.f32.xlu0 %v4728_v54  ;;  %4735 = vmax.xlane.f32.xlu1 %v4734_v26  ;;  %v4899_v54 = vsel %vm1262_vm5, %v10272_v51, 0.0  ;;  %v4835_v26 = vmul.f32 1.442695, %v4797_v18 }
 0xb43   : > { %11464 = vst [vmem:[#allocation57_spill] sm:$0xff] %v10268_v16 }
 0xb44   : > { %7190 = vpow2.f32 %v4835_v26 }
 0xb47   : > { %v4718_v23 = vpop.xlane.xlu0 %4717 }
 0xb48   : > { %v4798_v56 = vsub.f32 %v10184_v47, %v4718_v23  ;;  %v10309_v47 = vsel %vm8154_vm4, %v4514_v3, -inf }
 0xb4a   : > { %4900 = vadd.xlane.f32.xlu0 %v4899_v54  ;;  %4738 = vmax.xlane.f32.xlu1 %v4737_v61  ;;  %v10294_v54 = vpop.f32.mrf.mxu2  ;;  %v10297_v62 = vpop.eup %7190  ;;  %v4837_v18 = vmul.f32 1.442695, %v4798_v56 }
 0xb4b   : > { %11466 = vst [vmem:[#allocation42_spill] sm:$0xff] %v10294_v54  ;;  %v4905_v61 = vsel %vm1262_vm5, %v10297_v62, 0.0 }
 0xb4f   : > { %v4724_v59 = vpop.xlane.xlu0 %4723 }
 0xb50   : > { %v4800_v44 = vsub.f32 %v10190_v20, %v4724_v59 }
 0xb52   : > { %v4841_v16 = vmul.f32 1.442695, %v4800_v44  ;;  %4732 = vmax.xlane.f32.xlu0 %v4731_v13  ;;  %v4570_v26 = vpop.f32.mrf.mxu2  ;;  %v4740_v44 = vsel %vm1262_vm5, %v10309_v47, -inf }
 0xb53   : > { %v10315_v23 = vsel %vm8148_vm3, %v4570_v26, -inf }
 0xb54   : > { %7192 = vpow2.f32 %v4841_v16  ;;  %v4743_v56 = vsel %vm1262_vm5, %v10315_v23, -inf }
 0xb55   : > { %7194 = vpow2.f32 %v4829_v1 }
 0xb56   : > { %7196 = vpow2.f32 %v4837_v18  ;;  %v5102_v18 = vpop.permute.xlu1 %5101 }
 0xb5a   : > { %v10301_v20 = vpop.eup %7192  ;;  %4906 = vadd.xlane.f32.xlu0 %v4905_v61  ;;  %v4572_v61 = vpop.f32.mrf.mxu2 }
 0xb5b   : > { %v10303_v59 = vpop.eup %7194  ;;  %v4914_v16 = vsel %vm1262_vm5, %v10301_v20, 0.0  ;;  %v10327_v26 = vsel %vm8179_vm7, %v4572_v61, -inf }
 0xb5c   : > { %4915 = vadd.xlane.f32.xlu1 %v4914_v16  ;;  %v4896_v1 = vsel %vm1262_vm5, %v10303_v59, 0.0  ;;  %v10319_v13 = vpop.eup %7196  ;;  %v4746_v16 = vsel %vm1262_vm5, %v10327_v26, -inf }
 0xb5d   : > { %v4908_v3 = vsel %vm1262_vm5, %v10319_v13, 0.0 }
 0xb5f   : > { %4897 = vadd.xlane.f32.xlu2 %v4896_v1 }
 0xb62   : > { %4741 = vmax.xlane.f32.xlu0 %v4740_v44 }
 0xb64   : > { %4744 = vmax.xlane.f32.xlu1 %v4743_v56 }
 0xb67   : > { %4909 = vadd.xlane.f32.xlu2 %v4908_v3 }
 0xb6b   : > { %v4721_v1 = vpop.xlane.xlu1 %4720 }
 0xb6c   : > { %v4799_v44 = vsub.f32 %v10200_v41, %v4721_v1  ;;  %4747 = vmax.xlane.f32.xlu1 %v4746_v16  ;;  %v11470_v1 = vld [vmem:[#allocation46_spill] sm:$0xff] }
 0xb6e   : > { %v4839_v48 = vmul.f32 1.442695, %v4799_v44 }
 0xb6f   : > { %v4238_v40 = vpop.f32.mrf.mxu3 }
 0xb70   : > { %7198 = vpow2.f32 %v4839_v48  ;;  %v4273_v15 = vpack.c.bf16 %v4238_v40, %v4238_v40  ;;  %v11469_v40 = vld [vmem:[#allocation49_spill] sm:$0xff] }
 0xb72   : > { %v10338_v22 = vunpack.c.l.b16 %v4273_v15 }
 0xb74   : > { %11467 = vst [vmem:[#allocation50_spill] sm:$0xff] %v10338_v22 }
 0xb76   : > { %v10332_v56 = vpop.eup %7198  ;;  %5178 = vrot.lane.b32.xlu0 %v11281_v45, %s7374_s5 }
 0xb77   : > { %v4240_v3 = vpop.f32.mrf.mxu3  ;;  %v4911_v61 = vsel %vm1262_vm5, %v10332_v56, 0.0 }
 0xb78   : > { %v4274_v39 = vpack.c.bf16 %v4240_v3, %v4240_v3  ;;  %4912 = vadd.xlane.f32.xlu2 %v4911_v61 }
 0xb7a   : > { %v10340_v54 = vunpack.c.l.b16 %v4274_v39 }
 0xb7c   : > { %11468 = vst [vmem:[#allocation45_spill] sm:$0xff] %v10340_v54 }
 0xb7e   : > { %5174 = vrot.lane.b32.xlu0 %v11301_v38, %s7374_s5 }
 0xb80   : > { %v4889_v48 = vpop.xlane.xlu2 %4888 }
 0xb85   : > { %5172 = vrot.lane.b32.xlu1 %v11469_v40, %s7374_s5 }
 0xb89   : > { %v4892_v45 = vpop.xlane.xlu2 %4891 }
 0xb8a   : > { %7200 = vrcp.f32 %v4892_v45 }
 0xb8b   : > { %7202 = vrcp.f32 %v4889_v48 }
 0xb90   : > { %v7201_v16 = vpop.eup %7200  ;;  %5176 = vrot.lane.b32.xlu2 %v11470_v1, %s7374_s5  ;;  %v4575_v1 = vpop.f32.mrf.mxu2 }
 0xb91   : > { %v5106_v15 = vpop.permute.xlu2 %5105  ;;  %v7203_v39 = vpop.eup %7202  ;;  %v5016_v44 = vmul.f32 %v7201_v16, %v10218_v6 }
 0xb92   : > { %5127 = vmatpush.bf16.msrb.mxu0 %v5106_v15  ;;  %v5015_v3 = vmul.f32 %v7203_v39, %v10214_v2  ;;  %v10355_v15 = vsel %vm8242_vm9, %v4575_v1, -inf }
 0xb93   : > { %v5048_v38 = vpack.c.bf16 %v5016_v44, %v5016_v44 }
 0xb94   : > { %v5047_v61 = vpack.c.bf16 %v5015_v3, %v5015_v3 }
 0xb95   : > { %v5088_v41 = vunpack.c.l.b16 %v5048_v38 }
 0xb96   : > { %5128 = vmatpush.bf16.msrb.mxu0 %v5104_v60  ;;  %v5087_v40 = vunpack.c.l.b16 %v5047_v61  ;;  %v4749_v60 = vsel %vm1262_vm5, %v10355_v15, -inf }
 0xb98   : > { %v5095_v48 = vpack.c.b16 %v5088_v41, %v5087_v40  ;;  %v4577_v61 = vpop.f32.mrf.mxu2 }
 0xb99   : > { %v5100_v22 = vpop.permute.xlu2 %5099  ;;  %v10370_v1 = vsel %vm8092_vm1, %v4577_v61, -inf }
 0xb9a   : > { %5129 = vmatpush.bf16.msrb.mxu0 %v5102_v18 }
 0xb9e   : > { %5130 = vmatpush.bf16.msrb.mxu0 %v5100_v22 }
 0xba1   : > { %6528 = vmatmul.msk.bf16.vlgmr.msrb.gmra.mxu0 %vm1262_vm5, %v5095_v48 }
 0xba5   : > { %v4895_v45 = vpop.xlane.xlu0 %4894 }
 0xbad   : > { %v10357_v6 = vpop.xlane.xlu1 %4903  ;;  %v4727_v2 = vpop.xlane.xlu0 %4726 }
 0xbae   : > { %v4801_v18 = vsub.f32 %v10242_v42, %v4727_v2 }
 0xbaf   : > { %4750 = vmax.xlane.f32.xlu1 %v4749_v60 }
 0xbb0   : > { %v4843_v16 = vmul.f32 1.442695, %v4801_v18 }
 0xbb2   : > { %7204 = vpow2.f32 %v4843_v16 }
 0xbb5   : > { %v4736_v22 = vpop.xlane.xlu1 %4735  ;;  %v4730_v41 = vpop.xlane.xlu0 %4729 }
 0xbb6   : > { %v4802_v39 = vsub.f32 %v10256_v55, %v4730_v41  ;;  %v4804_v3 = vsub.f32 %v10260_v57, %v4736_v22  ;;  %v4752_v55 = vsel %vm1262_vm5, %v10370_v1, -inf  ;;  %v4580_v57 = vpop.f32.mrf.mxu2 }
 0xbb7   : > { %v10398_v54 = vsel %vm8168_vm6, %v4580_v57, -inf }
 0xbb8   : > { %v10363_v44 = vpop.eup %7204  ;;  %v4845_v38 = vmul.f32 1.442695, %v4802_v39  ;;  %v4849_v48 = vmul.f32 1.442695, %v4804_v3 }
 0xbb9   : > { %v4917_v40 = vsel %vm1262_vm5, %v10363_v44, 0.0 }
 0xbba   : > { %4918 = vadd.xlane.f32.xlu2 %v4917_v40  ;;  %7206 = vpow2.f32 %v4845_v38 }
 0xbbb   : > { %7208 = vpow2.f32 %v4849_v48 }
 0xbbd   : > { %v4901_v42 = vpop.xlane.xlu0 %4900  ;;  %v4739_v41 = vpop.xlane.xlu1 %4738 }
 0xbbe   : > { %v4582_v38 = vpop.f32.mrf.mxu2 }
 0xbbf   : > { %v10387_v40 = vsel %vm8213_vm8, %v4582_v38, -inf }
 0xbc0   : > { %v10372_v2 = vpop.eup %7206 }
 0xbc1   : > { %v4920_v60 = vsel %vm1262_vm5, %v10372_v2, 0.0  ;;  %v10378_v16 = vpop.eup %7208 }
 0xbc2   : > { %4753 = vmax.xlane.f32.xlu2 %v4752_v55  ;;  %4921 = vadd.xlane.f32.xlu0 %v4920_v60  ;;  %v4926_v3 = vsel %vm1262_vm5, %v10378_v16, 0.0  ;;  %v4758_v60 = vsel %vm1262_vm5, %v10387_v40, -inf }
 0xbc5   : > { %v4733_v18 = vpop.xlane.xlu0 %4732 }
 0xbc6   : > { %v4803_v22 = vsub.f32 %v10289_v0, %v4733_v18  ;;  %v4805_v0 = vsub.f32 %v10276_v36, %v4739_v41 }
 0xbc8   : > { %v4847_v39 = vmul.f32 1.442695, %v4803_v22 }
 0xbca   : > { %7210 = vpow2.f32 %v4847_v39  ;;  %4927 = vadd.xlane.f32.xlu2 %v4926_v3  ;;  %v4585_v39 = vpop.f32.mrf.mxu2  ;;  %v4851_v3 = vmul.f32 1.442695, %v4805_v0  ;;  %v4755_v0 = vsel %vm1262_vm5, %v10398_v54, -inf }
 0xbcb   : > { %7212 = vrcp.f32 %v4895_v45  ;;  %v10402_v36 = vsel %vm8127_vm2, %v4585_v39, -inf }
 0xbcd   : > { %v10383_v61 = vpop.xlane.xlu0 %4906 }
 0xbcf   : > { %v4916_v48 = vpop.xlane.xlu1 %4915 }
 0xbd0   : > { %v10389_v55 = vpop.eup %7210 }
 0xbd1   : > { %v4923_v18 = vsel %vm1262_vm5, %v10389_v55, 0.0  ;;  %v7213_v45 = vpop.eup %7212 }
 0xbd2   : > { %v4898_v22 = vpop.xlane.xlu2 %4897  ;;  %4759 = vmax.xlane.f32.xlu2 %v4758_v60  ;;  %4924 = vadd.xlane.f32.xlu0 %v4923_v18  ;;  %v5017_v41 = vmul.f32 %v7213_v45, %v10230_v53 }
 0xbd3   : > { %7214 = vrcp.f32 %v4898_v22  ;;  %v4761_v22 = vsel %vm1262_vm5, %v10402_v36, -inf }
 0xbd4   : > { %7216 = vpow2.f32 %v4851_v3  ;;  %v5049_v14 = vpack.c.bf16 %v5017_v41, %v5017_v41 }
 0xbd5   : > { %v4742_v38 = vpop.xlane.xlu0 %4741 }
 0xbd6   : > { %v4806_v9 = vsub.f32 %v10309_v47, %v4742_v38  ;;  %v5089_v45 = vunpack.c.l.b16 %v5049_v14 }
 0xbd7   : > { %v4745_v4 = vpop.xlane.xlu1 %4744 }
 0xbd8   : > { %v4853_v60 = vmul.f32 1.442695, %v4806_v9  ;;  %v4807_v57 = vsub.f32 %v10315_v23, %v4745_v4 }
 0xbd9   : > { %v7215_v18 = vpop.eup %7214 }
 0xbda   : > { %v5018_v39 = vmul.f32 %v7215_v18, %v10303_v59  ;;  %7218 = vpow2.f32 %v4853_v60  ;;  %4762 = vmax.xlane.f32.xlu2 %v4761_v22  ;;  %4756 = vmax.xlane.f32.xlu0 %v4755_v0  ;;  %v4855_v9 = vmul.f32 1.442695, %v4807_v57  ;;  %v10413_v47 = vpop.eup %7216  ;;  %v4587_v60 = vpop.f32.mrf.mxu2 }
 0xbdb   : > { %7220 = vrcp.f32 %v4901_v42  ;;  %v4929_v59 = vsel %vm1262_vm5, %v10413_v47, 0.0  ;;  %v4910_v18 = vpop.xlane.xlu2 %4909 }
 0xbdc   : > { %v5050_v53 = vpack.c.bf16 %v5018_v39, %v5018_v39  ;;  %7222 = vrcp.f32 %v10357_v6 }
 0xbdd   : > { %7224 = vpow2.f32 %v4855_v9 }
 0xbde   : > { %v5090_v3 = vunpack.c.l.b16 %v5050_v53 }
 0xbdf   : > { %v4748_v38 = vpop.xlane.xlu1 %4747 }
 0xbe0   : > { %v10415_v33 = vpop.eup %7218  ;;  %v4808_v4 = vsub.f32 %v10327_v26, %v4748_v38  ;;  %v5096_v23 = vpack.c.b16 %v5090_v3, %v5089_v45  ;;  %v10426_v26 = vsel %vm8154_vm4, %v4587_v60, -inf }
 0xbe1   : > { %v7221_v41 = vpop.eup %7220  ;;  %v4932_v42 = vsel %vm1262_vm5, %v10415_v33, 0.0  ;;  %v4764_v9 = vsel %vm1262_vm5, %v10426_v26, -inf }
 0xbe2   : > { %v4857_v6 = vmul.f32 1.442695, %v4808_v4  ;;  %6529 = vmatmul.msk.bf16.gmra.mxu0 %vm1262_vm5, %v5096_v23  ;;  %4930 = vadd.xlane.f32.xlu0 %v4929_v59  ;;  %v7223_v14 = vpop.eup %7222  ;;  %v5019_v0 = vmul.f32 %v7221_v41, %v10272_v51 }
 0xbe3   : > { %4933 = vadd.xlane.f32.xlu1 %v4932_v42  ;;  %v5020_v22 = vmul.f32 %v7223_v14, %v10246_v34  ;;  %v10429_v57 = vpop.eup %7224 }
 0xbe4   : > { %7226 = vpow2.f32 %v4857_v6  ;;  %v5051_v39 = vpack.c.bf16 %v5019_v0, %v5019_v0  ;;  %v4935_v51 = vsel %vm1262_vm5, %v10429_v57, 0.0 }
 0xbe5   : > { %v5052_v3 = vpack.c.bf16 %v5020_v22, %v5020_v22  ;;  %7228 = vrcp.f32 %v4916_v48 }
 0xbe6   : > { %7230 = vrcp.f32 %v4910_v18  ;;  %v5091_v4 = vunpack.c.l.b16 %v5051_v39 }
 0xbe7   : > { %v5092_v23 = vunpack.c.l.b16 %v5052_v3 }
 0xbe8   : > { %v5179_v53 = vpop.permute.xlu0 %5178 }
 0xbe9   : > { %5200 = vmatpush.bf16.msra.mxu1 %v5179_v53  ;;  %v5097_v59 = vpack.c.b16 %v5092_v23, %v5091_v4 }
 0xbea   : > { %v10433_v45 = vpop.eup %7226  ;;  %4765 = vmax.xlane.f32.xlu0 %v4764_v9 }
 0xbeb   : > { %v4913_v38 = vpop.xlane.xlu2 %4912  ;;  %4936 = vadd.xlane.f32.xlu1 %v4935_v51  ;;  %v4938_v34 = vsel %vm1262_vm5, %v10433_v45, 0.0  ;;  %v7229_v41 = vpop.eup %7228 }
 0xbec   : > { %7232 = vrcp.f32 %v4913_v38  ;;  %4939 = vadd.xlane.f32.xlu2 %v4938_v34  ;;  %v7231_v42 = vpop.eup %7230  ;;  %v5024_v14 = vmul.f32 %v7229_v41, %v10301_v20 }
 0xbed   : > { %7234 = vrcp.f32 %v10383_v61  ;;  %v5022_v0 = vmul.f32 %v7231_v42, %v10319_v13 }
 0xbee   : > { %v5056_v61 = vpack.c.bf16 %v5024_v14, %v5024_v14 }
 0xbef   : > { %v5054_v9 = vpack.c.bf16 %v5022_v0, %v5022_v0 }
 0xbf0   : > { %v5175_v53 = vpop.permute.xlu0 %5174  ;;  %v5161_v38 = vunpack.c.l.b16 %v5056_v61 }
 0xbf1   : > { %v5094_v4 = vunpack.c.l.b16 %v5054_v9 }
 0xbf2   : > { %v7233_v48 = vpop.eup %7232  ;;  %6530 = vmatmul.msk.bf16.gmra.mxu0 %vm1262_vm5, %v5097_v59 }
 0xbf3   : > { %v7235_v6 = vpop.eup %7234  ;;  %v5023_v60 = vmul.f32 %v7233_v48, %v10332_v56  ;;  %v5177_v18 = vpop.permute.xlu2 %5176 }
 0xbf4   : > { %5201 = vmatpush.bf16.msra.mxu1 %v5177_v18  ;;  %v5021_v39 = vmul.f32 %v7235_v6, %v10297_v62  ;;  %v4643_v62 = vpop.f32.mrf.mxu3 }
 0xbf5   : > { %v5055_v22 = vpack.c.bf16 %v5023_v60, %v5023_v60  ;;  %v10458_v42 = vsel %vm8148_vm3, %v4643_v62, -inf }
 0xbf6   : > { %v5053_v51 = vpack.c.bf16 %v5021_v39, %v5021_v39  ;;  %v4767_v48 = vsel %vm1262_vm5, %v10458_v42, -inf }
 0xbf7   : > { %v5160_v3 = vunpack.c.l.b16 %v5055_v22  ;;  %v5173_v34 = vpop.permute.xlu1 %5172 }
 0xbf8   : > { %5202 = vmatpush.bf16.msra.mxu1 %v5175_v53  ;;  %v5093_v23 = vunpack.c.l.b16 %v5053_v51 }
 0xbf9   : > { %v5168_v20 = vpack.c.b16 %v5161_v38, %v5160_v3 }
 0xbfa   : > { %v5098_v13 = vpack.c.b16 %v5094_v4, %v5093_v23 }
 0xbfc   : > { %5203 = vmatpush.bf16.msra.mxu1 %v5173_v34  ;;  %v4645_v56 = vpop.f32.mrf.mxu3 }
 0xbfe   : > { %5251 = vrot.lane.b32.xlu0 %v11418_v35, %s7374_s5 }
 0xbff   : > { %6532 = vmatmul.msk.bf16.vlgmr.msra.gmra.mxu1 %vm1262_vm5, %v5168_v20 }
 0xc02   : > { %6531 = vmatmul.msk.bf16.gmra.mxu0 %vm1262_vm5, %v5098_v13 }
 0xc04   : > { %5247 = vrot.lane.b32.xlu2 %v11423_v58, %s7374_s5  ;;  %5249 = vrot.lane.b32.xlu1 %v11419_v12, %s7374_s5  ;;  %v4648_v59 = vpop.f32.mrf.mxu3  ;;  %v10464_v12 = vsel %vm8179_vm7, %v4645_v56, -inf }
 0xc0c   : > { %5245 = vrot.lane.b32.xlu2 %v11421_v10, %s7374_s5  ;;  %v4770_v10 = vsel %vm1262_vm5, %v10464_v12, -inf  ;;  %v4650_v6 = vpop.f32.mrf.mxu3 }
 0xc0d   : > { %v10472_v29 = vsel %vm8092_vm1, %v4650_v6, -inf }
 0xc0e   : > { %v4776_v50 = vsel %vm1262_vm5, %v10472_v29, -inf }
 0xc14   : > { %v4653_v61 = vpop.f32.mrf.mxu3 }
 0xc15   : > { %v10481_v37 = vsel %vm8168_vm6, %v4653_v61, -inf }
 0xc16   : > { %v4779_v51 = vsel %vm1262_vm5, %v10481_v37, -inf }
 0xc22   : > { %v4751_v41 = vpop.xlane.xlu1 %4750 }
 0xc23   : > { %v4809_v35 = vsub.f32 %v10355_v15, %v4751_v41 }
 0xc25   : > { %v4859_v58 = vmul.f32 1.442695, %v4809_v35  ;;  %v10493_v35 = vsel %vm8242_vm9, %v4648_v59, -inf }
 0xc27   : > { %7236 = vpow2.f32 %v4859_v58 }
 0xc28   : > { %4768 = vmax.xlane.f32.xlu0 %v4767_v48  ;;  %v4655_v48 = vpop.f32.mrf.mxu3 }
 0xc2d   : > { %v4919_v14 = vpop.xlane.xlu2 %4918  ;;  %v10468_v15 = vpop.eup %7236 }
 0xc2e   : > { %4771 = vmax.xlane.f32.xlu1 %v4770_v10  ;;  %7238 = vrcp.f32 %v4919_v14  ;;  %v4941_v60 = vsel %vm1262_vm5, %v10468_v15, 0.0  ;;  %v4773_v10 = vsel %vm1262_vm5, %v10493_v35, -inf }
 0xc34   : > { %v7239_v39 = vpop.eup %7238 }
 0xc35   : > { %4942 = vadd.xlane.f32.xlu2 %v4941_v60  ;;  %v4754_v18 = vpop.xlane.xlu2 %4753  ;;  %v4922_v22 = vpop.xlane.xlu0 %4921  ;;  %v5025_v9 = vmul.f32 %v7239_v39, %v10363_v44 }
 0xc36   : > { %v4810_v0 = vsub.f32 %v10370_v1, %v4754_v18  ;;  %4777 = vmax.xlane.f32.xlu1 %v4776_v50  ;;  %7240 = vrcp.f32 %v4922_v22 }
 0xc37   : > { %v5057_v34 = vpack.c.bf16 %v5025_v9, %v5025_v9 }
 0xc38   : > { %v4861_v53 = vmul.f32 1.442695, %v4810_v0 }
 0xc39   : > { %v5162_v23 = vunpack.c.l.b16 %v5057_v34 }
 0xc3a   : > { %7242 = vpow2.f32 %v4861_v53  ;;  %v4658_v53 = vpop.f32.mrf.mxu3 }
 0xc3b   : > { %v10534_v27 = vsel %vm8127_vm2, %v4658_v53, -inf }
 0xc3c   : > { %v7241_v3 = vpop.eup %7240 }
 0xc3d   : > { %v4928_v38 = vpop.xlane.xlu2 %4927  ;;  %v5026_v1 = vmul.f32 %v7241_v3, %v10372_v2 }
 0xc3e   : > { %4780 = vmax.xlane.f32.xlu1 %v4779_v51  ;;  %7244 = vrcp.f32 %v4928_v38 }
 0xc3f   : > { %v5058_v20 = vpack.c.bf16 %v5026_v1, %v5026_v1 }
 0xc40   : > { %v10487_v4 = vpop.eup %7242 }
 0xc41   : > { %v4944_v8 = vsel %vm1262_vm5, %v10487_v4, 0.0  ;;  %v5163_v13 = vunpack.c.l.b16 %v5058_v20 }
 0xc42   : > { %4945 = vadd.xlane.f32.xlu0 %v4944_v8  ;;  %v4660_v20 = vpop.f32.mrf.mxu3 }
 0xc43   : > { %v5169_v44 = vpack.c.b16 %v5163_v13, %v5162_v23 }
 0xc44   : > { %v7245_v41 = vpop.eup %7244 }
 0xc45   : > { %v4760_v62 = vpop.xlane.xlu2 %4759  ;;  %v4925_v56 = vpop.xlane.xlu0 %4924  ;;  %6533 = vmatmul.msk.bf16.gmra.mxu1 %vm1262_vm5, %v5169_v44  ;;  %v5028_v6 = vmul.f32 %v7245_v41, %v10378_v16 }
 0xc46   : > { %v4812_v2 = vsub.f32 %v10387_v40, %v4760_v62  ;;  %7246 = vrcp.f32 %v4925_v56  ;;  %v10519_v62 = vsel %vm8154_vm4, %v4660_v20, -inf }
 0xc47   : > { %v5060_v60 = vpack.c.bf16 %v5028_v6, %v5028_v6 }
 0xc48   : > { %v4865_v58 = vmul.f32 1.442695, %v4812_v2  ;;  %v10525_v2 = vsel %vm8213_vm8, %v4655_v48, -inf }
 0xc49   : > { %v5165_v9 = vunpack.c.l.b16 %v5060_v60  ;;  %v4782_v25 = vsel %vm1262_vm5, %v10525_v2, -inf }
 0xc4a   : > { %7248 = vpow2.f32 %v4865_v58  ;;  %4774 = vmax.xlane.f32.xlu0 %v4773_v10 }
 0xc4c   : > { %v7247_v14 = vpop.eup %7246 }
 0xc4d   : > { %v5027_v43 = vmul.f32 %v7247_v14, %v10389_v55  ;;  %v4763_v59 = vpop.xlane.xlu2 %4762  ;;  %v4757_v50 = vpop.xlane.xlu0 %4756  ;;  %v4788_v14 = vsel %vm1262_vm5, %v10519_v62, -inf }
 0xc4e   : > { %v4813_v40 = vsub.f32 %v10402_v36, %v4763_v59  ;;  %v4811_v18 = vsub.f32 %v10398_v54, %v4757_v50  ;;  %v4785_v50 = vsel %vm1262_vm5, %v10534_v27, -inf }
 0xc4f   : > { %v5059_v0 = vpack.c.bf16 %v5027_v43, %v5027_v43 }
 0xc50   : > { %v10503_v22 = vpop.eup %7248  ;;  %v4867_v39 = vmul.f32 1.442695, %v4813_v40  ;;  %v4863_v61 = vmul.f32 1.442695, %v4811_v18 }
 0xc51   : > { %v5164_v16 = vunpack.c.l.b16 %v5059_v0  ;;  %v4950_v3 = vsel %vm1262_vm5, %v10503_v22, 0.0 }
 0xc52   : > { %7250 = vpow2.f32 %v4867_v39  ;;  %4951 = vadd.xlane.f32.xlu2 %v4950_v3 }
 0xc53   : > { %7252 = vpow2.f32 %v4863_v61  ;;  %v5170_v55 = vpack.c.b16 %v5165_v9, %v5164_v16  ;;  %v4244_v9 = vpack.c.bf16 %v10049_v19, %v10049_v19 }
 0xc55   : > { %v4931_v51 = vpop.xlane.xlu0 %4930  ;;  %6534 = vmatmul.msk.bf16.gmra.mxu1 %vm1262_vm5, %v5170_v55  ;;  %v10546_v55 = vpop.f32.mrf.mxu0 }
 0xc56   : > { %v4934_v38 = vpop.xlane.xlu1 %4933  ;;  %7254 = vrcp.f32 %v4931_v51  ;;  %v4243_v51 = vpack.c.bf16 %v10043_v11, %v10043_v11 }
 0xc57   : > { %7256 = vrcp.f32 %v4934_v38 }
 0xc58   : > { %v10508_v54 = vpop.eup %7250 }
 0xc59   : > { %v10510_v36 = vpop.eup %7252  ;;  %v4953_v34 = vsel %vm1262_vm5, %v10508_v54, 0.0 }
 0xc5a   : > { %4954 = vadd.xlane.f32.xlu2 %v4953_v34  ;;  %v4947_v1 = vsel %vm1262_vm5, %v10510_v36, 0.0  ;;  %v5627_v34 = vunpack.c.l.b16 %v4243_v51  ;;  %v11473_v51 = vld [vmem:[#allocation14_spill] sm:$0xff] }
 0xc5b   : > { %4948 = vadd.xlane.f32.xlu0 %v4947_v1 }
 0xc5c   : > { %v7255_v8 = vpop.eup %7254 }
 0xc5d   : > { %v7257_v23 = vpop.eup %7256  ;;  %v5029_v13 = vmul.f32 %v7255_v8, %v10413_v47  ;;  %v4766_v44 = vpop.xlane.xlu0 %4765 }
 0xc5e   : > { %v5030_v56 = vmul.f32 %v7257_v23, %v10415_v33  ;;  %v4814_v41 = vsub.f32 %v10426_v26, %v4766_v44  ;;  %v4937_v26 = vpop.xlane.xlu1 %4936  ;;  %v5134_v19 = vpop.f32.mrf.mxu0  ;;  %v11471_v23 = vld [vmem:[#allocation15_spill] sm:$0xff] }
 0xc5f   : > { %v5061_v58 = vpack.c.bf16 %v5029_v13, %v5029_v13  ;;  %v4940_v43 = vpop.xlane.xlu2 %4939  ;;  %v3118_v11 = vpack.c.bf16 %v11471_v23, %v11471_v23  ;;  %v11472_v13 = vld [vmem:[#allocation13_spill] sm:$0xff] }
 0xc60   : > { %v5062_v10 = vpack.c.bf16 %v5030_v56, %v5030_v56  ;;  %v4869_v6 = vmul.f32 1.442695, %v4814_v41 }
 0xc61   : > { %v5166_v47 = vunpack.c.l.b16 %v5061_v58  ;;  %v5518_v56 = vunpack.c.l.b16 %v3118_v11 }
 0xc62   : > { %v5167_v60 = vunpack.c.l.b16 %v5062_v10  ;;  %7258 = vpow2.f32 %v4869_v6  ;;  %4789 = vmax.xlane.f32.xlu2 %v4788_v14  ;;  %v4246_v10 = vpack.c.bf16 %v10059_v21, %v10059_v21  ;;  %v4245_v6 = vpack.c.bf16 %v10053_v49, %v10053_v49 }
 0xc63   : > { %4783 = vmax.xlane.f32.xlu0 %v4782_v25  ;;  %7260 = vrcp.f32 %v4937_v26 }
 0xc64   : > { %v5171_v33 = vpack.c.b16 %v5167_v60, %v5166_v47  ;;  %7262 = vrcp.f32 %v4940_v43  ;;  %v5630_v14 = vunpack.c.l.b16 %v4246_v10  ;;  %v5629_v25 = vunpack.c.l.b16 %v4245_v6 }
 0xc66   : > { %6535 = vmatmul.msk.bf16.gmra.mxu1 %vm1262_vm5, %v5171_v33  ;;  %v5137_v44 = vpop.f32.mrf.mxu0  ;;  %v5660_v60 = vpack.c.b16 %v5630_v14, %v5629_v25 }
 0xc67   : > { %v5248_v61 = vpop.permute.xlu2 %5247  ;;  %v5373_v26 = vpack.c.bf16 %v5137_v44, %v5137_v44 }
 0xc68   : > { %v10536_v48 = vpop.eup %7258 }
 0xc69   : > { %v4956_v59 = vsel %vm1262_vm5, %v10536_v48, 0.0  ;;  %v7261_v40 = vpop.eup %7260 }
 0xc6a   : > { %4957 = vadd.xlane.f32.xlu1 %v4956_v59  ;;  %v7263_v0 = vpop.eup %7262  ;;  %v5031_v7 = vmul.f32 %v7261_v40, %v10429_v57  ;;  %v5628_v57 = vunpack.c.l.b16 %v4244_v9 }
 0xc6b   : > { %4786 = vmax.xlane.f32.xlu0 %v4785_v50  ;;  %v5032_v39 = vmul.f32 %v7263_v0, %v10433_v45  ;;  %v5741_v50 = vunpack.c.l.b16 %v5373_v26 }
 0xc6c   : > { %v5063_v16 = vpack.c.bf16 %v5031_v7, %v5031_v7  ;;  %v5659_v20 = vpack.c.b16 %v5628_v57, %v5627_v34  ;;  %v3116_v57 = vpack.c.bf16 %v11473_v51, %v11473_v51 }
 0xc6d   : > { %v5064_v3 = vpack.c.bf16 %v5032_v39, %v5032_v39 }
 0xc6e   : > { %v5233_v38 = vunpack.c.l.b16 %v5063_v16  ;;  %v5139_v47 = vpop.f32.mrf.mxu0 }
 0xc6f   : > { %v5234_v45 = vunpack.c.l.b16 %v5064_v3  ;;  %v5246_v1 = vpop.permute.xlu2 %5245  ;;  %v5374_v33 = vpack.c.bf16 %v5139_v47, %v5139_v47 }
 0xc70   : > { %v5252_v18 = vpop.permute.xlu0 %5251 }
 0xc71   : > { %5273 = vmatpush.bf16.msra.mxu2 %v5252_v18  ;;  %v5241_v8 = vpack.c.b16 %v5234_v45, %v5233_v38  ;;  %v5742_v43 = vunpack.c.l.b16 %v5374_v33  ;;  %v11474_v45 = vld [vmem:[#allocation12_spill] sm:$0xff] }
 0xc72   : > { %v3115_v34 = vpack.c.bf16 %v11474_v45, %v11474_v45 }
 0xc73   : > { %v5772_v21 = vpack.c.b16 %v5742_v43, %v5741_v50 }
 0xc74   : > { %v5515_v11 = vunpack.c.l.b16 %v3115_v34 }
 0xc76   : > { %v5250_v53 = vpop.permute.xlu1 %5249 }
 0xc77   : > { %5274 = vmatpush.bf16.msra.mxu2 %v5250_v53 }
 0xc7a   : > { %5324 = vrot.lane.b32.xlu2 %v11357_v24, %s7374_s5  ;;  %v3117_v24 = vpack.c.bf16 %v11472_v13, %v11472_v13 }
 0xc7b   : > { %5275 = vmatpush.bf16.msra.mxu2 %v5248_v61 }
 0xc7c   : > { %v5517_v41 = vunpack.c.l.b16 %v3117_v24 }
 0xc7e   : > { %v5548_v58 = vpack.c.b16 %v5518_v56, %v5517_v41  ;;  %v5372_v56 = vpack.c.bf16 %v5134_v19, %v5134_v19 }
 0xc7f   : > { %5276 = vmatpush.bf16.msra.mxu2 %v5246_v1 }
 0xc82   : > { %6536 = vmatmul.msk.bf16.vlgmr.msra.gmra.mxu2 %vm1262_vm5, %v5241_v8  ;;  %5675 = vrot.lane.b32.xlu2 %v5659_v20, %s7373_s8  ;;  %v5516_v20 = vunpack.c.l.b16 %v3116_v57 }
 0xc84   : > { %v5547_v44 = vpack.c.b16 %v5516_v20, %v5515_v11 }
 0xc8a   : > { %5318 = vrot.lane.b32.xlu2 %v11363_v30, %s7374_s5 }
 0xc92   : > { %5565 = vrot.lane.b32.xlu2 %v5548_v58, %s7374_s5 }
 0xc9a   : > { %5677 = vrot.lane.b32.xlu2 %v5660_v60, %s7373_s8 }
 0xc9b   : > { %v4769_v30 = vpop.xlane.xlu0 %4768 }
 0xc9c   : > { %v4815_v59 = vsub.f32 %v10458_v42, %v4769_v30 }
 0xc9e   : > { %v4871_v40 = vmul.f32 1.442695, %v4815_v59 }
 0xca0   : > { %7264 = vpow2.f32 %v4871_v40 }
 0xca1   : > { %v4772_v18 = vpop.xlane.xlu1 %4771 }
 0xca2   : > { %v4816_v49 = vsub.f32 %v10464_v12, %v4772_v18  ;;  %5789 = vrot.lane.b32.xlu2 %v5772_v21, %s7372_s29 }
 0xca4   : > { %v4873_v0 = vmul.f32 1.442695, %v4816_v49 }
 0xca6   : > { %v10569_v7 = vpop.eup %7264  ;;  %7266 = vpow2.f32 %v4873_v0 }
 0xca7   : > { %v4959_v39 = vsel %vm1262_vm5, %v10569_v7, 0.0 }
 0xca8   : > { %4960 = vadd.xlane.f32.xlu1 %v4959_v39  ;;  %v4943_v9 = vpop.xlane.xlu2 %4942 }
 0xca9   : > { %v10575_v42 = vpop.xlane.xlu1 %4777  ;;  %7268 = vrcp.f32 %v4943_v9 }
 0xcac   : > { %v10573_v61 = vpop.eup %7266 }
 0xcad   : > { %v4962_v53 = vsel %vm1262_vm5, %v10573_v61, 0.0 }
 0xcae   : > { %4963 = vadd.xlane.f32.xlu0 %v4962_v53 }
 0xcaf   : > { %v7269_v3 = vpop.eup %7268 }
 0xcb0   : > { %v5033_v1 = vmul.f32 %v7269_v3, %v10468_v15  ;;  %v5740_v15 = vunpack.c.l.b16 %v5372_v56  ;;  %v4818_v3 = vsub.f32 %v10472_v29, %v10575_v42  ;;  %v5142_v56 = vpop.f32.mrf.mxu0 }
 0xcb1   : > { %v4781_v16 = vpop.xlane.xlu1 %4780 }
 0xcb2   : > { %v4819_v38 = vsub.f32 %v10481_v37, %v4781_v16  ;;  %v5065_v13 = vpack.c.bf16 %v5033_v1, %v5033_v1  ;;  %v5371_v37 = vpack.c.bf16 %v10546_v55, %v10546_v55  ;;  %v4877_v34 = vmul.f32 1.442695, %v4818_v3 }
 0xcb4   : > { %v4879_v23 = vmul.f32 1.442695, %v4819_v38  ;;  %v5235_v58 = vunpack.c.l.b16 %v5065_v13  ;;  %v5739_v47 = vunpack.c.l.b16 %v5371_v37  ;;  %v5205_v13 = vpop.f32.mrf.mxu1  ;;  %v4249_v37 = vpack.c.bf16 %v10095_v52, %v10095_v52  ;;  %v6629_v52 = vld [vmem:[%s11049_s2 + $0x30] sm:$0xff] }
 0xcb5   : > { %v4946_v12 = vpop.xlane.xlu0 %4945 }
 0xcb6   : > { %7270 = vrcp.f32 %v4946_v12  ;;  %v5771_v19 = vpack.c.b16 %v5740_v15, %v5739_v47  ;;  %v11475_v15 = vld [vmem:[#allocation40_spill] sm:$0xff]  ;;  %v5633_v47 = vunpack.c.l.b16 %v4249_v37 }
 0xcb7   : > { %7272 = vpow2.f32 %v4879_v23 }
 0xcbc   : > { %v7271_v8 = vpop.eup %7270 }
 0xcbd   : > { %v5034_v24 = vmul.f32 %v7271_v8, %v10487_v4  ;;  %v4775_v25 = vpop.xlane.xlu0 %4774  ;;  %v10592_v4 = vpop.eup %7272 }
 0xcbe   : > { %v4817_v12 = vsub.f32 %v10493_v35, %v4775_v25 }
 0xcbf   : > { %v5066_v41 = vpack.c.bf16 %v5034_v24, %v5034_v24 }
 0xcc0   : > { %v4875_v57 = vmul.f32 1.442695, %v4817_v12  ;;  %v6626_v12 = vld [vmem:[%s11049_s2 + $0x18] sm:$0xff] }
 0xcc1   : > { %5322 = vrot.lane.b32.xlu1 %v11433_v46, %s7374_s5  ;;  %v5236_v10 = vunpack.c.l.b16 %v5066_v41  ;;  %v4971_v46 = vsel %vm1262_vm5, %v10592_v4, 0.0 }
 0xcc2   : > { %5563 = vrot.lane.b32.xlu0 %v5547_v44, %s7374_s5  ;;  %v4250_v44 = vpack.c.bf16 %v10105_v5, %v10105_v5  ;;  %v11476_v5 = vld [vmem:[#allocation38_spill] sm:$0xff] }
 0xcc3   : > { %v5242_v6 = vpack.c.b16 %v5236_v10, %v5235_v58  ;;  %v6630_v10 = vld [vmem:[%s11049_s2 + $0x38] sm:$0xff]  ;;  %v3119_v25 = vpack.c.bf16 %v11476_v5, %v11476_v5 }
 0xcc4   : > { %v5634_v58 = vunpack.c.l.b16 %v4250_v44  ;;  %6016 = vmatpush.bf16.msra.mxu0 %v6630_v10  ;;  %v11482_v44 = vld [vmem:[#allocation16_spill] sm:$0xff] }
 0xcc5   : > { %v4952_v14 = vpop.xlane.xlu2 %4951  ;;  %6537 = vmatmul.msk.bf16.gmra.mxu2 %vm1262_vm5, %v5242_v6  ;;  %v3120_v6 = vpack.c.bf16 %v11475_v15, %v11475_v15 }
 0xcc6   : > { %7274 = vrcp.f32 %v4952_v14  ;;  %v5207_v14 = vpop.f32.mrf.mxu1 }
 0xcc8   : > { %6017 = vmatpush.bf16.msra.mxu0 %v6629_v52 }
 0xcc9   : > { %5320 = vrot.lane.b32.xlu1 %v11435_v63, %s7374_s5 }
 0xcca   : > { %5787 = vrot.lane.b32.xlu0 %v5771_v19, %s7372_s29  ;;  %v5662_v19 = vpack.c.b16 %v5634_v58, %v5633_v47  ;;  %v11485_v47 = vld [vmem:[#allocation28_spill] sm:$0xff] }
 0xccb   : > { %4972 = vadd.xlane.f32.xlu2 %v4971_v46  ;;  %v5380_v46 = vpack.c.bf16 %v5207_v14, %v5207_v14  ;;  %v3132_v5 = vpack.c.bf16 %v11485_v47, %v11485_v47 }
 0xccc   : > { %v7275_v33 = vpop.eup %7274 }
 0xccd   : > { %v4955_v55 = vpop.xlane.xlu2 %4954  ;;  %v5036_v26 = vmul.f32 %v7275_v33, %v10503_v22  ;;  %v5379_v33 = vpack.c.bf16 %v5205_v13, %v5205_v13 }
 0xcce   : > { %v4949_v60 = vpop.xlane.xlu0 %4948 }
 0xccf   : > { %7276 = vrcp.f32 %v4949_v60  ;;  %v5068_v59 = vpack.c.bf16 %v5036_v26, %v5036_v26  ;;  %v5144_v60 = vpop.f32.mrf.mxu0  ;;  %v5519_v26 = vunpack.c.l.b16 %v3119_v25 }
 0xcd0   : > { %7278 = vrcp.f32 %v4955_v55  ;;  %v5520_v55 = vunpack.c.l.b16 %v3120_v6 }
 0xcd1   : > { %v5238_v21 = vunpack.c.l.b16 %v5068_v59  ;;  %v6628_v59 = vld [vmem:[%s11049_s2 + $0x28] sm:$0xff] }
 0xcd2   : > { %6018 = vmatpush.bf16.msra.mxu0 %v6628_v59  ;;  %v5532_v59 = vunpack.c.l.b16 %v3132_v5 }
 0xcd5   : > { %v7277_v30 = vpop.eup %7276  ;;  %v10600_v43 = vpop.xlane.xlu2 %4789 }
 0xcd6   : > { %v5035_v50 = vmul.f32 %v7277_v30, %v10510_v36  ;;  %v4784_v40 = vpop.xlane.xlu0 %4783  ;;  %v7279_v53 = vpop.eup %7278  ;;  %v5748_v30 = vunpack.c.l.b16 %v5380_v46 }
 0xcd7   : > { %v5037_v36 = vmul.f32 %v7279_v53, %v10508_v54  ;;  %v4820_v35 = vsub.f32 %v10525_v2, %v4784_v40  ;;  %v5376_v40 = vpack.c.bf16 %v5144_v60, %v5144_v60  ;;  %v4247_v53 = vpack.c.bf16 %v10072_v28, %v10072_v28  ;;  %v11487_v60 = vld [vmem:[#allocation89_spill] sm:$0xff] }
 0xcd8   : > { %v5067_v63 = vpack.c.bf16 %v5035_v50, %v5035_v50  ;;  %v5549_v50 = vpack.c.b16 %v5520_v55, %v5519_v26  ;;  %v11488_v26 = vld [vmem:[#allocation27_spill] sm:$0xff] }
 0xcd9   : > { %v5069_v38 = vpack.c.bf16 %v5037_v36, %v5037_v36  ;;  %v4881_v42 = vmul.f32 1.442695, %v4820_v35  ;;  %v5631_v3 = vunpack.c.l.b16 %v4247_v53 }
 0xcda   : > { %v5237_v18 = vunpack.c.l.b16 %v5067_v63  ;;  %v5747_v63 = vunpack.c.l.b16 %v5379_v33  ;;  %v3131_v33 = vpack.c.bf16 %v11487_v60, %v11487_v60 }
 0xcdc   : > { %v5243_v49 = vpack.c.b16 %v5238_v21, %v5237_v18  ;;  %v5375_v21 = vpack.c.bf16 %v5142_v56, %v5142_v56  ;;  %v5775_v18 = vpack.c.b16 %v5748_v30, %v5747_v63  ;;  %v11483_v56 = vld [vmem:[#allocation62_spill] sm:$0xff]  ;;  %v3123_v30 = vpack.c.bf16 %v11488_v26, %v11488_v26 }
 0xcdd   : > { %v5325_v0 = vpop.permute.xlu2 %5324  ;;  %v4958_v39 = vpop.xlane.xlu1 %4957 }
 0xcde   : > { %7280 = vrcp.f32 %v4958_v39  ;;  %6538 = vmatmul.msk.bf16.gmra.mxu2 %vm1262_vm5, %v5243_v49  ;;  %v4787_v9 = vpop.xlane.xlu0 %4786  ;;  %5346 = vmatpush.bf16.msrb.mxu3 %v5325_v0  ;;  %v6627_v49 = vld [vmem:[%s11049_s2 + $0x20] sm:$0xff]  ;;  %v4248_v0 = vpack.c.bf16 %v10080_v32, %v10080_v32  ;;  %v5744_v39 = vunpack.c.l.b16 %v5376_v40  ;;  %v6625_v32 = vld [vmem:[%s11049_s2 + $0x10] sm:$0xff]  ;;  %v5531_v40 = vunpack.c.l.b16 %v3131_v33 }
 0xcdf   : > { %v4821_v22 = vsub.f32 %v10534_v27, %v4787_v9  ;;  %v5239_v27 = vunpack.c.l.b16 %v5069_v38  ;;  %6019 = vmatpush.bf16.msra.mxu0 %v6627_v49  ;;  %v5743_v9 = vunpack.c.l.b16 %v5375_v21  ;;  %v11478_v38 = vpack.c.b16 %v9935_v31, %v9933_v17  ;;  %v6623_v31 = vld [vmem:[%s11049_s2] sm:$0xff]  ;;  %v11489_v49 = vld [vmem:[#allocation91_spill] sm:$0xff] }
 0xce0   : > { %v5632_v36 = vunpack.c.l.b16 %v4248_v0  ;;  %v5523_v63 = vunpack.c.l.b16 %v3123_v30  ;;  %v4822_v21 = vsub.f32 %v10519_v62, %v10600_v43  ;;  %v3134_v0 = vpack.c.bf16 %v11489_v49, %v11489_v49  ;;  %v11500_v49 = vld [vmem:[#allocation59_spill] sm:$0xff] }
 0xce1   : > { %v4883_v16 = vmul.f32 1.442695, %v4821_v22  ;;  %v5147_v22 = vpop.f32.mrf.mxu0 }
 0xce2   : > { %v5661_v28 = vpack.c.b16 %v5632_v36, %v5631_v3  ;;  %v5377_v37 = vpack.c.bf16 %v5147_v22, %v5147_v22  ;;  %v11492_v3 = vld [vmem:[#allocation20_spill] sm:$0xff]  ;;  %v4885_v43 = vmul.f32 1.442695, %v4822_v21 }
 0xce3   : > { %7282 = vpow2.f32 %v4883_v16  ;;  %v5773_v16 = vpack.c.b16 %v5744_v39, %v5743_v9  ;;  %6020 = vmatpush.bf16.msra.mxu0 %v6626_v12  ;;  %v11490_v9 = vld [vmem:[#allocation60_spill] sm:$0xff]  ;;  %v11491_v12 = vld [vmem:[#allocation90_spill] sm:$0xff]  ;;  %v4251_v62 = vpack.c.bf16 %v11492_v3, %v11492_v3 }
 0xce4   : > { %v7281_v51 = vpop.eup %7280  ;;  %7284 = vpow2.f32 %v4875_v57  ;;  %v5745_v6 = vunpack.c.l.b16 %v5377_v37  ;;  %v4252_v22 = vpack.c.bf16 %v11490_v9, %v11490_v9  ;;  %v3133_v36 = vpack.c.bf16 %v11491_v12, %v11491_v12 }
 0xce5   : > { %v5038_v45 = vmul.f32 %v7281_v51, %v10536_v48  ;;  %7286 = vpow2.f32 %v4877_v34  ;;  %v11477_v51 = vld [vmem:[#allocation21_spill] sm:$0xff]  ;;  %v10694_v55 = vpop.permute.xlu2 %5675 }
 0xce6   : > { %7288 = vpow2.f32 %v4881_v42  ;;  %v3122_v57 = vpack.c.bf16 %v11477_v51, %v11477_v51 }
 0xce7   : > { %v5070_v1 = vpack.c.bf16 %v5038_v45, %v5038_v45  ;;  %6021 = vmatpush.bf16.msra.mxu0 %v6625_v32  ;;  %v11479_v45 = vld [vmem:[#allocation74_spill] sm:$0xff] }
 0xce8   : > { %v3121_v34 = vpack.c.bf16 %v11479_v45, %v11479_v45 }
 0xce9   : > { %v10610_v20 = vpop.eup %7282  ;;  %v5240_v8 = vunpack.c.l.b16 %v5070_v1  ;;  %v6624_v1 = vld [vmem:[%s11049_s2 + $0x8] sm:$0xff]  ;;  %v5149_v35 = vpop.f32.mrf.mxu0 }
 0xcea   : > { %v4977_v54 = vsel %vm1262_vm5, %v10610_v20, 0.0  ;;  %v10616_v23 = vpop.eup %7284 }
 0xceb   : > { %4978 = vadd.xlane.f32.xlu2 %v4977_v54  ;;  %v5244_v29 = vpack.c.b16 %v5240_v8, %v5239_v27  ;;  %v10618_v48 = vpop.eup %7286  ;;  %v4965_v11 = vsel %vm1262_vm5, %v10616_v23, 0.0  ;;  %v5522_v27 = vunpack.c.l.b16 %v3122_v57  ;;  %v10674_v8 = vpop.f32.mrf.mxu1  ;;  %6022 = vmatpush.bf16.msra.mxu0 %v6624_v1  ;;  %v5521_v54 = vunpack.c.l.b16 %v3121_v34  ;;  %v11494_v1 = vld [vmem:[#allocation93_spill] sm:$0xff] }
 0xcec   : > { %v4968_v2 = vsel %vm1262_vm5, %v10618_v48, 0.0  ;;  %v10624_v24 = vpop.eup %7288  ;;  %v5534_v57 = vunpack.c.l.b16 %v3134_v0  ;;  %v5533_v34 = vunpack.c.l.b16 %v3133_v36  ;;  %v3128_v0 = vpack.c.bf16 %v11500_v49, %v11500_v49 }
 0xced   : > { %v4974_v41 = vsel %vm1262_vm5, %v10624_v24, 0.0  ;;  %v5550_v42 = vpack.c.b16 %v5522_v27, %v5521_v54  ;;  %v10715_v51 = vpop.permute.xlu2 %5318  ;;  %v3136_v27 = vpack.c.bf16 %v11494_v1, %v11494_v1  ;;  %v11495_v54 = vld [vmem:[#allocation9_spill] sm:$0xff] }
 0xcee   : > { %6539 = vmatmul.msk.bf16.gmra.mxu2 %vm1262_vm5, %v5244_v29  ;;  %v11480_v29 = vld [vmem:[#allocation88_spill] sm:$0xff] }
 0xcef   : > { %v3130_v17 = vpack.c.bf16 %v11480_v29, %v11480_v29  ;;  %6023 = vmatpush.bf16.msra.mxu0 %v6623_v31  ;;  %v1987_v29 = vpack.c.bf16 %v11495_v54, %v11495_v54 }
 0xcf1   : > { %v5530_v58 = vunpack.c.l.b16 %v3130_v17  ;;  %v5556_v17 = vpack.c.b16 %v5534_v57, %v5533_v34 }
 0xcf3   : > { %4966 = vadd.xlane.f32.xlu1 %v4965_v11  ;;  %v5378_v11 = vpack.c.bf16 %v5149_v35, %v5149_v35  ;;  %v10690_v25 = vpop.f32.mrf.mxu1  ;;  %v5635_v35 = vunpack.c.l.b16 %v4251_v62 }
 0xcf4   : > { %4969 = vadd.xlane.f32.xlu0 %v4968_v2  ;;  %v11481_v2 = vld [vmem:[#allocation37_spill] sm:$0xff] }
 0xcf5   : > { %v3129_v13 = vpack.c.bf16 %v11481_v2, %v11481_v2  ;;  %v5746_v10 = vunpack.c.l.b16 %v5378_v11  ;;  %v11497_v2 = vld [vmem:[#allocation92_spill] sm:$0xff]  ;;  %v10735_v60 = vpop.permute.xlu2 %5565 }
 0xcf7   : > { %v5529_v15 = vunpack.c.l.b16 %v3129_v13  ;;  %v5774_v52 = vpack.c.b16 %v5746_v10, %v5745_v6  ;;  %v3135_v13 = vpack.c.bf16 %v11497_v2, %v11497_v2  ;;  %v11505_v2 = vld [vmem:[#allocation43_spill] sm:$0xff] }
 0xcf9   : > { %v5554_v14 = vpack.c.b16 %v5530_v58, %v5529_v15  ;;  %v11498_v58 = vld [vmem:[#allocation25_spill] sm:$0xff]  ;;  %v5536_v15 = vunpack.c.l.b16 %v3136_v27 }
 0xcfa   : > { %v3125_v10 = vpack.c.bf16 %v11498_v58, %v11498_v58 }
 0xcfb   : > { %4975 = vadd.xlane.f32.xlu1 %v4974_v41  ;;  %v11484_v41 = vpack.c.b16 %v11482_v44, %v11483_v56 }
 0xcfc   : > { %v5525_v30 = vunpack.c.l.b16 %v3125_v10  ;;  %v5381_v10 = vpack.c.bf16 %v10674_v8, %v10674_v8 }
 0xcfd   : > { %v5678_v27 = vpop.permute.xlu2 %5677 }
 0xd03   : > { %5681 = vrot.lane.b32.xlu2 %v5662_v19, %s7373_s8  ;;  %v11486_v19 = vld [vmem:[#allocation77_spill] sm:$0xff] }
 0xd04   : > { %v3124_v46 = vpack.c.bf16 %v11486_v19, %v11486_v19 }
 0xd05   : > { %v10753_v62 = vpop.f32.mrf.mxu2 }
 0xd08   : > { %5567 = vrot.lane.b32.xlu0 %v5549_v50, %s7374_s5  ;;  %v5524_v50 = vunpack.c.l.b16 %v3124_v46 }
 0xd0a   : > { %v5551_v53 = vpack.c.b16 %v5524_v50, %v5523_v63  ;;  %v11499_v50 = vld [vmem:[#allocation95_spill] sm:$0xff] }
 0xd0b   : > { %5795 = vrot.lane.b32.xlu2 %v5775_v18, %s7372_s29  ;;  %v5555_v18 = vpack.c.b16 %v5532_v59, %v5531_v40  ;;  %v3138_v40 = vpack.c.bf16 %v11499_v50, %v11499_v50  ;;  %v5749_v50 = vunpack.c.l.b16 %v5381_v10 }
 0xd0d   : > { %v5538_v3 = vunpack.c.l.b16 %v3138_v40 }
 0xd10   : > { %5791 = vrot.lane.b32.xlu0 %v5773_v16, %s7372_s29  ;;  %v10710_v16 = vpop.f32.mrf.mxu1 }
 0xd13   : > { %5685 = vrot.lane.b32.xlu2 %v11478_v38, %s7373_s8  ;;  %v11493_v38 = vld [vmem:[#allocation52_spill] sm:$0xff] }
 0xd14   : > { %5679 = vrot.lane.b32.xlu1 %v5661_v28, %s7373_s8  ;;  %v5636_v28 = vunpack.c.l.b16 %v4252_v22  ;;  %v1988_v45 = vpack.c.bf16 %v11493_v38, %v11493_v38  ;;  %v11502_v22 = vld [vmem:[#allocation58_spill] sm:$0xff] }
 0xd15   : > { %v3127_v12 = vpack.c.bf16 %v11502_v22, %v11502_v22 }
 0xd16   : > { %v5663_v44 = vpack.c.b16 %v5636_v28, %v5635_v35  ;;  %v5436_v56 = vunpack.c.l.b16 %v1988_v45  ;;  %v5528_v28 = vunpack.c.l.b16 %v3128_v0 }
 0xd17   : > { %v5527_v1 = vunpack.c.l.b16 %v3127_v12 }
 0xd18   : > { %v5217_v47 = vpop.f32.mrf.mxu1 }
 0xd1b   : > { %5687 = vrot.lane.b32.xlu2 %v11484_v41, %s7373_s8  ;;  %v4961_v32 = vpop.xlane.xlu1 %4960 }
 0xd1c   : > { %5569 = vrot.lane.b32.xlu1 %v5550_v42, %s7374_s5  ;;  %v11496_v42 = vld [vmem:[#allocation34_spill] sm:$0xff] }
 0xd1d   : > { %v3126_v11 = vpack.c.bf16 %v11496_v42, %v11496_v42  ;;  %v5553_v42 = vpack.c.b16 %v5528_v28, %v5527_v1 }
 0xd1f   : > { %v5526_v46 = vunpack.c.l.b16 %v3126_v11  ;;  %v5384_v11 = vpack.c.bf16 %v5217_v47, %v5217_v47  ;;  %v5280_v47 = vpop.f32.mrf.mxu2 }
 0xd20   : > { %v5220_v45 = vpop.f32.mrf.mxu1 }
 0xd21   : > { %v4964_v39 = vpop.xlane.xlu0 %4963  ;;  %v5385_v12 = vpack.c.bf16 %v5220_v45, %v5220_v45  ;;  %v11514_v45 = vld [vmem:[#allocation64_spill] sm:$0xff] }
 0xd22   : > { %7290 = vrcp.f32 %v4964_v39  ;;  %v11501_v39 = vld [vmem:[#allocation94_spill] sm:$0xff] }
 0xd23   : > { %5577 = vrot.lane.b32.xlu2 %v5554_v14, %s7374_s5  ;;  %7292 = vrcp.f32 %v4961_v32  ;;  %v5435_v14 = vunpack.c.l.b16 %v1987_v29  ;;  %v11504_v29 = vld [vmem:[#allocation22_spill] sm:$0xff] }
 0xd24   : > { %5793 = vrot.lane.b32.xlu1 %v5774_v52, %s7372_s29  ;;  %7294 = vpow2.f32 %v4885_v43  ;;  %v5535_v52 = vunpack.c.l.b16 %v3135_v13  ;;  %v1989_v13 = vpack.c.bf16 %v11505_v2, %v11505_v2 }
 0xd25   : > { %v5467_v33 = vpack.c.b16 %v5436_v56, %v5435_v14 }
 0xd26   : > { %v5557_v59 = vpack.c.b16 %v5536_v15, %v5535_v52  ;;  %v5752_v15 = vunpack.c.l.b16 %v5384_v11  ;;  %v5387_v11 = vpack.c.bf16 %v10753_v62, %v10753_v62 }
 0xd28   : > { %v7291_v31 = vpop.eup %7290  ;;  %v5755_v10 = vunpack.c.l.b16 %v5387_v11 }
 0xd29   : > { %v7293_v37 = vpop.eup %7292  ;;  %v5040_v5 = vmul.f32 %v7291_v31, %v10573_v61 }
 0xd2a   : > { %v10733_v19 = vpop.eup %7294  ;;  %v5039_v26 = vmul.f32 %v7293_v37, %v10569_v7 }
 0xd2b   : > { %5579 = vrot.lane.b32.xlu2 %v5555_v18, %s7374_s5  ;;  %v5072_v63 = vpack.c.bf16 %v5040_v5, %v5040_v5  ;;  %v4980_v61 = vsel %vm1262_vm5, %v10733_v19, 0.0  ;;  %v5552_v18 = vpack.c.b16 %v5526_v46, %v5525_v30  ;;  %v5222_v30 = vpop.f32.mrf.mxu1 }
 0xd2c   : > { %5571 = vrot.lane.b32.xlu1 %v5551_v53, %s7374_s5  ;;  %v3137_v53 = vpack.c.bf16 %v11501_v39, %v11501_v39  ;;  %v5071_v7 = vpack.c.bf16 %v5039_v26, %v5039_v26  ;;  %v11507_v26 = vld [vmem:[#allocation98_spill] sm:$0xff]  ;;  %v5386_v39 = vpack.c.bf16 %v5222_v30, %v5222_v30 }
 0xd2d   : > { %v5307_v43 = vunpack.c.l.b16 %v5072_v63  ;;  %v5790_v63 = vpop.permute.xlu2 %5789 }
 0xd2e   : > { %v5537_v38 = vunpack.c.l.b16 %v3137_v53  ;;  %v5306_v34 = vunpack.c.l.b16 %v5071_v7 }
 0xd30   : > { %v5558_v54 = vpack.c.b16 %v5538_v3, %v5537_v38  ;;  %v5314_v31 = vpack.c.b16 %v5307_v43, %v5306_v34  ;;  %v5754_v3 = vunpack.c.l.b16 %v5386_v39  ;;  %v11512_v34 = vld [vmem:[#allocation17_spill] sm:$0xff] }
 0xd31   : > { %v4260_v1 = vpack.c.bf16 %v11512_v34, %v11512_v34 }
 0xd33   : > { %5581 = vrot.lane.b32.xlu2 %v5556_v17, %s7374_s5  ;;  %v5323_v41 = vpop.permute.xlu1 %5322  ;;  %v3140_v17 = vpack.c.bf16 %v11504_v29, %v11504_v29 }
 0xd34   : > { %v5564_v6 = vpop.permute.xlu0 %5563  ;;  %5347 = vmatpush.bf16.msrb.mxu3 %v5323_v41  ;;  %5683 = vrot.lane.b32.xlu1 %v5663_v44, %s7373_s8  ;;  %v11506_v44 = vld [vmem:[#allocation96_spill] sm:$0xff]  ;;  %v5383_v41 = vpack.c.bf16 %v10710_v16, %v10710_v16 }
 0xd35   : > { %v5821_v21 = vsel %vm929_vm0, %v5467_v33, %v5564_v6  ;;  %v3139_v56 = vpack.c.bf16 %v11506_v44, %v11506_v44  ;;  %v5540_v58 = vunpack.c.l.b16 %v3140_v17  ;;  %v5437_v6 = vunpack.c.l.b16 %v1989_v13  ;;  %v11508_v16 = vld [vmem:[#allocation32_spill] sm:$0xff] }
 0xd36   : > { %v5868_v36 = vsel %vm1262_vm5, %v5821_v21, %v10694_v55  ;;  %v11503_v55 = vld [vmem:[#allocation11_spill] sm:$0xff]  ;;  %v5751_v46 = vunpack.c.l.b16 %v5383_v41  ;;  %v11509_v21 = vld [vmem:[#allocation97_spill] sm:$0xff]  ;;  %v5388_v17 = vpack.c.bf16 %v5280_v47, %v5280_v47 }
 0xd37   : > { %v1990_v35 = vpack.c.bf16 %v11503_v55, %v11503_v55  ;;  %v5539_v14 = vunpack.c.l.b16 %v3139_v56  ;;  %v3141_v8 = vpack.c.bf16 %v11509_v21, %v11509_v21  ;;  %v11513_v55 = vld [vmem:[#allocation10_spill] sm:$0xff] }
 0xd38   : > { %v5777_v40 = vpack.c.b16 %v5752_v15, %v5751_v46  ;;  %v5756_v44 = vunpack.c.l.b16 %v5388_v17  ;;  %v11516_v15 = vld [vmem:[#allocation18_spill] sm:$0xff] }
 0xd39   : > { %v5438_v37 = vunpack.c.l.b16 %v1990_v35  ;;  %v5559_v33 = vpack.c.b16 %v5540_v58, %v5539_v14  ;;  %v3143_v35 = vpack.c.bf16 %v11513_v55, %v11513_v55 }
 0xd3a   : > { %4981 = vadd.xlane.f32.xlu0 %v4980_v61  ;;  %v5779_v14 = vpack.c.b16 %v5756_v44, %v5755_v10 }
 0xd3b   : > { %5583 = vrot.lane.b32.xlu2 %v5557_v59, %s7374_s5  ;;  %v5321_v9 = vpop.permute.xlu1 %5320  ;;  %v5468_v52 = vpack.c.b16 %v5438_v37, %v5437_v6  ;;  %v4258_v59 = vpack.c.bf16 %v11508_v16, %v11508_v16  ;;  %v5543_v2 = vunpack.c.l.b16 %v3143_v35  ;;  %v3145_v6 = vpack.c.bf16 %v11516_v15, %v11516_v15  ;;  %v11517_v16 = vld [vmem:[#allocation19_spill] sm:$0xff] }
 0xd3c   : > { %v5788_v32 = vpop.permute.xlu0 %5787  ;;  %5348 = vmatpush.bf16.msrb.mxu3 %v5321_v9  ;;  %5573 = vrot.lane.b32.xlu1 %v5552_v18, %s7374_s5  ;;  %v11510_v18 = vld [vmem:[#allocation33_spill] sm:$0xff] }
 0xd3d   : > { %v5901_v57 = vsel %vm5899_vm10, %v5868_v36, %v5788_v32  ;;  %v5824_v61 = vsel %vm929_vm0, %v5468_v52, %v10735_v60  ;;  %v4257_v49 = vpack.c.bf16 %v11510_v18, %v11510_v18  ;;  %v5642_v22 = vunpack.c.l.b16 %v4258_v59  ;;  %v11518_v59 = vld [vmem:[#allocation63_spill] sm:$0xff] }
 0xd3e   : > { %6024 = vmatmul.bf16.vlgmr.msra.gmra.mxu0 %v5901_v57  ;;  %v5870_v53 = vsel %vm1262_vm5, %v5824_v61, %v5678_v27  ;;  %v5541_v60 = vunpack.c.l.b16 %v3141_v8  ;;  %v11511_v57 = vld [vmem:[#allocation99_spill] sm:$0xff]  ;;  %v5753_v27 = vunpack.c.l.b16 %v5385_v12  ;;  %v5545_v46 = vunpack.c.l.b16 %v3145_v6  ;;  %v11520_v61 = vld [vmem:[#allocation42_spill] sm:$0xff] }
 0xd3f   : > { %v5904_v9 = vsel %vm5899_vm10, %v5870_v53, %v5790_v63  ;;  %v5641_v32 = vunpack.c.l.b16 %v4257_v49  ;;  %v3144_v28 = vpack.c.bf16 %v11511_v57, %v11511_v57  ;;  %v4266_v18 = vpack.c.bf16 %v11520_v61, %v11520_v61  ;;  %v11529_v6 = vld [vmem:[#allocation7_spill] sm:$0xff]  ;;  %v11534_v61 = vld [vmem:[#allocation5_spill] sm:$0xff] }
 0xd40   : > { %5349 = vmatpush.bf16.msrb.mxu3 %v10715_v51  ;;  %v5382_v51 = vpack.c.bf16 %v10690_v25, %v10690_v25  ;;  %v3142_v25 = vpack.c.bf16 %v11507_v26, %v11507_v26  ;;  %v5778_v29 = vpack.c.b16 %v5754_v3, %v5753_v27 }
 0xd41   : > { %v5666_v38 = vpack.c.b16 %v5642_v22, %v5641_v32  ;;  %v11523_v22 = vld [vmem:[#allocation36_spill] sm:$0xff]  ;;  %v5650_v32 = vunpack.c.l.b16 %v4266_v18  ;;  %v1993_v18 = vpack.c.bf16 %v11534_v61, %v11534_v61 }
 0xd42   : > { %v5750_v5 = vunpack.c.l.b16 %v5382_v51  ;;  %v5542_v7 = vunpack.c.l.b16 %v3142_v25  ;;  %v11515_v51 = vld [vmem:[#allocation100_spill] sm:$0xff] }
 0xd43   : > { %5585 = vrot.lane.b32.xlu2 %v5558_v54, %s7374_s5  ;;  %6540 = vmatmul.msk.bf16.vlgmr.msrb.gmra.mxu3 %vm1262_vm5, %v5314_v31  ;;  %v4259_v54 = vpack.c.bf16 %v11514_v45, %v11514_v45  ;;  %v5544_v31 = vunpack.c.l.b16 %v3144_v28  ;;  %v3146_v41 = vpack.c.bf16 %v11515_v51, %v11515_v51  ;;  %v4973_v28 = vpop.xlane.xlu2 %4972 }
 0xd44   : > { %5575 = vrot.lane.b32.xlu1 %v5553_v42, %s7374_s5  ;;  %v5776_v0 = vpack.c.b16 %v5750_v5, %v5749_v50  ;;  %v5560_v43 = vpack.c.b16 %v5542_v7, %v5541_v60  ;;  %v5644_v42 = vunpack.c.l.b16 %v4260_v1  ;;  %v11519_v50 = vpack.c.b16 %v11517_v16, %v11518_v59 }
 0xd45   : > { %v5643_v13 = vunpack.c.l.b16 %v4259_v54  ;;  %v5561_v56 = vpack.c.b16 %v5544_v31, %v5543_v2  ;;  %v5546_v62 = vunpack.c.l.b16 %v3146_v41  ;;  %v11526_v41 = vld [vmem:[#allocation24_spill] sm:$0xff] }
 0xd47   : > { %v5667_v58 = vpack.c.b16 %v5644_v42, %v5643_v13  ;;  %v11525_v13 = vld [vmem:[#allocation39_spill] sm:$0xff] }
 0xd48   : > { %v5283_v36 = vpop.f32.mrf.mxu2  ;;  %v1992_v44 = vpack.c.bf16 %v11525_v13, %v11525_v13 }
 0xd49   : > { %v5389_v5 = vpack.c.bf16 %v5283_v36, %v5283_v36 }
 0xd4b   : > { %5587 = vrot.lane.b32.xlu2 %v5559_v33, %s7374_s5  ;;  %v5562_v33 = vpack.c.b16 %v5546_v62, %v5545_v46  ;;  %v5757_v25 = vunpack.c.l.b16 %v5389_v5  ;;  %v5440_v62 = vunpack.c.l.b16 %v1992_v44  ;;  %v11543_v44 = vld [vmem:[#allocation47_spill] sm:$0xff] }
 0xd4c   : > { %5799 = vrot.lane.b32.xlu1 %v5777_v40, %s7372_s29 }
 0xd4e   : > { %5797 = vrot.lane.b32.xlu0 %v5776_v0, %s7372_s29  ;;  %6029 = vmatmul.bf16.gmra.mxu0 %v5904_v9  ;;  %v11521_v0 = vld [vmem:[#allocation41_spill] sm:$0xff]  ;;  %v11522_v9 = vld [vmem:[#allocation35_spill] sm:$0xff] }
 0xd4f   : > { %v4265_v39 = vpack.c.bf16 %v11521_v0, %v11521_v0  ;;  %v11524_v12 = vpack.c.b16 %v11522_v9, %v11523_v22  ;;  %v11535_v0 = vld [vmem:[#allocation57_spill] sm:$0xff]  ;;  %v5441_v22 = vunpack.c.l.b16 %v1993_v18 }
 0xd50   : > { %v5285_v37 = vpop.f32.mrf.mxu2 }
 0xd51   : > { %v5390_v47 = vpack.c.bf16 %v5285_v37, %v5285_v37  ;;  %v5649_v34 = vunpack.c.l.b16 %v4265_v39  ;;  %v11527_v37 = vld [vmem:[#allocation75_spill] sm:$0xff] }
 0xd52   : > { %v11536_v39 = vld [vmem:[#allocation55_spill] sm:$0xff] }
 0xd53   : > { %5589 = vrot.lane.b32.xlu2 %v5560_v43, %s7374_s5  ;;  %v5758_v52 = vunpack.c.l.b16 %v5390_v47  ;;  %v5670_v35 = vpack.c.b16 %v5650_v32, %v5649_v34  ;;  %v11539_v32 = vld [vmem:[#allocation50_spill] sm:$0xff]  ;;  %v11541_v34 = vld [vmem:[#allocation53_spill] sm:$0xff] }
 0xd54   : > { %5689 = vrot.lane.b32.xlu1 %v5666_v38, %s7373_s8 }
 0xd55   : > { %v5780_v30 = vpack.c.b16 %v5758_v52, %v5757_v25 }
 0xd56   : > { %5801 = vrot.lane.b32.xlu0 %v5778_v29, %s7372_s29 }
 0xd5b   : > { %5591 = vrot.lane.b32.xlu2 %v5561_v56, %s7374_s5 }
 0xd5c   : > { %5691 = vrot.lane.b32.xlu1 %v5667_v58, %s7373_s8  ;;  %v11528_v58 = vpack.c.b16 %v11526_v41, %v11527_v37  ;;  %v11544_v41 = vld [vmem:[#allocation67_spill] sm:$0xff] }
 0xd5d   : > { %v1997_v37 = vpack.c.bf16 %v11544_v41, %v11544_v41 }
 0xd5e   : > { %5803 = vrot.lane.b32.xlu0 %v5779_v14, %s7372_s29  ;;  %v1991_v14 = vpack.c.bf16 %v11529_v6, %v11529_v6 }
 0xd60   : > { %v5439_v5 = vunpack.c.l.b16 %v1991_v14  ;;  %v5445_v14 = vunpack.c.l.b16 %v1997_v37 }
 0xd61   : > { %v5288_v26 = vpop.f32.mrf.mxu2 }
 0xd62   : > { %v5391_v21 = vpack.c.bf16 %v5288_v26, %v5288_v26  ;;  %v5469_v52 = vpack.c.b16 %v5440_v62, %v5439_v5  ;;  %v11531_v26 = vld [vmem:[#allocation76_spill] sm:$0xff] }
 0xd63   : > { %5593 = vrot.lane.b32.xlu2 %v5562_v33, %s7374_s5  ;;  %v11530_v33 = vld [vmem:[#allocation30_spill] sm:$0xff]  ;;  %s191_s5 = sand.u32 1, %s7362_s16  }
 0xd64   : > { %5693 = vrot.lane.b32.xlu1 %v11519_v50, %s7373_s8  ;;  %v5759_v53 = vunpack.c.l.b16 %v5391_v21  ;;  %v11532_v25 = vpack.c.b16 %v11530_v33, %v11531_v26  ;;  %v11533_v21 = vld [vmem:[#allocation56_spill] sm:$0xff]  ;;  %s6252_s10 = sshll.u32 %s191_s5, 7  ;;  %s6170_s23 = scalar_lea.sflag [#allocation3], %s191_s5 }
 0xd65   : > { %s10893_s11 = scalar_lea.vmem [#allocation2], %s6252_s10 }
 0xd66   : > { %5805 = vrot.lane.b32.xlu0 %v5780_v30, %s7372_s29  ;;  %v4967_v40 = vpop.xlane.xlu1 %4966  ;;  %s6183_s20 = sshll.u32 %s10893_s11, 4  ;;  %s6184_s20 = int_to_ptr.vmem [resolvable:$true] %s6183_s20 }
 0xd67   : > { %7296 = vrcp.f32 %v4967_v40  ;;  %v4970_v63 = vpop.xlane.xlu0 %4969 }
 0xd68   : > { %7298 = vrcp.f32 %v4970_v63 }
 0xd69   : > { %v5290_v8 = vpop.f32.mrf.mxu2 }
 0xd6a   : > { %v5392_v49 = vpack.c.bf16 %v5290_v8, %v5290_v8  ;;  %v1994_v8 = vpack.c.bf16 %v11533_v21, %v11533_v21  ;;  %v11546_v21 = vld [vmem:[#allocation79_spill] sm:$0xff] }
 0xd6c   : > { %v5760_v7 = vunpack.c.l.b16 %v5392_v49  ;;  %5695 = vrot.lane.b32.xlu1 %v11524_v12, %s7373_s8  ;;  %v4979_v49 = vpop.xlane.xlu2 %4978 }
 0xd6d   : > { %v7297_v60 = vpop.eup %7296 }
 0xd6e   : > { %v7299_v36 = vpop.eup %7298  ;;  %v5041_v3 = vmul.f32 %v7297_v60, %v10616_v23  ;;  %v5781_v43 = vpack.c.b16 %v5760_v7, %v5759_v53  ;;  %v4976_v57 = vpop.xlane.xlu1 %4975  ;;  %v11537_v53 = vpack.c.b16 %v11535_v0, %v11536_v39  ;;  %v5442_v7 = vunpack.c.l.b16 %v1994_v8 }
 0xd6f   : > { %v5042_v38 = vmul.f32 %v7299_v36, %v10618_v48  ;;  %7300 = vrcp.f32 %v4976_v57  ;;  %v11538_v36 = vld [vmem:[#allocation45_spill] sm:$0xff]  ;;  %v1999_v8 = vpack.c.bf16 %v11546_v21, %v11546_v21 }
 0xd70   : > { %v5073_v1 = vpack.c.bf16 %v5041_v3, %v5041_v3  ;;  %5807 = vrot.lane.b32.xlu0 %v5781_v43, %s7372_s29  ;;  %7302 = vrcp.f32 %v4973_v28  ;;  %v5470_v12 = vpack.c.b16 %v5442_v7, %v5441_v22  ;;  %v11540_v3 = vpack.c.b16 %v11538_v36, %v11539_v32 }
 0xd71   : > { %v5074_v27 = vpack.c.bf16 %v5042_v38, %v5042_v38  ;;  %v5293_v55 = vpop.f32.mrf.mxu2  ;;  %7304 = vrcp.f32 %v4979_v49  ;;  %v5447_v0 = vunpack.c.l.b16 %v1999_v8 }
 0xd72   : > { %v5308_v45 = vunpack.c.l.b16 %v5073_v1  ;;  %v5393_v31 = vpack.c.bf16 %v5293_v55, %v5293_v55  ;;  %v1996_v1 = vpack.c.bf16 %v11541_v34, %v11541_v34 }
 0xd73   : > { %v5309_v54 = vunpack.c.l.b16 %v5074_v27  ;;  %v11542_v27 = vld [vmem:[#allocation44_spill] sm:$0xff] }
 0xd74   : > { %5697 = vrot.lane.b32.xlu1 %v5670_v35, %s7373_s8  ;;  %v5761_v56 = vunpack.c.l.b16 %v5393_v31  ;;  %v5682_v43 = vpop.permute.xlu2 %5681  ;;  %v1995_v55 = vpack.c.bf16 %v11542_v27, %v11542_v27 }
 0xd75   : > { %v5315_v29 = vpack.c.b16 %v5309_v54, %v5308_v45  ;;  %v7301_v23 = vpop.eup %7300  ;;  %v5444_v45 = vunpack.c.l.b16 %v1996_v1 }
 0xd76   : > { %v7303_v17 = vpop.eup %7302  ;;  %v5044_v48 = vmul.f32 %v7301_v23, %v10624_v24  ;;  %v5443_v54 = vunpack.c.l.b16 %v1995_v55 }
 0xd77   : > { %6541 = vmatmul.msk.bf16.gmra.mxu3 %vm1262_vm5, %v5315_v29  ;;  %v5043_v2 = vmul.f32 %v7303_v17, %v10592_v4 }
 0xd78   : > { %v5076_v10 = vpack.c.bf16 %v5044_v48, %v5044_v48  ;;  %v5471_v29 = vpack.c.b16 %v5444_v45, %v5443_v54 }
 0xd79   : > { %v5295_v42 = vpop.f32.mrf.mxu2  ;;  %v5075_v47 = vpack.c.bf16 %v5043_v2, %v5043_v2  ;;  %v7305_v2 = vpop.eup %7304 }
 0xd7a   : > { %v5394_v11 = vpack.c.bf16 %v5295_v42, %v5295_v42  ;;  %v5568_v15 = vpop.permute.xlu0 %5567  ;;  %v5311_v4 = vunpack.c.l.b16 %v5076_v10  ;;  %v5045_v13 = vmul.f32 %v7305_v2, %v10610_v20 }
 0xd7b   : > { %v5310_v46 = vunpack.c.l.b16 %v5075_v47  ;;  %v5827_v16 = vsel %vm929_vm0, %v5469_v52, %v5568_v15 }
 0xd7c   : > { %v5762_v51 = vunpack.c.l.b16 %v5394_v11  ;;  %5699 = vrot.lane.b32.xlu1 %v11528_v58, %s7373_s8  ;;  %v5796_v31 = vpop.permute.xlu2 %5795  ;;  %v5077_v58 = vpack.c.bf16 %v5045_v13, %v5045_v13 }
 0xd7d   : > { %v5316_v30 = vpack.c.b16 %v5311_v4, %v5310_v46 }
 0xd7e   : > { %v5782_v24 = vpack.c.b16 %v5762_v51, %v5761_v56  ;;  %v1998_v56 = vpack.c.bf16 %v11543_v44, %v11543_v44  ;;  %v11549_v44 = vld [vmem:[#allocation65_spill] sm:$0xff] }
 0xd80   : > { %5809 = vrot.lane.b32.xlu0 %v5782_v24, %s7372_s29  ;;  %v5446_v15 = vunpack.c.l.b16 %v1998_v56  ;;  %v5312_v24 = vunpack.c.l.b16 %v5077_v58  ;;  %v2004_v56 = vpack.c.bf16 %v11549_v44, %v11549_v44 }
 0xd82   : > { %v5792_v50 = vpop.permute.xlu0 %5791  ;;  %v5472_v4 = vpack.c.b16 %v5446_v15, %v5445_v14  ;;  %v5452_v37 = vunpack.c.l.b16 %v2004_v56 }
 0xd84   : > { %5701 = vrot.lane.b32.xlu1 %v11532_v25, %s7373_s8  ;;  %v5686_v52 = vpop.permute.xlu2 %5685 }
 0xd86   : > { %v5680_v59 = vpop.permute.xlu1 %5679 }
 0xd87   : > { %v5872_v40 = vsel %vm1262_vm5, %v5827_v16, %v5680_v59  ;;  %6542 = vmatmul.msk.bf16.gmra.mxu3 %vm1262_vm5, %v5316_v30  ;;  %v11545_v30 = vld [vmem:[#allocation80_spill] sm:$0xff] }
 0xd88   : > { %v5907_v63 = vsel %vm5899_vm10, %v5872_v40, %v5792_v50  ;;  %v2000_v16 = vpack.c.bf16 %v11545_v30, %v11545_v30 }
 0xd89   : > { %6034 = vmatmul.bf16.gmra.mxu0 %v5907_v63 }
 0xd8a   : > { %v5448_v18 = vunpack.c.l.b16 %v2000_v16 }
 0xd8c   : > { %5703 = vrot.lane.b32.xlu1 %v11537_v53, %s7373_s8  ;;  %v5473_v39 = vpack.c.b16 %v5448_v18, %v5447_v0  ;;  %v11553_v18 = vld [vmem:[#allocation73_spill] sm:$0xff] }
 0xd8e   : > { %v5570_v9 = vpop.permute.xlu1 %5569 }
 0xd8f   : > { %v5830_v60 = vsel %vm929_vm0, %v5470_v12, %v5570_v9  ;;  %v5688_v12 = vpop.permute.xlu2 %5687 }
 0xd90   : > { %v5874_v28 = vsel %vm1262_vm5, %v5830_v60, %v5682_v43 }
 0xd94   : > { %5705 = vrot.lane.b32.xlu1 %v11540_v3, %s7373_s8 }
 0xd96   : > { %v5794_v57 = vpop.permute.xlu1 %5793 }
 0xd97   : > { %v5910_v38 = vsel %vm5899_vm10, %v5874_v28, %v5794_v57  ;;  %v11547_v28 = vld [vmem:[#allocation68_spill] sm:$0xff] }
 0xd99   : > { %6039 = vmatmul.bf16.gmra.mxu0 %v5910_v38  ;;  %v2002_v38 = vpack.c.bf16 %v11547_v28, %v11547_v28 }
 0xd9e   : > { %v5572_v35 = vpop.permute.xlu1 %5571 }
 0xd9f   : > { %v5833_v23 = vsel %vm929_vm0, %v5471_v29, %v5572_v35  ;;  %v11548_v35 = vld [vmem:[#allocation81_spill] sm:$0xff]  ;;  %v5450_v29 = vunpack.c.l.b16 %v2002_v38 }
 0xda0   : > { %v2001_v45 = vpack.c.bf16 %v11548_v35, %v11548_v35 }
 0xda6   : > { %v5684_v17 = vpop.permute.xlu1 %5683 }
 0xda7   : > { %v5876_v48 = vsel %vm1262_vm5, %v5833_v23, %v5684_v17  ;;  %v5449_v23 = vunpack.c.l.b16 %v2001_v45  ;;  %v5578_v17 = vpop.permute.xlu2 %5577 }
 0xda8   : > { %v5913_v42 = vsel %vm5899_vm10, %v5876_v48, %v5796_v31 }
 0xda9   : > { %6044 = vmatmul.bf16.gmra.mxu0 %v5913_v42  ;;  %v5474_v31 = vpack.c.b16 %v5450_v29, %v5449_v23  ;;  %v11555_v23 = vld [vmem:[#allocation82_spill] sm:$0xff] }
 0xdab   : > { %v5842_v42 = vsel %vm929_vm0, %v5474_v31, %v5578_v17  ;;  %v2010_v17 = vpack.c.bf16 %v11555_v23, %v11555_v23 }
 0xdad   : > { %v4982_v11 = vpop.xlane.xlu0 %4981  ;;  %v5458_v44 = vunpack.c.l.b16 %v2010_v17  ;;  %v11560_v17 = vld [vmem:[#allocation23_spill] sm:$0xff] }
 0xdae   : > { %7306 = vrcp.f32 %v4982_v11  ;;  %v5574_v62 = vpop.permute.xlu1 %5573 }
 0xdaf   : > { %v5836_v46 = vsel %vm929_vm0, %v5472_v4, %v5574_v62  ;;  %v11551_v4 = vld [vmem:[#allocation71_spill] sm:$0xff] }
 0xdb0   : > { %v5878_v26 = vsel %vm1262_vm5, %v5836_v46, %v5686_v52 }
 0xdb4   : > { %v7307_v51 = vpop.eup %7306 }
 0xdb5   : > { %v5046_v10 = vmul.f32 %v7307_v51, %v10733_v19  ;;  %v10881_v19 = vld [vmem:[%s11050_s3] ss:$0 sm:$0xff] }
 0xdb6   : > { %v5576_v50 = vpop.permute.xlu1 %5575  ;;  %v11550_v51 = vld [vmem:[#allocation61_spill] sm:$0xff] }
 0xdb7   : > { %v5078_v6 = vpack.c.bf16 %v5046_v10, %v5046_v10  ;;  %v5839_v7 = vsel %vm929_vm0, %v5473_v39, %v5576_v50  ;;  %v2003_v41 = vpack.c.bf16 %v11550_v51, %v11550_v51  ;;  %v5580_v10 = vpop.permute.xlu2 %5579 }
 0xdb8   : > { %v5880_v32 = vsel %vm1262_vm5, %v5839_v7, %v5688_v12  ;;  %v11554_v7 = vld [vmem:[#allocation72_spill] sm:$0xff] }
 0xdb9   : > { %v5313_v47 = vunpack.c.l.b16 %v5078_v6  ;;  %v5451_v58 = vunpack.c.l.b16 %v2003_v41 }
 0xdbb   : > { %v6025_v20 = vpop.f32.mrf.mxu0  ;;  %v5317_v5 = vpack.c.b16 %v5313_v47, %v5312_v24  ;;  %v5475_v15 = vpack.c.b16 %v5452_v37, %v5451_v58 }
 0xdbc   : > { %v6026_v40 = vadd.f32 %v10881_v19, %v6025_v20  ;;  %v2006_v20 = vpack.c.bf16 %v11551_v4, %v11551_v4 }
 0xdbd   : > { %6543 = vmatmul.msk.bf16.gmra.mxu3 %vm1262_vm5, %v5317_v5  ;;  %v5845_v14 = vsel %vm929_vm0, %v5475_v15, %v5580_v10  ;;  %v11552_v5 = vld [vmem:[#allocation69_spill] sm:$0xff] }
 0xdbe   : > { %v5800_v9 = vpop.permute.xlu1 %5799  ;;  %v2005_v46 = vpack.c.bf16 %v11552_v5, %v11552_v5  ;;  %v5454_v52 = vunpack.c.l.b16 %v2006_v20 }
 0xdbf   : > { %v5919_v3 = vsel %vm5899_vm10, %v5880_v32, %v5800_v9  ;;  %v2007_v9 = vpack.c.bf16 %v11554_v7, %v11554_v7 }
 0xdc0   : > { %v5798_v33 = vpop.permute.xlu0 %5797 }
 0xdc1   : > { %v5916_v25 = vsel %vm5899_vm10, %v5878_v26, %v5798_v33  ;;  %v5453_v33 = vunpack.c.l.b16 %v2005_v46  ;;  %v5582_v26 = vpop.permute.xlu2 %5581 }
 0xdc2   : > { %6049 = vmatmul.bf16.gmra.mxu0 %v5916_v25 }
 0xdc3   : > { %v6027_v59 = vpop.f32.mrf.mxu0  ;;  %v5476_v30 = vpack.c.b16 %v5454_v52, %v5453_v33  ;;  %v11557_v33 = vld [vmem:[#allocation8_spill] sm:$0xff] }
 0xdc4   : > { %v6028_v63 = vadd.f32 %v10881_v19, %v6027_v59 }
 0xdc5   : > { %v5848_v59 = vsel %vm929_vm0, %v5476_v30, %v5582_v26  ;;  %v2012_v26 = vpack.c.bf16 %v11557_v33, %v11557_v33 }
 0xdc6   : > { %v6636_v61 = vpack.c.bf16 %v6028_v63, %v6026_v40  ;;  %v5351_v49 = vpop.f32.mrf.mxu3  ;;  %v5690_v48 = vpop.permute.xlu1 %5689 }
 0xdc7   : > { %v5395_v22 = vpack.c.bf16 %v5351_v49, %v5351_v49  ;;  %v5882_v11 = vsel %vm1262_vm5, %v5842_v42, %v5690_v48  ;;  %v2008_v49 = vpack.c.bf16 %v11553_v18, %v11553_v18 }
 0xdc8   : > { %6637 = vst [vmem:[%s10893_s11] sm:$0xff] %v6636_v61   ;;  %v5802_v2 = vpop.permute.xlu0 %5801 }
 0xdc9   : > { %v5763_v43 = vunpack.c.l.b16 %v5395_v22  ;;  %v5922_v13 = vsel %vm5899_vm10, %v5882_v11, %v5802_v2  ;;  %v5456_v12 = vunpack.c.l.b16 %v2008_v49  ;;  %v5584_v32 = vpop.permute.xlu2 %5583  ;;  %v11556_v11 = vld [vmem:[#allocation78_spill] sm:$0xff] }
 0xdca   : > { %v2009_v2 = vpack.c.bf16 %v11556_v11, %v11556_v11 }
 0xdcb   : > { %v6030_v53 = vpop.f32.mrf.mxu0 }
 0xdcc   : > { %v6031_v1 = vadd.f32 %v10881_v19, %v6030_v53  ;;  %v5457_v56 = vunpack.c.l.b16 %v2009_v2 }
 0xdce   : > { %v5353_v60 = vpop.f32.mrf.mxu3  ;;  %v5692_v6 = vpop.permute.xlu1 %5691  ;;  %v5478_v41 = vpack.c.b16 %v5458_v44, %v5457_v56 }
 0xdcf   : > { %v5396_v36 = vpack.c.bf16 %v5353_v60, %v5353_v60  ;;  %v5884_v24 = vsel %vm1262_vm5, %v5845_v14, %v5692_v6 }
 0xdd0   : > { %v5804_v47 = vpop.permute.xlu0 %5803 }
 0xdd1   : > { %v5764_v57 = vunpack.c.l.b16 %v5396_v36  ;;  %v5925_v62 = vsel %vm5899_vm10, %v5884_v24, %v5804_v47  ;;  %v5455_v36 = vunpack.c.l.b16 %v2007_v9  ;;  %v5586_v51 = vpop.permute.xlu2 %5585 }
 0xdd2   : > { %6054 = vmatmul.bf16.gmra.mxu0 %v5919_v3  ;;  %v5854_v15 = vsel %vm929_vm0, %v5478_v41, %v5586_v51 }
 0xdd3   : > { %v6032_v34 = vpop.f32.mrf.mxu0  ;;  %v5783_v27 = vpack.c.b16 %v5764_v57, %v5763_v43  ;;  %v5477_v3 = vpack.c.b16 %v5456_v12, %v5455_v36 }
 0xdd4   : > { %v6033_v55 = vadd.f32 %v10881_v19, %v6032_v34 }
 0xdd5   : > { %5811 = vrot.lane.b32.xlu0 %v5783_v27, %s7372_s29  ;;  %v5851_v38 = vsel %vm929_vm0, %v5477_v3, %v5584_v32 }
 0xdd6   : > { %v6641_v54 = vpack.c.bf16 %v6033_v55, %v6031_v1  ;;  %v5694_v16 = vpop.permute.xlu1 %5693 }
 0xdd7   : > { %v5886_v50 = vsel %vm1262_vm5, %v5848_v59, %v5694_v16 }
 0xdd8   : > { %6713 = vst [vmem:[%s10893_s11 + $0x8] sm:$0xff] %v6641_v54   ;;  %v5806_v40 = vpop.permute.xlu0 %5805 }
 0xdd9   : > { %v5928_v21 = vsel %vm5899_vm10, %v5886_v50, %v5806_v40  ;;  %v5460_v50 = vunpack.c.l.b16 %v2012_v26 }
 0xdde   : > { %v5696_v43 = vpop.permute.xlu1 %5695 }
 0xddf   : > { %v5888_v27 = vsel %vm1262_vm5, %v5851_v38, %v5696_v43 }
 0xde2   : > { %6059 = vmatmul.bf16.gmra.mxu0 %v5922_v13  ;;  %v5808_v57 = vpop.permute.xlu0 %5807 }
 0xde3   : > { %v5931_v45 = vsel %vm5899_vm10, %v5888_v27, %v5808_v57 }
 0xde6   : > { %v5698_v37 = vpop.permute.xlu1 %5697 }
 0xde7   : > { %v5890_v24 = vsel %vm1262_vm5, %v5854_v15, %v5698_v37 }
 0xdf2   : > { %6064 = vmatmul.bf16.gmra.mxu0 %v5925_v62  ;;  %v5810_v58 = vpop.permute.xlu0 %5809 }
 0xdf3   : > { %v5934_v62 = vsel %vm5899_vm10, %v5890_v24, %v5810_v58 }
 0xdfa   : > { %v5356_v25 = vpop.f32.mrf.mxu3 }
 0xdfb   : > { %v5397_v63 = vpack.c.bf16 %v5356_v25, %v5356_v25  ;;  %v11558_v25 = vld [vmem:[#allocation6_spill] sm:$0xff] }
 0xdfc   : > { %v2011_v30 = vpack.c.bf16 %v11558_v25, %v11558_v25 }
 0xdfd   : > { %v5765_v0 = vunpack.c.l.b16 %v5397_v63  ;;  %v5588_v63 = vpop.permute.xlu2 %5587 }
 0xdfe   : > { %v5459_v40 = vunpack.c.l.b16 %v2011_v30 }
 0xe02   : > { %v5358_v8 = vpop.f32.mrf.mxu3  ;;  %6069 = vmatmul.bf16.gmra.mxu0 %v5928_v21  ;;  %v5479_v21 = vpack.c.b16 %v5460_v50, %v5459_v40 }
 0xe03   : > { %v5398_v61 = vpack.c.bf16 %v5358_v8, %v5358_v8  ;;  %v5700_v8 = vpop.permute.xlu1 %5699 }
 0xe05   : > { %v5766_v39 = vunpack.c.l.b16 %v5398_v61  ;;  %v5857_v61 = vsel %vm929_vm0, %v5479_v21, %v5588_v63  ;;  %v5590_v11 = vpop.permute.xlu2 %5589 }
 0xe06   : > { %v6035_v53 = vpop.f32.mrf.mxu0 }
 0xe07   : > { %v5784_v22 = vpack.c.b16 %v5766_v39, %v5765_v0  ;;  %v6036_v34 = vadd.f32 %v10881_v19, %v6035_v53  ;;  %v5892_v0 = vsel %vm1262_vm5, %v5857_v61, %v5700_v8 }
 0xe09   : > { %5813 = vrot.lane.b32.xlu0 %v5784_v22, %s7372_s29 }
 0xe0a   : > { %v5361_v60 = vpop.f32.mrf.mxu3 }
 0xe0b   : > { %v5399_v55 = vpack.c.bf16 %v5361_v60, %v5361_v60  ;;  %v5702_v44 = vpop.permute.xlu1 %5701 }
 0xe0d   : > { %v5767_v31 = vunpack.c.l.b16 %v5399_v55 }
 0xe0e   : > { %v6037_v28 = vpop.f32.mrf.mxu0 }
 0xe0f   : > { %v6038_v1 = vadd.f32 %v10881_v19, %v6037_v28 }
 0xe11   : > { %v6646_v35 = vpack.c.bf16 %v6038_v1, %v6036_v34 }
 0xe12   : > { %v5363_v54 = vpop.f32.mrf.mxu3  ;;  %6074 = vmatmul.bf16.gmra.mxu0 %v5931_v45 }
 0xe13   : > { %6714 = vst [vmem:[%s10893_s11 + $0x10] sm:$0xff] %v6646_v35   ;;  %v5400_v29 = vpack.c.bf16 %v5363_v54, %v5363_v54  ;;  %v5704_v33 = vpop.permute.xlu1 %5703 }
 0xe15   : > { %v5768_v48 = vunpack.c.l.b16 %v5400_v29  ;;  %v11559_v29 = vld [vmem:[#allocation83_spill] sm:$0xff] }
 0xe16   : > { %v6040_v42 = vpop.f32.mrf.mxu0  ;;  %v2014_v23 = vpack.c.bf16 %v11559_v29, %v11559_v29 }
 0xe17   : > { %v5785_v13 = vpack.c.b16 %v5768_v48, %v5767_v31  ;;  %v6041_v6 = vadd.f32 %v10881_v19, %v6040_v42  ;;  %v2013_v31 = vpack.c.bf16 %v11560_v17, %v11560_v17 }
 0xe18   : > { %v5462_v48 = vunpack.c.l.b16 %v2014_v23 }
 0xe19   : > { %5815 = vrot.lane.b32.xlu0 %v5785_v13, %s7372_s29  ;;  %v5461_v42 = vunpack.c.l.b16 %v2013_v31 }
 0xe1b   : > { %v5480_v13 = vpack.c.b16 %v5462_v48, %v5461_v42 }
 0xe1d   : > { %v5860_v41 = vsel %vm929_vm0, %v5480_v13, %v5590_v11 }
 0xe1e   : > { %v6042_v10 = vpop.f32.mrf.mxu0  ;;  %v5894_v58 = vsel %vm1262_vm5, %v5860_v41, %v5702_v44 }
 0xe1f   : > { %v6043_v14 = vadd.f32 %v10881_v19, %v6042_v10 }
 0xe21   : > { %v6651_v47 = vpack.c.bf16 %v6043_v14, %v6041_v6  ;;  %v11561_v14 = vld [vmem:[#allocation85_spill] sm:$0xff] }
 0xe22   : > { %6079 = vmatmul.bf16.gmra.mxu0 %v5934_v62  ;;  %v2016_v24 = vpack.c.bf16 %v11561_v14, %v11561_v14 }
 0xe23   : > { %6715 = vst [vmem:[%s10893_s11 + $0x18] sm:$0xff] %v6651_v47   ;;  %v11562_v47 = vld [vmem:[#allocation84_spill] sm:$0xff] }
 0xe24   : > { %v2015_v62 = vpack.c.bf16 %v11562_v47, %v11562_v47 }
 0xe26   : > { %v6045_v4 = vpop.f32.mrf.mxu0 }
 0xe27   : > { %v6046_v5 = vadd.f32 %v10881_v19, %v6045_v4  ;;  %v5464_v4 = vunpack.c.l.b16 %v2016_v24 }
 0xe2e   : > { %v6047_v20 = vpop.f32.mrf.mxu0 }
 0xe2f   : > { %v6048_v46 = vadd.f32 %v10881_v19, %v6047_v20  ;;  %v5463_v20 = vunpack.c.l.b16 %v2015_v62 }
 0xe31   : > { %v6656_v52 = vpack.c.bf16 %v6048_v46, %v6046_v5  ;;  %v5592_v5 = vpop.permute.xlu2 %5591 }
 0xe33   : > { %6716 = vst [vmem:[%s10893_s11 + $0x20] sm:$0xff] %v6656_v52   ;;  %v5481_v52 = vpack.c.b16 %v5464_v4, %v5463_v20 }
 0xe35   : > { %v5863_v30 = vsel %vm929_vm0, %v5481_v52, %v5592_v5 }
 0xe3f   : > { %v6050_v16 = vpop.f32.mrf.mxu0 }
 0xe40   : > { %v5366_v59 = vpop.f32.mrf.mxu3  ;;  %v6051_v39 = vadd.f32 %v10881_v19, %v6050_v16 }
 0xe41   : > { %v5401_v18 = vpack.c.bf16 %v5366_v59, %v5366_v59  ;;  %v5896_v59 = vsel %vm1262_vm5, %v5863_v30, %v5704_v33 }
 0xe43   : > { %v5769_v36 = vunpack.c.l.b16 %v5401_v18 }
 0xe47   : > { %v6052_v49 = vpop.f32.mrf.mxu0  ;;  %v5812_v9 = vpop.permute.xlu0 %5811 }
 0xe48   : > { %v6053_v53 = vadd.f32 %v10881_v19, %v6052_v49  ;;  %v5368_v7 = vpop.f32.mrf.mxu3  ;;  %v5937_v12 = vsel %vm5899_vm10, %v5892_v0, %v5812_v9  ;;  %v11563_v9 = vld [vmem:[#allocation87_spill] sm:$0xff] }
 0xe49   : > { %v5402_v22 = vpack.c.bf16 %v5368_v7, %v5368_v7  ;;  %6084 = vmatmul.bf16.gmra.mxu0 %v5937_v12  ;;  %v11564_v12 = vld [vmem:[#allocation86_spill] sm:$0xff] }
 0xe4a   : > { %v6661_v60 = vpack.c.bf16 %v6053_v53, %v6051_v39 }
 0xe4b   : > { %v5770_v32 = vunpack.c.l.b16 %v5402_v22  ;;  %v2018_v22 = vpack.c.bf16 %v11563_v9, %v11563_v9 }
 0xe4c   : > { %6717 = vst [vmem:[%s10893_s11 + $0x28] sm:$0xff] %v6661_v60   ;;  %v2017_v60 = vpack.c.bf16 %v11564_v12, %v11564_v12 }
 0xe4d   : > { %v5786_v3 = vpack.c.b16 %v5770_v32, %v5769_v36  ;;  %v5466_v36 = vunpack.c.l.b16 %v2018_v22 }
 0xe4e   : > { %v5465_v32 = vunpack.c.l.b16 %v2017_v60 }
 0xe4f   : > { %5817 = vrot.lane.b32.xlu0 %v5786_v3, %s7372_s29  ;;  %v6055_v43 = vpop.f32.mrf.mxu0  ;;  %v5594_v3 = vpop.permute.xlu2 %5593  ;;  %s6632_s29 = sshll.u32 %s7422_s19, 7 }
 0xe50   : > { %v6056_v28 = vadd.f32 %v10881_v19, %v6055_v43  ;;  %v5482_v43 = vpack.c.b16 %v5466_v36, %v5465_v32  ;;  %s6182_s14 = scalar_lea.hbm %s11051_s4, %s6632_s29 }
 0xe51   : > { %s6185_s22 = sshll.u32 %s6182_s14, 4  ;;  %s6186_s22 = int_to_ptr.hbm [resolvable:$true] %s6185_s22 }
 0xe52   : > { %s7322_s27 = sshra.s32 %s6186_s22, 4  ;;  %s7323_s27 = int_to_ptr.hbm [resolvable:$true] %s7322_s27 }
 0xe53   : > { %s7324_s19 = scalar_lea.hbm %s7323_s27, 128  ;;  %p7329_p0 = scmp.lt.s32.totalorder %s7323_s27, %s11051_s4 }
 0xe54   : > { %p7325_p11 = scmp.ne.s32.totalorder %s7323_s27, %s7324_s19  ;;  %p7330_p1 = scmp.lt.s32.totalorder %s7328_s7, %s7324_s19 }
 0xe56   : > { %p7326_p12 = pnand %p7325_p11, %p7439_p5  ;;  %p7331_p2 = por %p7330_p1, %p7329_p0 }
 0xe57   : > { %v6057_v57 = vpop.f32.mrf.mxu0 }
 0xe58   : > { %v6058_v38 = vadd.f32 %v10881_v19, %v6057_v57  ;;  %v5706_v57 = vpop.permute.xlu1 %5705  ;;  %p7327_p13 = pneg %p7326_p12 }
 0xe5a   : > { %v6666_v34 = vpack.c.bf16 %v6058_v38, %v6056_v28  ;;  %v5866_v28 = vsel %vm929_vm0, %v5482_v43, %v5594_v3  ;;  %p7332_p3 = pnand %p7331_p2, %p7327_p13 }
 0xe5b   : > { %v5898_v38 = vsel %vm1262_vm5, %v5866_v28, %v5706_v57 }
 0xe5c   : > { %6718 = vst [vmem:[%s10893_s11 + $0x30] sm:$0xff] %v6666_v34  }
 0xe5f   : > { %v6060_v1 = vpop.f32.mrf.mxu0 }
 0xe60   : > { %v6061_v55 = vadd.f32 %v10881_v19, %v6060_v1 }
 0xe67   : > { %v6062_v27 = vpop.f32.mrf.mxu0 }
 0xe68   : > { %v6063_v35 = vadd.f32 %v10881_v19, %v6062_v27 }
 0xe6a   : > { %v6671_v45 = vpack.c.bf16 %v6063_v35, %v6061_v55 }
 0xe6c   : > { %6719 = vst [vmem:[%s10893_s11 + $0x38] sm:$0xff] %v6671_v45  }
 0xe6f   : > { %v6065_v54 = vpop.f32.mrf.mxu0 }
 0xe70   : > { %v6066_v56 = vadd.f32 %v10881_v19, %v6065_v54 }
 0xe77   : > { %v6067_v2 = vpop.f32.mrf.mxu0 }
 0xe78   : > { %v6068_v51 = vadd.f32 %v10881_v19, %v6067_v2 }
 0xe7a   : > { %v6676_v37 = vpack.c.bf16 %v6068_v51, %v6066_v56 }
 0xe7b   : > { %v5814_v10 = vpop.permute.xlu0 %5813 }
 0xe7c   : > { %6720 = vst [vmem:[%s10893_s11 + $0x40] sm:$0xff] %v6676_v37   ;;  %v5940_v15 = vsel %vm5899_vm10, %v5894_v58, %v5814_v10 }
 0xe7d   : > { %6089 = vmatmul.bf16.gmra.mxu0 %v5940_v15 }
 0xe7f   : > { %v6070_v6 = vpop.f32.mrf.mxu0 }
 0xe80   : > { %v6071_v26 = vadd.f32 %v10881_v19, %v6070_v6 }
 0xe87   : > { %v6072_v46 = vpop.f32.mrf.mxu0 }
 0xe88   : > { %v6073_v25 = vadd.f32 %v10881_v19, %v6072_v46 }
 0xe8a   : > { %v6681_v16 = vpack.c.bf16 %v6073_v25, %v6071_v26 }
 0xe8b   : > { %v5816_v50 = vpop.permute.xlu0 %5815 }
 0xe8c   : > { %6721 = vst [vmem:[%s10893_s11 + $0x48] sm:$0xff] %v6681_v16   ;;  %v5943_v40 = vsel %vm5899_vm10, %v5896_v59, %v5816_v50 }
 0xe8d   : > { %6094 = vmatmul.bf16.gmra.mxu0 %v5943_v40 }
 0xe8f   : > { %v6075_v63 = vpop.f32.mrf.mxu0 }
 0xe90   : > { %v6076_v8 = vadd.f32 %v10881_v19, %v6075_v63 }
 0xe97   : > { %v6077_v21 = vpop.f32.mrf.mxu0 }
 0xe98   : > { %v6078_v61 = vadd.f32 %v10881_v19, %v6077_v21 }
 0xe9a   : > { %v6686_v18 = vpack.c.bf16 %v6078_v61, %v6076_v8 }
 0xe9c   : > { %6722 = vst [vmem:[%s10893_s11 + $0x50] sm:$0xff] %v6686_v18  }
 0xe9f   : > { %v6080_v49 = vpop.f32.mrf.mxu0 }
 0xea0   : > { %v6081_v39 = vadd.f32 %v10881_v19, %v6080_v49 }
 0xea7   : > { %v6082_v0 = vpop.f32.mrf.mxu0 }
 0xea8   : > { %v6083_v53 = vadd.f32 %v10881_v19, %v6082_v0 }
 0xeaa   : > { %v6691_v7 = vpack.c.bf16 %v6083_v53, %v6081_v39 }
 0xeac   : > { %6723 = vst [vmem:[%s10893_s11 + $0x58] sm:$0xff] %v6691_v7  }
 0xec1   : > { %v5818_v34 = vpop.permute.xlu0 %5817 }
 0xec2   : > { %v5946_v1 = vsel %vm5899_vm10, %v5898_v38, %v5818_v34 }
 0xec3   : > { %6099 = vmatmul.bf16.gmra.mxu0 %v5946_v1 }
 0xec6   : > { %v6085_v27 = vpop.f32.mrf.mxu0 }
 0xec7   : > { %v6086_v35 = vadd.f32 %v10881_v19, %v6085_v27 }
 0xece   : > { %v6087_v55 = vpop.f32.mrf.mxu0 }
 0xecf   : > { %v6088_v45 = vadd.f32 %v10881_v19, %v6087_v55 }
 0xed1   : > { %v6696_v54 = vpack.c.bf16 %v6088_v45, %v6086_v35 }
 0xed3   : > { %6724 = vst [vmem:[%s10893_s11 + $0x60] sm:$0xff] %v6696_v54  }
 0xefa   : > { %v6090_v29 = vpop.f32.mrf.mxu0 }
 0xefb   : > { %v6091_v17 = vadd.f32 %v10881_v19, %v6090_v29 }
 0xf02   : > { %v6092_v23 = vpop.f32.mrf.mxu0 }
 0xf03   : > { %v6093_v31 = vadd.f32 %v10881_v19, %v6092_v23 }
 0xf05   : > { %v6701_v48 = vpack.c.bf16 %v6093_v31, %v6091_v17 }
 0xf07   : > { %6725 = vst [vmem:[%s10893_s11 + $0x68] sm:$0xff] %v6701_v48  }
 0xf0a   : > { %v6095_v42 = vpop.f32.mrf.mxu0 }
 0xf0b   : > { %v6096_v2 = vadd.f32 %v10881_v19, %v6095_v42 }
 0xf12   : > { %v6097_v11 = vpop.f32.mrf.mxu0 }
 0xf13   : > { %v6098_v13 = vadd.f32 %v10881_v19, %v6097_v11 }
 0xf15   : > { %v6706_v44 = vpack.c.bf16 %v6098_v13, %v6096_v2 }
 0xf17   : > { %6726 = vst [vmem:[%s10893_s11 + $0x70] sm:$0xff] %v6706_v44  }
 0xf40   : > { %v6100_v56 = vpop.f32.mrf.mxu0 }
 0xf41   : > { %v6101_v41 = vadd.f32 %v10881_v19, %v6100_v56 }
 0xf48   : > { %v6102_v51 = vpop.f32.mrf.mxu0 }
 0xf49   : > { %v6103_v37 = vadd.f32 %v10881_v19, %v6102_v51 }
 0xf4b   : > { %v6711_v58 = vpack.c.bf16 %v6103_v37, %v6101_v41 }
 0xf4d   : > { %6727 = vst [vmem:[%s10893_s11 + $0x78] sm:$0xff] %v6711_v58  }
 0xf4e   : > { %7335 = shalt.err (!%p7332_p3)
}
 0xf4f   : > { %s7375_s5 = smov 4  }
 0xf50   : > { %6752 = dma.vmem_to_hbm [thread:$0]  (%p7439_p5), %s6184_s20, 2048, %s6186_s22, %s6170_s23, %s7373_s8, %s7373_s8, %s7375_s5  }
 0xf51 PF: > { %p6758_p4 = scmp.ge.s32.totalorder %s7370_s18, 2  ;;  %s6200_s10 = sand.u32 1, %s7358_s15  }
 0xf52   : > { %s6201_s11 = scalar_lea.sflag [#allocation3], %s6200_s10 }
 0xf53   : > { %p6755_p7 = pnand %p6758_p4, %p7443_p6 }
 0xf55   : > { %p6756_p8 = pneg %p6755_p7 }
 0xf57   : > { %7353 = dma.done.wait (%p6756_p8), %s6201_s11, 2048  }
 0xf58   : > { %7355 = vsyncadd (%p6756_p8), %s6201_s11, 4294965248  ;;  %p14_p9 = scmp.ge.s32.totalorder %s7426_s21, 4   ;;  %s11565_s15 = smov %s7362_s16 }
 0xf59   : > { %s11566_s16 = smov %s7366_s17  ;;  %s11567_s17 = smov %s7437_s24 }
 0xf5a   : > { %s11568_s18 = smov %s7426_s21  ;;  %16 = sbr.rel (!%p14_p9) target bundleno = 3 (0x3), region = 71 }
 0xf5f   :  { %6207 = vsyncpa [#allocation3], 1 }
 0xf60   :  { %6209 = vsyncpa [#allocation3 + $0x1], 1 }

</bundles_post_ra>
